<compile_context>
chip_gen: v7x
topology: tpu7x:2x2x1
jax: 0.10.0
libtpu: 0.0.40
codegen_flags: <defaults>
</compile_context>

<pallas_src>
import functools

import jax
import jax.numpy as jnp
from jax.experimental import pallas as pl
from jax.experimental.pallas import tpu as pltpu

_EPS = 1e-5


# ---------------------------------------------------------------------------
# Generation-aware VMEM budgeting / tile selection
# ---------------------------------------------------------------------------
@functools.lru_cache(maxsize=1)
def _vmem_limit_bytes():
    """Scoped-VMEM limit derived from the chip (v5e/v6e: 128 MiB, v7x: 64 MiB)."""
    cap = 64 * 1024 * 1024                      # conservative default (v7x physical VMEM)
    try:
        cap = int(pltpu.get_tpu_info().vmem_capacity_bytes)
    except Exception:                           # off-TPU / older jax: keep the default
        pass
    return int(min(cap * 3 // 4, 100 * 1024 * 1024))


def _residual_vmem_estimate(tile_h, WN, C, Ch):
    """Rough per-grid-step VMEM bytes, including the im2col temporary."""
    bf, f4 = 2, 4
    rows_c = tile_h * WN
    rows_h = rows_c + 2 * WN
    io = 2 * rows_c * C * bf                     # center input (double-buffered)
    io += 2 * 2 * WN * C * bf                    # above/below halos
    io += 2 * rows_c * C * bf                    # output
    w = 2 * bf * (C * Ch + 9 * Ch * Ch + Ch * C) + 2 * f4 * (3 * 2 * C)
    tmp = rows_h * C * (f4 + bf)                 # x_halo f32 + t0 bf16
    tmp += rows_h * Ch * (2 * f4 + 4 * bf)       # t1 / masked copies / rolled slabs
    tmp += rows_c * 9 * Ch * bf                  # im2col col
    tmp += rows_c * Ch * (f4 + bf)               # y2 + t2
    tmp += rows_c * C * 2 * f4                   # y3 + skip add
    return io + w + tmp


def _pick_tile_h(H, WN, C, Ch, budget):
    """Largest divisor of H that fits the VMEM budget; prefer n_tiles >= 2 (v7x)."""
    divs = [d for d in range(1, H + 1) if H % d == 0]
    feas = [d for d in divs
            if _residual_vmem_estimate(d, WN, C, Ch) <= budget and d * WN <= 2048]
    if not feas:
        feas = [1]
    multi = [d for d in feas if H // d >= 2]
    return max(multi) if multi else max(feas)


def _pick_divisor(n, per_unit_bytes, budget):
    """Largest divisor of n with per-step bytes under budget; prefer >= 2 grid steps."""
    divs = [d for d in range(1, n + 1) if n % d == 0]
    feas = [d for d in divs if d * per_unit_bytes <= budget] or [1]
    multi = [d for d in feas if n // d >= 2]
    return max(multi) if multi else max(feas)


# ---------------------------------------------------------------------------
# Pallas kernels
# ---------------------------------------------------------------------------
def _residual_kernel(xa_ref, xc_ref, xb_ref,
                     bn0_ref, w1_ref, bn1_ref, w2_ref, bn2_ref, w3_ref, b3_ref,
                     o_ref, *, tile_h, W, N):
    """Fused pre-activation residual block on one (tile_h*W*N, C) row tile.

    xa/xb are the one-spatial-row halo above/below the center tile (clamped at the
    image boundary; their contribution is zeroed there to reproduce zero padding in H).
    """
    WN = W * N
    rows_c = tile_h * WN
    rows_h = rows_c + 2 * WN
    Ch = w1_ref.shape[1]

    def bn_relu(v, bn_ref):
        # folded eval-mode BN (scale, shift) followed by ReLU, in f32
        return jnp.maximum(v * bn_ref[0:1, :] + bn_ref[1:2, :], 0.0)

    x_c = xc_ref[...]                                                   # (rows_c, C) bf16
    x_halo = jnp.concatenate([xa_ref[...], x_c, xb_ref[...]],
                             axis=0).astype(jnp.float32)                # (rows_h, C)

    # BN0 -> ReLU -> 1x1 conv (C -> Ch); bf16 operands on the MXU, f32 accumulation.
    t0 = bn_relu(x_halo, bn0_ref).astype(jnp.bfloat16)
    y1 = jnp.dot(t0, w1_ref[...], preferred_element_type=jnp.float32)
    t1 = bn_relu(y1, bn1_ref)            # (rows_h, Ch) f32; conv bias b1 folded into bn1

    # In-kernel masks from a 2-D iota (no (rows,1) VMEM inputs, no concat copies).
    tid = pl.program_id(0)
    row = jax.lax.broadcasted_iota(jnp.int32, (rows_h, Ch), 0)
    q = row % WN                         # (w, n) position inside one spatial H-row

    # Zero the +-1 H halo rows that fall outside the image (conv zero padding in H):
    # one jnp.where instead of a 3-slice concatenate.
    pad_top = jnp.logical_and(row < WN, tid == 0)
    pad_bot = jnp.logical_and(row >= WN + rows_c, tid == pl.num_programs(0) - 1)
    t1 = jnp.where(jnp.logical_or(pad_top, pad_bot), 0.0, t1)

    # W-boundary zero padding for the kw=0 / kw=2 taps: the kw=0 taps must never see
    # column w=W-1 data, the kw=2 taps must never see column w=0 data (those reads are
    # the zero-padded w=-1 / w=W positions in flattened row order).  The same rows are
    # exactly the ones that wrap around in the rolls below, so no extra zero caps needed.
    t1_lm = jnp.where(q >= WN - N, 0.0, t1)          # source for kw = 0 taps
    t1_rm = jnp.where(q < N, 0.0, t1)                # source for kw = 2 taps

    # +-1 shift in w == +-N flattened rows, done with an XLU roll (f32, unpacked
    # sublanes) instead of zero-cap concatenation + misaligned slices.
    src_l = pltpu.roll(t1_lm, shift=N, axis=0).astype(jnp.bfloat16)           # [p] = t1_lm[p-N]
    src_r = pltpu.roll(t1_rm, shift=rows_h - N, axis=0).astype(jnp.bfloat16)  # [p] = t1_rm[p+N]
    t1_c = t1.astype(jnp.bfloat16)                                            # kw = 1 taps

    # im2col: 9 shifted slabs -> one (rows_c, 9*Ch) matrix -> a single MXU matmul
    # with contraction dim 9*Ch.  All slab slices start at multiples of WN (8-aligned),
    # and Ch is a multiple of 128 so the lane-axis concat needs no relayout.
    slabs = []
    for kh in range(3):
        base = kh * WN
        slabs.append(src_l[base:base + rows_c])      # tap (kh, kw=0)
        slabs.append(t1_c[base:base + rows_c])       # tap (kh, kw=1)
        slabs.append(src_r[base:base + rows_c])      # tap (kh, kw=2)
    col = jnp.concatenate(slabs, axis=1)             # (rows_c, 9*Ch) bf16
    y2 = jnp.dot(col, w2_ref[...], preferred_element_type=jnp.float32)
    t2 = bn_relu(y2, bn2_ref).astype(jnp.bfloat16)   # conv bias b2 folded into bn2

    # 1x1 conv (Ch -> C) + bias + identity skip (f32 add, bf16 store).
    y3 = jnp.dot(t2, w3_ref[...], preferred_element_type=jnp.float32) + b3_ref[...]
    o_ref[...] = (y3 + x_c.astype(jnp.float32)).astype(o_ref.dtype)


def _maxpool_kernel(x_ref, o_ref):
    """MaxPool2d(kernel=(2,2), stride=(2,2)) on a (2*T, W, N, C) row tile."""
    H_in, W_in, N, C = x_ref.shape
    T, W2 = H_in // 2, W_in // 2
    x = x_ref[...].reshape(T, 2, W2, 2, N, C)        # leading-dims-only reshape
    m = jnp.maximum(x[:, 0], x[:, 1])
    o_ref[...] = jnp.maximum(m[:, :, 0], m[:, :, 1])


def _upsample_add_kernel(lo_ref, skip_ref, o_ref):
    """nearest Upsample(scale=2) of `lo` fused with the residual skip add (f32 add)."""
    T, W2, N, C = lo_ref.shape
    lo = lo_ref[...].astype(jnp.float32)
    up = jnp.broadcast_to(lo[:, None, :, None, :, :], (T, 2, W2, 2, N, C))
    out = up.reshape(T * 2, W2 * 2, N, C) + skip_ref[...].astype(jnp.float32)
    o_ref[...] = out.astype(o_ref.dtype)


# ---------------------------------------------------------------------------
# pallas_call wrappers
# ---------------------------------------------------------------------------
def residual_apply(x4, p):
    H, W, N, C = x4.shape
    WN = W * N
    Ch = C // 2
    assert C % 128 == 0 and Ch % 128 == 0, "channels must be lane-aligned (C % 256 == 0)"
    assert WN % 8 == 0, "W * N must be a multiple of 8 for the row-tiled residual"

    vlim = _vmem_limit_bytes()
    tile_h = _pick_tile_h(H, WN, C, Ch, budget=int(vlim * 0.6))
    n_tiles = H // tile_h

    x2 = x4.reshape(H * WN, C)   # contiguous, free reshape outside the kernel

    def const_spec(shape):
        return pl.BlockSpec(shape, lambda t: (0, 0))   # resident across the grid

    above = pl.BlockSpec((WN, C), lambda t: (jnp.maximum(t * tile_h - 1, 0), 0))
    center = pl.BlockSpec((tile_h * WN, C), lambda t: (t, 0))
    below = pl.BlockSpec((WN, C),
                         lambda t: (jnp.minimum(t * tile_h + tile_h, H - 1), 0))

    kernel = functools.partial(_residual_kernel, tile_h=tile_h, W=W, N=N)
    out2 = pl.pallas_call(
        kernel,
        out_shape=jax.ShapeDtypeStruct((H * WN, C), jnp.bfloat16),
        grid_spec=pltpu.PrefetchScalarGridSpec(
            num_scalar_prefetch=0,
            grid=(n_tiles,),
            in_specs=[
                above, center, below,
                const_spec(p["bn0"].shape), const_spec(p["w1"].shape),
                const_spec(p["bn1"].shape), const_spec(p["w2"].shape),
                const_spec(p["bn2"].shape), const_spec(p["w3"].shape),
                const_spec(p["b3"].shape),
            ],
            out_specs=pl.BlockSpec((tile_h * WN, C), lambda t: (t, 0)),
        ),
        compiler_params=pltpu.CompilerParams(
            dimension_semantics=("parallel",),
            vmem_limit_bytes=vlim),
    )(x2, x2, x2,
      p["bn0"], p["w1"], p["bn1"], p["w2"], p["bn2"], p["w3"], p["b3"])
    return out2.reshape(H, W, N, C)


def maxpool_apply(x4):
    H, W, N, C = x4.shape
    H2, W2 = H // 2, W // 2
    vlim = _vmem_limit_bytes()
    per_unit = (2 * W * N * C + W2 * N * C) * 2 * 2          # bf16, double-buffered in+out
    t2 = _pick_divisor(H2, per_unit, budget=vlim // 3)
    return pl.pallas_call(
        _maxpool_kernel,
        out_shape=jax.ShapeDtypeStruct((H2, W2, N, C), jnp.bfloat16),
        grid_spec=pltpu.PrefetchScalarGridSpec(
            num_scalar_prefetch=0,
            grid=(H2 // t2,),
            in_specs=[pl.BlockSpec((2 * t2, W, N, C), lambda t: (t, 0, 0, 0))],
            out_specs=pl.BlockSpec((t2, W2, N, C), lambda t: (t, 0, 0, 0)),
        ),
        compiler_params=pltpu.CompilerParams(
            dimension_semantics=("parallel",),
            vmem_limit_bytes=vlim),
    )(x4)


def upsample_add_apply(lo4, skip4):
    H, W, N, C = skip4.shape
    H2, W2 = H // 2, W // 2
    vlim = _vmem_limit_bytes()
    per_unit = (W2 * N * C + 2 * 2 * W * N * C) * 2 * 2      # lo + skip + out, bf16, x2 buf
    t2 = _pick_divisor(H2, per_unit, budget=vlim // 3)
    return pl.pallas_call(
        _upsample_add_kernel,
        out_shape=jax.ShapeDtypeStruct((H, W, N, C), jnp.bfloat16),
        grid_spec=pltpu.PrefetchScalarGridSpec(
            num_scalar_prefetch=0,
            grid=(H2 // t2,),
            in_specs=[pl.BlockSpec((t2, W2, N, C), lambda t: (t, 0, 0, 0)),
                      pl.BlockSpec((2 * t2, W, N, C), lambda t: (t, 0, 0, 0))],
            out_specs=pl.BlockSpec((2 * t2, W, N, C), lambda t: (t, 0, 0, 0)),
        ),
        compiler_params=pltpu.CompilerParams(
            dimension_semantics=("parallel",),
            vmem_limit_bytes=vlim),
    )(lo4, skip4)


# ---------------------------------------------------------------------------
# Parameter init (deterministic, synthetic, BN + conv biases pre-folded)
# ---------------------------------------------------------------------------
def _folded_bn(key, n, conv_bias=None):
    k1, k2, k3, k4 = jax.random.split(key, 4)
    gamma = 1.0 + 0.1 * jax.random.normal(k1, (n,))
    beta = 0.1 * jax.random.normal(k2, (n,))
    mean = 0.1 * jax.random.normal(k3, (n,))
    var = 1.0 + 0.1 * jax.random.uniform(k4, (n,))
    scale = gamma * jax.lax.rsqrt(var + _EPS)
    shift = beta - mean * scale
    if conv_bias is not None:      # BN applied after "conv + bias": fold the bias in
        shift = shift + scale * conv_bias
    return jnp.stack([scale, shift]).astype(jnp.float32)   # (2, n)


def _init_residual(key, C):
    Ch = C // 2
    k = jax.random.split(key, 9)
    b1 = 0.01 * jax.random.normal(k[2], (Ch,))
    b2 = 0.01 * jax.random.normal(k[5], (Ch,))
    w2 = 0.1 * jax.random.normal(k[4], (9, Ch, Ch))   # taps ordered kh*3 + kw, (in, out)
    return {
        "bn0": _folded_bn(k[0], C),
        "w1": (0.1 * jax.random.normal(k[1], (C, Ch))).astype(jnp.bfloat16),
        "bn1": _folded_bn(k[3], Ch, b1),
        "w2": w2.reshape(9 * Ch, Ch).astype(jnp.bfloat16),
        "bn2": _folded_bn(k[6], Ch, b2),
        "w3": (0.1 * jax.random.normal(k[7], (Ch, C))).astype(jnp.bfloat16),
        "b3": (0.01 * jax.random.normal(k[8], (1, C))).astype(jnp.float32),
    }


def init_hourglass(key, C, num_reductions, n_modules):
    k_skip, k_after, k_low, k_hg = jax.random.split(key, 4)
    params = {
        "skip": [_init_residual(k, C) for k in jax.random.split(k_skip, n_modules)],
        "afterpool": [_init_residual(k, C) for k in jax.random.split(k_after, n_modules)],
        "lowres": [_init_residual(k, C) for k in jax.random.split(k_low, n_modules)],
    }
    if num_reductions > 1:
        params["hg"] = init_hourglass(k_hg, C, num_reductions - 1, n_modules)
    else:
        params["hg"] = _init_residual(k_hg, C)
    return params


# ---------------------------------------------------------------------------
# Forward pass (mirrors Hourglass.forward)
# ---------------------------------------------------------------------------
def _hourglass_apply(x, params, num_reductions):
    out1 = x
    for p in params["skip"]:
        out1 = residual_apply(out1, p)

    out2 = maxpool_apply(x)
    for p in params["afterpool"]:
        out2 = residual_apply(out2, p)

    if num_reductions > 1:
        out2 = _hourglass_apply(out2, params["hg"], num_reductions - 1)
    else:
        out2 = residual_apply(out2, params["hg"])

    for p in params["lowres"]:
        out2 = residual_apply(out2, p)

    return upsample_add_apply(out2, out1)    # up(out2) + out1


def hourglass_forward(x_nchw, params, num_reductions):
    # NCHW f32 -> (H, W, N, C) bf16 kernel layout, run, then back to NCHW f32.
    x = jnp.transpose(x_nchw, (2, 3, 0, 1)).astype(jnp.bfloat16)
    y = _hourglass_apply(x, params, num_reductions)
    return jnp.transpose(y, (2, 3, 0, 1)).astype(jnp.float32)


# ---------------------------------------------------------------------------
if __name__ == "__main__":
    # nChannels=256 is the module's default width and keeps C / C//2 lane-aligned.
    N, C, H, W = 2, 256, 16, 16
    NUM_REDUCTIONS = 2
    N_MODULES = 2

    key = jax.random.PRNGKey(0)
    k_params, k_x = jax.random.split(key)
    params = init_hourglass(k_params, C, NUM_REDUCTIONS, N_MODULES)
    x = jax.random.normal(k_x, (N, C, H, W), dtype=jnp.float32)

    fwd = jax.jit(lambda xx, pp: hourglass_forward(xx, pp, NUM_REDUCTIONS))
    y = fwd(x, params)
    jax.block_until_ready(y)

    assert y.shape == (N, C, H, W) and y.dtype == jnp.float32
    print("KERNEL_OK")
</pallas_src>

<mosaic_0001>
module attributes {stable_mosaic.version = 11 : i64} {
  func.func @_residual_kernel(%arg0: i32, %arg1: memref<32x256xbf16, #tpu.memory_space<vmem>>, %arg2: memref<256x256xbf16, #tpu.memory_space<vmem>>, %arg3: memref<32x256xbf16, #tpu.memory_space<vmem>>, %arg4: memref<2x256xf32, #tpu.memory_space<vmem>>, %arg5: memref<256x128xbf16, #tpu.memory_space<vmem>>, %arg6: memref<2x128xf32, #tpu.memory_space<vmem>>, %arg7: memref<1152x128xbf16, #tpu.memory_space<vmem>>, %arg8: memref<2x128xf32, #tpu.memory_space<vmem>>, %arg9: memref<128x256xbf16, #tpu.memory_space<vmem>>, %arg10: memref<1x256xf32, #tpu.memory_space<vmem>>, %arg11: memref<256x256xbf16, #tpu.memory_space<vmem>>) attributes {dimension_semantics = [#tpu.dimension_semantics<parallel>], iteration_bounds = array<i64: 2>, scalar_prefetch = 0 : i64, scratch_operands = 0 : i64, tpu.core_type = #tpu.core_type<tc>, window_params = [{transform_indices = @transform_0, window_bounds = array<i64: 32, 256>}, {transform_indices = @transform_1, window_bounds = array<i64: 256, 256>}, {transform_indices = @transform_2, window_bounds = array<i64: 32, 256>}, {pipeline_mode = #tpu.pipeline_mode<synchronous>, transform_indices = @transform_3, window_bounds = array<i64: 2, 256>}, {pipeline_mode = #tpu.pipeline_mode<synchronous>, transform_indices = @transform_4, window_bounds = array<i64: 256, 128>}, {pipeline_mode = #tpu.pipeline_mode<synchronous>, transform_indices = @transform_5, window_bounds = array<i64: 2, 128>}, {pipeline_mode = #tpu.pipeline_mode<synchronous>, transform_indices = @transform_6, window_bounds = array<i64: 1152, 128>}, {pipeline_mode = #tpu.pipeline_mode<synchronous>, transform_indices = @transform_7, window_bounds = array<i64: 2, 128>}, {pipeline_mode = #tpu.pipeline_mode<synchronous>, transform_indices = @transform_8, window_bounds = array<i64: 128, 256>}, {pipeline_mode = #tpu.pipeline_mode<synchronous>, transform_indices = @transform_9, window_bounds = array<i64: 1, 256>}, {transform_indices = @transform_10, window_bounds = array<i64: 256, 256>}]} {
    %c0 = arith.constant 0 : index
    %c0_0 = arith.constant 0 : index
    %0 = vector.load %arg2[%c0, %c0_0] : memref<256x256xbf16, #tpu.memory_space<vmem>>, vector<256x256xbf16>
    %c0_1 = arith.constant 0 : index
    %c0_2 = arith.constant 0 : index
    %1 = vector.load %arg1[%c0_1, %c0_2] : memref<32x256xbf16, #tpu.memory_space<vmem>>, vector<32x256xbf16>
    %c0_3 = arith.constant 0 : index
    %c0_4 = arith.constant 0 : index
    %2 = vector.load %arg3[%c0_3, %c0_4] : memref<32x256xbf16, #tpu.memory_space<vmem>>, vector<32x256xbf16>
    %3 = tpu.concatenate %1, %0, %2 in 0 : vector<32x256xbf16>, vector<256x256xbf16>, vector<32x256xbf16> -> vector<320x256xbf16>
    %4 = arith.extf %3 : vector<320x256xbf16> to vector<320x256xf32>
    %c0_5 = arith.constant 0 : index
    %c0_6 = arith.constant 0 : index
    %5 = vector.load %arg4[%c0_5, %c0_6] : memref<2x256xf32, #tpu.memory_space<vmem>>, vector<1x256xf32>
    %6 = vector.broadcast %5 : vector<1x256xf32> to vector<320x256xf32>
    %7 = arith.mulf %4, %6 : vector<320x256xf32>
    %c1 = arith.constant 1 : index
    %c0_7 = arith.constant 0 : index
    %8 = vector.load %arg4[%c1, %c0_7] : memref<2x256xf32, #tpu.memory_space<vmem>>, vector<1x256xf32>
    %9 = vector.broadcast %8 : vector<1x256xf32> to vector<320x256xf32>
    %10 = arith.addf %7, %9 : vector<320x256xf32>
    %cst = arith.constant 0.000000e+00 : f32
    %11 = vector.broadcast %cst : f32 to vector<320x256xf32>
    %12 = arith.maximumf %10, %11 : vector<320x256xf32>
    %13 = arith.truncf %12 : vector<320x256xf32> to vector<320x256xbf16>
    %c0_8 = arith.constant 0 : index
    %c0_9 = arith.constant 0 : index
    %14 = vector.load %arg5[%c0_8, %c0_9] : memref<256x128xbf16, #tpu.memory_space<vmem>>, vector<256x128xbf16>
    %cst_10 = arith.constant dense<0.000000e+00> : vector<320x128xf32>
    %15 = tpu.matmul %13, %14, %cst_10 {dimension_numbers = #tpu.dot_dimension_numbers<[1], [0], [0], [1], [0, 0, 1, 1], [], []>} : vector<320x256xbf16>, vector<256x128xbf16>, vector<320x128xf32> -> vector<320x128xf32>
    %c0_11 = arith.constant 0 : index
    %c0_12 = arith.constant 0 : index
    %16 = vector.load %arg6[%c0_11, %c0_12] : memref<2x128xf32, #tpu.memory_space<vmem>>, vector<1x128xf32>
    %17 = vector.broadcast %16 : vector<1x128xf32> to vector<320x128xf32>
    %18 = arith.mulf %15, %17 : vector<320x128xf32>
    %c1_13 = arith.constant 1 : index
    %c0_14 = arith.constant 0 : index
    %19 = vector.load %arg6[%c1_13, %c0_14] : memref<2x128xf32, #tpu.memory_space<vmem>>, vector<1x128xf32>
    %20 = vector.broadcast %19 : vector<1x128xf32> to vector<320x128xf32>
    %21 = arith.addf %18, %20 : vector<320x128xf32>
    %cst_15 = arith.constant 0.000000e+00 : f32
    %22 = vector.broadcast %cst_15 : f32 to vector<320x128xf32>
    %23 = arith.maximumf %21, %22 : vector<320x128xf32>
    %24 = tpu.iota {dimensions = array<i32: 0>} : vector<320x128xi32>
    %c32_i32 = arith.constant 32 : i32
    %c0_i32 = arith.constant 0 : i32
    %25 = arith.cmpi eq, %c32_i32, %c0_i32 : i32
    %c1_i32 = arith.constant 1 : i32
    %26 = arith.select %25, %c1_i32, %c32_i32 : i32
    %27 = vector.broadcast %26 : i32 to vector<320x128xi32>
    %28 = arith.remsi %24, %27 : vector<320x128xi32>
    %c0_i32_16 = arith.constant 0 : i32
    %29 = vector.broadcast %c0_i32_16 : i32 to vector<320x128xi32>
    %30 = arith.cmpi ne, %28, %29 : vector<320x128xi32>
    %c0_i32_17 = arith.constant 0 : i32
    %31 = vector.broadcast %c0_i32_17 : i32 to vector<320x128xi32>
    %32 = arith.cmpi slt, %28, %31 : vector<320x128xi32>
    %c0_i32_18 = arith.constant 0 : i32
    %33 = arith.cmpi slt, %26, %c0_i32_18 : i32
    %34 = vector.broadcast %33 : i1 to vector<320x128xi1>
    %35 = vector.broadcast %34 : vector<320x128xi1> to vector<320x128xi1>
    %36 = arith.xori %32, %35 : vector<320x128xi1>
    %37 = arith.andi %36, %30 : vector<320x128xi1>
    %38 = vector.broadcast %26 : i32 to vector<320x128xi32>
    %39 = arith.addi %28, %38 : vector<320x128xi32>
    %40 = arith.select %37, %39, %28 : vector<320x128xi1>, vector<320x128xi32>
    %c32_i32_19 = arith.constant 32 : i32
    %41 = vector.broadcast %c32_i32_19 : i32 to vector<320x128xi32>
    %42 = arith.cmpi slt, %24, %41 : vector<320x128xi32>
    %c0_i32_20 = arith.constant 0 : i32
    %43 = arith.cmpi eq, %arg0, %c0_i32_20 : i32
    %44 = vector.broadcast %43 : i1 to vector<320x128xi1>
    %45 = arith.andi %42, %44 : vector<320x128xi1>
    %c288_i32 = arith.constant 288 : i32
    %46 = vector.broadcast %c288_i32 : i32 to vector<320x128xi32>
    %47 = arith.cmpi sge, %24, %46 : vector<320x128xi32>
    %c1_i32_21 = arith.constant 1 : i32
    %48 = arith.cmpi eq, %arg0, %c1_i32_21 : i32
    %49 = vector.broadcast %48 : i1 to vector<320x128xi1>
    %50 = arith.andi %47, %49 : vector<320x128xi1>
    %51 = arith.ori %45, %50 : vector<320x128xi1>
    %cst_22 = arith.constant 0.000000e+00 : f32
    %52 = vector.broadcast %cst_22 : f32 to vector<320x128xf32>
    %53 = arith.select %51, %52, %23 : vector<320x128xi1>, vector<320x128xf32>
    %c30_i32 = arith.constant 30 : i32
    %54 = vector.broadcast %c30_i32 : i32 to vector<320x128xi32>
    %55 = arith.cmpi sge, %40, %54 : vector<320x128xi32>
    %cst_23 = arith.constant 0.000000e+00 : f32
    %56 = vector.broadcast %cst_23 : f32 to vector<320x128xf32>
    %57 = arith.select %55, %56, %53 : vector<320x128xi1>, vector<320x128xf32>
    %c2_i32 = arith.constant 2 : i32
    %58 = vector.broadcast %c2_i32 : i32 to vector<320x128xi32>
    %59 = arith.cmpi slt, %40, %58 : vector<320x128xi32>
    %cst_24 = arith.constant 0.000000e+00 : f32
    %60 = vector.broadcast %cst_24 : f32 to vector<320x128xf32>
    %61 = arith.select %59, %60, %53 : vector<320x128xi1>, vector<320x128xf32>
    %c2_i32_25 = arith.constant 2 : i32
    %62 = tpu.dynamic_rotate %57 by %c2_i32_25 dim 0 : vector<320x128xf32>, i32 -> vector<320x128xf32>
    %63 = arith.truncf %62 : vector<320x128xf32> to vector<320x128xbf16>
    %c318_i32 = arith.constant 318 : i32
    %64 = tpu.dynamic_rotate %61 by %c318_i32 dim 0 : vector<320x128xf32>, i32 -> vector<320x128xf32>
    %65 = arith.truncf %64 : vector<320x128xf32> to vector<320x128xbf16>
    %66 = arith.truncf %53 : vector<320x128xf32> to vector<320x128xbf16>
    %67 = vector.extract_strided_slice %63 {offsets = [0, 0], sizes = [256, 128], strides = [1, 1]} : vector<320x128xbf16> to vector<256x128xbf16>
    %68 = vector.extract_strided_slice %66 {offsets = [0, 0], sizes = [256, 128], strides = [1, 1]} : vector<320x128xbf16> to vector<256x128xbf16>
    %69 = vector.extract_strided_slice %65 {offsets = [0, 0], sizes = [256, 128], strides = [1, 1]} : vector<320x128xbf16> to vector<256x128xbf16>
    %70 = vector.extract_strided_slice %63 {offsets = [32, 0], sizes = [256, 128], strides = [1, 1]} : vector<320x128xbf16> to vector<256x128xbf16>
    %71 = vector.extract_strided_slice %66 {offsets = [32, 0], sizes = [256, 128], strides = [1, 1]} : vector<320x128xbf16> to vector<256x128xbf16>
    %72 = vector.extract_strided_slice %65 {offsets = [32, 0], sizes = [256, 128], strides = [1, 1]} : vector<320x128xbf16> to vector<256x128xbf16>
    %73 = vector.extract_strided_slice %63 {offsets = [64, 0], sizes = [256, 128], strides = [1, 1]} : vector<320x128xbf16> to vector<256x128xbf16>
    %74 = vector.extract_strided_slice %66 {offsets = [64, 0], sizes = [256, 128], strides = [1, 1]} : vector<320x128xbf16> to vector<256x128xbf16>
    %75 = vector.extract_strided_slice %65 {offsets = [64, 0], sizes = [256, 128], strides = [1, 1]} : vector<320x128xbf16> to vector<256x128xbf16>
    %76 = tpu.concatenate %67, %68, %69, %70, %71, %72, %73, %74, %75 in 1 : vector<256x128xbf16>, vector<256x128xbf16>, vector<256x128xbf16>, vector<256x128xbf16>, vector<256x128xbf16>, vector<256x128xbf16>, vector<256x128xbf16>, vector<256x128xbf16>, vector<256x128xbf16> -> vector<256x1152xbf16>
    %c0_26 = arith.constant 0 : index
    %c0_27 = arith.constant 0 : index
    %77 = vector.load %arg7[%c0_26, %c0_27] : memref<1152x128xbf16, #tpu.memory_space<vmem>>, vector<1152x128xbf16>
    %cst_28 = arith.constant dense<0.000000e+00> : vector<256x128xf32>
    %78 = tpu.matmul %76, %77, %cst_28 {dimension_numbers = #tpu.dot_dimension_numbers<[1], [0], [0], [1], [0, 0, 1, 1], [], []>} : vector<256x1152xbf16>, vector<1152x128xbf16>, vector<256x128xf32> -> vector<256x128xf32>
    %c0_29 = arith.constant 0 : index
    %c0_30 = arith.constant 0 : index
    %79 = vector.load %arg8[%c0_29, %c0_30] : memref<2x128xf32, #tpu.memory_space<vmem>>, vector<1x128xf32>
    %80 = vector.broadcast %79 : vector<1x128xf32> to vector<256x128xf32>
    %81 = arith.mulf %78, %80 : vector<256x128xf32>
    %c1_31 = arith.constant 1 : index
    %c0_32 = arith.constant 0 : index
    %82 = vector.load %arg8[%c1_31, %c0_32] : memref<2x128xf32, #tpu.memory_space<vmem>>, vector<1x128xf32>
    %83 = vector.broadcast %82 : vector<1x128xf32> to vector<256x128xf32>
    %84 = arith.addf %81, %83 : vector<256x128xf32>
    %cst_33 = arith.constant 0.000000e+00 : f32
    %85 = vector.broadcast %cst_33 : f32 to vector<256x128xf32>
    %86 = arith.maximumf %84, %85 : vector<256x128xf32>
    %87 = arith.truncf %86 : vector<256x128xf32> to vector<256x128xbf16>
    %c0_34 = arith.constant 0 : index
    %c0_35 = arith.constant 0 : index
    %88 = vector.load %arg9[%c0_34, %c0_35] : memref<128x256xbf16, #tpu.memory_space<vmem>>, vector<128x256xbf16>
    %cst_36 = arith.constant dense<0.000000e+00> : vector<256x256xf32>
    %89 = tpu.matmul %87, %88, %cst_36 {dimension_numbers = #tpu.dot_dimension_numbers<[1], [0], [0], [1], [0, 0, 1, 1], [], []>} : vector<256x128xbf16>, vector<128x256xbf16>, vector<256x256xf32> -> vector<256x256xf32>
    %c0_37 = arith.constant 0 : index
    %c0_38 = arith.constant 0 : index
    %90 = vector.load %arg10[%c0_37, %c0_38] : memref<1x256xf32, #tpu.memory_space<vmem>>, vector<1x256xf32>
    %91 = vector.broadcast %90 : vector<1x256xf32> to vector<256x256xf32>
    %92 = arith.addf %89, %91 : vector<256x256xf32>
    %93 = arith.extf %0 : vector<256x256xbf16> to vector<256x256xf32>
    %94 = arith.addf %92, %93 : vector<256x256xf32>
    %95 = arith.truncf %94 : vector<256x256xf32> to vector<256x256xbf16>
    %c0_39 = arith.constant 0 : index
    %c0_40 = arith.constant 0 : index
    %96 = vector.load %arg11[%c0_39, %c0_40] : memref<256x256xbf16, #tpu.memory_space<vmem>>, vector<256x256xbf16>
    tpu.vector_store %arg11[%c0_39, %c0_40], %95 {strides = array<i32>} : memref<256x256xbf16, #tpu.memory_space<vmem>>, vector<256x256xbf16>,
    return
  }
  func.func @transform_0(%arg0: i32) -> (i32, i32) {
    %c8_i32 = arith.constant 8 : i32
    %0 = arith.muli %arg0, %c8_i32 : i32
    %c1_i32 = arith.constant 1 : i32
    %1 = arith.subi %0, %c1_i32 : i32
    %c0_i32 = arith.constant 0 : i32
    %2 = arith.maxsi %1, %c0_i32 : i32
    %c0_i32_0 = arith.constant 0 : i32
    %c0_i32_1 = arith.constant 0 : i32
    return %2, %c0_i32_0 : i32, i32
  }
  func.func @transform_1(%arg0: i32) -> (i32, i32) {
    %c0_i32 = arith.constant 0 : i32
    %c0_i32_0 = arith.constant 0 : i32
    return %arg0, %c0_i32 : i32, i32
  }
  func.func @transform_2(%arg0: i32) -> (i32, i32) {
    %c8_i32 = arith.constant 8 : i32
    %0 = arith.muli %arg0, %c8_i32 : i32
    %c8_i32_0 = arith.constant 8 : i32
    %1 = arith.addi %0, %c8_i32_0 : i32
    %c15_i32 = arith.constant 15 : i32
    %2 = arith.minsi %1, %c15_i32 : i32
    %c0_i32 = arith.constant 0 : i32
    %c0_i32_1 = arith.constant 0 : i32
    return %2, %c0_i32 : i32, i32
  }
  func.func @transform_3(%arg0: i32) -> (i32, i32) {
    %c0_i32 = arith.constant 0 : i32
    %c0_i32_0 = arith.constant 0 : i32
    %c0_i32_1 = arith.constant 0 : i32
    return %c0_i32, %c0_i32_0 : i32, i32
  }
  func.func @transform_4(%arg0: i32) -> (i32, i32) {
    %c0_i32 = arith.constant 0 : i32
    %c0_i32_0 = arith.constant 0 : i32
    %c0_i32_1 = arith.constant 0 : i32
    return %c0_i32, %c0_i32_0 : i32, i32
  }
  func.func @transform_5(%arg0: i32) -> (i32, i32) {
    %c0_i32 = arith.constant 0 : i32
    %c0_i32_0 = arith.constant 0 : i32
    %c0_i32_1 = arith.constant 0 : i32
    return %c0_i32, %c0_i32_0 : i32, i32
  }
  func.func @transform_6(%arg0: i32) -> (i32, i32) {
    %c0_i32 = arith.constant 0 : i32
    %c0_i32_0 = arith.constant 0 : i32
    %c0_i32_1 = arith.constant 0 : i32
    return %c0_i32, %c0_i32_0 : i32, i32
  }
  func.func @transform_7(%arg0: i32) -> (i32, i32) {
    %c0_i32 = arith.constant 0 : i32
    %c0_i32_0 = arith.constant 0 : i32
    %c0_i32_1 = arith.constant 0 : i32
    return %c0_i32, %c0_i32_0 : i32, i32
  }
  func.func @transform_8(%arg0: i32) -> (i32, i32) {
    %c0_i32 = arith.constant 0 : i32
    %c0_i32_0 = arith.constant 0 : i32
    %c0_i32_1 = arith.constant 0 : i32
    return %c0_i32, %c0_i32_0 : i32, i32
  }
  func.func @transform_9(%arg0: i32) -> (i32, i32) {
    %c0_i32 = arith.constant 0 : i32
    %c0_i32_0 = arith.constant 0 : i32
    %c0_i32_1 = arith.constant 0 : i32
    return %c0_i32, %c0_i32_0 : i32, i32
  }
  func.func @transform_10(%arg0: i32) -> (i32, i32) {
    %c0_i32 = arith.constant 0 : i32
    %c0_i32_0 = arith.constant 0 : i32
    return %arg0, %c0_i32 : i32, i32
  }
}

module attributes {stable_mosaic.version = 11 : i64} {
  func.func @_maxpool_kernel(%arg0: i32, %arg1: memref<8x16x2x256xbf16, #tpu.memory_space<vmem>>, %arg2: memref<4x8x2x256xbf16, #tpu.memory_space<vmem>>) attributes {dimension_semantics = [#tpu.dimension_semantics<parallel>], iteration_bounds = array<i64: 2>, scalar_prefetch = 0 : i64, scratch_operands = 0 : i64, tpu.core_type = #tpu.core_type<tc>, window_params = [{transform_indices = @transform_0, window_bounds = array<i64: 8, 16, 2, 256>}, {transform_indices = @transform_1, window_bounds = array<i64: 4, 8, 2, 256>}]} {
    %c0 = arith.constant 0 : index
    %c0_0 = arith.constant 0 : index
    %c0_1 = arith.constant 0 : index
    %c0_2 = arith.constant 0 : index
    %0 = vector.load %arg1[%c0, %c0_0, %c0_1, %c0_2] : memref<8x16x2x256xbf16, #tpu.memory_space<vmem>>, vector<8x16x2x256xbf16>
    %1 = vector.shape_cast %0 : vector<8x16x2x256xbf16> to vector<4x2x8x2x2x256xbf16>
    %2 = vector.extract_strided_slice %1 {offsets = [0, 0, 0, 0, 0, 0], sizes = [4, 1, 8, 2, 2, 256], strides = [1, 1, 1, 1, 1, 1]} : vector<4x2x8x2x2x256xbf16> to vector<4x1x8x2x2x256xbf16>
    %3 = vector.shape_cast %2 : vector<4x1x8x2x2x256xbf16> to vector<4x8x2x2x256xbf16>
    %4 = vector.extract_strided_slice %1 {offsets = [0, 1, 0, 0, 0, 0], sizes = [4, 1, 8, 2, 2, 256], strides = [1, 1, 1, 1, 1, 1]} : vector<4x2x8x2x2x256xbf16> to vector<4x1x8x2x2x256xbf16>
    %5 = vector.shape_cast %4 : vector<4x1x8x2x2x256xbf16> to vector<4x8x2x2x256xbf16>
    %6 = arith.maximumf %3, %5 : vector<4x8x2x2x256xbf16>
    %7 = vector.extract_strided_slice %6 {offsets = [0, 0, 0, 0, 0], sizes = [4, 8, 1, 2, 256], strides = [1, 1, 1, 1, 1]} : vector<4x8x2x2x256xbf16> to vector<4x8x1x2x256xbf16>
    %8 = vector.shape_cast %7 : vector<4x8x1x2x256xbf16> to vector<4x8x2x256xbf16>
    %9 = vector.extract_strided_slice %6 {offsets = [0, 0, 1, 0, 0], sizes = [4, 8, 1, 2, 256], strides = [1, 1, 1, 1, 1]} : vector<4x8x2x2x256xbf16> to vector<4x8x1x2x256xbf16>
    %10 = vector.shape_cast %9 : vector<4x8x1x2x256xbf16> to vector<4x8x2x256xbf16>
    %11 = arith.maximumf %8, %10 : vector<4x8x2x256xbf16>
    %c0_3 = arith.constant 0 : index
    %c0_4 = arith.constant 0 : index
    %c0_5 = arith.constant 0 : index
    %c0_6 = arith.constant 0 : index
    %12 = vector.load %arg2[%c0_3, %c0_4, %c0_5, %c0_6] : memref<4x8x2x256xbf16, #tpu.memory_space<vmem>>, vector<4x8x2x256xbf16>
    tpu.vector_store %arg2[%c0_3, %c0_4, %c0_5, %c0_6], %11 {strides = array<i32>} : memref<4x8x2x256xbf16, #tpu.memory_space<vmem>>, vector<4x8x2x256xbf16>,
    return
  }
  func.func @transform_0(%arg0: i32) -> (i32, i32, i32, i32) {
    %c0_i32 = arith.constant 0 : i32
    %c0_i32_0 = arith.constant 0 : i32
    %c0_i32_1 = arith.constant 0 : i32
    %c0_i32_2 = arith.constant 0 : i32
    return %arg0, %c0_i32, %c0_i32_0, %c0_i32_1 : i32, i32, i32, i32
  }
  func.func @transform_1(%arg0: i32) -> (i32, i32, i32, i32) {
    %c0_i32 = arith.constant 0 : i32
    %c0_i32_0 = arith.constant 0 : i32
    %c0_i32_1 = arith.constant 0 : i32
    %c0_i32_2 = arith.constant 0 : i32
    return %arg0, %c0_i32, %c0_i32_0, %c0_i32_1 : i32, i32, i32, i32
  }
}

module attributes {stable_mosaic.version = 11 : i64} {
  func.func @_residual_kernel(%arg0: i32, %arg1: memref<16x256xbf16, #tpu.memory_space<vmem>>, %arg2: memref<64x256xbf16, #tpu.memory_space<vmem>>, %arg3: memref<16x256xbf16, #tpu.memory_space<vmem>>, %arg4: memref<2x256xf32, #tpu.memory_space<vmem>>, %arg5: memref<256x128xbf16, #tpu.memory_space<vmem>>, %arg6: memref<2x128xf32, #tpu.memory_space<vmem>>, %arg7: memref<1152x128xbf16, #tpu.memory_space<vmem>>, %arg8: memref<2x128xf32, #tpu.memory_space<vmem>>, %arg9: memref<128x256xbf16, #tpu.memory_space<vmem>>, %arg10: memref<1x256xf32, #tpu.memory_space<vmem>>, %arg11: memref<64x256xbf16, #tpu.memory_space<vmem>>) attributes {dimension_semantics = [#tpu.dimension_semantics<parallel>], iteration_bounds = array<i64: 2>, scalar_prefetch = 0 : i64, scratch_operands = 0 : i64, tpu.core_type = #tpu.core_type<tc>, window_params = [{transform_indices = @transform_0, window_bounds = array<i64: 16, 256>}, {transform_indices = @transform_1, window_bounds = array<i64: 64, 256>}, {transform_indices = @transform_2, window_bounds = array<i64: 16, 256>}, {pipeline_mode = #tpu.pipeline_mode<synchronous>, transform_indices = @transform_3, window_bounds = array<i64: 2, 256>}, {pipeline_mode = #tpu.pipeline_mode<synchronous>, transform_indices = @transform_4, window_bounds = array<i64: 256, 128>}, {pipeline_mode = #tpu.pipeline_mode<synchronous>, transform_indices = @transform_5, window_bounds = array<i64: 2, 128>}, {pipeline_mode = #tpu.pipeline_mode<synchronous>, transform_indices = @transform_6, window_bounds = array<i64: 1152, 128>}, {pipeline_mode = #tpu.pipeline_mode<synchronous>, transform_indices = @transform_7, window_bounds = array<i64: 2, 128>}, {pipeline_mode = #tpu.pipeline_mode<synchronous>, transform_indices = @transform_8, window_bounds = array<i64: 128, 256>}, {pipeline_mode = #tpu.pipeline_mode<synchronous>, transform_indices = @transform_9, window_bounds = array<i64: 1, 256>}, {transform_indices = @transform_10, window_bounds = array<i64: 64, 256>}]} {
    %c0 = arith.constant 0 : index
    %c0_0 = arith.constant 0 : index
    %0 = vector.load %arg2[%c0, %c0_0] : memref<64x256xbf16, #tpu.memory_space<vmem>>, vector<64x256xbf16>
    %c0_1 = arith.constant 0 : index
    %c0_2 = arith.constant 0 : index
    %1 = vector.load %arg1[%c0_1, %c0_2] : memref<16x256xbf16, #tpu.memory_space<vmem>>, vector<16x256xbf16>
    %c0_3 = arith.constant 0 : index
    %c0_4 = arith.constant 0 : index
    %2 = vector.load %arg3[%c0_3, %c0_4] : memref<16x256xbf16, #tpu.memory_space<vmem>>, vector<16x256xbf16>
    %3 = tpu.concatenate %1, %0, %2 in 0 : vector<16x256xbf16>, vector<64x256xbf16>, vector<16x256xbf16> -> vector<96x256xbf16>
    %4 = arith.extf %3 : vector<96x256xbf16> to vector<96x256xf32>
    %c0_5 = arith.constant 0 : index
    %c0_6 = arith.constant 0 : index
    %5 = vector.load %arg4[%c0_5, %c0_6] : memref<2x256xf32, #tpu.memory_space<vmem>>, vector<1x256xf32>
    %6 = vector.broadcast %5 : vector<1x256xf32> to vector<96x256xf32>
    %7 = arith.mulf %4, %6 : vector<96x256xf32>
    %c1 = arith.constant 1 : index
    %c0_7 = arith.constant 0 : index
    %8 = vector.load %arg4[%c1, %c0_7] : memref<2x256xf32, #tpu.memory_space<vmem>>, vector<1x256xf32>
    %9 = vector.broadcast %8 : vector<1x256xf32> to vector<96x256xf32>
    %10 = arith.addf %7, %9 : vector<96x256xf32>
    %cst = arith.constant 0.000000e+00 : f32
    %11 = vector.broadcast %cst : f32 to vector<96x256xf32>
    %12 = arith.maximumf %10, %11 : vector<96x256xf32>
    %13 = arith.truncf %12 : vector<96x256xf32> to vector<96x256xbf16>
    %c0_8 = arith.constant 0 : index
    %c0_9 = arith.constant 0 : index
    %14 = vector.load %arg5[%c0_8, %c0_9] : memref<256x128xbf16, #tpu.memory_space<vmem>>, vector<256x128xbf16>
    %cst_10 = arith.constant dense<0.000000e+00> : vector<96x128xf32>
    %15 = tpu.matmul %13, %14, %cst_10 {dimension_numbers = #tpu.dot_dimension_numbers<[1], [0], [0], [1], [0, 0, 1, 1], [], []>} : vector<96x256xbf16>, vector<256x128xbf16>, vector<96x128xf32> -> vector<96x128xf32>
    %c0_11 = arith.constant 0 : index
    %c0_12 = arith.constant 0 : index
    %16 = vector.load %arg6[%c0_11, %c0_12] : memref<2x128xf32, #tpu.memory_space<vmem>>, vector<1x128xf32>
    %17 = vector.broadcast %16 : vector<1x128xf32> to vector<96x128xf32>
    %18 = arith.mulf %15, %17 : vector<96x128xf32>
    %c1_13 = arith.constant 1 : index
    %c0_14 = arith.constant 0 : index
    %19 = vector.load %arg6[%c1_13, %c0_14] : memref<2x128xf32, #tpu.memory_space<vmem>>, vector<1x128xf32>
    %20 = vector.broadcast %19 : vector<1x128xf32> to vector<96x128xf32>
    %21 = arith.addf %18, %20 : vector<96x128xf32>
    %cst_15 = arith.constant 0.000000e+00 : f32
    %22 = vector.broadcast %cst_15 : f32 to vector<96x128xf32>
    %23 = arith.maximumf %21, %22 : vector<96x128xf32>
    %24 = tpu.iota {dimensions = array<i32: 0>} : vector<96x128xi32>
    %c16_i32 = arith.constant 16 : i32
    %c0_i32 = arith.constant 0 : i32
    %25 = arith.cmpi eq, %c16_i32, %c0_i32 : i32
    %c1_i32 = arith.constant 1 : i32
    %26 = arith.select %25, %c1_i32, %c16_i32 : i32
    %27 = vector.broadcast %26 : i32 to vector<96x128xi32>
    %28 = arith.remsi %24, %27 : vector<96x128xi32>
    %c0_i32_16 = arith.constant 0 : i32
    %29 = vector.broadcast %c0_i32_16 : i32 to vector<96x128xi32>
    %30 = arith.cmpi ne, %28, %29 : vector<96x128xi32>
    %c0_i32_17 = arith.constant 0 : i32
    %31 = vector.broadcast %c0_i32_17 : i32 to vector<96x128xi32>
    %32 = arith.cmpi slt, %28, %31 : vector<96x128xi32>
    %c0_i32_18 = arith.constant 0 : i32
    %33 = arith.cmpi slt, %26, %c0_i32_18 : i32
    %34 = vector.broadcast %33 : i1 to vector<96x128xi1>
    %35 = vector.broadcast %34 : vector<96x128xi1> to vector<96x128xi1>
    %36 = arith.xori %32, %35 : vector<96x128xi1>
    %37 = arith.andi %36, %30 : vector<96x128xi1>
    %38 = vector.broadcast %26 : i32 to vector<96x128xi32>
    %39 = arith.addi %28, %38 : vector<96x128xi32>
    %40 = arith.select %37, %39, %28 : vector<96x128xi1>, vector<96x128xi32>
    %c16_i32_19 = arith.constant 16 : i32
    %41 = vector.broadcast %c16_i32_19 : i32 to vector<96x128xi32>
    %42 = arith.cmpi slt, %24, %41 : vector<96x128xi32>
    %c0_i32_20 = arith.constant 0 : i32
    %43 = arith.cmpi eq, %arg0, %c0_i32_20 : i32
    %44 = vector.broadcast %43 : i1 to vector<96x128xi1>
    %45 = arith.andi %42, %44 : vector<96x128xi1>
    %c80_i32 = arith.constant 80 : i32
    %46 = vector.broadcast %c80_i32 : i32 to vector<96x128xi32>
    %47 = arith.cmpi sge, %24, %46 : vector<96x128xi32>
    %c1_i32_21 = arith.constant 1 : i32
    %48 = arith.cmpi eq, %arg0, %c1_i32_21 : i32
    %49 = vector.broadcast %48 : i1 to vector<96x128xi1>
    %50 = arith.andi %47, %49 : vector<96x128xi1>
    %51 = arith.ori %45, %50 : vector<96x128xi1>
    %cst_22 = arith.constant 0.000000e+00 : f32
    %52 = vector.broadcast %cst_22 : f32 to vector<96x128xf32>
    %53 = arith.select %51, %52, %23 : vector<96x128xi1>, vector<96x128xf32>
    %c14_i32 = arith.constant 14 : i32
    %54 = vector.broadcast %c14_i32 : i32 to vector<96x128xi32>
    %55 = arith.cmpi sge, %40, %54 : vector<96x128xi32>
    %cst_23 = arith.constant 0.000000e+00 : f32
    %56 = vector.broadcast %cst_23 : f32 to vector<96x128xf32>
    %57 = arith.select %55, %56, %53 : vector<96x128xi1>, vector<96x128xf32>
    %c2_i32 = arith.constant 2 : i32
    %58 = vector.broadcast %c2_i32 : i32 to vector<96x128xi32>
    %59 = arith.cmpi slt, %40, %58 : vector<96x128xi32>
    %cst_24 = arith.constant 0.000000e+00 : f32
    %60 = vector.broadcast %cst_24 : f32 to vector<96x128xf32>
    %61 = arith.select %59, %60, %53 : vector<96x128xi1>, vector<96x128xf32>
    %c2_i32_25 = arith.constant 2 : i32
    %62 = tpu.dynamic_rotate %57 by %c2_i32_25 dim 0 : vector<96x128xf32>, i32 -> vector<96x128xf32>
    %63 = arith.truncf %62 : vector<96x128xf32> to vector<96x128xbf16>
    %c94_i32 = arith.constant 94 : i32
    %64 = tpu.dynamic_rotate %61 by %c94_i32 dim 0 : vector<96x128xf32>, i32 -> vector<96x128xf32>
    %65 = arith.truncf %64 : vector<96x128xf32> to vector<96x128xbf16>
    %66 = arith.truncf %53 : vector<96x128xf32> to vector<96x128xbf16>
    %67 = vector.extract_strided_slice %63 {offsets = [0, 0], sizes = [64, 128], strides = [1, 1]} : vector<96x128xbf16> to vector<64x128xbf16>
    %68 = vector.extract_strided_slice %66 {offsets = [0, 0], sizes = [64, 128], strides = [1, 1]} : vector<96x128xbf16> to vector<64x128xbf16>
    %69 = vector.extract_strided_slice %65 {offsets = [0, 0], sizes = [64, 128], strides = [1, 1]} : vector<96x128xbf16> to vector<64x128xbf16>
    %70 = vector.extract_strided_slice %63 {offsets = [16, 0], sizes = [64, 128], strides = [1, 1]} : vector<96x128xbf16> to vector<64x128xbf16>
    %71 = vector.extract_strided_slice %66 {offsets = [16, 0], sizes = [64, 128], strides = [1, 1]} : vector<96x128xbf16> to vector<64x128xbf16>
    %72 = vector.extract_strided_slice %65 {offsets = [16, 0], sizes = [64, 128], strides = [1, 1]} : vector<96x128xbf16> to vector<64x128xbf16>
    %73 = vector.extract_strided_slice %63 {offsets = [32, 0], sizes = [64, 128], strides = [1, 1]} : vector<96x128xbf16> to vector<64x128xbf16>
    %74 = vector.extract_strided_slice %66 {offsets = [32, 0], sizes = [64, 128], strides = [1, 1]} : vector<96x128xbf16> to vector<64x128xbf16>
    %75 = vector.extract_strided_slice %65 {offsets = [32, 0], sizes = [64, 128], strides = [1, 1]} : vector<96x128xbf16> to vector<64x128xbf16>
    %76 = tpu.concatenate %67, %68, %69, %70, %71, %72, %73, %74, %75 in 1 : vector<64x128xbf16>, vector<64x128xbf16>, vector<64x128xbf16>, vector<64x128xbf16>, vector<64x128xbf16>, vector<64x128xbf16>, vector<64x128xbf16>, vector<64x128xbf16>, vector<64x128xbf16> -> vector<64x1152xbf16>
    %c0_26 = arith.constant 0 : index
    %c0_27 = arith.constant 0 : index
    %77 = vector.load %arg7[%c0_26, %c0_27] : memref<1152x128xbf16, #tpu.memory_space<vmem>>, vector<1152x128xbf16>
    %cst_28 = arith.constant dense<0.000000e+00> : vector<64x128xf32>
    %78 = tpu.matmul %76, %77, %cst_28 {dimension_numbers = #tpu.dot_dimension_numbers<[1], [0], [0], [1], [0, 0, 1, 1], [], []>} : vector<64x1152xbf16>, vector<1152x128xbf16>, vector<64x128xf32> -> vector<64x128xf32>
    %c0_29 = arith.constant 0 : index
    %c0_30 = arith.constant 0 : index
    %79 = vector.load %arg8[%c0_29, %c0_30] : memref<2x128xf32, #tpu.memory_space<vmem>>, vector<1x128xf32>
    %80 = vector.broadcast %79 : vector<1x128xf32> to vector<64x128xf32>
    %81 = arith.mulf %78, %80 : vector<64x128xf32>
    %c1_31 = arith.constant 1 : index
    %c0_32 = arith.constant 0 : index
    %82 = vector.load %arg8[%c1_31, %c0_32] : memref<2x128xf32, #tpu.memory_space<vmem>>, vector<1x128xf32>
    %83 = vector.broadcast %82 : vector<1x128xf32> to vector<64x128xf32>
    %84 = arith.addf %81, %83 : vector<64x128xf32>
    %cst_33 = arith.constant 0.000000e+00 : f32
    %85 = vector.broadcast %cst_33 : f32 to vector<64x128xf32>
    %86 = arith.maximumf %84, %85 : vector<64x128xf32>
    %87 = arith.truncf %86 : vector<64x128xf32> to vector<64x128xbf16>
    %c0_34 = arith.constant 0 : index
    %c0_35 = arith.constant 0 : index
    %88 = vector.load %arg9[%c0_34, %c0_35] : memref<128x256xbf16, #tpu.memory_space<vmem>>, vector<128x256xbf16>
    %cst_36 = arith.constant dense<0.000000e+00> : vector<64x256xf32>
    %89 = tpu.matmul %87, %88, %cst_36 {dimension_numbers = #tpu.dot_dimension_numbers<[1], [0], [0], [1], [0, 0, 1, 1], [], []>} : vector<64x128xbf16>, vector<128x256xbf16>, vector<64x256xf32> -> vector<64x256xf32>
    %c0_37 = arith.constant 0 : index
    %c0_38 = arith.constant 0 : index
    %90 = vector.load %arg10[%c0_37, %c0_38] : memref<1x256xf32, #tpu.memory_space<vmem>>, vector<1x256xf32>
    %91 = vector.broadcast %90 : vector<1x256xf32> to vector<64x256xf32>
    %92 = arith.addf %89, %91 : vector<64x256xf32>
    %93 = arith.extf %0 : vector<64x256xbf16> to vector<64x256xf32>
    %94 = arith.addf %92, %93 : vector<64x256xf32>
    %95 = arith.truncf %94 : vector<64x256xf32> to vector<64x256xbf16>
    %c0_39 = arith.constant 0 : index
    %c0_40 = arith.constant 0 : index
    %96 = vector.load %arg11[%c0_39, %c0_40] : memref<64x256xbf16, #tpu.memory_space<vmem>>, vector<64x256xbf16>
    tpu.vector_store %arg11[%c0_39, %c0_40], %95 {strides = array<i32>} : memref<64x256xbf16, #tpu.memory_space<vmem>>, vector<64x256xbf16>,
    return
  }
  func.func @transform_0(%arg0: i32) -> (i32, i32) {
    %c4_i32 = arith.constant 4 : i32
    %0 = arith.muli %arg0, %c4_i32 : i32
    %c1_i32 = arith.constant 1 : i32
    %1 = arith.subi %0, %c1_i32 : i32
    %c0_i32 = arith.constant 0 : i32
    %2 = arith.maxsi %1, %c0_i32 : i32
    %c0_i32_0 = arith.constant 0 : i32
    %c0_i32_1 = arith.constant 0 : i32
    return %2, %c0_i32_0 : i32, i32
  }
  func.func @transform_1(%arg0: i32) -> (i32, i32) {
    %c0_i32 = arith.constant 0 : i32
    %c0_i32_0 = arith.constant 0 : i32
    return %arg0, %c0_i32 : i32, i32
  }
  func.func @transform_2(%arg0: i32) -> (i32, i32) {
    %c4_i32 = arith.constant 4 : i32
    %0 = arith.muli %arg0, %c4_i32 : i32
    %c4_i32_0 = arith.constant 4 : i32
    %1 = arith.addi %0, %c4_i32_0 : i32
    %c7_i32 = arith.constant 7 : i32
    %2 = arith.minsi %1, %c7_i32 : i32
    %c0_i32 = arith.constant 0 : i32
    %c0_i32_1 = arith.constant 0 : i32
    return %2, %c0_i32 : i32, i32
  }
  func.func @transform_3(%arg0: i32) -> (i32, i32) {
    %c0_i32 = arith.constant 0 : i32
    %c0_i32_0 = arith.constant 0 : i32
    %c0_i32_1 = arith.constant 0 : i32
    return %c0_i32, %c0_i32_0 : i32, i32
  }
  func.func @transform_4(%arg0: i32) -> (i32, i32) {
    %c0_i32 = arith.constant 0 : i32
    %c0_i32_0 = arith.constant 0 : i32
    %c0_i32_1 = arith.constant 0 : i32
    return %c0_i32, %c0_i32_0 : i32, i32
  }
  func.func @transform_5(%arg0: i32) -> (i32, i32) {
    %c0_i32 = arith.constant 0 : i32
    %c0_i32_0 = arith.constant 0 : i32
    %c0_i32_1 = arith.constant 0 : i32
    return %c0_i32, %c0_i32_0 : i32, i32
  }
  func.func @transform_6(%arg0: i32) -> (i32, i32) {
    %c0_i32 = arith.constant 0 : i32
    %c0_i32_0 = arith.constant 0 : i32
    %c0_i32_1 = arith.constant 0 : i32
    return %c0_i32, %c0_i32_0 : i32, i32
  }
  func.func @transform_7(%arg0: i32) -> (i32, i32) {
    %c0_i32 = arith.constant 0 : i32
    %c0_i32_0 = arith.constant 0 : i32
    %c0_i32_1 = arith.constant 0 : i32
    return %c0_i32, %c0_i32_0 : i32, i32
  }
  func.func @transform_8(%arg0: i32) -> (i32, i32) {
    %c0_i32 = arith.constant 0 : i32
    %c0_i32_0 = arith.constant 0 : i32
    %c0_i32_1 = arith.constant 0 : i32
    return %c0_i32, %c0_i32_0 : i32, i32
  }
  func.func @transform_9(%arg0: i32) -> (i32, i32) {
    %c0_i32 = arith.constant 0 : i32
    %c0_i32_0 = arith.constant 0 : i32
    %c0_i32_1 = arith.constant 0 : i32
    return %c0_i32, %c0_i32_0 : i32, i32
  }
  func.func @transform_10(%arg0: i32) -> (i32, i32) {
    %c0_i32 = arith.constant 0 : i32
    %c0_i32_0 = arith.constant 0 : i32
    return %arg0, %c0_i32 : i32, i32
  }
}

module attributes {stable_mosaic.version = 11 : i64} {
  func.func @_maxpool_kernel(%arg0: i32, %arg1: memref<4x8x2x256xbf16, #tpu.memory_space<vmem>>, %arg2: memref<2x4x2x256xbf16, #tpu.memory_space<vmem>>) attributes {dimension_semantics = [#tpu.dimension_semantics<parallel>], iteration_bounds = array<i64: 2>, scalar_prefetch = 0 : i64, scratch_operands = 0 : i64, tpu.core_type = #tpu.core_type<tc>, window_params = [{transform_indices = @transform_0, window_bounds = array<i64: 4, 8, 2, 256>}, {transform_indices = @transform_1, window_bounds = array<i64: 2, 4, 2, 256>}]} {
    %c0 = arith.constant 0 : index
    %c0_0 = arith.constant 0 : index
    %c0_1 = arith.constant 0 : index
    %c0_2 = arith.constant 0 : index
    %0 = vector.load %arg1[%c0, %c0_0, %c0_1, %c0_2] : memref<4x8x2x256xbf16, #tpu.memory_space<vmem>>, vector<4x8x2x256xbf16>
    %1 = vector.shape_cast %0 : vector<4x8x2x256xbf16> to vector<2x2x4x2x2x256xbf16>
    %2 = vector.extract_strided_slice %1 {offsets = [0, 0, 0, 0, 0, 0], sizes = [2, 1, 4, 2, 2, 256], strides = [1, 1, 1, 1, 1, 1]} : vector<2x2x4x2x2x256xbf16> to vector<2x1x4x2x2x256xbf16>
    %3 = vector.shape_cast %2 : vector<2x1x4x2x2x256xbf16> to vector<2x4x2x2x256xbf16>
    %4 = vector.extract_strided_slice %1 {offsets = [0, 1, 0, 0, 0, 0], sizes = [2, 1, 4, 2, 2, 256], strides = [1, 1, 1, 1, 1, 1]} : vector<2x2x4x2x2x256xbf16> to vector<2x1x4x2x2x256xbf16>
    %5 = vector.shape_cast %4 : vector<2x1x4x2x2x256xbf16> to vector<2x4x2x2x256xbf16>
    %6 = arith.maximumf %3, %5 : vector<2x4x2x2x256xbf16>
    %7 = vector.extract_strided_slice %6 {offsets = [0, 0, 0, 0, 0], sizes = [2, 4, 1, 2, 256], strides = [1, 1, 1, 1, 1]} : vector<2x4x2x2x256xbf16> to vector<2x4x1x2x256xbf16>
    %8 = vector.shape_cast %7 : vector<2x4x1x2x256xbf16> to vector<2x4x2x256xbf16>
    %9 = vector.extract_strided_slice %6 {offsets = [0, 0, 1, 0, 0], sizes = [2, 4, 1, 2, 256], strides = [1, 1, 1, 1, 1]} : vector<2x4x2x2x256xbf16> to vector<2x4x1x2x256xbf16>
    %10 = vector.shape_cast %9 : vector<2x4x1x2x256xbf16> to vector<2x4x2x256xbf16>
    %11 = arith.maximumf %8, %10 : vector<2x4x2x256xbf16>
    %c0_3 = arith.constant 0 : index
    %c0_4 = arith.constant 0 : index
    %c0_5 = arith.constant 0 : index
    %c0_6 = arith.constant 0 : index
    %12 = vector.load %arg2[%c0_3, %c0_4, %c0_5, %c0_6] : memref<2x4x2x256xbf16, #tpu.memory_space<vmem>>, vector<2x4x2x256xbf16>
    tpu.vector_store %arg2[%c0_3, %c0_4, %c0_5, %c0_6], %11 {strides = array<i32>} : memref<2x4x2x256xbf16, #tpu.memory_space<vmem>>, vector<2x4x2x256xbf16>,
    return
  }
  func.func @transform_0(%arg0: i32) -> (i32, i32, i32, i32) {
    %c0_i32 = arith.constant 0 : i32
    %c0_i32_0 = arith.constant 0 : i32
    %c0_i32_1 = arith.constant 0 : i32
    %c0_i32_2 = arith.constant 0 : i32
    return %arg0, %c0_i32, %c0_i32_0, %c0_i32_1 : i32, i32, i32, i32
  }
  func.func @transform_1(%arg0: i32) -> (i32, i32, i32, i32) {
    %c0_i32 = arith.constant 0 : i32
    %c0_i32_0 = arith.constant 0 : i32
    %c0_i32_1 = arith.constant 0 : i32
    %c0_i32_2 = arith.constant 0 : i32
    return %arg0, %c0_i32, %c0_i32_0, %c0_i32_1 : i32, i32, i32, i32
  }
}

module attributes {stable_mosaic.version = 11 : i64} {
  func.func @_residual_kernel(%arg0: i32, %arg1: memref<8x256xbf16, #tpu.memory_space<vmem>>, %arg2: memref<16x256xbf16, #tpu.memory_space<vmem>>, %arg3: memref<8x256xbf16, #tpu.memory_space<vmem>>, %arg4: memref<2x256xf32, #tpu.memory_space<vmem>>, %arg5: memref<256x128xbf16, #tpu.memory_space<vmem>>, %arg6: memref<2x128xf32, #tpu.memory_space<vmem>>, %arg7: memref<1152x128xbf16, #tpu.memory_space<vmem>>, %arg8: memref<2x128xf32, #tpu.memory_space<vmem>>, %arg9: memref<128x256xbf16, #tpu.memory_space<vmem>>, %arg10: memref<1x256xf32, #tpu.memory_space<vmem>>, %arg11: memref<16x256xbf16, #tpu.memory_space<vmem>>) attributes {dimension_semantics = [#tpu.dimension_semantics<parallel>], iteration_bounds = array<i64: 2>, scalar_prefetch = 0 : i64, scratch_operands = 0 : i64, tpu.core_type = #tpu.core_type<tc>, window_params = [{transform_indices = @transform_0, window_bounds = array<i64: 8, 256>}, {transform_indices = @transform_1, window_bounds = array<i64: 16, 256>}, {transform_indices = @transform_2, window_bounds = array<i64: 8, 256>}, {pipeline_mode = #tpu.pipeline_mode<synchronous>, transform_indices = @transform_3, window_bounds = array<i64: 2, 256>}, {pipeline_mode = #tpu.pipeline_mode<synchronous>, transform_indices = @transform_4, window_bounds = array<i64: 256, 128>}, {pipeline_mode = #tpu.pipeline_mode<synchronous>, transform_indices = @transform_5, window_bounds = array<i64: 2, 128>}, {pipeline_mode = #tpu.pipeline_mode<synchronous>, transform_indices = @transform_6, window_bounds = array<i64: 1152, 128>}, {pipeline_mode = #tpu.pipeline_mode<synchronous>, transform_indices = @transform_7, window_bounds = array<i64: 2, 128>}, {pipeline_mode = #tpu.pipeline_mode<synchronous>, transform_indices = @transform_8, window_bounds = array<i64: 128, 256>}, {pipeline_mode = #tpu.pipeline_mode<synchronous>, transform_indices = @transform_9, window_bounds = array<i64: 1, 256>}, {transform_indices = @transform_10, window_bounds = array<i64: 16, 256>}]} {
    %c0 = arith.constant 0 : index
    %c0_0 = arith.constant 0 : index
    %0 = vector.load %arg2[%c0, %c0_0] : memref<16x256xbf16, #tpu.memory_space<vmem>>, vector<16x256xbf16>
    %c0_1 = arith.constant 0 : index
    %c0_2 = arith.constant 0 : index
    %1 = vector.load %arg1[%c0_1, %c0_2] : memref<8x256xbf16, #tpu.memory_space<vmem>>, vector<8x256xbf16>
    %c0_3 = arith.constant 0 : index
    %c0_4 = arith.constant 0 : index
    %2 = vector.load %arg3[%c0_3, %c0_4] : memref<8x256xbf16, #tpu.memory_space<vmem>>, vector<8x256xbf16>
    %3 = tpu.concatenate %1, %0, %2 in 0 : vector<8x256xbf16>, vector<16x256xbf16>, vector<8x256xbf16> -> vector<32x256xbf16>
    %4 = arith.extf %3 : vector<32x256xbf16> to vector<32x256xf32>
    %c0_5 = arith.constant 0 : index
    %c0_6 = arith.constant 0 : index
    %5 = vector.load %arg4[%c0_5, %c0_6] : memref<2x256xf32, #tpu.memory_space<vmem>>, vector<1x256xf32>
    %6 = vector.broadcast %5 : vector<1x256xf32> to vector<32x256xf32>
    %7 = arith.mulf %4, %6 : vector<32x256xf32>
    %c1 = arith.constant 1 : index
    %c0_7 = arith.constant 0 : index
    %8 = vector.load %arg4[%c1, %c0_7] : memref<2x256xf32, #tpu.memory_space<vmem>>, vector<1x256xf32>
    %9 = vector.broadcast %8 : vector<1x256xf32> to vector<32x256xf32>
    %10 = arith.addf %7, %9 : vector<32x256xf32>
    %cst = arith.constant 0.000000e+00 : f32
    %11 = vector.broadcast %cst : f32 to vector<32x256xf32>
    %12 = arith.maximumf %10, %11 : vector<32x256xf32>
    %13 = arith.truncf %12 : vector<32x256xf32> to vector<32x256xbf16>
    %c0_8 = arith.constant 0 : index
    %c0_9 = arith.constant 0 : index
    %14 = vector.load %arg5[%c0_8, %c0_9] : memref<256x128xbf16, #tpu.memory_space<vmem>>, vector<256x128xbf16>
    %cst_10 = arith.constant dense<0.000000e+00> : vector<32x128xf32>
    %15 = tpu.matmul %13, %14, %cst_10 {dimension_numbers = #tpu.dot_dimension_numbers<[1], [0], [0], [1], [0, 0, 1, 1], [], []>} : vector<32x256xbf16>, vector<256x128xbf16>, vector<32x128xf32> -> vector<32x128xf32>
    %c0_11 = arith.constant 0 : index
    %c0_12 = arith.constant 0 : index
    %16 = vector.load %arg6[%c0_11, %c0_12] : memref<2x128xf32, #tpu.memory_space<vmem>>, vector<1x128xf32>
    %17 = vector.broadcast %16 : vector<1x128xf32> to vector<32x128xf32>
    %18 = arith.mulf %15, %17 : vector<32x128xf32>
    %c1_13 = arith.constant 1 : index
    %c0_14 = arith.constant 0 : index
    %19 = vector.load %arg6[%c1_13, %c0_14] : memref<2x128xf32, #tpu.memory_space<vmem>>, vector<1x128xf32>
    %20 = vector.broadcast %19 : vector<1x128xf32> to vector<32x128xf32>
    %21 = arith.addf %18, %20 : vector<32x128xf32>
    %cst_15 = arith.constant 0.000000e+00 : f32
    %22 = vector.broadcast %cst_15 : f32 to vector<32x128xf32>
    %23 = arith.maximumf %21, %22 : vector<32x128xf32>
    %24 = tpu.iota {dimensions = array<i32: 0>} : vector<32x128xi32>
    %c8_i32 = arith.constant 8 : i32
    %c0_i32 = arith.constant 0 : i32
    %25 = arith.cmpi eq, %c8_i32, %c0_i32 : i32
    %c1_i32 = arith.constant 1 : i32
    %26 = arith.select %25, %c1_i32, %c8_i32 : i32
    %27 = vector.broadcast %26 : i32 to vector<32x128xi32>
    %28 = arith.remsi %24, %27 : vector<32x128xi32>
    %c0_i32_16 = arith.constant 0 : i32
    %29 = vector.broadcast %c0_i32_16 : i32 to vector<32x128xi32>
    %30 = arith.cmpi ne, %28, %29 : vector<32x128xi32>
    %c0_i32_17 = arith.constant 0 : i32
    %31 = vector.broadcast %c0_i32_17 : i32 to vector<32x128xi32>
    %32 = arith.cmpi slt, %28, %31 : vector<32x128xi32>
    %c0_i32_18 = arith.constant 0 : i32
    %33 = arith.cmpi slt, %26, %c0_i32_18 : i32
    %34 = vector.broadcast %33 : i1 to vector<32x128xi1>
    %35 = vector.broadcast %34 : vector<32x128xi1> to vector<32x128xi1>
    %36 = arith.xori %32, %35 : vector<32x128xi1>
    %37 = arith.andi %36, %30 : vector<32x128xi1>
    %38 = vector.broadcast %26 : i32 to vector<32x128xi32>
    %39 = arith.addi %28, %38 : vector<32x128xi32>
    %40 = arith.select %37, %39, %28 : vector<32x128xi1>, vector<32x128xi32>
    %c8_i32_19 = arith.constant 8 : i32
    %41 = vector.broadcast %c8_i32_19 : i32 to vector<32x128xi32>
    %42 = arith.cmpi slt, %24, %41 : vector<32x128xi32>
    %c0_i32_20 = arith.constant 0 : i32
    %43 = arith.cmpi eq, %arg0, %c0_i32_20 : i32
    %44 = vector.broadcast %43 : i1 to vector<32x128xi1>
    %45 = arith.andi %42, %44 : vector<32x128xi1>
    %c24_i32 = arith.constant 24 : i32
    %46 = vector.broadcast %c24_i32 : i32 to vector<32x128xi32>
    %47 = arith.cmpi sge, %24, %46 : vector<32x128xi32>
    %c1_i32_21 = arith.constant 1 : i32
    %48 = arith.cmpi eq, %arg0, %c1_i32_21 : i32
    %49 = vector.broadcast %48 : i1 to vector<32x128xi1>
    %50 = arith.andi %47, %49 : vector<32x128xi1>
    %51 = arith.ori %45, %50 : vector<32x128xi1>
    %cst_22 = arith.constant 0.000000e+00 : f32
    %52 = vector.broadcast %cst_22 : f32 to vector<32x128xf32>
    %53 = arith.select %51, %52, %23 : vector<32x128xi1>, vector<32x128xf32>
    %c6_i32 = arith.constant 6 : i32
    %54 = vector.broadcast %c6_i32 : i32 to vector<32x128xi32>
    %55 = arith.cmpi sge, %40, %54 : vector<32x128xi32>
    %cst_23 = arith.constant 0.000000e+00 : f32
    %56 = vector.broadcast %cst_23 : f32 to vector<32x128xf32>
    %57 = arith.select %55, %56, %53 : vector<32x128xi1>, vector<32x128xf32>
    %c2_i32 = arith.constant 2 : i32
    %58 = vector.broadcast %c2_i32 : i32 to vector<32x128xi32>
    %59 = arith.cmpi slt, %40, %58 : vector<32x128xi32>
    %cst_24 = arith.constant 0.000000e+00 : f32
    %60 = vector.broadcast %cst_24 : f32 to vector<32x128xf32>
    %61 = arith.select %59, %60, %53 : vector<32x128xi1>, vector<32x128xf32>
    %c2_i32_25 = arith.constant 2 : i32
    %62 = tpu.dynamic_rotate %57 by %c2_i32_25 dim 0 : vector<32x128xf32>, i32 -> vector<32x128xf32>
    %63 = arith.truncf %62 : vector<32x128xf32> to vector<32x128xbf16>
    %c30_i32 = arith.constant 30 : i32
    %64 = tpu.dynamic_rotate %61 by %c30_i32 dim 0 : vector<32x128xf32>, i32 -> vector<32x128xf32>
    %65 = arith.truncf %64 : vector<32x128xf32> to vector<32x128xbf16>
    %66 = arith.truncf %53 : vector<32x128xf32> to vector<32x128xbf16>
    %67 = vector.extract_strided_slice %63 {offsets = [0, 0], sizes = [16, 128], strides = [1, 1]} : vector<32x128xbf16> to vector<16x128xbf16>
    %68 = vector.extract_strided_slice %66 {offsets = [0, 0], sizes = [16, 128], strides = [1, 1]} : vector<32x128xbf16> to vector<16x128xbf16>
    %69 = vector.extract_strided_slice %65 {offsets = [0, 0], sizes = [16, 128], strides = [1, 1]} : vector<32x128xbf16> to vector<16x128xbf16>
    %70 = vector.extract_strided_slice %63 {offsets = [8, 0], sizes = [16, 128], strides = [1, 1]} : vector<32x128xbf16> to vector<16x128xbf16>
    %71 = vector.extract_strided_slice %66 {offsets = [8, 0], sizes = [16, 128], strides = [1, 1]} : vector<32x128xbf16> to vector<16x128xbf16>
    %72 = vector.extract_strided_slice %65 {offsets = [8, 0], sizes = [16, 128], strides = [1, 1]} : vector<32x128xbf16> to vector<16x128xbf16>
    %73 = vector.extract_strided_slice %63 {offsets = [16, 0], sizes = [16, 128], strides = [1, 1]} : vector<32x128xbf16> to vector<16x128xbf16>
    %74 = vector.extract_strided_slice %66 {offsets = [16, 0], sizes = [16, 128], strides = [1, 1]} : vector<32x128xbf16> to vector<16x128xbf16>
    %75 = vector.extract_strided_slice %65 {offsets = [16, 0], sizes = [16, 128], strides = [1, 1]} : vector<32x128xbf16> to vector<16x128xbf16>
    %76 = tpu.concatenate %67, %68, %69, %70, %71, %72, %73, %74, %75 in 1 : vector<16x128xbf16>, vector<16x128xbf16>, vector<16x128xbf16>, vector<16x128xbf16>, vector<16x128xbf16>, vector<16x128xbf16>, vector<16x128xbf16>, vector<16x128xbf16>, vector<16x128xbf16> -> vector<16x1152xbf16>
    %c0_26 = arith.constant 0 : index
    %c0_27 = arith.constant 0 : index
    %77 = vector.load %arg7[%c0_26, %c0_27] : memref<1152x128xbf16, #tpu.memory_space<vmem>>, vector<1152x128xbf16>
    %cst_28 = arith.constant dense<0.000000e+00> : vector<16x128xf32>
    %78 = tpu.matmul %76, %77, %cst_28 {dimension_numbers = #tpu.dot_dimension_numbers<[1], [0], [0], [1], [0, 0, 1, 1], [], []>} : vector<16x1152xbf16>, vector<1152x128xbf16>, vector<16x128xf32> -> vector<16x128xf32>
    %c0_29 = arith.constant 0 : index
    %c0_30 = arith.constant 0 : index
    %79 = vector.load %arg8[%c0_29, %c0_30] : memref<2x128xf32, #tpu.memory_space<vmem>>, vector<1x128xf32>
    %80 = vector.broadcast %79 : vector<1x128xf32> to vector<16x128xf32>
    %81 = arith.mulf %78, %80 : vector<16x128xf32>
    %c1_31 = arith.constant 1 : index
    %c0_32 = arith.constant 0 : index
    %82 = vector.load %arg8[%c1_31, %c0_32] : memref<2x128xf32, #tpu.memory_space<vmem>>, vector<1x128xf32>
    %83 = vector.broadcast %82 : vector<1x128xf32> to vector<16x128xf32>
    %84 = arith.addf %81, %83 : vector<16x128xf32>
    %cst_33 = arith.constant 0.000000e+00 : f32
    %85 = vector.broadcast %cst_33 : f32 to vector<16x128xf32>
    %86 = arith.maximumf %84, %85 : vector<16x128xf32>
    %87 = arith.truncf %86 : vector<16x128xf32> to vector<16x128xbf16>
    %c0_34 = arith.constant 0 : index
    %c0_35 = arith.constant 0 : index
    %88 = vector.load %arg9[%c0_34, %c0_35] : memref<128x256xbf16, #tpu.memory_space<vmem>>, vector<128x256xbf16>
    %cst_36 = arith.constant dense<0.000000e+00> : vector<16x256xf32>
    %89 = tpu.matmul %87, %88, %cst_36 {dimension_numbers = #tpu.dot_dimension_numbers<[1], [0], [0], [1], [0, 0, 1, 1], [], []>} : vector<16x128xbf16>, vector<128x256xbf16>, vector<16x256xf32> -> vector<16x256xf32>
    %c0_37 = arith.constant 0 : index
    %c0_38 = arith.constant 0 : index
    %90 = vector.load %arg10[%c0_37, %c0_38] : memref<1x256xf32, #tpu.memory_space<vmem>>, vector<1x256xf32>
    %91 = vector.broadcast %90 : vector<1x256xf32> to vector<16x256xf32>
    %92 = arith.addf %89, %91 : vector<16x256xf32>
    %93 = arith.extf %0 : vector<16x256xbf16> to vector<16x256xf32>
    %94 = arith.addf %92, %93 : vector<16x256xf32>
    %95 = arith.truncf %94 : vector<16x256xf32> to vector<16x256xbf16>
    %c0_39 = arith.constant 0 : index
    %c0_40 = arith.constant 0 : index
    %96 = vector.load %arg11[%c0_39, %c0_40] : memref<16x256xbf16, #tpu.memory_space<vmem>>, vector<16x256xbf16>
    tpu.vector_store %arg11[%c0_39, %c0_40], %95 {strides = array<i32>} : memref<16x256xbf16, #tpu.memory_space<vmem>>, vector<16x256xbf16>,
    return
  }
  func.func @transform_0(%arg0: i32) -> (i32, i32) {
    %c2_i32 = arith.constant 2 : i32
    %0 = arith.muli %arg0, %c2_i32 : i32
    %c1_i32 = arith.constant 1 : i32
    %1 = arith.subi %0, %c1_i32 : i32
    %c0_i32 = arith.constant 0 : i32
    %2 = arith.maxsi %1, %c0_i32 : i32
    %c0_i32_0 = arith.constant 0 : i32
    %c0_i32_1 = arith.constant 0 : i32
    return %2, %c0_i32_0 : i32, i32
  }
  func.func @transform_1(%arg0: i32) -> (i32, i32) {
    %c0_i32 = arith.constant 0 : i32
    %c0_i32_0 = arith.constant 0 : i32
    return %arg0, %c0_i32 : i32, i32
  }
  func.func @transform_2(%arg0: i32) -> (i32, i32) {
    %c2_i32 = arith.constant 2 : i32
    %0 = arith.muli %arg0, %c2_i32 : i32
    %c2_i32_0 = arith.constant 2 : i32
    %1 = arith.addi %0, %c2_i32_0 : i32
    %c3_i32 = arith.constant 3 : i32
    %2 = arith.minsi %1, %c3_i32 : i32
    %c0_i32 = arith.constant 0 : i32
    %c0_i32_1 = arith.constant 0 : i32
    return %2, %c0_i32 : i32, i32
  }
  func.func @transform_3(%arg0: i32) -> (i32, i32) {
    %c0_i32 = arith.constant 0 : i32
    %c0_i32_0 = arith.constant 0 : i32
    %c0_i32_1 = arith.constant 0 : i32
    return %c0_i32, %c0_i32_0 : i32, i32
  }
  func.func @transform_4(%arg0: i32) -> (i32, i32) {
    %c0_i32 = arith.constant 0 : i32
    %c0_i32_0 = arith.constant 0 : i32
    %c0_i32_1 = arith.constant 0 : i32
    return %c0_i32, %c0_i32_0 : i32, i32
  }
  func.func @transform_5(%arg0: i32) -> (i32, i32) {
    %c0_i32 = arith.constant 0 : i32
    %c0_i32_0 = arith.constant 0 : i32
    %c0_i32_1 = arith.constant 0 : i32
    return %c0_i32, %c0_i32_0 : i32, i32
  }
  func.func @transform_6(%arg0: i32) -> (i32, i32) {
    %c0_i32 = arith.constant 0 : i32
    %c0_i32_0 = arith.constant 0 : i32
    %c0_i32_1 = arith.constant 0 : i32
    return %c0_i32, %c0_i32_0 : i32, i32
  }
  func.func @transform_7(%arg0: i32) -> (i32, i32) {
    %c0_i32 = arith.constant 0 : i32
    %c0_i32_0 = arith.constant 0 : i32
    %c0_i32_1 = arith.constant 0 : i32
    return %c0_i32, %c0_i32_0 : i32, i32
  }
  func.func @transform_8(%arg0: i32) -> (i32, i32) {
    %c0_i32 = arith.constant 0 : i32
    %c0_i32_0 = arith.constant 0 : i32
    %c0_i32_1 = arith.constant 0 : i32
    return %c0_i32, %c0_i32_0 : i32, i32
  }
  func.func @transform_9(%arg0: i32) -> (i32, i32) {
    %c0_i32 = arith.constant 0 : i32
    %c0_i32_0 = arith.constant 0 : i32
    %c0_i32_1 = arith.constant 0 : i32
    return %c0_i32, %c0_i32_0 : i32, i32
  }
  func.func @transform_10(%arg0: i32) -> (i32, i32) {
    %c0_i32 = arith.constant 0 : i32
    %c0_i32_0 = arith.constant 0 : i32
    return %arg0, %c0_i32 : i32, i32
  }
}

module attributes {stable_mosaic.version = 11 : i64} {
  func.func @_upsample_add_kernel(%arg0: i32, %arg1: memref<2x4x2x256xbf16, #tpu.memory_space<vmem>>, %arg2: memref<4x8x2x256xbf16, #tpu.memory_space<vmem>>, %arg3: memref<4x8x2x256xbf16, #tpu.memory_space<vmem>>) attributes {dimension_semantics = [#tpu.dimension_semantics<parallel>], iteration_bounds = array<i64: 2>, scalar_prefetch = 0 : i64, scratch_operands = 0 : i64, tpu.core_type = #tpu.core_type<tc>, window_params = [{transform_indices = @transform_0, window_bounds = array<i64: 2, 4, 2, 256>}, {transform_indices = @transform_1, window_bounds = array<i64: 4, 8, 2, 256>}, {transform_indices = @transform_2, window_bounds = array<i64: 4, 8, 2, 256>}]} {
    %c0 = arith.constant 0 : index
    %c0_0 = arith.constant 0 : index
    %c0_1 = arith.constant 0 : index
    %c0_2 = arith.constant 0 : index
    %0 = vector.load %arg1[%c0, %c0_0, %c0_1, %c0_2] : memref<2x4x2x256xbf16, #tpu.memory_space<vmem>>, vector<2x4x2x256xbf16>
    %1 = arith.extf %0 : vector<2x4x2x256xbf16> to vector<2x4x2x256xf32>
    %2 = vector.shape_cast %1 : vector<2x4x2x256xf32> to vector<2x1x4x1x2x256xf32>
    %3 = vector.shape_cast %2 : vector<2x1x4x1x2x256xf32> to vector<2x1x4x1x2x256xf32>
    %4 = vector.broadcast %3 : vector<2x1x4x1x2x256xf32> to vector<2x2x4x2x2x256xf32>
    %5 = vector.shape_cast %4 : vector<2x2x4x2x2x256xf32> to vector<4x8x2x256xf32>
    %c0_3 = arith.constant 0 : index
    %c0_4 = arith.constant 0 : index
    %c0_5 = arith.constant 0 : index
    %c0_6 = arith.constant 0 : index
    %6 = vector.load %arg2[%c0_3, %c0_4, %c0_5, %c0_6] : memref<4x8x2x256xbf16, #tpu.memory_space<vmem>>, vector<4x8x2x256xbf16>
    %7 = arith.extf %6 : vector<4x8x2x256xbf16> to vector<4x8x2x256xf32>
    %8 = arith.addf %5, %7 : vector<4x8x2x256xf32>
    %9 = arith.truncf %8 : vector<4x8x2x256xf32> to vector<4x8x2x256xbf16>
    %c0_7 = arith.constant 0 : index
    %c0_8 = arith.constant 0 : index
    %c0_9 = arith.constant 0 : index
    %c0_10 = arith.constant 0 : index
    %10 = vector.load %arg3[%c0_7, %c0_8, %c0_9, %c0_10] : memref<4x8x2x256xbf16, #tpu.memory_space<vmem>>, vector<4x8x2x256xbf16>
    tpu.vector_store %arg3[%c0_7, %c0_8, %c0_9, %c0_10], %9 {strides = array<i32>} : memref<4x8x2x256xbf16, #tpu.memory_space<vmem>>, vector<4x8x2x256xbf16>,
    return
  }
  func.func @transform_0(%arg0: i32) -> (i32, i32, i32, i32) {
    %c0_i32 = arith.constant 0 : i32
    %c0_i32_0 = arith.constant 0 : i32
    %c0_i32_1 = arith.constant 0 : i32
    %c0_i32_2 = arith.constant 0 : i32
    return %arg0, %c0_i32, %c0_i32_0, %c0_i32_1 : i32, i32, i32, i32
  }
  func.func @transform_1(%arg0: i32) -> (i32, i32, i32, i32) {
    %c0_i32 = arith.constant 0 : i32
    %c0_i32_0 = arith.constant 0 : i32
    %c0_i32_1 = arith.constant 0 : i32
    %c0_i32_2 = arith.constant 0 : i32
    return %arg0, %c0_i32, %c0_i32_0, %c0_i32_1 : i32, i32, i32, i32
  }
  func.func @transform_2(%arg0: i32) -> (i32, i32, i32, i32) {
    %c0_i32 = arith.constant 0 : i32
    %c0_i32_0 = arith.constant 0 : i32
    %c0_i32_1 = arith.constant 0 : i32
    %c0_i32_2 = arith.constant 0 : i32
    return %arg0, %c0_i32, %c0_i32_0, %c0_i32_1 : i32, i32, i32, i32
  }
}

module attributes {stable_mosaic.version = 11 : i64} {
  func.func @_upsample_add_kernel(%arg0: i32, %arg1: memref<4x8x2x256xbf16, #tpu.memory_space<vmem>>, %arg2: memref<8x16x2x256xbf16, #tpu.memory_space<vmem>>, %arg3: memref<8x16x2x256xbf16, #tpu.memory_space<vmem>>) attributes {dimension_semantics = [#tpu.dimension_semantics<parallel>], iteration_bounds = array<i64: 2>, scalar_prefetch = 0 : i64, scratch_operands = 0 : i64, tpu.core_type = #tpu.core_type<tc>, window_params = [{transform_indices = @transform_0, window_bounds = array<i64: 4, 8, 2, 256>}, {transform_indices = @transform_1, window_bounds = array<i64: 8, 16, 2, 256>}, {transform_indices = @transform_2, window_bounds = array<i64: 8, 16, 2, 256>}]} {
    %c0 = arith.constant 0 : index
    %c0_0 = arith.constant 0 : index
    %c0_1 = arith.constant 0 : index
    %c0_2 = arith.constant 0 : index
    %0 = vector.load %arg1[%c0, %c0_0, %c0_1, %c0_2] : memref<4x8x2x256xbf16, #tpu.memory_space<vmem>>, vector<4x8x2x256xbf16>
    %1 = arith.extf %0 : vector<4x8x2x256xbf16> to vector<4x8x2x256xf32>
    %2 = vector.shape_cast %1 : vector<4x8x2x256xf32> to vector<4x1x8x1x2x256xf32>
    %3 = vector.shape_cast %2 : vector<4x1x8x1x2x256xf32> to vector<4x1x8x1x2x256xf32>
    %4 = vector.broadcast %3 : vector<4x1x8x1x2x256xf32> to vector<4x2x8x2x2x256xf32>
    %5 = vector.shape_cast %4 : vector<4x2x8x2x2x256xf32> to vector<8x16x2x256xf32>
    %c0_3 = arith.constant 0 : index
    %c0_4 = arith.constant 0 : index
    %c0_5 = arith.constant 0 : index
    %c0_6 = arith.constant 0 : index
    %6 = vector.load %arg2[%c0_3, %c0_4, %c0_5, %c0_6] : memref<8x16x2x256xbf16, #tpu.memory_space<vmem>>, vector<8x16x2x256xbf16>
    %7 = arith.extf %6 : vector<8x16x2x256xbf16> to vector<8x16x2x256xf32>
    %8 = arith.addf %5, %7 : vector<8x16x2x256xf32>
    %9 = arith.truncf %8 : vector<8x16x2x256xf32> to vector<8x16x2x256xbf16>
    %c0_7 = arith.constant 0 : index
    %c0_8 = arith.constant 0 : index
    %c0_9 = arith.constant 0 : index
    %c0_10 = arith.constant 0 : index
    %10 = vector.load %arg3[%c0_7, %c0_8, %c0_9, %c0_10] : memref<8x16x2x256xbf16, #tpu.memory_space<vmem>>, vector<8x16x2x256xbf16>
    tpu.vector_store %arg3[%c0_7, %c0_8, %c0_9, %c0_10], %9 {strides = array<i32>} : memref<8x16x2x256xbf16, #tpu.memory_space<vmem>>, vector<8x16x2x256xbf16>,
    return
  }
  func.func @transform_0(%arg0: i32) -> (i32, i32, i32, i32) {
    %c0_i32 = arith.constant 0 : i32
    %c0_i32_0 = arith.constant 0 : i32
    %c0_i32_1 = arith.constant 0 : i32
    %c0_i32_2 = arith.constant 0 : i32
    return %arg0, %c0_i32, %c0_i32_0, %c0_i32_1 : i32, i32, i32, i32
  }
  func.func @transform_1(%arg0: i32) -> (i32, i32, i32, i32) {
    %c0_i32 = arith.constant 0 : i32
    %c0_i32_0 = arith.constant 0 : i32
    %c0_i32_1 = arith.constant 0 : i32
    %c0_i32_2 = arith.constant 0 : i32
    return %arg0, %c0_i32, %c0_i32_0, %c0_i32_1 : i32, i32, i32, i32
  }
  func.func @transform_2(%arg0: i32) -> (i32, i32, i32, i32) {
    %c0_i32 = arith.constant 0 : i32
    %c0_i32_0 = arith.constant 0 : i32
    %c0_i32_1 = arith.constant 0 : i32
    %c0_i32_2 = arith.constant 0 : i32
    return %arg0, %c0_i32, %c0_i32_0, %c0_i32_1 : i32, i32, i32, i32
  }
}

</mosaic_0001>

<bundles_post_ra>
// kernel: _lambda_.19
= control target key start
LH: loop header
LB: loop body
LE: loop exit
PB: predicated region body
PF: predicated region fallthrough
CT: control target
= control target key end

     0   :  { %s469_s6 = smov 0   ;;  %s650_s0 = inlined_call_operand.vmem [shape: bf16[16,16,2,256], index: 0, kind: input, shape index: {}]   ;;  %s651_s1 = inlined_call_operand.vmem [shape: bf16[8,8,2,256], index: 1, kind: output, shape index: {}]  }
   0x1 LB: > { %s432_s7 = sadd.s32 4294967295, %s457_s6   ;;  %p436_p0 = scmp.ge.s32.totalorder %s457_s6, 1  ;;  %s457_s6 = sphi %s469_s6, %s11_s6  }
   0x2   : > { %p88_p1 = scmp.lt.s32.totalorder %s457_s6, 3 }
   0x4   : > { %p89_p2 = pnand %p436_p0, %p88_p1 }
   0x5   : > { %s437_s8 = sshll.u32 (!%p89_p2), %s432_s7, 3  ;;  %s439_s9 = sshll.u32 (!%p89_p2), %s432_s7, 2 }
   0x6   : > { %92 = sbr.rel (%p89_p2) target bundleno = 73 (0x49), region = 24  ;;  %p109_p3 = scmp.lt.s32.totalorder (!%p89_p2), %s437_s8, 15 }
   0x7   : > { %p115_p4 = scmp.lt.s32.totalorder (!%p89_p2), %s439_s9, 7 }
   0xd   : > { %s653_s8 = smov (!%p109_p3, %s437_s8), 15  ;;  %s655_s9 = smov (!%p115_p4, %s439_s9), 7 }
   0xe   : > { %s438_s10 = sshll.u32 %s653_s8, 5  ;;  %s440_s14 = sshll.u32 %s655_s9, 4 }
   0xf   : > { %s480_s13 = scalar_lea.vmem %s650_s0, %s438_s10  ;;  %s494_s17 = scalar_lea.vmem %s651_s1, %s440_s14 }
  0x10   : > { %v120_v0 = vld [vmem:[%s480_s13] sm:$0x3]  ;;  %v121_v1 = vld [vmem:[%s480_s13 + $0x2] sm:$0x3]  ;;  %v122_v5 = vld [vmem:[%s480_s13 + $0x4] sm:$0x3] }
  0x11   : > { %v136_v2 = vld [vmem:[%s480_s13 + $0x20] sm:$0x3]  ;;  %v137_v3 = vld [vmem:[%s480_s13 + $0x22] sm:$0x3]  ;;  %v123_v6 = vld [vmem:[%s480_s13 + $0x6] sm:$0x3] }
  0x12   : > { %v248_v4 = vmax.bf16 %v136_v2, %v120_v0  ;;  %v249_v7 = vmax.bf16 %v137_v3, %v121_v1  ;;  %v138_v8 = vld [vmem:[%s480_s13 + $0x24] sm:$0x3]  ;;  %v139_v9 = vld [vmem:[%s480_s13 + $0x26] sm:$0x3]  ;;  %v124_v10 = vld [vmem:[%s480_s13 + $0x8] sm:$0x3] }
  0x13   : > { %v250_v11 = vmax.bf16 %v138_v8, %v122_v5  ;;  %v251_v12 = vmax.bf16 %v139_v9, %v123_v6  ;;  %v125_v13 = vld [vmem:[%s480_s13 + $0xa] sm:$0x3]  ;;  %v140_v14 = vld [vmem:[%s480_s13 + $0x28] sm:$0x3]  ;;  %v126_v19 = vld [vmem:[%s480_s13 + $0xc] sm:$0x3] }
  0x14   : > { %v141_v15 = vld [vmem:[%s480_s13 + $0x2a] sm:$0x3]  ;;  %v312_v16 = vmax.bf16 %v249_v7, %v248_v4  ;;  %v252_v17 = vmax.bf16 %v140_v14, %v124_v10  ;;  %v127_v20 = vld [vmem:[%s480_s13 + $0xe] sm:$0x3]  ;;  %v142_v21 = vld [vmem:[%s480_s13 + $0x2c] sm:$0x3] }
  0x15   : > { %v253_v18 = vmax.bf16 %v141_v15, %v125_v13  ;;  %v313_v22 = vmax.bf16 %v251_v12, %v250_v11  ;;  %v143_v23 = vld [vmem:[%s480_s13 + $0x2e] sm:$0x3]  ;;  %v254_v24 = vmax.bf16 %v142_v21, %v126_v19  ;;  %v128_v25 = vld [vmem:[%s480_s13 + $0x10] sm:$0x3]  ;;  %v129_v26 = vld [vmem:[%s480_s13 + $0x12] sm:$0x3] }
  0x16   : > { %344 = vst [vmem:[%s494_s17] sm:$0x3] %v312_v16  ;;  %v255_v28 = vmax.bf16 %v143_v23, %v127_v20  ;;  %v144_v29 = vld [vmem:[%s480_s13 + $0x30] sm:$0x3]  ;;  %v145_v30 = vld [vmem:[%s480_s13 + $0x32] sm:$0x3] }
  0x17   : > { %v314_v27 = vmax.bf16 %v253_v18, %v252_v17  ;;  %v130_v31 = vld [vmem:[%s480_s13 + $0x14] sm:$0x3]  ;;  %345 = vst [vmem:[%s494_s17 + $0x2] sm:$0x3] %v313_v22  ;;  %v256_v32 = vmax.bf16 %v144_v29, %v128_v25  ;;  %v257_v33 = vmax.bf16 %v145_v30, %v129_v26  ;;  %v131_v34 = vld [vmem:[%s480_s13 + $0x16] sm:$0x3] }
  0x18   : > { %v146_v35 = vld [vmem:[%s480_s13 + $0x34] sm:$0x3]  ;;  %v147_v36 = vld [vmem:[%s480_s13 + $0x36] sm:$0x3]  ;;  %v315_v37 = vmax.bf16 %v255_v28, %v254_v24  ;;  %v132_v40 = vld [vmem:[%s480_s13 + $0x18] sm:$0x3] }
  0x19   : > { %346 = vst [vmem:[%s494_s17 + $0x4] sm:$0x3] %v314_v27  ;;  %v258_v38 = vmax.bf16 %v146_v35, %v130_v31  ;;  %v259_v39 = vmax.bf16 %v147_v36, %v131_v34  ;;  %v133_v41 = vld [vmem:[%s480_s13 + $0x1a] sm:$0x3]  ;;  %v148_v42 = vld [vmem:[%s480_s13 + $0x38] sm:$0x3]  ;;  %v316_v43 = vmax.bf16 %v257_v33, %v256_v32 }
  0x1a   : > { %v149_v44 = vld [vmem:[%s480_s13 + $0x3a] sm:$0x3]  ;;  %v260_v45 = vmax.bf16 %v148_v42, %v132_v40  ;;  %v134_v46 = vld [vmem:[%s480_s13 + $0x1c] sm:$0x3]  ;;  %v135_v47 = vld [vmem:[%s480_s13 + $0x1e] sm:$0x3] }
  0x1b   : > { %347 = vst [vmem:[%s494_s17 + $0x6] sm:$0x3] %v315_v37  ;;  %v317_v48 = vmax.bf16 %v259_v39, %v258_v38  ;;  %v261_v49 = vmax.bf16 %v149_v44, %v133_v41  ;;  %v150_v50 = vld [vmem:[%s480_s13 + $0x3c] sm:$0x3]  ;;  %v151_v51 = vld [vmem:[%s480_s13 + $0x3e] sm:$0x3] }
  0x1c   : > { %v152_v52 = vld [vmem:[%s480_s13 + $0x40] sm:$0x3]  ;;  %348 = vst [vmem:[%s494_s17 + $0x8] sm:$0x3] %v316_v43  ;;  %v262_v53 = vmax.bf16 %v150_v50, %v134_v46  ;;  %v263_v54 = vmax.bf16 %v151_v51, %v135_v47  ;;  %v153_v55 = vld [vmem:[%s480_s13 + $0x42] sm:$0x3] }
  0x1d   : > { %v168_v56 = vld [vmem:[%s480_s13 + $0x60] sm:$0x3]  ;;  %v169_v57 = vld [vmem:[%s480_s13 + $0x62] sm:$0x3]  ;;  %349 = vst [vmem:[%s494_s17 + $0xa] sm:$0x3] %v317_v48  ;;  %v318_v58 = vmax.bf16 %v261_v49, %v260_v45 }
  0x1e   : > { %v264_v59 = vmax.bf16 %v168_v56, %v152_v52  ;;  %v265_v60 = vmax.bf16 %v169_v57, %v153_v55  ;;  %v154_v61 = vld [vmem:[%s480_s13 + $0x44] sm:$0x3]  ;;  %v155_v62 = vld [vmem:[%s480_s13 + $0x46] sm:$0x3]  ;;  %v319_v0 = vmax.bf16 %v263_v54, %v262_v53  ;;  %v156_v3 = vld [vmem:[%s480_s13 + $0x48] sm:$0x3] }
  0x1f   : > { %v170_v63 = vld [vmem:[%s480_s13 + $0x64] sm:$0x3]  ;;  %v171_v1 = vld [vmem:[%s480_s13 + $0x66] sm:$0x3]  ;;  %v157_v4 = vld [vmem:[%s480_s13 + $0x4a] sm:$0x3] }
  0x20   : > { %v266_v2 = vmax.bf16 %v170_v63, %v154_v61  ;;  %350 = vst [vmem:[%s494_s17 + $0xc] sm:$0x3] %v318_v58  ;;  %v320_v5 = vmax.bf16 %v265_v60, %v264_v59  ;;  %v267_v6 = vmax.bf16 %v171_v1, %v155_v62  ;;  %v172_v7 = vld [vmem:[%s480_s13 + $0x68] sm:$0x3]  ;;  %v173_v8 = vld [vmem:[%s480_s13 + $0x6a] sm:$0x3] }
  0x21   : > { %v158_v9 = vld [vmem:[%s480_s13 + $0x4c] sm:$0x3]  ;;  %351 = vst [vmem:[%s494_s17 + $0xe] sm:$0x3] %v319_v0  ;;  %v268_v10 = vmax.bf16 %v172_v7, %v156_v3  ;;  %v269_v11 = vmax.bf16 %v173_v8, %v157_v4  ;;  %v159_v12 = vld [vmem:[%s480_s13 + $0x4e] sm:$0x3] }
  0x22   : > { %v174_v13 = vld [vmem:[%s480_s13 + $0x6c] sm:$0x3]  ;;  %v175_v14 = vld [vmem:[%s480_s13 + $0x6e] sm:$0x3]  ;;  %352 = vst [vmem:[%s494_s17 + $0x10] sm:$0x3] %v320_v5  ;;  %v321_v15 = vmax.bf16 %v267_v6, %v266_v2 }
  0x23   : > { %v270_v16 = vmax.bf16 %v174_v13, %v158_v9  ;;  %v271_v17 = vmax.bf16 %v175_v14, %v159_v12  ;;  %v160_v18 = vld [vmem:[%s480_s13 + $0x50] sm:$0x3]  ;;  %v161_v19 = vld [vmem:[%s480_s13 + $0x52] sm:$0x3]  ;;  %v322_v21 = vmax.bf16 %v269_v11, %v268_v10  ;;  %v162_v24 = vld [vmem:[%s480_s13 + $0x54] sm:$0x3] }
  0x24   : > { %v176_v20 = vld [vmem:[%s480_s13 + $0x70] sm:$0x3]  ;;  %v177_v22 = vld [vmem:[%s480_s13 + $0x72] sm:$0x3]  ;;  %v163_v25 = vld [vmem:[%s480_s13 + $0x56] sm:$0x3] }
  0x25   : > { %v272_v23 = vmax.bf16 %v176_v20, %v160_v18  ;;  %353 = vst [vmem:[%s494_s17 + $0x12] sm:$0x3] %v321_v15  ;;  %v323_v26 = vmax.bf16 %v271_v17, %v270_v16  ;;  %v273_v27 = vmax.bf16 %v177_v22, %v161_v19  ;;  %v178_v28 = vld [vmem:[%s480_s13 + $0x74] sm:$0x3]  ;;  %v179_v29 = vld [vmem:[%s480_s13 + $0x76] sm:$0x3] }
  0x26   : > { %v164_v30 = vld [vmem:[%s480_s13 + $0x58] sm:$0x3]  ;;  %354 = vst [vmem:[%s494_s17 + $0x14] sm:$0x3] %v322_v21  ;;  %v274_v31 = vmax.bf16 %v178_v28, %v162_v24  ;;  %v275_v32 = vmax.bf16 %v179_v29, %v163_v25  ;;  %v165_v33 = vld [vmem:[%s480_s13 + $0x5a] sm:$0x3] }
  0x27   : > { %v180_v34 = vld [vmem:[%s480_s13 + $0x78] sm:$0x3]  ;;  %v181_v35 = vld [vmem:[%s480_s13 + $0x7a] sm:$0x3]  ;;  %355 = vst [vmem:[%s494_s17 + $0x16] sm:$0x3] %v323_v26  ;;  %v324_v36 = vmax.bf16 %v273_v27, %v272_v23 }
  0x28   : > { %v276_v37 = vmax.bf16 %v180_v34, %v164_v30  ;;  %v277_v38 = vmax.bf16 %v181_v35, %v165_v33  ;;  %v166_v39 = vld [vmem:[%s480_s13 + $0x5c] sm:$0x3]  ;;  %v167_v40 = vld [vmem:[%s480_s13 + $0x5e] sm:$0x3]  ;;  %v325_v42 = vmax.bf16 %v275_v32, %v274_v31  ;;  %v184_v45 = vld [vmem:[%s480_s13 + $0x80] sm:$0x3] }
  0x29   : > { %v182_v41 = vld [vmem:[%s480_s13 + $0x7c] sm:$0x3]  ;;  %v183_v43 = vld [vmem:[%s480_s13 + $0x7e] sm:$0x3]  ;;  %v185_v46 = vld [vmem:[%s480_s13 + $0x82] sm:$0x3] }
  0x2a   : > { %v278_v44 = vmax.bf16 %v182_v41, %v166_v39  ;;  %356 = vst [vmem:[%s494_s17 + $0x18] sm:$0x3] %v324_v36  ;;  %v326_v47 = vmax.bf16 %v277_v38, %v276_v37  ;;  %v279_v48 = vmax.bf16 %v183_v43, %v167_v40  ;;  %v200_v49 = vld [vmem:[%s480_s13 + $0xa0] sm:$0x3]  ;;  %v201_v50 = vld [vmem:[%s480_s13 + $0xa2] sm:$0x3] }
  0x2b   : > { %v186_v51 = vld [vmem:[%s480_s13 + $0x84] sm:$0x3]  ;;  %357 = vst [vmem:[%s494_s17 + $0x1a] sm:$0x3] %v325_v42  ;;  %v280_v52 = vmax.bf16 %v200_v49, %v184_v45  ;;  %v281_v53 = vmax.bf16 %v201_v50, %v185_v46  ;;  %v187_v54 = vld [vmem:[%s480_s13 + $0x86] sm:$0x3] }
  0x2c   : > { %v202_v55 = vld [vmem:[%s480_s13 + $0xa4] sm:$0x3]  ;;  %v203_v56 = vld [vmem:[%s480_s13 + $0xa6] sm:$0x3]  ;;  %358 = vst [vmem:[%s494_s17 + $0x1c] sm:$0x3] %v326_v47  ;;  %v327_v57 = vmax.bf16 %v279_v48, %v278_v44 }
  0x2d   : > { %v282_v58 = vmax.bf16 %v202_v55, %v186_v51  ;;  %v283_v59 = vmax.bf16 %v203_v56, %v187_v54  ;;  %v188_v60 = vld [vmem:[%s480_s13 + $0x88] sm:$0x3]  ;;  %v189_v61 = vld [vmem:[%s480_s13 + $0x8a] sm:$0x3]  ;;  %v328_v63 = vmax.bf16 %v281_v53, %v280_v52  ;;  %v190_v2 = vld [vmem:[%s480_s13 + $0x8c] sm:$0x3] }
  0x2e   : > { %v204_v62 = vld [vmem:[%s480_s13 + $0xa8] sm:$0x3]  ;;  %v205_v0 = vld [vmem:[%s480_s13 + $0xaa] sm:$0x3]  ;;  %v191_v3 = vld [vmem:[%s480_s13 + $0x8e] sm:$0x3] }
  0x2f   : > { %v284_v1 = vmax.bf16 %v204_v62, %v188_v60  ;;  %359 = vst [vmem:[%s494_s17 + $0x1e] sm:$0x3] %v327_v57  ;;  %v329_v4 = vmax.bf16 %v283_v59, %v282_v58  ;;  %v285_v5 = vmax.bf16 %v205_v0, %v189_v61  ;;  %v206_v6 = vld [vmem:[%s480_s13 + $0xac] sm:$0x3]  ;;  %v207_v7 = vld [vmem:[%s480_s13 + $0xae] sm:$0x3] }
  0x30   : > { %v192_v8 = vld [vmem:[%s480_s13 + $0x90] sm:$0x3]  ;;  %360 = vst [vmem:[%s494_s17 + $0x20] sm:$0x3] %v328_v63  ;;  %v286_v9 = vmax.bf16 %v206_v6, %v190_v2  ;;  %v287_v10 = vmax.bf16 %v207_v7, %v191_v3  ;;  %v193_v11 = vld [vmem:[%s480_s13 + $0x92] sm:$0x3] }
  0x31   : > { %v208_v12 = vld [vmem:[%s480_s13 + $0xb0] sm:$0x3]  ;;  %v209_v13 = vld [vmem:[%s480_s13 + $0xb2] sm:$0x3]  ;;  %361 = vst [vmem:[%s494_s17 + $0x22] sm:$0x3] %v329_v4  ;;  %v330_v14 = vmax.bf16 %v285_v5, %v284_v1 }
  0x32   : > { %v288_v15 = vmax.bf16 %v208_v12, %v192_v8  ;;  %v289_v16 = vmax.bf16 %v209_v13, %v193_v11  ;;  %v194_v17 = vld [vmem:[%s480_s13 + $0x94] sm:$0x3]  ;;  %v195_v18 = vld [vmem:[%s480_s13 + $0x96] sm:$0x3]  ;;  %v331_v20 = vmax.bf16 %v287_v10, %v286_v9  ;;  %v196_v23 = vld [vmem:[%s480_s13 + $0x98] sm:$0x3] }
  0x33   : > { %v210_v19 = vld [vmem:[%s480_s13 + $0xb4] sm:$0x3]  ;;  %v211_v21 = vld [vmem:[%s480_s13 + $0xb6] sm:$0x3]  ;;  %v197_v24 = vld [vmem:[%s480_s13 + $0x9a] sm:$0x3] }
  0x34   : > { %v290_v22 = vmax.bf16 %v210_v19, %v194_v17  ;;  %362 = vst [vmem:[%s494_s17 + $0x24] sm:$0x3] %v330_v14  ;;  %v332_v25 = vmax.bf16 %v289_v16, %v288_v15  ;;  %v291_v26 = vmax.bf16 %v211_v21, %v195_v18  ;;  %v212_v27 = vld [vmem:[%s480_s13 + $0xb8] sm:$0x3]  ;;  %v213_v28 = vld [vmem:[%s480_s13 + $0xba] sm:$0x3] }
  0x35   : > { %v198_v29 = vld [vmem:[%s480_s13 + $0x9c] sm:$0x3]  ;;  %363 = vst [vmem:[%s494_s17 + $0x26] sm:$0x3] %v331_v20  ;;  %v292_v30 = vmax.bf16 %v212_v27, %v196_v23  ;;  %v293_v31 = vmax.bf16 %v213_v28, %v197_v24  ;;  %v199_v32 = vld [vmem:[%s480_s13 + $0x9e] sm:$0x3] }
  0x36   : > { %v214_v33 = vld [vmem:[%s480_s13 + $0xbc] sm:$0x3]  ;;  %v215_v34 = vld [vmem:[%s480_s13 + $0xbe] sm:$0x3]  ;;  %364 = vst [vmem:[%s494_s17 + $0x28] sm:$0x3] %v332_v25  ;;  %v333_v35 = vmax.bf16 %v291_v26, %v290_v22 }
  0x37   : > { %v294_v36 = vmax.bf16 %v214_v33, %v198_v29  ;;  %v295_v37 = vmax.bf16 %v215_v34, %v199_v32  ;;  %v216_v38 = vld [vmem:[%s480_s13 + $0xc0] sm:$0x3]  ;;  %v217_v39 = vld [vmem:[%s480_s13 + $0xc2] sm:$0x3]  ;;  %v334_v41 = vmax.bf16 %v293_v31, %v292_v30  ;;  %v218_v44 = vld [vmem:[%s480_s13 + $0xc4] sm:$0x3] }
  0x38   : > { %v232_v40 = vld [vmem:[%s480_s13 + $0xe0] sm:$0x3]  ;;  %v233_v42 = vld [vmem:[%s480_s13 + $0xe2] sm:$0x3]  ;;  %v219_v45 = vld [vmem:[%s480_s13 + $0xc6] sm:$0x3] }
  0x39   : > { %v296_v43 = vmax.bf16 %v232_v40, %v216_v38  ;;  %365 = vst [vmem:[%s494_s17 + $0x2a] sm:$0x3] %v333_v35  ;;  %v335_v46 = vmax.bf16 %v295_v37, %v294_v36  ;;  %v297_v47 = vmax.bf16 %v233_v42, %v217_v39  ;;  %v234_v48 = vld [vmem:[%s480_s13 + $0xe4] sm:$0x3]  ;;  %v235_v49 = vld [vmem:[%s480_s13 + $0xe6] sm:$0x3] }
  0x3a   : > { %v220_v50 = vld [vmem:[%s480_s13 + $0xc8] sm:$0x3]  ;;  %366 = vst [vmem:[%s494_s17 + $0x2c] sm:$0x3] %v334_v41  ;;  %v298_v51 = vmax.bf16 %v234_v48, %v218_v44  ;;  %v299_v52 = vmax.bf16 %v235_v49, %v219_v45  ;;  %v221_v53 = vld [vmem:[%s480_s13 + $0xca] sm:$0x3] }
  0x3b   : > { %v236_v54 = vld [vmem:[%s480_s13 + $0xe8] sm:$0x3]  ;;  %v237_v55 = vld [vmem:[%s480_s13 + $0xea] sm:$0x3]  ;;  %367 = vst [vmem:[%s494_s17 + $0x2e] sm:$0x3] %v335_v46  ;;  %v336_v56 = vmax.bf16 %v297_v47, %v296_v43 }
  0x3c   : > { %v300_v57 = vmax.bf16 %v236_v54, %v220_v50  ;;  %v301_v58 = vmax.bf16 %v237_v55, %v221_v53  ;;  %v222_v59 = vld [vmem:[%s480_s13 + $0xcc] sm:$0x3]  ;;  %v223_v60 = vld [vmem:[%s480_s13 + $0xce] sm:$0x3]  ;;  %v337_v62 = vmax.bf16 %v299_v52, %v298_v51  ;;  %v224_v1 = vld [vmem:[%s480_s13 + $0xd0] sm:$0x3] }
  0x3d   : > { %v238_v61 = vld [vmem:[%s480_s13 + $0xec] sm:$0x3]  ;;  %v239_v63 = vld [vmem:[%s480_s13 + $0xee] sm:$0x3]  ;;  %v225_v2 = vld [vmem:[%s480_s13 + $0xd2] sm:$0x3] }
  0x3e   : > { %v302_v0 = vmax.bf16 %v238_v61, %v222_v59  ;;  %368 = vst [vmem:[%s494_s17 + $0x30] sm:$0x3] %v336_v56  ;;  %v338_v3 = vmax.bf16 %v301_v58, %v300_v57  ;;  %v303_v4 = vmax.bf16 %v239_v63, %v223_v60  ;;  %v240_v5 = vld [vmem:[%s480_s13 + $0xf0] sm:$0x3]  ;;  %v241_v6 = vld [vmem:[%s480_s13 + $0xf2] sm:$0x3] }
  0x3f   : > { %v226_v7 = vld [vmem:[%s480_s13 + $0xd4] sm:$0x3]  ;;  %369 = vst [vmem:[%s494_s17 + $0x32] sm:$0x3] %v337_v62  ;;  %v304_v8 = vmax.bf16 %v240_v5, %v224_v1  ;;  %v305_v9 = vmax.bf16 %v241_v6, %v225_v2  ;;  %v227_v10 = vld [vmem:[%s480_s13 + $0xd6] sm:$0x3] }
  0x40   : > { %v242_v11 = vld [vmem:[%s480_s13 + $0xf4] sm:$0x3]  ;;  %v243_v12 = vld [vmem:[%s480_s13 + $0xf6] sm:$0x3]  ;;  %370 = vst [vmem:[%s494_s17 + $0x34] sm:$0x3] %v338_v3  ;;  %v339_v13 = vmax.bf16 %v303_v4, %v302_v0 }
  0x41   : > { %v306_v14 = vmax.bf16 %v242_v11, %v226_v7  ;;  %v307_v15 = vmax.bf16 %v243_v12, %v227_v10  ;;  %v228_v16 = vld [vmem:[%s480_s13 + $0xd8] sm:$0x3]  ;;  %v229_v17 = vld [vmem:[%s480_s13 + $0xda] sm:$0x3]  ;;  %v340_v19 = vmax.bf16 %v305_v9, %v304_v8  ;;  %v230_v22 = vld [vmem:[%s480_s13 + $0xdc] sm:$0x3] }
  0x42   : > { %v244_v18 = vld [vmem:[%s480_s13 + $0xf8] sm:$0x3]  ;;  %v245_v20 = vld [vmem:[%s480_s13 + $0xfa] sm:$0x3]  ;;  %v231_v23 = vld [vmem:[%s480_s13 + $0xde] sm:$0x3] }
  0x43   : > { %v308_v21 = vmax.bf16 %v244_v18, %v228_v16  ;;  %371 = vst [vmem:[%s494_s17 + $0x36] sm:$0x3] %v339_v13  ;;  %v341_v24 = vmax.bf16 %v307_v15, %v306_v14  ;;  %v309_v25 = vmax.bf16 %v245_v20, %v229_v17  ;;  %v246_v26 = vld [vmem:[%s480_s13 + $0xfc] sm:$0x3]  ;;  %v247_v27 = vld [vmem:[%s480_s13 + $0xfe] sm:$0x3] }
  0x44   : > { %372 = vst [vmem:[%s494_s17 + $0x38] sm:$0x3] %v340_v19  ;;  %v310_v28 = vmax.bf16 %v246_v26, %v230_v22  ;;  %v311_v29 = vmax.bf16 %v247_v27, %v231_v23 }
  0x45   : > { %373 = vst [vmem:[%s494_s17 + $0x3a] sm:$0x3] %v341_v24  ;;  %v342_v30 = vmax.bf16 %v309_v25, %v308_v21 }
  0x46   : > { %v343_v31 = vmax.bf16 %v311_v29, %v310_v28 }
  0x47   : > { %374 = vst [vmem:[%s494_s17 + $0x3c] sm:$0x3] %v342_v30 }
  0x48   : > { %375 = vst [vmem:[%s494_s17 + $0x3e] sm:$0x3] %v343_v31 }
  0x49 PF: > { %s11_s6 = sadd.s32 1, %s457_s6  }
  0x4a   : > { %p8_p5 = scmp.ge.s32.totalorder %s11_s6, 4  }
  0x4c   :  { %10 = sbr.rel (!%p8_p5) target bundleno = 1 (0x1), region = 54 }

// kernel: _lambda_.17
= control target key start
LH: loop header
LB: loop body
LE: loop exit
PB: predicated region body
PF: predicated region fallthrough
CT: control target
= control target key end

     0   :  { %s6024_s13 = smov 0   ;;  %s7930_s0 = inlined_call_operand.vmem [shape: bf16[512,256], index: 0, kind: input, shape index: {}, may-alias: {0,1,2}]   ;;  %s7931_s1 = inlined_call_operand.vmem [shape: bf16[512,256], index: 1, kind: input, shape index: {}, may-alias: {0,1,2}]   ;;  %s7932_s2 = inlined_call_operand.vmem [shape: bf16[512,256], index: 2, kind: input, shape index: {}, may-alias: {0,1,2}]   ;;  %s7933_s3 = inlined_call_operand.vmem [shape: f32[2,256], index: 3, kind: input, shape index: {}]   ;;  %s7934_s4 = inlined_call_operand.vmem [shape: bf16[256,128], index: 4, kind: input, shape index: {}]   ;;  %s7935_s5 = inlined_call_operand.vmem [shape: f32[2,128], index: 5, kind: input, shape index: {}]   ;;  %s7936_s6 = inlined_call_operand.vmem [shape: bf16[1152,128], index: 6, kind: input, shape index: {}]   ;;  %s7937_s7 = inlined_call_operand.vmem [shape: f32[2,128], index: 7, kind: input, shape index: {}]   ;;  %s7938_s8 = inlined_call_operand.vmem [shape: bf16[128,256], index: 8, kind: input, shape index: {}]   ;;  %s7939_s9 = inlined_call_operand.vmem [shape: f32[1,256], index: 9, kind: input, shape index: {}]   ;;  %s7940_s10 = inlined_call_operand.vmem [shape: bf16[512,256], index: 10, kind: output, shape index: {}]  }
   0x1 LB: > { %s6030_s14 = sadd.s32 4294967295, %s5966_s13   ;;  %p4950_p0 = scmp.ge.s32.totalorder %s5966_s13, 1  ;;  %s5966_s13 = sphi %s6024_s13, %s20_s13  }
   0x2   : > { %p370_p1 = scmp.lt.s32.totalorder %s5966_s13, 3 }
   0x4   : > { %p371_p2 = pnand %p4950_p0, %p370_p1 }
   0x6   : > { %374 = sbr.rel (%p371_p2) target bundleno = 1348 (0x544), region = 60 }
   0xd   : > { %v5754_v0 = vld [vmem:[%s7934_s4] sm:$0xff]   ;;  %v7941_v1 = vmov 0   ;;  %s4951_s17 = sshll.u32 %s6030_s14, 3  ;;  %v5755_v2 = vld [vmem:[%s7934_s4 + $0x8] sm:$0xff]   ;;  %v5756_v3 = vld [vmem:[%s7934_s4 + $0x10] sm:$0xff]   ;;  %v797_v4 = vlaneseq  ;;  %p2112_p8 = scmp.eq.s32.totalorder %s6030_s14, 0 }
   0xe   : > { %1228 = vmatprep.subr.bf16.mxu0 %v7941_v1  ;;  %s4952_s20 = sadd.s32 4294967295, %s4951_s17  ;;  %v5757_v5 = vld [vmem:[%s7934_s4 + $0x18] sm:$0xff]   ;;  %v5758_v7 = vld [vmem:[%s7934_s4 + $0x20] sm:$0xff]   ;;  %v5759_v11 = vld [vmem:[%s7934_s4 + $0x28] sm:$0xff]   ;;  %p2196_p9 = scmp.eq.s32.totalorder %s6030_s14, 1 }
   0xf   : > { %1229 = vmatpush1.bf16.msra.mxu0 %v5754_v0  ;;  %p432_p3 = scmp.gt.s32.totalorder %s4952_s20, 0  ;;  %v6052_v6 = vshrl.u32 %v797_v4, 7  ;;  %v795_v10 = vld [vmem:[%s7933_s3] ss:$2 sm:$0x3]  ;;  %v5760_v17 = vld [vmem:[%s7934_s4 + $0x30] sm:$0xff]  }
  0x10   : > { %1230 = vmatprep.subr.bf16.mxu0 %v7941_v1  ;;  %v5006_v13 = vld [vmem:[%s7933_s3 + $0x1] ss:$2 sm:$0x3]  ;;  %v5761_v24 = vld [vmem:[%s7934_s4 + $0x38] sm:$0xff]   ;;  %v5763_v27 = vld [vmem:[%s7934_s4 + $0x48] sm:$0xff]  }
  0x11   : > { %s8157_s20 = smov (!%p432_p3, %s4952_s20), 0  ;;  %v6064_v8 = vsub.s32 1, %v6052_v6  ;;  %v5762_v26 = vld [vmem:[%s7934_s4 + $0x40] sm:$0xff]   ;;  %v5764_v28 = vld [vmem:[%s7934_s4 + $0x50] sm:$0xff]   ;;  %v6112_v30 = vsub.s32 0, %v6052_v6  ;;  %v5765_v32 = vld [vmem:[%s7934_s4 + $0x58] sm:$0xff]  }
  0x12   : > { %s4953_s23 = sshll.u32 %s8157_s20, 2  ;;  %v5766_v36 = vld [vmem:[%s7934_s4 + $0x60] sm:$0xff]   ;;  %v5767_v44 = vld [vmem:[%s7934_s4 + $0x68] sm:$0xff]   ;;  %v5768_v50 = vld [vmem:[%s7934_s4 + $0x70] sm:$0xff]   ;;  %vm2520_vm4 = vcmp.lt.s32.totalorder %v6052_v6, 2  ;;  %vm2621_vm5 = vcmp.lt.s32.totalorder %v6052_v6, 6 }
  0x13   : > { %1231 = vmatpush1.bf16.msra.mxu0 %v5755_v2  ;;  %p435_p4 = scmp.lt.s32.totalorder %s4953_s23, 63  ;;  %7980 = vst [vmem:[#allocation2_spill] sm:$0xff] %v6064_v8  ;;  %v6075_v12 = vrot.slane %v795_v10, %v6064_v8  ;;  %v6082_v16 = vrot.slane %v5006_v13, %v6064_v8  ;;  %7981 = vst [vmem:[#allocation3_spill] sm:$0xff] %v6112_v30  ;;  %v6122_v33 = vrot.slane %v795_v10, %v6112_v30  ;;  %v5769_v62 = vld [vmem:[%s7934_s4 + $0x78] sm:$0xff]  }
  0x14   : > { %1232 = vmatprep.subr.bf16.mxu0 %v7941_v1  ;;  %v6138_v41 = vrot.slane %v5006_v13, %v6112_v30  ;;  %s2197_s25 = scalar_select %p2196_p9, 1, 0 }
  0x15   : > { %s8159_s23 = smov (!%p435_p4, %s4953_s23), 63 }
  0x16   : > { %s5173_s26 = sshll.u32 %s8159_s23, 3  ;;  %s4956_s23 = sshll.u32 %s6030_s14, 5 }
  0x17   : > { %1233 = vmatpush1.bf16.msra.mxu0 %v5756_v3  ;;  %s6061_s11 = scalar_lea.vmem %s7930_s0, %s5173_s26  ;;  %p446_p5 = scmp.lt.s32.totalorder %s4956_s23, 63 }
  0x18   : > { %1234 = vmatprep.subr.bf16.mxu0 %v7941_v1  ;;  %v5772_v9 = vld [vmem:[%s6061_s11 + $0x4] ss:$8 sps:$4 sm:$0xff]   ;;  %v5770_v29 = vld [vmem:[%s6061_s11] ss:$8 sps:$4 sm:$0xff]   ;;  %v5773_v31 = vld [vmem:[%s6061_s11 + $0x14] ss:$8 sps:$4 sm:$0xff]  }
  0x19   : > { %v716_v14 = vunpack.c.l.bf16 %v5772_v9  ;;  %v718_v15 = vunpack.c.h.bf16 %v5772_v9  ;;  %s8161_s23 = smov (!%p446_p5, %s4956_s23), 63  ;;  %v715_v34 = vunpack.c.l.bf16 %v5770_v29  ;;  %v717_v35 = vunpack.c.h.bf16 %v5770_v29  ;;  %v5775_v39 = vld [vmem:[%s6061_s11 + $0x10] ss:$8 sps:$4 sm:$0xff]   ;;  %s6151_s11 = sadd.s32 8, %s4951_s17 }
  0x1a   : > { %s5174_s15 = sshll.u32 %s8161_s23, 3  ;;  %v720_v37 = vunpack.c.l.bf16 %v5773_v31  ;;  %v722_v38 = vunpack.c.h.bf16 %v5773_v31  ;;  %v719_v52 = vunpack.c.l.bf16 %v5775_v39  ;;  %v721_v53 = vunpack.c.h.bf16 %v5775_v39  ;;  %p454_p6 = scmp.lt.s32.totalorder %s6151_s11, 15 }
  0x1b   : > { %1235 = vmatpush1.bf16.msra.mxu0 %v5757_v5  ;;  %v808_v18 = vmul.f32 %v6075_v12, %v716_v14  ;;  %v810_v19 = vmul.f32 %v6075_v12, %v718_v15  ;;  %s6129_s21 = scalar_lea.vmem %s7931_s1, %s5174_s15  ;;  %v807_v42 = vmul.f32 %v6122_v33, %v715_v34  ;;  %v809_v45 = vmul.f32 %v6122_v33, %v717_v35  ;;  %s7803_s17 = scalar_lea.vmem %s7940_s10, %s5174_s15 }
  0x1c   : > { %1236 = vmatprep.subr.bf16.mxu0 %v7941_v1  ;;  %v475_v40 = vld [vmem:[%s6129_s21] sm:$0xff]  ;;  %v476_v43 = vld [vmem:[%s6129_s21 + $0x8] sm:$0xff]  ;;  %v812_v46 = vmul.f32 %v6075_v12, %v720_v37  ;;  %v814_v47 = vmul.f32 %v6075_v12, %v722_v38  ;;  %v477_v59 = vld [vmem:[%s6129_s21 + $0x10] sm:$0xff]  ;;  %v811_v0 = vmul.f32 %v6122_v33, %v719_v52  ;;  %v813_v2 = vmul.f32 %v6122_v33, %v721_v53  ;;  %s8163_s11 = smov (!%p454_p6, %s6151_s11), 15 }
  0x1d   : > { %v901_v20 = vadd.f32 %v6082_v16, %v808_v18  ;;  %v903_v21 = vadd.f32 %v6082_v16, %v810_v19  ;;  %v4971_v48 = vcombine.high %v475_v40, %v476_v43  ;;  %v900_v49 = vadd.f32 %v6138_v41, %v807_v42  ;;  %v478_v61 = vld [vmem:[%s6129_s21 + $0x18] sm:$0xff]  ;;  %v479_v3 = vld [vmem:[%s6129_s21 + $0x20] sm:$0xff]  ;;  %v480_v4 = vld [vmem:[%s6129_s21 + $0x28] sm:$0xff]  ;;  %s4960_s30 = sshll.u32 %s8163_s11, 2 }
  0x1e   : > { %v902_v51 = vadd.f32 %v6138_v41, %v809_v45  ;;  %v905_v54 = vadd.f32 %v6082_v16, %v812_v46  ;;  %v907_v55 = vadd.f32 %v6082_v16, %v814_v47  ;;  %v4970_v56 = vcombine.low %v475_v40, %v476_v43  ;;  %p457_p7 = scmp.lt.s32.totalorder %s4960_s30, 63  ;;  %v481_v46 = vld [vmem:[%s6129_s21 + $0x30] sm:$0xff] }
  0x1f   : > { %1237 = vmatpush1.bf16.msra.mxu0 %v5758_v7  ;;  %v981_v22 = vmax.f32 %v901_v20, 0.0  ;;  %v983_v23 = vmax.f32 %v903_v21, 0.0  ;;  %v724_v57 = vunpack.c.l.bf16 %v4971_v48  ;;  %v726_v58 = vunpack.c.h.bf16 %v4971_v48  ;;  %s2113_s11 = scalar_select %p2112_p8, 1, 0 }
  0x20   : > { %1238 = vmatprep.subr.bf16.mxu0 %v7941_v1  ;;  %v980_v60 = vmax.f32 %v900_v49, 0.0  ;;  %v982_v63 = vmax.f32 %v902_v51, 0.0  ;;  %v985_v5 = vmax.f32 %v905_v54, 0.0  ;;  %v987_v7 = vmax.f32 %v907_v55, 0.0  ;;  %s8165_s30 = smov (!%p457_p7, %s4960_s30), 63  ;;  %v482_v51 = vld [vmem:[%s6129_s21 + $0x38] sm:$0xff] }
  0x21   : > { %v1061_v25 = vpack.c.bf16 %v983_v23, %v981_v22  ;;  %v723_v9 = vunpack.c.l.bf16 %v4970_v56  ;;  %v725_v10 = vunpack.c.h.bf16 %v4970_v56  ;;  %v818_v13 = vmul.f32 %v6075_v12, %v726_v58  ;;  %s5175_s12 = sshll.u32 %s8165_s30, 3 }
  0x22   : > { %v4973_v14 = vcombine.high %v477_v59, %v478_v61  ;;  %v1060_v15 = vpack.c.bf16 %v982_v63, %v980_v60  ;;  %v906_v18 = vadd.f32 %v6138_v41, %v813_v2  ;;  %v4972_v19 = vcombine.low %v477_v59, %v478_v61  ;;  %s6190_s19 = scalar_lea.vmem %s7932_s2, %s5175_s12 }
  0x23   : > { %1239 = vmatpush1.bf16.msra.mxu0 %v5759_v11  ;;  %1260 = vmatprep.mubr.bf16.mxu0 %v1061_v25  ;;  %v816_v11 = vmul.f32 %v6075_v12, %v724_v57  ;;  %v1063_v20 = vpack.c.bf16 %v987_v7, %v985_v5  ;;  %v815_v21 = vmul.f32 %v6122_v33, %v723_v9 }
  0x24   : > { %1240 = vmatprep.subr.bf16.mxu0 %v7941_v1  ;;  %v817_v22 = vmul.f32 %v6122_v33, %v725_v10  ;;  %v4975_v23 = vcombine.high %v479_v3, %v480_v4  ;;  %v911_v25 = vadd.f32 %v6082_v16, %v818_v13  ;;  %v986_v29 = vmax.f32 %v906_v18, 0.0  ;;  %v483_v10 = vld [vmem:[%s6129_s21 + $0x40] sm:$0xff] }
  0x25   : > { %v727_v31 = vunpack.c.l.bf16 %v4972_v19  ;;  %v908_v34 = vadd.f32 %v6138_v41, %v815_v21  ;;  %v4974_v55 = vcombine.low %v479_v3, %v480_v4  ;;  %v4977_v60 = vcombine.high %v481_v46, %v482_v51 }
  0x26   : > { %v910_v35 = vadd.f32 %v6138_v41, %v817_v22  ;;  %v734_v37 = vunpack.c.h.bf16 %v4975_v23  ;;  %v991_v39 = vmax.f32 %v911_v25, 0.0  ;;  %v4976_v18 = vcombine.low %v481_v46, %v482_v51 }
  0x27   : > { %1241 = vmatpush1.bf16.msra.mxu0 %v5760_v17  ;;  %v904_v17 = vadd.f32 %v6138_v41, %v811_v0  ;;  %v988_v47 = vmax.f32 %v908_v34, 0.0  ;;  %v731_v63 = vunpack.c.l.bf16 %v4974_v55  ;;  %v733_v0 = vunpack.c.h.bf16 %v4974_v55 }
  0x28   : > { %1242 = vmatprep.subr.bf16.mxu0 %v7941_v1  ;;  %v990_v48 = vmax.f32 %v910_v35, 0.0  ;;  %v736_v9 = vunpack.c.l.bf16 %v4977_v60  ;;  %v737_v25 = vunpack.c.h.bf16 %v4976_v18  ;;  %v486_v35 = vld [vmem:[%s6129_s21 + $0x58] sm:$0xff] }
  0x2a   : > { %v1064_v2 = vpack.c.bf16 %v990_v48, %v988_v47 }
  0x2b   : > { %1243 = vmatpush1.bf16.msra.mxu0 %v5761_v24  ;;  %v909_v24 = vadd.f32 %v6082_v16, %v816_v11  ;;  %v484_v11 = vld [vmem:[%s6129_s21 + $0x48] sm:$0xff] }
  0x2c   : > { %1244 = vmatprep.subr.bf16.mxu0 %v7941_v1  ;;  %v4979_v21 = vcombine.high %v483_v10, %v484_v11 }
  0x2d   : > { %v989_v38 = vmax.f32 %v909_v24, 0.0  ;;  %v735_v24 = vunpack.c.l.bf16 %v4976_v18 }
  0x2e   : > { %v742_v34 = vunpack.c.h.bf16 %v4979_v21 }
  0x2f   : > { %1245 = vmatpush1.bf16.msra.mxu0 %v5762_v26  ;;  %v728_v26 = vunpack.c.l.bf16 %v4973_v14  ;;  %v1065_v52 = vpack.c.bf16 %v991_v39, %v989_v38  ;;  %v827_v38 = vmul.f32 %v6122_v33, %v735_v24  ;;  %v829_v39 = vmul.f32 %v6122_v33, %v737_v25 }
  0x30   : > { %1246 = vmatprep.subr.bf16.mxu0 %v7941_v1  ;;  %v834_v46 = vmul.f32 %v6075_v12, %v742_v34 }
  0x31   : > { %v820_v40 = vmul.f32 %v6075_v12, %v728_v26  ;;  %v920_v47 = vadd.f32 %v6138_v41, %v827_v38  ;;  %v922_v48 = vadd.f32 %v6138_v41, %v829_v39 }
  0x32   : > { %v927_v55 = vadd.f32 %v6082_v16, %v834_v46  ;;  %v492_v46 = vld [vmem:[%s6129_s21 + $0x88] sm:$0xff] }
  0x33   : > { %1247 = vmatpush1.bf16.msra.mxu0 %v5763_v27  ;;  %v730_v27 = vunpack.c.h.bf16 %v4973_v14  ;;  %v913_v53 = vadd.f32 %v6082_v16, %v820_v40  ;;  %v738_v14 = vunpack.c.h.bf16 %v4977_v60  ;;  %v4978_v40 = vcombine.low %v483_v10, %v484_v11 }
  0x34   : > { %1248 = vmatprep.subr.bf16.mxu0 %v7941_v1 }
  0x35   : > { %v822_v42 = vmul.f32 %v6075_v12, %v730_v27  ;;  %v993_v61 = vmax.f32 %v913_v53, 0.0  ;;  %v741_v51 = vunpack.c.h.bf16 %v4978_v40 }
  0x37   : > { %1249 = vmatpush1.bf16.msra.mxu0 %v5764_v28  ;;  %v984_v28 = vmax.f32 %v904_v17, 0.0  ;;  %v915_v54 = vadd.f32 %v6082_v16, %v822_v42  ;;  %v825_v17 = vmul.f32 %v6122_v33, %v733_v0 }
  0x38   : > { %1250 = vmatprep.subr.bf16.mxu0 %v7941_v1 }
  0x39   : > { %v1062_v43 = vpack.c.bf16 %v986_v29, %v984_v28  ;;  %v485_v28 = vld [vmem:[%s6129_s21 + $0x50] sm:$0xff] }
  0x3a   : > { %v4981_v42 = vcombine.high %v485_v28, %v486_v35  ;;  %v4980_v60 = vcombine.low %v485_v28, %v486_v35 }
  0x3b   : > { %1251 = vmatpush1.bf16.msra.mxu0 %v5765_v32  ;;  %v729_v32 = vunpack.c.h.bf16 %v4972_v19  ;;  %v828_v19 = vmul.f32 %v6075_v12, %v736_v9 }
  0x3c   : > { %1252 = vmatprep.subr.bf16.mxu0 %v7941_v1  ;;  %v745_v9 = vunpack.c.h.bf16 %v4980_v60 }
  0x3d   : > { %v821_v45 = vmul.f32 %v6122_v33, %v729_v32  ;;  %v921_v27 = vadd.f32 %v6082_v16, %v828_v19  ;;  %v740_v32 = vunpack.c.l.bf16 %v4979_v21  ;;  %v490_v21 = vld [vmem:[%s6129_s21 + $0x78] sm:$0xff] }
  0x3f   : > { %1253 = vmatpush1.bf16.msra.mxu0 %v5766_v36  ;;  %v732_v36 = vunpack.c.l.bf16 %v4975_v23  ;;  %v914_v57 = vadd.f32 %v6138_v41, %v821_v45  ;;  %v918_v23 = vadd.f32 %v6138_v41, %v825_v17  ;;  %v832_v45 = vmul.f32 %v6075_v12, %v740_v32 }
  0x40   : > { %1254 = vmatprep.subr.bf16.mxu0 %v7941_v1 }
  0x41   : > { %v824_v49 = vmul.f32 %v6075_v12, %v732_v36  ;;  %v994_v3 = vmax.f32 %v914_v57, 0.0  ;;  %v487_v57 = vld [vmem:[%s6129_s21 + $0x60] sm:$0xff] }
  0x43   : > { %1255 = vmatpush1.bf16.msra.mxu0 %v5767_v44  ;;  %v819_v44 = vmul.f32 %v6122_v33, %v727_v31  ;;  %v917_v58 = vadd.f32 %v6082_v16, %v824_v49 }
  0x44   : > { %1256 = vmatprep.subr.bf16.mxu0 %v7941_v1 }
  0x45   : > { %v912_v56 = vadd.f32 %v6138_v41, %v819_v44  ;;  %v997_v4 = vmax.f32 %v917_v58, 0.0  ;;  %v488_v58 = vld [vmem:[%s6129_s21 + $0x68] sm:$0xff] }
  0x47   : > { %1257 = vmatpush1.bf16.msra.mxu0 %v5768_v50  ;;  %v826_v50 = vmul.f32 %v6075_v12, %v734_v37  ;;  %v992_v5 = vmax.f32 %v912_v56, 0.0  ;;  %v998_v37 = vmax.f32 %v918_v23, 0.0  ;;  %v746_v56 = vunpack.c.h.bf16 %v4981_v42 }
  0x48   : > { %1258 = vmatprep.subr.bf16.mxu0 %v7941_v1  ;;  %v837_v23 = vmul.f32 %v6122_v33, %v745_v9 }
  0x49   : > { %v919_v59 = vadd.f32 %v6082_v16, %v826_v50  ;;  %v1066_v26 = vpack.c.bf16 %v994_v3, %v992_v5  ;;  %v739_v50 = vunpack.c.l.bf16 %v4978_v40  ;;  %v1007_v5 = vmax.f32 %v927_v55, 0.0 }
  0x4a   : > { %v838_v3 = vmul.f32 %v6075_v12, %v746_v56  ;;  %v930_v35 = vadd.f32 %v6138_v41, %v837_v23 }
  0x4b   : > { %1259 = vmatpush1.bf16.msra.mxu0 %v5769_v62  ;;  %v995_v62 = vmax.f32 %v915_v54, 0.0  ;;  %v999_v7 = vmax.f32 %v919_v59, 0.0  ;;  %v925_v54 = vadd.f32 %v6082_v16, %v832_v45  ;;  %v1000_v59 = vmax.f32 %v920_v47, 0.0  ;;  %v491_v45 = vld [vmem:[%s6129_s21 + $0x80] sm:$0xff] }
  0x4c   : > { %v931_v17 = vadd.f32 %v6082_v16, %v838_v3  ;;  %v4987_v56 = vcombine.high %v491_v45, %v492_v46  ;;  %v493_v3 = vld [vmem:[%s6129_s21 + $0x90] sm:$0xff] }
  0x4d   : > { %v1067_v13 = vpack.c.bf16 %v995_v62, %v993_v61  ;;  %v1069_v29 = vpack.c.bf16 %v999_v7, %v997_v4  ;;  %v1002_v61 = vmax.f32 %v922_v48, 0.0  ;;  %v831_v62 = vmul.f32 %v6122_v33, %v739_v50 }
  0x4e   : > { %1261 = vmatmul.mubr.bf16.vlgmr.msra.gmra.mrb[0].mxu0 %v1060_v15  ;;  %v823_v15 = vmul.f32 %v6122_v33, %v731_v63  ;;  %v833_v63 = vmul.f32 %v6122_v33, %v741_v51  ;;  %v4983_v4 = vcombine.high %v487_v57, %v488_v58  ;;  %v743_v7 = vunpack.c.l.bf16 %v4980_v60 }
  0x4f   : > { %1268 = vmatprep.mubr.bf16.mxu0 %v1063_v20  ;;  %v830_v20 = vmul.f32 %v6075_v12, %v738_v14  ;;  %v1070_v10 = vpack.c.bf16 %v1002_v61, %v1000_v59  ;;  %v924_v11 = vadd.f32 %v6138_v41, %v831_v62 }
  0x50   : > { %v916_v22 = vadd.f32 %v6138_v41, %v823_v15  ;;  %v748_v18 = vunpack.c.l.bf16 %v4983_v4  ;;  %v750_v19 = vunpack.c.h.bf16 %v4983_v4  ;;  %v494_v4 = vld [vmem:[%s6129_s21 + $0x98] sm:$0xff] }
  0x51   : > { %v923_v31 = vadd.f32 %v6082_v16, %v830_v20  ;;  %v489_v20 = vld [vmem:[%s6129_s21 + $0x70] sm:$0xff]  ;;  %v1004_v24 = vmax.f32 %v924_v11, 0.0 }
  0x52   : > { %v996_v36 = vmax.f32 %v916_v22, 0.0  ;;  %v835_v22 = vmul.f32 %v6122_v33, %v743_v7  ;;  %v842_v32 = vmul.f32 %v6075_v12, %v750_v19  ;;  %v4984_v48 = vcombine.low %v489_v20, %v490_v21 }
  0x53   : > { %v1003_v44 = vmax.f32 %v923_v31, 0.0  ;;  %v840_v31 = vmul.f32 %v6075_v12, %v748_v18 }
  0x54   : > { %v1068_v49 = vpack.c.bf16 %v998_v37, %v996_v36  ;;  %v928_v34 = vadd.f32 %v6138_v41, %v835_v22 }
  0x56   : > { %1269 = vmatmul.mubr.bf16.gmra.mrb[4].mxu0 %v1062_v43  ;;  %v1001_v43 = vmax.f32 %v921_v27, 0.0  ;;  %v4985_v27 = vcombine.high %v489_v20, %v490_v21  ;;  %v1008_v47 = vmax.f32 %v928_v34, 0.0 }
  0x57   : > { %1276 = vmatprep.mubr.bf16.mxu0 %v1065_v52  ;;  %v744_v52 = vunpack.c.l.bf16 %v4981_v42  ;;  %v933_v42 = vadd.f32 %v6082_v16, %v840_v31  ;;  %v495_v31 = vld [vmem:[%s6129_s21 + $0xa0] sm:$0xff] }
  0x58   : > { %v1071_v53 = vpack.c.bf16 %v1003_v44, %v1001_v43  ;;  %v752_v39 = vunpack.c.l.bf16 %v4985_v27  ;;  %v935_v43 = vadd.f32 %v6082_v16, %v842_v32  ;;  %v754_v44 = vunpack.c.h.bf16 %v4985_v27  ;;  %v496_v32 = vld [vmem:[%s6129_s21 + $0xa8] sm:$0xff] }
  0x59   : > { %v836_v0 = vmul.f32 %v6075_v12, %v744_v52 }
  0x5a   : > { %v844_v52 = vmul.f32 %v6075_v12, %v752_v39  ;;  %v846_v55 = vmul.f32 %v6075_v12, %v754_v44  ;;  %v4991_v44 = vcombine.high %v495_v31, %v496_v32 }
  0x5b   : > { %v929_v14 = vadd.f32 %v6082_v16, %v836_v0 }
  0x5c   : > { %v937_v62 = vadd.f32 %v6082_v16, %v844_v52  ;;  %v939_v0 = vadd.f32 %v6082_v16, %v846_v55  ;;  %v497_v55 = vld [vmem:[%s6129_s21 + $0xb0] sm:$0xff] }
  0x5d   : > { %v1009_v28 = vmax.f32 %v929_v14, 0.0  ;;  %v4989_v14 = vcombine.high %v493_v3, %v494_v4 }
  0x5e   : > { %1277 = vmatmul.mubr.bf16.gmra.mrb[8].mxu0 %v1064_v2  ;;  %v1005_v2 = vmax.f32 %v925_v54, 0.0  ;;  %v1015_v54 = vmax.f32 %v935_v43, 0.0 }
  0x5f   : > { %1284 = vmatprep.mubr.bf16.mxu0 %v1067_v13  ;;  %v926_v13 = vadd.f32 %v6138_v41, %v833_v63 }
  0x60   : > { %v1073_v15 = vpack.c.bf16 %v1007_v5, %v1005_v2  ;;  %v756_v2 = vunpack.c.l.bf16 %v4987_v56  ;;  %v758_v5 = vunpack.c.h.bf16 %v4987_v56  ;;  %v498_v56 = vld [vmem:[%s6129_s21 + $0xb8] sm:$0xff] }
  0x61   : > { %v1006_v25 = vmax.f32 %v926_v13, 0.0  ;;  %v4986_v13 = vcombine.low %v491_v45, %v492_v46 }
  0x62   : > { %v848_v18 = vmul.f32 %v6075_v12, %v756_v2  ;;  %v850_v19 = vmul.f32 %v6075_v12, %v758_v5 }
  0x63   : > { %v1072_v36 = vpack.c.bf16 %v1006_v25, %v1004_v24  ;;  %v755_v23 = vunpack.c.l.bf16 %v4986_v13  ;;  %v757_v24 = vunpack.c.h.bf16 %v4986_v13  ;;  %v760_v25 = vunpack.c.l.bf16 %v4989_v14 }
  0x64   : > { %v941_v27 = vadd.f32 %v6082_v16, %v848_v18  ;;  %v499_v18 = vld [vmem:[%s6129_s21 + $0xc0] sm:$0xff] }
  0x65   : > { %v852_v39 = vmul.f32 %v6075_v12, %v760_v25 }
  0x66   : > { %1285 = vmatmul.mubr.bf16.gmra.mrb[12].mxu0 %v1066_v26  ;;  %v4982_v26 = vcombine.low %v487_v57, %v488_v58  ;;  %v751_v57 = vunpack.c.l.bf16 %v4984_v48  ;;  %v753_v58 = vunpack.c.h.bf16 %v4984_v48 }
  0x67   : > { %1292 = vmatprep.mubr.bf16.mxu0 %v1069_v29  ;;  %v1011_v29 = vmax.f32 %v931_v17, 0.0  ;;  %v1019_v17 = vmax.f32 %v939_v0, 0.0 }
  0x68   : > { %v747_v37 = vunpack.c.l.bf16 %v4982_v26  ;;  %v749_v38 = vunpack.c.h.bf16 %v4982_v26  ;;  %v843_v7 = vmul.f32 %v6122_v33, %v751_v57  ;;  %v845_v9 = vmul.f32 %v6122_v33, %v753_v58 }
  0x69   : > { %v1075_v40 = vpack.c.bf16 %v1011_v29, %v1009_v28  ;;  %v943_v28 = vadd.f32 %v6082_v16, %v850_v19  ;;  %v762_v29 = vunpack.c.h.bf16 %v4989_v14  ;;  %v500_v19 = vld [vmem:[%s6129_s21 + $0xc8] sm:$0xff] }
  0x6a   : > { %v839_v50 = vmul.f32 %v6122_v33, %v747_v37  ;;  %v841_v51 = vmul.f32 %v6122_v33, %v749_v38  ;;  %v936_v20 = vadd.f32 %v6138_v41, %v843_v7  ;;  %v938_v21 = vadd.f32 %v6138_v41, %v845_v9 }
  0x6b   : > { %v847_v37 = vmul.f32 %v6122_v33, %v755_v23  ;;  %v849_v38 = vmul.f32 %v6122_v33, %v757_v24  ;;  %v854_v43 = vmul.f32 %v6075_v12, %v762_v29  ;;  %v4995_v29 = vcombine.high %v499_v18, %v500_v19 }
  0x6c   : > { %v932_v60 = vadd.f32 %v6138_v41, %v839_v50  ;;  %v934_v61 = vadd.f32 %v6138_v41, %v841_v51  ;;  %v1016_v34 = vmax.f32 %v936_v20, 0.0  ;;  %v945_v50 = vadd.f32 %v6082_v16, %v852_v39 }
  0x6d   : > { %v940_v48 = vadd.f32 %v6138_v41, %v847_v37  ;;  %v947_v52 = vadd.f32 %v6082_v16, %v854_v43  ;;  %v501_v43 = vld [vmem:[%s6129_s21 + $0xd0] sm:$0xff] }
  0x6e   : > { %1293 = vmatmul.mubr.bf16.gmra.mrb[16].mxu0 %v1068_v49  ;;  %v1010_v49 = vmax.f32 %v930_v35, 0.0  ;;  %v1014_v11 = vmax.f32 %v934_v61, 0.0  ;;  %v4988_v35 = vcombine.low %v493_v3, %v494_v4  ;;  %v4990_v61 = vcombine.low %v495_v31, %v496_v32 }
  0x6f   : > { %1300 = vmatprep.mubr.bf16.mxu0 %v1071_v53  ;;  %v1013_v53 = vmax.f32 %v933_v42, 0.0  ;;  %v1023_v42 = vmax.f32 %v943_v28, 0.0  ;;  %v1027_v0 = vmax.f32 %v947_v52, 0.0 }
  0x70   : > { %v1074_v59 = vpack.c.bf16 %v1010_v49, %v1008_v47  ;;  %v759_v45 = vunpack.c.l.bf16 %v4988_v35  ;;  %v761_v46 = vunpack.c.h.bf16 %v4988_v35  ;;  %v942_v49 = vadd.f32 %v6138_v41, %v849_v38 }
  0x71   : > { %v1077_v63 = vpack.c.bf16 %v1015_v54, %v1013_v53  ;;  %v764_v53 = vunpack.c.l.bf16 %v4991_v44  ;;  %v766_v54 = vunpack.c.h.bf16 %v4991_v44  ;;  %v763_v9 = vunpack.c.l.bf16 %v4990_v61  ;;  %v502_v44 = vld [vmem:[%s6129_s21 + $0xd8] sm:$0xff] }
  0x72   : > { %v851_v57 = vmul.f32 %v6122_v33, %v759_v45  ;;  %v853_v58 = vmul.f32 %v6122_v33, %v761_v46  ;;  %v5814_v45 = vld [vmem:[%s7936_s6 + $0x140] sm:$0xff]   ;;  %v4997_v52 = vcombine.high %v501_v43, %v502_v44 }
  0x73   : > { %v856_v2 = vmul.f32 %v6075_v12, %v764_v53  ;;  %v858_v5 = vmul.f32 %v6075_v12, %v766_v54  ;;  %v855_v23 = vmul.f32 %v6122_v33, %v763_v9  ;;  %5433 = vmatprep.subr.bf16.mxu0 %v5814_v45  ;;  %v504_v9 = vld [vmem:[%s6129_s21 + $0xe8] sm:$0xff]  ;;  %v5823_v45 = vld [vmem:[%s7936_s6 + $0x120] sm:$0xff]  }
  0x74   : > { %v944_v3 = vadd.f32 %v6138_v41, %v851_v57  ;;  %v946_v4 = vadd.f32 %v6138_v41, %v853_v58  ;;  %v5816_v57 = vld [vmem:[%s7936_s6 + $0x148] sm:$0xff]  }
  0x75   : > { %v949_v14 = vadd.f32 %v6082_v16, %v856_v2  ;;  %v948_v35 = vadd.f32 %v6138_v41, %v855_v23 }
  0x76   : > { %1301 = vmatmul.mubr.bf16.gmra.mrb[20].mxu0 %v1070_v10  ;;  %v1012_v10 = vmax.f32 %v932_v60, 0.0  ;;  %v1022_v60 = vmax.f32 %v942_v49, 0.0  ;;  %v1024_v20 = vmax.f32 %v944_v3, 0.0 }
  0x77   : > { %1308 = vmatprep.mubr.bf16.mxu0 %v1073_v15  ;;  %v1017_v15 = vmax.f32 %v937_v62, 0.0  ;;  %v4993_v62 = vcombine.high %v497_v55, %v498_v56  ;;  %v1028_v49 = vmax.f32 %v948_v35, 0.0 }
  0x78   : > { %v1076_v22 = vpack.c.bf16 %v1014_v11, %v1012_v10  ;;  %v765_v10 = vunpack.c.h.bf16 %v4990_v61 }
  0x79   : > { %v1079_v26 = vpack.c.bf16 %v1019_v17, %v1017_v15  ;;  %v768_v11 = vunpack.c.l.bf16 %v4993_v62  ;;  %v951_v15 = vadd.f32 %v6082_v16, %v858_v5  ;;  %v770_v17 = vunpack.c.h.bf16 %v4993_v62 }
  0x7a   : > { %v857_v24 = vmul.f32 %v6122_v33, %v765_v10  ;;  %v5818_v10 = vld [vmem:[%s7936_s6 + $0x150] sm:$0xff]  }
  0x7b   : > { %v860_v25 = vmul.f32 %v6075_v12, %v768_v11  ;;  %v862_v28 = vmul.f32 %v6075_v12, %v770_v17 }
  0x7d   : > { %v953_v37 = vadd.f32 %v6082_v16, %v860_v25  ;;  %v955_v39 = vadd.f32 %v6082_v16, %v862_v28 }
  0x7e   : > { %1309 = vmatmul.mubr.bf16.gmra.mrb[24].mxu0 %v1072_v36  ;;  %v1018_v36 = vmax.f32 %v938_v21, 0.0  ;;  %v4992_v21 = vcombine.low %v497_v55, %v498_v56 }
  0x7f   : > { %1316 = vmatprep.mubr.bf16.mxu0 %v1075_v40  ;;  %v1021_v40 = vmax.f32 %v941_v27, 0.0  ;;  %v1031_v27 = vmax.f32 %v951_v15, 0.0  ;;  %v1033_v53 = vmax.f32 %v953_v37, 0.0  ;;  %v1035_v54 = vmax.f32 %v955_v39, 0.0  ;;  %v506_v39 = vld [vmem:[%s6129_s21 + $0xf8] sm:$0xff] }
  0x80   : > { %v1078_v47 = vpack.c.bf16 %v1018_v36, %v1016_v34  ;;  %v767_v31 = vunpack.c.l.bf16 %v4992_v21  ;;  %v769_v32 = vunpack.c.h.bf16 %v4992_v21  ;;  %v950_v36 = vadd.f32 %v6138_v41, %v857_v24  ;;  %v5820_v24 = vld [vmem:[%s7936_s6 + $0x158] sm:$0xff]  }
  0x81   : > { %v1081_v51 = vpack.c.bf16 %v1023_v42, %v1021_v40  ;;  %v772_v40 = vunpack.c.l.bf16 %v4995_v29  ;;  %v774_v42 = vunpack.c.h.bf16 %v4995_v29  ;;  %v1087_v2 = vpack.c.bf16 %v1035_v54, %v1033_v53  ;;  %v5824_v53 = vld [vmem:[%s7936_s6 + $0x168] sm:$0xff]  }
  0x82   : > { %v859_v46 = vmul.f32 %v6122_v33, %v767_v31 }
  0x83   : > { %v864_v55 = vmul.f32 %v6075_v12, %v772_v40  ;;  %v866_v56 = vmul.f32 %v6075_v12, %v774_v42  ;;  %v5822_v40 = vld [vmem:[%s7936_s6 + $0x160] sm:$0xff]  }
  0x84   : > { %v952_v58 = vadd.f32 %v6138_v41, %v859_v46 }
  0x85   : > { %v957_v5 = vadd.f32 %v6082_v16, %v864_v55  ;;  %v959_v3 = vadd.f32 %v6082_v16, %v866_v56 }
  0x86   : > { %1317 = vmatmul.mubr.bf16.gmra.mrb[28].mxu0 %v1074_v59  ;;  %v1020_v59 = vmax.f32 %v940_v48, 0.0  ;;  %v5815_v48 = vld [vmem:[%s7936_s6 + $0x100] sm:$0xff]   ;;  %v1032_v11 = vmax.f32 %v952_v58, 0.0 }
  0x87   : > { %1324 = vmatprep.mubr.bf16.mxu0 %v1077_v63  ;;  %v1025_v63 = vmax.f32 %v945_v50, 0.0  ;;  %v1030_v50 = vmax.f32 %v950_v36, 0.0  ;;  %5434 = vmatpush3.bf16.msra.mxu0 %v5815_v48  ;;  %v1039_v21 = vmax.f32 %v959_v3, 0.0 }
  0x88   : > { %v1080_v7 = vpack.c.bf16 %v1022_v60, %v1020_v59  ;;  %v5817_v60 = vld [vmem:[%s7936_s6 + $0x108] sm:$0xff]   ;;  %5435 = vmatprep.subr.bf16.mxu0 %v5816_v57 }
  0x89   : > { %v1083_v13 = vpack.c.bf16 %v1027_v0, %v1025_v63  ;;  %v1084_v61 = vpack.c.bf16 %v1030_v50, %v1028_v49  ;;  %v776_v0 = vunpack.c.l.bf16 %v4997_v52  ;;  %v5825_v57 = vld [vmem:[%s7936_s6 + $0x128] sm:$0xff]  }
  0x8b   : > { %5436 = vmatpush3.bf16.msra.mxu0 %v5817_v60 }
  0x8c   : > { %5437 = vmatprep.subr.bf16.mxu0 %v5818_v10 }
  0x8e   : > { %1325 = vmatmul.mubr.bf16.gmra.mrb[32].mxu0 %v1076_v22  ;;  %v1026_v22 = vmax.f32 %v946_v4, 0.0  ;;  %v778_v4 = vunpack.c.h.bf16 %v4997_v52 }
  0x8f   : > { %1332 = vmatprep.mubr.bf16.mxu0 %v1079_v26  ;;  %v1029_v26 = vmax.f32 %v949_v14, 0.0  ;;  %v5819_v14 = vld [vmem:[%s7936_s6 + $0x110] sm:$0xff]  }
  0x90   : > { %v1082_v34 = vpack.c.bf16 %v1026_v22, %v1024_v20  ;;  %v1037_v20 = vmax.f32 %v957_v5, 0.0  ;;  %v870_v22 = vmul.f32 %v6075_v12, %v778_v4  ;;  %5438 = vmatpush3.bf16.msra.mxu0 %v5819_v14 }
  0x91   : > { %v1085_v38 = vpack.c.bf16 %v1031_v27, %v1029_v26  ;;  %v5821_v27 = vld [vmem:[%s7936_s6 + $0x118] sm:$0xff]   ;;  %5439 = vmatprep.subr.bf16.mxu0 %v5820_v24 }
  0x92   : > { %v963_v35 = vadd.f32 %v6082_v16, %v870_v22  ;;  %v5829_v22 = vld [vmem:[%s7936_s6 + $0x138] sm:$0xff]  }
  0x94   : > { %5440 = vmatpush3.bf16.msra.mxu0 %v5821_v27  ;;  %v1043_v50 = vmax.f32 %v963_v35, 0.0 }
  0x95   : > { %5441 = vmatprep.subr.bf16.mxu0 %v5822_v40 }
  0x96   : > { %1333 = vmatmul.mubr.bf16.gmra.mrb[36].mxu0 %v1078_v47  ;;  %v861_v47 = vmul.f32 %v6122_v33, %v769_v32 }
  0x97   : > { %1340 = vmatprep.mubr.bf16.mxu0 %v1081_v51  ;;  %v4994_v51 = vcombine.low %v499_v18, %v500_v19  ;;  %v868_v19 = vmul.f32 %v6075_v12, %v776_v0 }
  0x98   : > { %v954_v59 = vadd.f32 %v6138_v41, %v861_v47  ;;  %5442 = vmatpush3.bf16.msra.mxu0 %v5823_v45 }
  0x99   : > { %v771_v62 = vunpack.c.l.bf16 %v4994_v51  ;;  %v773_v63 = vunpack.c.h.bf16 %v4994_v51  ;;  %v961_v32 = vadd.f32 %v6082_v16, %v868_v19  ;;  %5443 = vmatprep.subr.bf16.mxu0 %v5824_v53 }
  0x9a   : > { %v1034_v15 = vmax.f32 %v954_v59, 0.0 }
  0x9b   : > { %v863_v17 = vmul.f32 %v6122_v33, %v771_v62  ;;  %v865_v18 = vmul.f32 %v6122_v33, %v773_v63  ;;  %v1041_v49 = vmax.f32 %v961_v32, 0.0 }
  0x9c   : > { %v1086_v28 = vpack.c.bf16 %v1034_v15, %v1032_v11  ;;  %5444 = vmatpush3.bf16.msra.mxu0 %v5825_v57  ;;  %v5813_v57 = vld [vmem:[%s6190_s19 + $0x10] ss:$8 sps:$4 sm:$0xff]  }
  0x9d   : > { %v956_v29 = vadd.f32 %v6138_v41, %v863_v17  ;;  %v958_v31 = vadd.f32 %v6138_v41, %v865_v18  ;;  %v1091_v62 = vpack.c.bf16 %v1043_v50, %v1041_v49  ;;  %v5808_v17 = vld [vmem:[%s6190_s19 + $0x4] ss:$8 sps:$4 sm:$0xff]   ;;  %v5828_v18 = vld [vmem:[%s7936_s6 + $0x178] sm:$0xff]  }
  0x9e   : > { %1341 = vmatmul.mubr.bf16.gmra.mrb[40].mxu0 %v1080_v7  ;;  %v503_v7 = vld [vmem:[%s6129_s21 + $0xe0] sm:$0xff] }
  0x9f   : > { %1348 = vmatprep.mubr.bf16.mxu0 %v1083_v13  ;;  %v4996_v13 = vcombine.low %v501_v43, %v502_v44  ;;  %v4999_v23 = vcombine.high %v503_v7, %v504_v9  ;;  %v4998_v44 = vcombine.low %v503_v7, %v504_v9  ;;  %v1036_v46 = vmax.f32 %v956_v29, 0.0  ;;  %v5827_v9 = vld [vmem:[%s7936_s6 + $0x130] sm:$0xff]  }
  0xa0   : > { %v1038_v47 = vmax.f32 %v958_v31, 0.0  ;;  %v790_v29 = vunpack.c.h.bf16 %v5808_v17 }
  0xa1   : > { %v775_v25 = vunpack.c.l.bf16 %v4996_v13  ;;  %v777_v26 = vunpack.c.h.bf16 %v4996_v13  ;;  %v780_v36 = vunpack.c.l.bf16 %v4999_v23  ;;  %v782_v37 = vunpack.c.h.bf16 %v4999_v23 }
  0xa2   : > { %v779_v56 = vunpack.c.l.bf16 %v4998_v44  ;;  %v1088_v58 = vpack.c.bf16 %v1038_v47, %v1036_v46  ;;  %v781_v59 = vunpack.c.h.bf16 %v4998_v44  ;;  %v882_v40 = vmul.f32 %v6075_v12, %v790_v29 }
  0xa3   : > { %v867_v42 = vmul.f32 %v6122_v33, %v775_v25  ;;  %v869_v43 = vmul.f32 %v6122_v33, %v777_v26  ;;  %v872_v51 = vmul.f32 %v6075_v12, %v780_v36  ;;  %v874_v52 = vmul.f32 %v6075_v12, %v782_v37 }
  0xa4   : > { %v871_v4 = vmul.f32 %v6122_v33, %v779_v56  ;;  %v873_v10 = vmul.f32 %v6122_v33, %v781_v59  ;;  %v975_v50 = vadd.f32 %v6082_v16, %v882_v40  ;;  %v1596_v29 = vand.u32 31, %v6052_v6 }
  0xa5   : > { %v960_v54 = vadd.f32 %v6138_v41, %v867_v42  ;;  %v962_v55 = vadd.f32 %v6138_v41, %v869_v43  ;;  %v965_v63 = vadd.f32 %v6082_v16, %v872_v51  ;;  %v967_v0 = vadd.f32 %v6082_v16, %v874_v52  ;;  %v5811_v42 = vld [vmem:[%s6190_s19 + $0x14] ss:$8 sps:$4 sm:$0xff]  }
  0xa6   : > { %1349 = vmatmul.mubr.bf16.gmra.mrb[44].mxu0 %v1082_v34  ;;  %v1089_v34 = vpack.c.bf16 %v1039_v21, %v1037_v20  ;;  %v964_v23 = vadd.f32 %v6138_v41, %v871_v4  ;;  %v966_v24 = vadd.f32 %v6138_v41, %v873_v10  ;;  %v792_v51 = vunpack.c.l.bf16 %v5811_v42 }
  0xa7   : > { %1356 = vmatprep.mubr.bf16.mxu0 %v1085_v38  ;;  %v505_v38 = vld [vmem:[%s6129_s21 + $0xf0] sm:$0xff]  ;;  %v1040_v5 = vmax.f32 %v960_v54, 0.0  ;;  %v1042_v3 = vmax.f32 %v962_v55, 0.0  ;;  %v1045_v14 = vmax.f32 %v965_v63, 0.0  ;;  %v1047_v15 = vmax.f32 %v967_v0, 0.0 }
  0xa8   : > { %v5001_v48 = vcombine.high %v505_v38, %v506_v39  ;;  %v5000_v7 = vcombine.low %v505_v38, %v506_v39  ;;  %v1046_v35 = vmax.f32 %v966_v24, 0.0  ;;  %v5810_v38 = vld [vmem:[%s6190_s19] ss:$8 sps:$4 sm:$0xff]   ;;  %v794_v52 = vunpack.c.h.bf16 %v5811_v42 }
  0xa9   : > { %v1090_v19 = vpack.c.bf16 %v1042_v3, %v1040_v5  ;;  %v1093_v27 = vpack.c.bf16 %v1047_v15, %v1045_v14  ;;  %v787_v47 = vunpack.c.l.bf16 %v5810_v38  ;;  %v1055_v59 = vmax.f32 %v975_v50, 0.0  ;;  %v5838_v42 = vld [vmem:[%s7936_s6 + $0x40] sm:$0xff]  }
  0xaa   : > { %v784_v60 = vunpack.c.l.bf16 %v5001_v48  ;;  %v783_v20 = vunpack.c.l.bf16 %v5000_v7  ;;  %v785_v21 = vunpack.c.h.bf16 %v5000_v7  ;;  %v793_v5 = vunpack.c.h.bf16 %v5813_v57  ;;  %5209 = vmatprep.subr.bf16.mxu1 %v5838_v42 }
  0xab   : > { %v879_v55 = vmul.f32 %v6122_v33, %v787_v47  ;;  %vm6436_vm2 = vcmp.lt.s32.totalorder %v1596_v29, 2  ;;  %v1555_v40 = vadd.s32 24, %v6052_v6 }
  0xac   : > { %v876_v11 = vmul.f32 %v6075_v12, %v784_v60  ;;  %v875_v31 = vmul.f32 %v6122_v33, %v783_v20  ;;  %v877_v32 = vmul.f32 %v6122_v33, %v785_v21  ;;  %v884_v60 = vmul.f32 %v6075_v12, %v792_v51 }
  0xad   : > { %v972_v63 = vadd.f32 %v6138_v41, %v879_v55 }
  0xae   : > { %1357 = vmatmul.mubr.bf16.gmra.mrb[48].mxu0 %v1084_v61  ;;  %v786_v61 = vunpack.c.h.bf16 %v5001_v48  ;;  %v969_v25 = vadd.f32 %v6082_v16, %v876_v11  ;;  %v968_v43 = vadd.f32 %v6138_v41, %v875_v31  ;;  %v970_v44 = vadd.f32 %v6138_v41, %v877_v32 }
  0xaf   : > { %1364 = vmatprep.mubr.bf16.mxu0 %v1087_v2  ;;  %v5826_v2 = vld [vmem:[%s7936_s6 + $0x170] sm:$0xff]   ;;  %v789_v48 = vunpack.c.h.bf16 %v5810_v38  ;;  %v977_v4 = vadd.f32 %v6082_v16, %v884_v60  ;;  %v5841_v60 = vld [vmem:[%s7936_s6 + $0x8] sm:$0xff]  }
  0xb0   : > { %v878_v13 = vmul.f32 %v6075_v12, %v786_v61  ;;  %5445 = vmatprep.subr.bf16.mxu0 %v5826_v2  ;;  %v1049_v36 = vmax.f32 %v969_v25, 0.0  ;;  %v1048_v53 = vmax.f32 %v968_v43, 0.0  ;;  %v1050_v54 = vmax.f32 %v970_v44, 0.0  ;;  %v5860_v44 = vld [vmem:[%s7936_s6 + $0xd8] sm:$0xff]  }
  0xb1   : > { %5446 = vmatpush3.bf16.msra.mxu0 %v5827_v9  ;;  %v881_v56 = vmul.f32 %v6122_v33, %v789_v48  ;;  %v886_v61 = vmul.f32 %v6075_v12, %v794_v52  ;;  %v791_v2 = vunpack.c.l.bf16 %v5813_v57  ;;  %v1052_v9 = vmax.f32 %v972_v63, 0.0 }
  0xb2   : > { %v971_v26 = vadd.f32 %v6082_v16, %v878_v13  ;;  %5447 = vmatprep.subr.bf16.mxu0 %v5828_v18  ;;  %v885_v13 = vmul.f32 %v6122_v33, %v793_v5  ;;  %v2114_v25 = vstv %s2113_s11 }
  0xb3   : > { %v974_v0 = vadd.f32 %v6138_v41, %v881_v56  ;;  %v979_v7 = vadd.f32 %v6082_v16, %v886_v61  ;;  %v883_v11 = vmul.f32 %v6122_v33, %v791_v2  ;;  %v6407_v33 = vld [vmem:[%s7936_s6 + $0x200] sm:$0xff]   ;;  %vm6425_vm0 = vcmp.eq.s32.totalorder %v2114_v25, 1 }
  0xb4   : > { %v1051_v37 = vmax.f32 %v971_v26, 0.0  ;;  %v978_v18 = vadd.f32 %v6138_v41, %v885_v13  ;;  %vm5097_vm1 = vmneg %vm6425_vm0  ;;  %v1617_v56 = vand.u32 31, %v1555_v40 }
  0xb5   : > { %5448 = vmatpush3.bf16.msra.mxu0 %v5829_v22  ;;  %v1054_v10 = vmax.f32 %v974_v0, 0.0  ;;  %v1059_v14 = vmax.f32 %v979_v7, 0.0  ;;  %vm6444_vm3 = vmpackc.low %vm5097_vm1, %vm5097_vm1  ;;  %v5842_v7 = vld [vmem:[%s7936_s6 + $0x50] sm:$0xff]  }
  0xb6   : > { %1365 = vmatmul.mubr.bf16.gmra.mrb[52].mxu0 %v1086_v28  ;;  %v788_v28 = vunpack.c.l.bf16 %v5808_v17  ;;  %v1095_v46 = vpack.c.bf16 %v1051_v37, %v1049_v36  ;;  %v976_v17 = vadd.f32 %v6138_v41, %v883_v11  ;;  %5681 = vmatprep.subr.bf16.mxu0 %v6407_v33  ;;  %v6414_v41 = vld [vmem:[%s7935_s5] ss:$0 sm:$0xff]  ;;  %vm6482_vm6 = vcmp.ge.s32.totalorder %v1617_v56, 30 }
  0xb7   : > { %1372 = vmatprep.mubr.bf16.mxu0 %v1089_v34  ;;  %v1044_v34 = vmax.f32 %v964_v23, 0.0  ;;  %v1096_v15 = vpack.c.bf16 %v1054_v10, %v1052_v9  ;;  %v6419_v23 = vld [vmem:[%s7935_s5 + $0x1] ss:$0 sm:$0xff] }
  0xb8   : > { %v880_v39 = vmul.f32 %v6075_v12, %v788_v28  ;;  %v1057_v12 = vmax.f32 %v977_v4, 0.0  ;;  %v1056_v20 = vmax.f32 %v976_v17, 0.0  ;;  %v1560_v4 = vadd.s32 64, %v6052_v6 }
  0xb9   : > { %v1092_v45 = vpack.c.bf16 %v1046_v35, %v1044_v34 }
  0xba   : > { %v973_v49 = vadd.f32 %v6082_v16, %v880_v39  ;;  %v1058_v16 = vmax.f32 %v978_v18, 0.0 }
  0xbc   : > { %v1098_v21 = vpack.c.bf16 %v1058_v16, %v1056_v20 }
  0xbe   : > { %1373 = vmatmul.mubr.bf16.gmra.mrb[56].mxu0 %v1088_v58  ;;  %v1053_v58 = vmax.f32 %v973_v49, 0.0 }
  0xbf   : > { %1380 = vmatprep.mubr.bf16.mxu0 %v1091_v62  ;;  %v1094_v62 = vpack.c.bf16 %v1050_v54, %v1048_v53 }
  0xc0   : > { %v1097_v3 = vpack.c.bf16 %v1055_v59, %v1053_v58  ;;  %v5840_v58 = vld [vmem:[%s7936_s6 + $0x48] sm:$0xff]   ;;  %v1556_v59 = vadd.s32 32, %v6052_v6 }
  0xc2   : > { %v1624_v13 = vand.u32 31, %v1556_v59 }
  0xc4   : > { %vm2404_vm7 = vcmp.lt.s32.totalorder %v1624_v13, 2 }
  0xc6   : > { %1381 = vmatmul.mubr.bf16.gmra.mrb[60].mxu0 %v1090_v19  ;;  %v1099_v19 = vpack.c.bf16 %v1059_v14, %v1057_v12  ;;  %v5843_v12 = vld [vmem:[%s7936_s6 + $0x10] sm:$0xff]  }
  0xc7   : > { %1388 = vmatprep.mubr.bf16.mxu0 %v1093_v27 }
  0xce   : > { %1389 = vmatmul.mubr.bf16.gmra.mrb[64].mxu0 %v1092_v45  ;;  %v5839_v45 = vld [vmem:[%s7936_s6] sm:$0xff]  }
  0xcf   : > { %1396 = vmatprep.mubr.bf16.mxu0 %v1095_v46  ;;  %5210 = vmatpush3.bf16.msra.mxu1 %v5839_v45 }
  0xd0   : > { %5211 = vmatprep.subr.bf16.mxu1 %v5840_v58 }
  0xd3   : > { %5212 = vmatpush3.bf16.msra.mxu1 %v5841_v60 }
  0xd4   : > { %5213 = vmatprep.subr.bf16.mxu1 %v5842_v7  ;;  %v5849_v7 = vld [vmem:[%s7936_s6 + $0x28] sm:$0xff]  }
  0xd6   : > { %1397 = vmatmul.mubr.bf16.gmra.mrb[68].mxu0 %v1094_v62 }
  0xd7   : > { %1404 = vmatprep.mubr.bf16.mxu0 %v1097_v3  ;;  %5214 = vmatpush3.bf16.msra.mxu1 %v5843_v12 }
  0xde   : > { %1405 = vmatmul.mubr.bf16.gmra.mrb[72].mxu0 %v1096_v15 }
  0xdf   : > { %1412 = vmatprep.mubr.bf16.mxu0 %v1099_v19 }
  0xe6   : > { %1413 = vmatmul.mubr.bf16.gmra.mrb[76].mxu0 %v1098_v21 }
 0x121   : > { %v1262_v22 = vpop.f32.mrb[0].mxu0 }
 0x122   : > { %v1426_v24 = vmul.f32 %v6414_v41, %v1262_v22  ;;  %v1264_v26 = vpop.f32.mrb[1].mxu0 }
 0x123   : > { %v1265_v27 = vpop.f32.mrb[2].mxu0 }
 0x124   : > { %v1471_v28 = vadd.f32 %v6419_v23, %v1426_v24  ;;  %v1427_v31 = vmul.f32 %v6414_v41, %v1265_v27  ;;  %v1267_v32 = vpop.f32.mrb[3].mxu0 }
 0x125   : > { %v5845_v32 = vld [vmem:[%s7936_s6 + $0x18] sm:$0xff]  }
 0x126   : > { %v1511_v35 = vmax.f32 %v1471_v28, 0.0  ;;  %v1472_v36 = vadd.f32 %v6419_v23, %v1427_v31  ;;  %v5844_v31 = vld [vmem:[%s7936_s6 + $0x58] sm:$0xff]  }
 0x127   : > { %5215 = vmatprep.subr.bf16.mxu1 %v5844_v31 }
 0x128   : > { %v6434_v37 = vsel %vm6425_vm0, 0.0, %v1511_v35  ;;  %v1512_v39 = vmax.f32 %v1472_v36, 0.0  ;;  %5216 = vmatpush3.bf16.msra.mxu1 %v5845_v32 }
 0x129   : > { %v1270_v43 = vpop.f32.mrb[4].mxu0  ;;  %v2440_v50 = vsel %vm6436_vm2, 0.0, %v6434_v37  ;;  %v7943_v51 = vrot.slane %v6434_v37, 6 }
 0x12a   : > { %v2281_v46 = vsel %vm6425_vm0, 0.0, %v1512_v39  ;;  %v1428_v47 = vmul.f32 %v6414_v41, %v1270_v43  ;;  %v1272_v48 = vpop.f32.mrb[5].mxu0  ;;  %v5100_v49 = vpack.c.bf16 %v1512_v39, %v1511_v35  ;;  %v6476_v62 = vrot.slane %v2440_v50, 2 }
 0x12b   : > { %v2481_v52 = vrot.slane %v2281_v46, 6  ;;  %v1273_v53 = vpop.f32.mrb[6].mxu0  ;;  %v2582_v63 = vrot.slane %v2281_v46, 2  ;;  %v1559_v39 = vadd.s32 56, %v6052_v6  ;;  %v5846_v46 = vld [vmem:[%s7936_s6 + $0x60] sm:$0xff]  }
 0x12c   : > { %v1473_v54 = vadd.f32 %v6419_v23, %v1428_v47  ;;  %v1429_v55 = vmul.f32 %v6414_v41, %v1273_v53  ;;  %v1275_v57 = vpop.f32.mrb[7].mxu0  ;;  %5101 = vmatprep.mubr.msk.bf16.mxu1 %vm6444_vm3, %v5100_v49  ;;  %v5847_v49 = vld [vmem:[%s7936_s6 + $0x20] sm:$0xff]   ;;  %5217 = vmatprep.subr.bf16.mxu1 %v5846_v46 }
 0x12d   : > { %v6474_v61 = vsel %vm2520_vm4, %v7943_v51, %v2481_v52  ;;  %v6495_v14 = vsel %vm2621_vm5, %v6476_v62, %v2582_v63  ;;  %v1645_v57 = vand.u32 31, %v1559_v39  ;;  %5218 = vmatpush3.bf16.msra.mxu1 %v5847_v49  ;;  %v5853_v49 = vld [vmem:[%s7936_s6 + $0x38] sm:$0xff]  }
 0x12e   : > { %v1513_v0 = vmax.f32 %v1473_v54, 0.0  ;;  %v1474_v2 = vadd.f32 %v6419_v23, %v1429_v55 }
 0x12f   : > { %vm2327_vm8 = vcmp.ge.s32.totalorder %v1645_v57, 30 }
 0x130   : > { %v2282_v5 = vsel %vm6425_vm0, 0.0, %v1513_v0  ;;  %v1514_v3 = vmax.f32 %v1474_v2, 0.0 }
 0x131   : > { %v2482_v9 = vrot.slane %v2282_v5, 6  ;;  %v2583_v10 = vrot.slane %v2282_v5, 2  ;;  %v1278_v11 = vpop.f32.mrb[8].mxu0  ;;  %v5848_v5 = vld [vmem:[%s7936_s6 + $0x68] sm:$0xff]  }
 0x132   : > { %v2283_v15 = vsel %vm6425_vm0, 0.0, %v1514_v3  ;;  %v6499_v17 = vpack.c.bf16 %v1514_v3, %v1513_v0  ;;  %v1430_v18 = vmul.f32 %v6414_v41, %v1278_v11  ;;  %v1280_v19 = vpop.f32.mrb[9].mxu0  ;;  %5219 = vmatprep.subr.bf16.mxu1 %v5848_v5  ;;  %v5832_v5 = vld [vmem:[%s7936_s6 + $0x210] sm:$0xff]  }
 0x133   : > { %v6504_v20 = vsel %vm2621_vm5, %v2582_v63, %v2583_v10  ;;  %v2363_v16 = vsel %vm6482_vm6, 0.0, %v2283_v15  ;;  %v2584_v21 = vrot.slane %v2283_v15, 2  ;;  %v1281_v22 = vpop.f32.mrb[10].mxu0  ;;  %v6510_v24 = vsel %vm2520_vm4, %v2481_v52, %v2482_v9  ;;  %5220 = vmatpush3.bf16.msra.mxu1 %v5849_v7  ;;  %v5850_v19 = vld [vmem:[%s7936_s6 + $0x70] sm:$0xff]  }
 0x134   : > { %v2483_v26 = vrot.slane %v2363_v16, 6  ;;  %v1475_v27 = vadd.f32 %v6419_v23, %v1430_v18  ;;  %v1431_v28 = vmul.f32 %v6414_v41, %v1281_v22  ;;  %v1283_v29 = vpop.f32.mrb[11].mxu0  ;;  %v5851_v22 = vld [vmem:[%s7936_s6 + $0x30] sm:$0xff]   ;;  %5221 = vmatprep.subr.bf16.mxu1 %v5850_v19 }
 0x135   : > { %v6524_v34 = vsel %vm2621_vm5, %v2583_v10, %v2584_v21 }
 0x136   : > { %7990 = vst [vmem:[#allocation4_spill] sm:$0xff] %v6524_v34  ;;  %v1515_v35 = vmax.f32 %v1475_v27, 0.0  ;;  %v1476_v36 = vadd.f32 %v6419_v23, %v1431_v28  ;;  %v6529_v38 = vsel %vm2520_vm4, %v2482_v9, %v2483_v26 }
 0x137   : > { %5222 = vmatpush3.bf16.msra.mxu1 %v5851_v22 }
 0x138   : > { %v2444_v42 = vsel %vm2404_vm7, 0.0, %v1515_v35  ;;  %v2484_v43 = vrot.slane %v1515_v35, 6  ;;  %v1516_v45 = vmax.f32 %v1476_v36, 0.0 }
 0x139   : > { %v2585_v47 = vrot.slane %v2444_v42, 2  ;;  %v1286_v48 = vpop.f32.mrb[12].mxu0 }
 0x13a   : > { %v2485_v50 = vrot.slane %v1516_v45, 6  ;;  %v2586_v52 = vrot.slane %v1516_v45, 2  ;;  %v6540_v53 = vpack.c.bf16 %v1516_v45, %v1515_v35  ;;  %v1432_v54 = vmul.f32 %v6414_v41, %v1286_v48  ;;  %v1288_v55 = vpop.f32.mrb[13].mxu0  ;;  %v5852_v48 = vld [vmem:[%s7936_s6 + $0x78] sm:$0xff]  }
 0x13b   : > { %v1289_v56 = vpop.f32.mrb[14].mxu0  ;;  %v2556_v58 = vsel %vm2520_vm4, %v2483_v26, %v2484_v43  ;;  %v6547_v59 = vsel %vm2621_vm5, %v2584_v21, %v2585_v47  ;;  %v1652_v21 = vand.u32 31, %v1560_v4  ;;  %5223 = vmatprep.subr.bf16.mxu1 %v5852_v48 }
 0x13c   : > { %7991 = vst [vmem:[#allocation5_spill] sm:$0xff] %v6547_v59  ;;  %v1477_v60 = vadd.f32 %v6419_v23, %v1432_v54  ;;  %v1433_v63 = vmul.f32 %v6414_v41, %v1289_v56  ;;  %v1291_v0 = vpop.f32.mrb[15].mxu0  ;;  %v2656_v2 = vsel %vm2621_vm5, %v2585_v47, %v2586_v52  ;;  %v2555_v3 = vsel %vm2520_vm4, %v2484_v43, %v2485_v50  ;;  %v5831_v47 = vld [vmem:[%s7936_s6 + $0x208] sm:$0xff]  }
 0x13d   : > { %v6562_v9 = vpack.c.bf16 %v2555_v3, %v2556_v58  ;;  %vm6595_vm9 = vcmp.lt.s32.totalorder %v1652_v21, 2  ;;  %v5854_v58 = vld [vmem:[%s7936_s6 + $0xc0] sm:$0xff]   ;;  %5224 = vmatpush3.bf16.msra.mxu1 %v5853_v49 }
 0x13e   : > { %v1517_v11 = vmax.f32 %v1477_v60, 0.0  ;;  %v1478_v13 = vadd.f32 %v6419_v23, %v1433_v63  ;;  %v1563_v60 = vadd.s32 88, %v6052_v6  ;;  %5321 = vmatprep.subr.bf16.mxu1 %v5854_v58 }
 0x140   : > { %v2486_v12 = vrot.slane %v1517_v11, 6  ;;  %v2587_v15 = vrot.slane %v1517_v11, 2  ;;  %v1518_v18 = vmax.f32 %v1478_v13, 0.0 }
 0x141   : > { %v1294_v16 = vpop.f32.mrb[16].mxu0 }
 0x142   : > { %v2367_v26 = vsel %vm2327_vm8, 0.0, %v1518_v18  ;;  %v2588_v27 = vrot.slane %v1518_v18, 2  ;;  %v1434_v28 = vmul.f32 %v6414_v41, %v1294_v16  ;;  %v1296_v29 = vpop.f32.mrb[17].mxu0  ;;  %v2655_v31 = vsel %vm2621_vm5, %v2586_v52, %v2587_v15 }
 0x143   : > { %v2487_v32 = vrot.slane %v2367_v26, 6  ;;  %v1297_v35 = vpop.f32.mrb[18].mxu0  ;;  %v6576_v36 = vpack.c.bf16 %v2655_v31, %v2656_v2  ;;  %v6578_v39 = vpack.c.bf16 %v1518_v18, %v1517_v11  ;;  %v2554_v52 = vsel %vm2520_vm4, %v2485_v50, %v2486_v12 }
 0x144   : > { %v1479_v42 = vadd.f32 %v6419_v23, %v1434_v28  ;;  %v1435_v43 = vmul.f32 %v6414_v41, %v1297_v35  ;;  %v1299_v45 = vpop.f32.mrb[19].mxu0  ;;  %v2654_v46 = vsel %vm2621_vm5, %v2587_v15, %v2588_v27  ;;  %v1673_v18 = vand.u32 31, %v1563_v60 }
 0x145   : > { %7992 = vst [vmem:[#allocation6_spill] sm:$0xff] %v6576_v36  ;;  %3632 = vmatprep.mubr.bf16.mxu0 %v6576_v36  ;;  %v2553_v55 = vsel %vm2520_vm4, %v2486_v12, %v2487_v32  ;;  %v1564_v31 = vadd.s32 96, %v6052_v6 }
 0x146   : > { %v1519_v56 = vmax.f32 %v1479_v42, 0.0  ;;  %v1480_v57 = vadd.f32 %v6419_v23, %v1435_v43  ;;  %3633 = vmatmul.mubr.bf16.vlgmr.msra.gmra.mrb[80].mxu0 %v6540_v53  ;;  %v6607_v50 = vpack.c.bf16 %v2553_v55, %v2554_v52  ;;  %vm2331_vm10 = vcmp.ge.s32.totalorder %v1673_v18, 30  ;;  %v5834_v52 = vld [vmem:[%s7936_s6 + $0x220] sm:$0xff]  }
 0x147   : > { %5682 = vmatpush3.bf16.msra.mxu0 %v6407_v33  ;;  %v1680_v49 = vand.u32 31, %v1564_v31 }
 0x148   : > { %v2448_v63 = vsel %vm6595_vm9, 0.0, %v1519_v56  ;;  %v2488_v0 = vrot.slane %v1519_v56, 6  ;;  %v1520_v2 = vmax.f32 %v1480_v57, 0.0  ;;  %5683 = vmatprep.subr.bf16.mxu0 %v5831_v47 }
 0x149   : > { %v2589_v3 = vrot.slane %v2448_v63, 2  ;;  %v1302_v4 = vpop.f32.mrb[20].mxu0  ;;  %vm2412_vm11 = vcmp.lt.s32.totalorder %v1680_v49, 2 }
 0x14a   : > { %v2489_v7 = vrot.slane %v1520_v2, 6  ;;  %v2590_v11 = vrot.slane %v1520_v2, 2  ;;  %v1436_v13 = vmul.f32 %v6414_v41, %v1302_v4  ;;  %v1304_v12 = vpop.f32.mrb[21].mxu0  ;;  %v6617_v33 = vpack.c.bf16 %v1520_v2, %v1519_v56 }
 0x14b   : > { %v1305_v15 = vpop.f32.mrb[22].mxu0  ;;  %v2653_v19 = vsel %vm2621_vm5, %v2588_v27, %v2589_v3  ;;  %5684 = vmatpush3.bf16.msra.mxu0 %v5831_v47  ;;  %v2552_v16 = vsel %vm2520_vm4, %v2487_v32, %v2488_v0  ;;  %v5833_v27 = vld [vmem:[%s7936_s6 + $0x218] sm:$0xff]  }
 0x14c   : > { %v1481_v21 = vadd.f32 %v6419_v23, %v1436_v13  ;;  %v1437_v22 = vmul.f32 %v6414_v41, %v1305_v15  ;;  %v1307_v26 = vpop.f32.mrb[23].mxu0  ;;  %v6625_v28 = vpack.c.bf16 %v2653_v19, %v2654_v46  ;;  %v2652_v29 = vsel %vm2621_vm5, %v2589_v3, %v2590_v11  ;;  %5685 = vmatprep.subr.bf16.mxu0 %v5832_v5 }
 0x14d   : > { %v2551_v32 = vsel %vm2520_vm4, %v2488_v0, %v2489_v7 }
 0x14e   : > { %7995 = vst [vmem:[#allocation7_spill] sm:$0xff] %v6625_v28  ;;  %v1521_v35 = vmax.f32 %v1481_v21, 0.0  ;;  %v1482_v42 = vadd.f32 %v6419_v23, %v1437_v22  ;;  %3640 = vmatprep.mubr.bf16.mxu0 %v6625_v28  ;;  %v6637_v43 = vpack.c.bf16 %v2551_v32, %v2552_v16  ;;  %v1567_v16 = vadd.s32 120, %v6052_v6 }
 0x14f   : > { %3641 = vmatmul.mubr.bf16.gmra.mrb[84].mxu0 %v6578_v39 }
 0x150   : > { %v2490_v45 = vrot.slane %v1521_v35, 6  ;;  %v2591_v46 = vrot.slane %v1521_v35, 2  ;;  %v1522_v47 = vmax.f32 %v1482_v42, 0.0  ;;  %5686 = vmatpush3.bf16.msra.mxu0 %v5832_v5 }
 0x151   : > { %v1310_v48 = vpop.f32.mrb[24].mxu0  ;;  %5687 = vmatprep.subr.bf16.mxu0 %v5833_v27 }
 0x152   : > { %v2371_v54 = vsel %vm2331_vm10, 0.0, %v1522_v47  ;;  %v2592_v55 = vrot.slane %v1522_v47, 2  ;;  %v1438_v56 = vmul.f32 %v6414_v41, %v1310_v48  ;;  %v1312_v57 = vpop.f32.mrb[25].mxu0  ;;  %v2651_v58 = vsel %vm2621_vm5, %v2590_v11, %v2591_v46  ;;  %v5835_v11 = vld [vmem:[%s7936_s6 + $0x228] sm:$0xff]  }
 0x153   : > { %v2491_v60 = vrot.slane %v2371_v54, 6  ;;  %v1313_v63 = vpop.f32.mrb[26].mxu0  ;;  %v6646_v0 = vpack.c.bf16 %v2651_v58, %v2652_v29  ;;  %v6648_v2 = vpack.c.bf16 %v1522_v47, %v1521_v35  ;;  %v2550_v5 = vsel %vm2520_vm4, %v2489_v7, %v2490_v45 }
 0x154   : > { %v1483_v3 = vadd.f32 %v6419_v23, %v1438_v56  ;;  %v1439_v4 = vmul.f32 %v6414_v41, %v1313_v63  ;;  %v1315_v13 = vpop.f32.mrb[27].mxu0  ;;  %v2650_v12 = vsel %vm2621_vm5, %v2591_v46, %v2592_v55  ;;  %5688 = vmatpush3.bf16.msra.mxu0 %v5833_v27  ;;  %v5836_v27 = vld [vmem:[%s7936_s6 + $0x230] sm:$0xff]   ;;  %v1701_v48 = vand.u32 31, %v1567_v16 }
 0x155   : > { %7996 = vst [vmem:[#allocation8_spill] sm:$0xff] %v6646_v0  ;;  %3648 = vmatprep.mubr.bf16.mxu0 %v6646_v0  ;;  %5689 = vmatprep.subr.bf16.mxu0 %v5834_v52  ;;  %v2549_v7 = vsel %vm2520_vm4, %v2490_v45, %v2491_v60 }
 0x156   : > { %v1523_v15 = vmax.f32 %v1483_v3, 0.0  ;;  %v1484_v18 = vadd.f32 %v6419_v23, %v1439_v4  ;;  %v6663_v19 = vpack.c.bf16 %v2549_v7, %v2550_v5  ;;  %v1568_v5 = vadd.s32 128, %v6052_v6 }
 0x157   : > { %3649 = vmatmul.mubr.bf16.gmra.mrb[88].mxu0 %v6617_v33  ;;  %vm2335_vm12 = vcmp.ge.s32.totalorder %v1701_v48, 30 }
 0x158   : > { %v2452_v21 = vsel %vm2412_vm11, 0.0, %v1523_v15  ;;  %v2492_v22 = vrot.slane %v1523_v15, 6  ;;  %v1524_v26 = vmax.f32 %v1484_v18, 0.0  ;;  %5690 = vmatpush3.bf16.msra.mxu0 %v5834_v52  ;;  %v1708_v18 = vand.u32 31, %v1568_v5 }
 0x159   : > { %v2593_v29 = vrot.slane %v2452_v21, 2  ;;  %v1318_v31 = vpop.f32.mrb[28].mxu0  ;;  %5691 = vmatprep.subr.bf16.mxu0 %v5835_v11 }
 0x15a   : > { %v2493_v32 = vrot.slane %v1524_v26, 6  ;;  %v2594_v35 = vrot.slane %v1524_v26, 2  ;;  %v1440_v42 = vmul.f32 %v6414_v41, %v1318_v31  ;;  %v1320_v45 = vpop.f32.mrb[29].mxu0  ;;  %v6671_v46 = vpack.c.bf16 %v1524_v26, %v1523_v15 }
 0x15b   : > { %v1321_v47 = vpop.f32.mrb[30].mxu0  ;;  %v2649_v49 = vsel %vm2621_vm5, %v2592_v55, %v2593_v29  ;;  %v2548_v52 = vsel %vm2520_vm4, %v2491_v60, %v2492_v22  ;;  %v5837_v55 = vld [vmem:[%s7936_s6 + $0x238] sm:$0xff]   ;;  %vm2416_vm13 = vcmp.lt.s32.totalorder %v1708_v18, 2 }
 0x15c   : > { %v1485_v54 = vadd.f32 %v6419_v23, %v1440_v42  ;;  %v1441_v56 = vmul.f32 %v6414_v41, %v1321_v47  ;;  %v1323_v57 = vpop.f32.mrb[31].mxu0  ;;  %v6679_v58 = vpack.c.bf16 %v2649_v49, %v2650_v12  ;;  %v2648_v63 = vsel %vm2621_vm5, %v2593_v29, %v2594_v35  ;;  %5692 = vmatpush3.bf16.msra.mxu0 %v5835_v11 }
 0x15d   : > { %5693 = vmatprep.subr.bf16.mxu0 %v5836_v27  ;;  %v2547_v60 = vsel %vm2520_vm4, %v2492_v22, %v2493_v32 }
 0x15e   : > { %7997 = vst [vmem:[#allocation9_spill] sm:$0xff] %v6679_v58  ;;  %v1525_v3 = vmax.f32 %v1485_v54, 0.0  ;;  %v1486_v4 = vadd.f32 %v6419_v23, %v1441_v56  ;;  %3656 = vmatprep.mubr.bf16.mxu0 %v6679_v58  ;;  %v6691_v13 = vpack.c.bf16 %v2547_v60, %v2548_v52 }
 0x15f   : > { %3657 = vmatmul.mubr.bf16.gmra.mrb[92].mxu0 %v6648_v2 }
 0x160   : > { %v2494_v12 = vrot.slane %v1525_v3, 6  ;;  %v2595_v11 = vrot.slane %v1525_v3, 2  ;;  %v1526_v7 = vmax.f32 %v1486_v4, 0.0  ;;  %5694 = vmatpush3.bf16.msra.mxu0 %v5836_v27 }
 0x161   : > { %v1326_v15 = vpop.f32.mrb[32].mxu0  ;;  %5695 = vmatprep.subr.bf16.mxu0 %v5837_v55 }
 0x162   : > { %v2375_v16 = vsel %vm2335_vm12, 0.0, %v1526_v7  ;;  %v2596_v21 = vrot.slane %v1526_v7, 2  ;;  %v1442_v22 = vmul.f32 %v6414_v41, %v1326_v15  ;;  %v1328_v26 = vpop.f32.mrb[33].mxu0  ;;  %v2647_v29 = vsel %vm2621_vm5, %v2594_v35, %v2595_v11 }
 0x163   : > { %v2495_v31 = vrot.slane %v2375_v16, 6  ;;  %v1329_v42 = vpop.f32.mrb[34].mxu0  ;;  %v6697_v45 = vpack.c.bf16 %v2647_v29, %v2648_v63  ;;  %v6699_v47 = vpack.c.bf16 %v1526_v7, %v1525_v3  ;;  %v2546_v27 = vsel %vm2520_vm4, %v2493_v32, %v2494_v12 }
 0x164   : > { %v1487_v48 = vadd.f32 %v6419_v23, %v1442_v22  ;;  %v1443_v49 = vmul.f32 %v6414_v41, %v1329_v42  ;;  %v1331_v52 = vpop.f32.mrb[35].mxu0  ;;  %v2646_v54 = vsel %vm2621_vm5, %v2595_v11, %v2596_v21  ;;  %5696 = vmatpush3.bf16.msra.mxu0 %v5837_v55  ;;  %v1571_v32 = vadd.s32 152, %v6052_v6 }
 0x165   : > { %7998 = vst [vmem:[#allocation10_spill] sm:$0xff] %v6697_v45  ;;  %3664 = vmatprep.mubr.bf16.mxu0 %v6697_v45  ;;  %v2545_v35 = vsel %vm2520_vm4, %v2494_v12, %v2495_v31 }
 0x166   : > { %v1527_v56 = vmax.f32 %v1487_v48, 0.0  ;;  %v1488_v57 = vadd.f32 %v6419_v23, %v1443_v49  ;;  %v6711_v63 = vpack.c.bf16 %v2545_v35, %v2546_v27  ;;  %v1729_v22 = vand.u32 31, %v1571_v32 }
 0x167   : > { %3665 = vmatmul.mubr.bf16.gmra.mrb[96].mxu0 %v6671_v46  ;;  %v1572_v35 = vadd.s32 160, %v6052_v6 }
 0x168   : > { %v2456_v5 = vsel %vm2416_vm13, 0.0, %v1527_v56  ;;  %v2496_v60 = vrot.slane %v1527_v56, 6  ;;  %v1528_v3 = vmax.f32 %v1488_v57, 0.0  ;;  %vm2339_vm14 = vcmp.ge.s32.totalorder %v1729_v22, 30 }
 0x169   : > { %v2597_v4 = vrot.slane %v2456_v5, 2  ;;  %v1334_v55 = vpop.f32.mrb[36].mxu0 }
 0x16a   : > { %v2497_v11 = vrot.slane %v1528_v3, 6  ;;  %v2598_v7 = vrot.slane %v1528_v3, 2  ;;  %v1444_v15 = vmul.f32 %v6414_v41, %v1334_v55  ;;  %v1336_v18 = vpop.f32.mrb[37].mxu0  ;;  %v6716_v12 = vpack.c.bf16 %v1528_v3, %v1527_v56 }
 0x16b   : > { %v1337_v16 = vpop.f32.mrb[38].mxu0  ;;  %v2645_v26 = vsel %vm2621_vm5, %v2596_v21, %v2597_v4  ;;  %v2544_v29 = vsel %vm2520_vm4, %v2495_v31, %v2496_v60 }
 0x16c   : > { %v1489_v42 = vadd.f32 %v6419_v23, %v1444_v15  ;;  %v1445_v27 = vmul.f32 %v6414_v41, %v1337_v16  ;;  %v1339_v48 = vpop.f32.mrb[39].mxu0  ;;  %v6724_v49 = vpack.c.bf16 %v2645_v26, %v2646_v54  ;;  %v2644_v52 = vsel %vm2621_vm5, %v2597_v4, %v2598_v7 }
 0x16d   : > { %v2543_v56 = vsel %vm2520_vm4, %v2496_v60, %v2497_v11  ;;  %v1736_v4 = vand.u32 31, %v1572_v35 }
 0x16e   : > { %7999 = vst [vmem:[#allocation11_spill] sm:$0xff] %v6724_v49  ;;  %v1529_v57 = vmax.f32 %v1489_v42, 0.0  ;;  %v1490_v21 = vadd.f32 %v6419_v23, %v1445_v27  ;;  %3672 = vmatprep.mubr.bf16.mxu0 %v6724_v49  ;;  %v6733_v31 = vpack.c.bf16 %v2543_v56, %v2544_v29 }
 0x16f   : > { %3673 = vmatmul.mubr.bf16.gmra.mrb[100].mxu0 %v6699_v47  ;;  %vm2420_vm15 = vcmp.lt.s32.totalorder %v1736_v4, 2 }
 0x170   : > { %v2498_v54 = vrot.slane %v1529_v57, 6  ;;  %v2599_v32 = vrot.slane %v1529_v57, 2  ;;  %v1530_v5 = vmax.f32 %v1490_v21, 0.0 }
 0x171   : > { %v1342_v3 = vpop.f32.mrb[40].mxu0 }
 0x172   : > { %v2379_v55 = vsel %vm2339_vm14, 0.0, %v1530_v5  ;;  %v2600_v15 = vrot.slane %v1530_v5, 2  ;;  %v1446_v18 = vmul.f32 %v6414_v41, %v1342_v3  ;;  %v1344_v60 = vpop.f32.mrb[41].mxu0  ;;  %v2643_v16 = vsel %vm2621_vm5, %v2598_v7, %v2599_v32 }
 0x173   : > { %v2499_v26 = vrot.slane %v2379_v55, 6  ;;  %v1345_v42 = vpop.f32.mrb[42].mxu0  ;;  %v6739_v29 = vpack.c.bf16 %v2643_v16, %v2644_v52  ;;  %v6741_v22 = vpack.c.bf16 %v1530_v5, %v1529_v57  ;;  %v2542_v27 = vsel %vm2520_vm4, %v2497_v11, %v2498_v54 }
 0x174   : > { %v1491_v48 = vadd.f32 %v6419_v23, %v1446_v18  ;;  %v1447_v35 = vmul.f32 %v6414_v41, %v1345_v42  ;;  %v1347_v56 = vpop.f32.mrb[43].mxu0  ;;  %v2642_v21 = vsel %vm2621_vm5, %v2599_v32, %v2600_v15  ;;  %v1575_v11 = vadd.s32 184, %v6052_v6 }
 0x175   : > { %8000 = vst [vmem:[#allocation12_spill] sm:$0xff] %v6739_v29  ;;  %3680 = vmatprep.mubr.bf16.mxu0 %v6739_v29  ;;  %v2541_v7 = vsel %vm2520_vm4, %v2498_v54, %v2499_v26 }
 0x176   : > { %v1531_v52 = vmax.f32 %v1491_v48, 0.0  ;;  %v1492_v57 = vadd.f32 %v6419_v23, %v1447_v35  ;;  %v6753_v5 = vpack.c.bf16 %v2541_v7, %v2542_v27  ;;  %v1757_v35 = vand.u32 31, %v1575_v11 }
 0x177   : > { %3681 = vmatmul.mubr.bf16.gmra.mrb[104].mxu0 %v6716_v12 }
 0x178   : > { %v2460_v3 = vsel %vm2420_vm15, 0.0, %v1531_v52  ;;  %v2500_v55 = vrot.slane %v1531_v52, 6  ;;  %v1532_v18 = vmax.f32 %v1492_v57, 0.0  ;;  %vm2343_vm0 = vcmp.ge.s32.totalorder %v1757_v35, 30 }
 0x179   : > { %v2601_v60 = vrot.slane %v2460_v3, 2  ;;  %v1350_v32 = vpop.f32.mrb[44].mxu0 }
 0x17a   : > { %v2501_v4 = vrot.slane %v1532_v18, 6  ;;  %v2602_v16 = vrot.slane %v1532_v18, 2  ;;  %v1448_v42 = vmul.f32 %v6414_v41, %v1350_v32  ;;  %v1352_v56 = vpop.f32.mrb[45].mxu0  ;;  %v6758_v54 = vpack.c.bf16 %v1532_v18, %v1531_v52 }
 0x17b   : > { %v1353_v48 = vpop.f32.mrb[46].mxu0  ;;  %v2641_v27 = vsel %vm2621_vm5, %v2600_v15, %v2601_v60  ;;  %v2540_v7 = vsel %vm2520_vm4, %v2499_v26, %v2500_v55  ;;  %v1576_v52 = vadd.s32 192, %v6052_v6 }
 0x17c   : > { %v1493_v10 = vadd.f32 %v6419_v23, %v1448_v42  ;;  %v1449_v57 = vmul.f32 %v6414_v41, %v1353_v48  ;;  %v1355_v3 = vpop.f32.mrb[47].mxu0  ;;  %v6766_v25 = vpack.c.bf16 %v2641_v27, %v2642_v21  ;;  %v2640_v32 = vsel %vm2621_vm5, %v2601_v60, %v2602_v16 }
 0x17d   : > { %v2539_v11 = vsel %vm2520_vm4, %v2500_v55, %v2501_v4  ;;  %v1764_v48 = vand.u32 31, %v1576_v52 }
 0x17e   : > { %8001 = vst [vmem:[#allocation13_spill] sm:$0xff] %v6766_v25  ;;  %v1533_v18 = vmax.f32 %v1493_v10, 0.0  ;;  %v1494_v15 = vadd.f32 %v6419_v23, %v1449_v57  ;;  %3688 = vmatprep.mubr.bf16.mxu0 %v6766_v25  ;;  %v6775_v26 = vpack.c.bf16 %v2539_v11, %v2540_v7 }
 0x17f   : > { %3689 = vmatmul.mubr.bf16.gmra.mrb[108].mxu0 %v6741_v22  ;;  %vm2424_vm1 = vcmp.lt.s32.totalorder %v1764_v48, 2 }
 0x180   : > { %v2502_v21 = vrot.slane %v1533_v18, 6  ;;  %v2603_v42 = vrot.slane %v1533_v18, 2  ;;  %v1534_v56 = vmax.f32 %v1494_v15, 0.0  ;;  %5697 = vmatprep.mubr.bf16.mxu0 %v6646_v0 }
 0x181   : > { %v1358_v60 = vpop.f32.mrb[48].mxu0 }
 0x182   : > { %v2383_v27 = vsel %vm2343_vm0, 0.0, %v1534_v56  ;;  %v2604_v3 = vrot.slane %v1534_v56, 2  ;;  %v1450_v10 = vmul.f32 %v6414_v41, %v1358_v60  ;;  %v1360_v55 = vpop.f32.mrb[49].mxu0  ;;  %v2639_v57 = vsel %vm2621_vm5, %v2602_v16, %v2603_v42 }
 0x183   : > { %v2503_v7 = vrot.slane %v2383_v27, 6  ;;  %v1361_v11 = vpop.f32.mrb[50].mxu0  ;;  %v6782_v35 = vpack.c.bf16 %v2639_v57, %v2640_v32  ;;  %v6784_v40 = vpack.c.bf16 %v1534_v56, %v1533_v18  ;;  %v2538_v15 = vsel %vm2520_vm4, %v2501_v4, %v2502_v21 }
 0x184   : > { %v1495_v1 = vadd.f32 %v6419_v23, %v1450_v10  ;;  %v1451_v52 = vmul.f32 %v6414_v41, %v1361_v11  ;;  %v1363_v51 = vpop.f32.mrb[51].mxu0  ;;  %v2638_v60 = vsel %vm2621_vm5, %v2603_v42, %v2604_v3  ;;  %v1579_v4 = vadd.s32 216, %v6052_v6 }
 0x185   : > { %8002 = vst [vmem:[#allocation14_spill] sm:$0xff] %v6782_v35  ;;  %v2537_v16 = vsel %vm2520_vm4, %v2502_v21, %v2503_v7 }
 0x186   : > { %v1535_v27 = vmax.f32 %v1495_v1, 0.0  ;;  %v1496_v32 = vadd.f32 %v6419_v23, %v1451_v52  ;;  %v6795_v18 = vpack.c.bf16 %v2537_v16, %v2538_v15  ;;  %v1785_v52 = vand.u32 31, %v1579_v4 }
 0x187   : > { %5698 = vmatmul.mubr.bf16.vlgmr.msra.gmra.mrb[112].mxu0 %v6679_v58 }
 0x188   : > { %v2464_v56 = vsel %vm2424_vm1, 0.0, %v1535_v27  ;;  %v2504_v10 = vrot.slane %v1535_v27, 6  ;;  %v1536_v55 = vmax.f32 %v1496_v32, 0.0  ;;  %5701 = vmatprep.mubr.bf16.mxu0 %v6697_v45  ;;  %vm2347_vm2 = vcmp.ge.s32.totalorder %v1785_v52, 30 }
 0x189   : > { %v2605_v51 = vrot.slane %v2464_v56, 2  ;;  %v1366_v42 = vpop.f32.mrb[52].mxu0 }
 0x18a   : > { %v2505_v48 = vrot.slane %v1536_v55, 6  ;;  %v2606_v57 = vrot.slane %v1536_v55, 2  ;;  %v1452_v21 = vmul.f32 %v6414_v41, %v1366_v42  ;;  %v1368_v1 = vpop.f32.mrb[53].mxu0  ;;  %v6801_v11 = vpack.c.bf16 %v1536_v55, %v1535_v27 }
 0x18b   : > { %v1369_v15 = vpop.f32.mrb[54].mxu0  ;;  %v2637_v16 = vsel %vm2621_vm5, %v2604_v3, %v2605_v51  ;;  %v2536_v8 = vsel %vm2520_vm4, %v2503_v7, %v2504_v10  ;;  %v1580_v27 = vadd.s32 224, %v6052_v6 }
 0x18c   : > { %v1497_v32 = vadd.f32 %v6419_v23, %v1452_v21  ;;  %v1453_v56 = vmul.f32 %v6414_v41, %v1369_v15  ;;  %v1371_v30 = vpop.f32.mrb[55].mxu0  ;;  %v6809_v45 = vpack.c.bf16 %v2637_v16, %v2638_v60  ;;  %v2636_v42 = vsel %vm2621_vm5, %v2605_v51, %v2606_v57 }
 0x18d   : > { %v2535_v4 = vsel %vm2520_vm4, %v2504_v10, %v2505_v48  ;;  %v1792_v51 = vand.u32 31, %v1580_v27 }
 0x18e   : > { %8003 = vst [vmem:[#allocation15_spill] sm:$0xff] %v6809_v45  ;;  %v1537_v55 = vmax.f32 %v1497_v32, 0.0  ;;  %v1498_v3 = vadd.f32 %v6419_v23, %v1453_v56  ;;  %v6817_v1 = vpack.c.bf16 %v2535_v4, %v2536_v8 }
 0x18f   : > { %5702 = vmatmul.mubr.bf16.gmra.mrb[116].mxu0 %v6724_v49  ;;  %vm2428_vm6 = vcmp.lt.s32.totalorder %v1792_v51, 2 }
 0x190   : > { %v2506_v7 = vrot.slane %v1537_v55, 6  ;;  %v2607_v30 = vrot.slane %v1537_v55, 2  ;;  %v1538_v60 = vmax.f32 %v1498_v3, 0.0  ;;  %5705 = vmatprep.mubr.bf16.mxu0 %v6739_v29 }
 0x191   : > { %v1374_v21 = vpop.f32.mrb[56].mxu0 }
 0x192   : > { %v2387_v15 = vsel %vm2347_vm2, 0.0, %v1538_v60  ;;  %v2608_v16 = vrot.slane %v1538_v60, 2  ;;  %v1454_v58 = vmul.f32 %v6414_v41, %v1374_v21  ;;  %v1376_v10 = vpop.f32.mrb[57].mxu0  ;;  %v2635_v32 = vsel %vm2621_vm5, %v2606_v57, %v2607_v30 }
 0x193   : > { %v2507_v8 = vrot.slane %v2387_v15, 6  ;;  %v1377_v56 = vpop.f32.mrb[58].mxu0  ;;  %v6824_v52 = vpack.c.bf16 %v2635_v32, %v2636_v42  ;;  %v6826_v4 = vpack.c.bf16 %v1538_v60, %v1537_v55  ;;  %v2534_v3 = vsel %vm2520_vm4, %v2505_v48, %v2506_v7 }
 0x194   : > { %v1499_v29 = vadd.f32 %v6419_v23, %v1454_v58  ;;  %v1455_v27 = vmul.f32 %v6414_v41, %v1377_v56  ;;  %v1379_v49 = vpop.f32.mrb[59].mxu0  ;;  %v2634_v21 = vsel %vm2621_vm5, %v2607_v30, %v2608_v16  ;;  %v1583_v48 = vadd.s32 248, %v6052_v6 }
 0x195   : > { %8004 = vst [vmem:[#allocation16_spill] sm:$0xff] %v6824_v52  ;;  %v2533_v57 = vsel %vm2520_vm4, %v2506_v7, %v2507_v8 }
 0x196   : > { %v1539_v15 = vmax.f32 %v1499_v29, 0.0  ;;  %v1500_v42 = vadd.f32 %v6419_v23, %v1455_v27  ;;  %v6837_v55 = vpack.c.bf16 %v2533_v57, %v2534_v3  ;;  %v1813_v27 = vand.u32 31, %v1583_v48 }
 0x197   : > { %5706 = vmatmul.mubr.bf16.gmra.mrb[120].mxu0 %v6766_v25 }
 0x198   : > { %v2468_v58 = vsel %vm2428_vm6, 0.0, %v1539_v15  ;;  %v2508_v60 = vrot.slane %v1539_v15, 6  ;;  %v1540_v10 = vmax.f32 %v1500_v42, 0.0  ;;  %5709 = vmatprep.mubr.bf16.mxu0 %v6782_v35  ;;  %vm2351_vm7 = vcmp.ge.s32.totalorder %v1813_v27, 30 }
 0x199   : > { %v2609_v49 = vrot.slane %v2468_v58, 2  ;;  %v1382_v30 = vpop.f32.mrb[60].mxu0 }
 0x19a   : > { %v2509_v51 = vrot.slane %v1540_v10, 6  ;;  %v2610_v32 = vrot.slane %v1540_v10, 2  ;;  %v1456_v7 = vmul.f32 %v6414_v41, %v1382_v30  ;;  %v1384_v29 = vpop.f32.mrb[61].mxu0  ;;  %v6843_v56 = vpack.c.bf16 %v1540_v10, %v1539_v15 }
 0x19b   : > { %v1385_v3 = vpop.f32.mrb[62].mxu0  ;;  %v2633_v57 = vsel %vm2621_vm5, %v2608_v16, %v2609_v49  ;;  %v2532_v25 = vsel %vm2520_vm4, %v2507_v8, %v2508_v60  ;;  %v1584_v15 = vadd.s32 256, %v6052_v6 }
 0x19c   : > { %v1501_v42 = vadd.f32 %v6419_v23, %v1456_v7  ;;  %v1457_v58 = vmul.f32 %v6414_v41, %v1385_v3  ;;  %v1387_v35 = vpop.f32.mrb[63].mxu0  ;;  %v6851_v0 = vpack.c.bf16 %v2633_v57, %v2634_v21  ;;  %v2632_v30 = vsel %vm2621_vm5, %v2609_v49, %v2610_v32 }
 0x19d   : > { %v2531_v48 = vsel %vm2520_vm4, %v2508_v60, %v2509_v51  ;;  %v1820_v49 = vand.u32 31, %v1584_v15 }
 0x19e   : > { %8005 = vst [vmem:[#allocation17_spill] sm:$0xff] %v6851_v0  ;;  %v1541_v10 = vmax.f32 %v1501_v42, 0.0  ;;  %v1502_v16 = vadd.f32 %v6419_v23, %v1457_v58  ;;  %v6859_v29 = vpack.c.bf16 %v2531_v48, %v2532_v25 }
 0x19f   : > { %5710 = vmatmul.mubr.bf16.gmra.mrb[124].mxu0 %v6809_v45  ;;  %vm2432_vm8 = vcmp.lt.s32.totalorder %v1820_v49, 2 }
 0x1a0   : > { %8006 = vst [vmem:[#allocation18_spill] sm:$0xff] %v6859_v29  ;;  %v2510_v8 = vrot.slane %v1541_v10, 6  ;;  %v2611_v35 = vrot.slane %v1541_v10, 2  ;;  %v1542_v21 = vmax.f32 %v1502_v16, 0.0  ;;  %5713 = vmatprep.mubr.bf16.mxu0 %v6824_v52 }
 0x1a1   : > { %v1390_v7 = vpop.f32.mrb[64].mxu0 }
 0x1a2   : > { %v2391_v3 = vsel %vm2351_vm7, 0.0, %v1542_v21  ;;  %v2612_v57 = vrot.slane %v1542_v21, 2  ;;  %v1458_v28 = vmul.f32 %v6414_v41, %v1390_v7  ;;  %v1392_v60 = vpop.f32.mrb[65].mxu0  ;;  %v2631_v42 = vsel %vm2621_vm5, %v2610_v32, %v2611_v35 }
 0x1a3   : > { %v2511_v25 = vrot.slane %v2391_v3, 6  ;;  %v1393_v58 = vpop.f32.mrb[66].mxu0  ;;  %v6866_v27 = vpack.c.bf16 %v2631_v42, %v2632_v30  ;;  %v6868_v48 = vpack.c.bf16 %v1542_v21, %v1541_v10  ;;  %v2530_v16 = vsel %vm2520_vm4, %v2509_v51, %v2510_v8 }
 0x1a4   : > { %v1503_v52 = vadd.f32 %v6419_v23, %v1458_v28  ;;  %v1459_v15 = vmul.f32 %v6414_v41, %v1393_v58  ;;  %v1395_v45 = vpop.f32.mrb[67].mxu0  ;;  %v2630_v7 = vsel %vm2621_vm5, %v2611_v35, %v2612_v57  ;;  %v1587_v28 = vadd.s32 280, %v6052_v6 }
 0x1a5   : > { %8007 = vst [vmem:[#allocation19_spill] sm:$0xff] %v6866_v27  ;;  %v2529_v32 = vsel %vm2520_vm4, %v2510_v8, %v2511_v25 }
 0x1a6   : > { %v1543_v30 = vmax.f32 %v1503_v52, 0.0  ;;  %v1504_v10 = vadd.f32 %v6419_v23, %v1459_v15  ;;  %v6879_v21 = vpack.c.bf16 %v2529_v32, %v2530_v16  ;;  %v6888_v23 = vld [vmem:[%s7935_s5] ss:$0 sm:$0xff]  ;;  %v1841_v16 = vand.u32 31, %v1587_v28 }
 0x1a7   : > { %5714 = vmatmul.mubr.bf16.gmra.mrb[128].mxu0 %v6851_v0  ;;  %v1588_v28 = vadd.s32 288, %v6052_v6 }
 0x1a8   : > { %8008 = vst [vmem:[#allocation20_spill] sm:$0xff] %v6879_v21  ;;  %v2472_v51 = vsel %vm2432_vm8, 0.0, %v1543_v30  ;;  %v2512_v41 = vrot.slane %v1543_v30, 6  ;;  %v1544_v3 = vmax.f32 %v1504_v10, 0.0  ;;  %5717 = vmatprep.mubr.bf16.mxu0 %v6866_v27  ;;  %v6900_v10 = vld [vmem:[%s7935_s5 + $0x1] ss:$0 sm:$0xff] }
 0x1a9   : > { %v2613_v45 = vrot.slane %v2472_v51, 2  ;;  %v1398_v35 = vpop.f32.mrb[68].mxu0  ;;  %vm2355_vm9 = vcmp.ge.s32.totalorder %v1841_v16, 30 }
 0x1aa   : > { %v2513_v49 = vrot.slane %v1544_v3, 6  ;;  %v2614_v60 = vrot.slane %v1544_v3, 2  ;;  %v1460_v52 = vmul.f32 %v6888_v23, %v1398_v35  ;;  %v1400_v8 = vpop.f32.mrb[69].mxu0  ;;  %v2528_v42 = vsel %vm2520_vm4, %v2511_v25, %v2512_v41 }
 0x1ab   : > { %v1401_v58 = vpop.f32.mrb[70].mxu0  ;;  %v2629_v15 = vsel %vm2621_vm5, %v2612_v57, %v2613_v45  ;;  %v6895_v32 = vpack.c.bf16 %v1544_v3, %v1543_v30 }
 0x1ac   : > { %v1505_v51 = vadd.f32 %v6900_v10, %v1460_v52  ;;  %v1461_v35 = vmul.f32 %v6888_v23, %v1401_v58  ;;  %v1403_v8 = vpop.f32.mrb[71].mxu0  ;;  %v6904_v27 = vpack.c.bf16 %v2629_v15, %v2630_v7  ;;  %v2628_v25 = vsel %vm2621_vm5, %v2613_v45, %v2614_v60 }
 0x1ad   : > { %8009 = vst [vmem:[#allocation21_spill] sm:$0xff] %v6895_v32  ;;  %v2527_v57 = vsel %vm2520_vm4, %v2512_v41, %v2513_v49  ;;  %v1848_v45 = vand.u32 31, %v1588_v28  ;;  %v2198_v8 = vstv %s2197_s25 }
 0x1ae   : > { %8010 = vst [vmem:[#allocation22_spill] sm:$0xff] %v6904_v27  ;;  %v1545_v30 = vmax.f32 %v1505_v51, 0.0  ;;  %v1506_v3 = vadd.f32 %v6900_v10, %v1461_v35  ;;  %v6914_v32 = vpack.c.bf16 %v2527_v57, %v2528_v42  ;;  %vm6930_vm10 = vcmp.eq.s32.totalorder %v2198_v8, 1 }
 0x1af   : > { %5718 = vmatmul.mubr.bf16.gmra.mrb[132].mxu0 %v6904_v27  ;;  %vm2436_vm11 = vcmp.lt.s32.totalorder %v1848_v45, 2 }
 0x1b0   : > { %8011 = vst [vmem:[#allocation23_spill] sm:$0xff] %v6914_v32  ;;  %v2514_v7 = vrot.slane %v1545_v30, 6  ;;  %v2615_v52 = vrot.slane %v1545_v30, 2  ;;  %v1546_v58 = vmax.f32 %v1506_v3, 0.0 }
 0x1b1   : > { %v1406_v15 = vpop.f32.mrb[72].mxu0 }
 0x1b2   : > { %v2395_v0 = vsel %vm2355_vm9, 0.0, %v1546_v58  ;;  %v2616_v36 = vrot.slane %v1546_v58, 2  ;;  %v1462_v34 = vmul.f32 %v6888_v23, %v1406_v15  ;;  %v1408_v59 = vpop.f32.mrb[73].mxu0  ;;  %v2627_v41 = vsel %vm2621_vm5, %v2614_v60, %v2615_v52 }
 0x1b3   : > { %v2515_v51 = vrot.slane %v2395_v0, 6  ;;  %v1409_v42 = vpop.f32.mrb[74].mxu0  ;;  %v6920_v35 = vpack.c.bf16 %v2627_v41, %v2628_v25  ;;  %v2526_v16 = vsel %vm2520_vm4, %v2513_v49, %v2514_v7  ;;  %v6924_v57 = vpack.c.bf16 %v1546_v58, %v1545_v30 }
 0x1b4   : > { %v1507_v28 = vadd.f32 %v6900_v10, %v1462_v34  ;;  %v1463_v3 = vmul.f32 %v6888_v23, %v1409_v42  ;;  %v1411_v27 = vpop.f32.mrb[75].mxu0  ;;  %v2626_v59 = vsel %vm2621_vm5, %v2615_v52, %v2616_v36  ;;  %v8014_v15 = vmov 0 }
 0x1b5   : > { %8012 = vst [vmem:[#allocation24_spill] sm:$0xff] %v6920_v35  ;;  %8013 = vst [vmem:[#allocation25_spill] sm:$0xff] %v6924_v57  ;;  %v8015_v15 = vsel %vm6930_vm10, 4294967295, %v8014_v15  ;;  %5721 = vmatprep.mubr.bf16.mxu0 %v6920_v35  ;;  %v2525_v0 = vsel %vm2520_vm4, %v2514_v7, %v2515_v51  ;;  %v1591_v30 = vadd.s32 312, %v6052_v6  ;;  %v5857_v6 = vld [vmem:[%s7936_s6 + $0x88] sm:$0xff]  }
 0x1b6   : > { %8016 = vst [vmem:[#allocation26_spill] sm:$0xff] %v8015_v15  ;;  %v1547_v49 = vmax.f32 %v1507_v28, 0.0  ;;  %v1508_v60 = vadd.f32 %v6900_v10, %v1463_v3  ;;  %v6938_v34 = vpack.c.bf16 %v2525_v0, %v2526_v16  ;;  %v8078_v15 = vld [vmem:[#allocation19_spill] sm:$0xff] }
 0x1b8   : > { %8017 = vst [vmem:[#allocation27_spill] sm:$0xff] %v6938_v34  ;;  %v2316_v27 = vsel %vm6930_vm10, 0.0, %v1547_v49  ;;  %v1548_v25 = vmax.f32 %v1508_v60, 0.0 }
 0x1b9   : > { %v2476_v52 = vsel %vm2436_vm11, 0.0, %v2316_v27  ;;  %v2516_v58 = vrot.slane %v2316_v27, 6  ;;  %v1414_v8 = vpop.f32.mrb[76].mxu0 }
 0x1ba   : > { %v2617_v41 = vrot.slane %v2476_v52, 2  ;;  %v2317_v42 = vsel %vm6930_vm10, 0.0, %v1548_v25  ;;  %v6945_v7 = vpack.c.bf16 %v1548_v25, %v1547_v49  ;;  %v1464_v45 = vmul.f32 %v6888_v23, %v1414_v8  ;;  %v1416_v28 = vpop.f32.mrb[77].mxu0 }
 0x1bb   : > { %v2517_v16 = vrot.slane %v2317_v42, 6  ;;  %v2618_v3 = vrot.slane %v2317_v42, 2  ;;  %v1417_v0 = vpop.f32.mrb[78].mxu0  ;;  %v6950_v60 = vsel %vm2520_vm4, %v2515_v51, %v2516_v58  ;;  %v1869_v52 = vand.u32 31, %v1591_v30 }
 0x1bc   : > { %8018 = vst [vmem:[#allocation28_spill] sm:$0xff] %v6945_v7  ;;  %8019 = vst [vmem:[#allocation29_spill] sm:$0xff] %v6950_v60  ;;  %v1509_v57 = vadd.f32 %v6900_v10, %v1464_v45  ;;  %v1465_v27 = vmul.f32 %v6888_v23, %v1417_v0  ;;  %v1419_v35 = vpop.f32.mrb[79].mxu0  ;;  %v2625_v49 = vsel %vm2621_vm5, %v2616_v36, %v2617_v41  ;;  %v8077_v60 = vld [vmem:[#allocation17_spill] sm:$0xff] }
 0x1bd   : > { %v6956_v25 = vpack.c.bf16 %v2625_v49, %v2626_v59  ;;  %v2624_v8 = vsel %vm2621_vm5, %v2617_v41, %v2618_v3  ;;  %v6962_v42 = vsel %vm2520_vm4, %v2516_v58, %v2517_v16  ;;  %vm2359_vm12 = vcmp.ge.s32.totalorder %v1869_v52, 30 }
 0x1be   : > { %8020 = vst [vmem:[#allocation30_spill] sm:$0xff] %v6962_v42  ;;  %v1549_v51 = vmax.f32 %v1509_v57, 0.0  ;;  %v1510_v28 = vadd.f32 %v6900_v10, %v1465_v27 }
 0x1bf   : > { %5722 = vmatmul.mubr.bf16.gmra.mrb[136].mxu0 %v6956_v25 }
 0x1c0   : > { %v2318_v36 = vsel %vm6930_vm10, 0.0, %v1549_v51  ;;  %v1550_v35 = vmax.f32 %v1510_v28, 0.0 }
 0x1c1   : > { %v2518_v59 = vrot.slane %v2318_v36, 6  ;;  %v2619_v30 = vrot.slane %v2318_v36, 2  ;;  %v8023_v36 = vrot.slane %v6434_v37, 6  ;;  %v5927_v37 = vld [vmem:[%s7936_s6 + $0x138] sm:$0xff]  }
 0x1c2   : > { %v2319_v41 = vsel %vm6930_vm10, 0.0, %v1550_v35  ;;  %v6972_v58 = vpack.c.bf16 %v1550_v35, %v1549_v51 }
 0x1c3   : > { %v2399_v57 = vsel %vm2359_vm12, 0.0, %v2319_v41  ;;  %v2620_v45 = vrot.slane %v2319_v41, 2  ;;  %v2623_v10 = vsel %vm2621_vm5, %v2618_v3, %v2619_v30  ;;  %v6978_v0 = vsel %vm2520_vm4, %v2517_v16, %v2518_v59  ;;  %v5855_v16 = vld [vmem:[%s7936_s6 + $0x80] sm:$0xff]   ;;  %v5861_v41 = vld [vmem:[%s7936_s6 + $0x98] sm:$0xff]  }
 0x1c4   : > { %8021 = vst [vmem:[#allocation31_spill] sm:$0xff] %v6972_v58  ;;  %8022 = vst [vmem:[#allocation32_spill] sm:$0xff] %v6978_v0  ;;  %v2519_v27 = vrot.slane %v2399_v57, 6  ;;  %v2680_v49 = vpack.c.bf16 %v2623_v10, %v2624_v8  ;;  %v5862_v57 = vld [vmem:[%s7936_s6 + $0xe0] sm:$0xff]   ;;  %v5867_v10 = vld [vmem:[%s7936_s6 + $0xb0] sm:$0xff]  }
 0x1c5   : > { %v2622_v52 = vsel %vm2621_vm5, %v2619_v30, %v2620_v45  ;;  %v2661_v28 = vsel %vm2621_vm5, %v2620_v45, %v6476_v62  ;;  %v5856_v62 = vld [vmem:[%s7936_s6 + $0xc8] sm:$0xff]   ;;  %v8025_v30 = vmov 0   ;;  %v5863_v45 = vld [vmem:[%s7936_s6 + $0xa0] sm:$0xff]  }
 0x1c6   : > { %5725 = vmatprep.mubr.bf16.mxu0 %v2680_v49  ;;  %v2681_v51 = vpack.c.bf16 %v2661_v28, %v2622_v52  ;;  %v2560_v3 = vsel %vm2520_vm4, %v2519_v27, %v8023_v36  ;;  %v6994_v8 = vsel %vm2520_vm4, %v2518_v59, %v2519_v27  ;;  %v5859_v59 = vld [vmem:[%s7936_s6 + $0x90] sm:$0xff]   ;;  %v5869_v27 = vld [vmem:[%s7936_s6 + $0xb8] sm:$0xff]   ;;  %v5912_v49 = vld [vmem:[%s7936_s6 + $0x140] sm:$0xff]  }
 0x1c7   : > { %8024 = vst [vmem:[#allocation33_spill] sm:$0xff] %v6994_v8  ;;  %v2561_v35 = vpack.c.bf16 %v6474_v61, %v2560_v3  ;;  %v5858_v61 = vld [vmem:[%s7936_s6 + $0xd0] sm:$0xff]  }
 0x1c8   : > { %5726 = vmatmul.mubr.bf16.gmra.mrb[140].mxu0 %v2681_v51 }
 0x1c9   : > { %3311 = vmatmul.mubr.bf16.vlgmr.msra.gmra.mrb[0].mxu1 %v2561_v35  ;;  %4345 = vmatprep.mubr.bf16.mxu0 %v8025_v30  ;;  %v8054_v30 = vld [vmem:[#allocation10_spill] sm:$0xff] }
 0x1ca   : > { %5322 = vmatpush3.bf16.msra.mxu1 %v5855_v16  ;;  %5106 = vmatprep.mubr.msk.bf16.mxu1 %vm6444_vm3, %v6499_v17  ;;  %v8026_v17 = vpack.c.bf16 %v6529_v38, %v6510_v24  ;;  %v5864_v24 = vld [vmem:[%s7936_s6 + $0xe8] sm:$0xff]   ;;  %vm5107_vm3 = vmneg %vm6930_vm10 }
 0x1cb   : > { %5323 = vmatprep.subr.bf16.mxu1 %v5856_v62  ;;  %v5865_v38 = vld [vmem:[%s7936_s6 + $0xa8] sm:$0xff]   ;;  %vm5109_vm4 = vmpackc.low %vm5107_vm3, %vm5107_vm3 }
 0x1ce   : > { %5324 = vmatpush3.bf16.msra.mxu1 %v5857_v6 }
 0x1cf   : > { %5325 = vmatprep.subr.bf16.mxu1 %v5858_v61 }
 0x1d1   : > { %3319 = vmatmul.mubr.bf16.gmra.mrb[4].mxu1 %v8026_v17 }
 0x1d2   : > { %3326 = vmatprep.mubr.bf16.mxu1 %v6540_v53  ;;  %5326 = vmatpush3.bf16.msra.mxu1 %v5859_v59  ;;  %v5866_v53 = vld [vmem:[%s7936_s6 + $0xf0] sm:$0xff]  }
 0x1d3   : > { %5327 = vmatprep.subr.bf16.mxu1 %v5860_v44 }
 0x1d6   : > { %5328 = vmatpush3.bf16.msra.mxu1 %v5861_v41 }
 0x1d7   : > { %5329 = vmatprep.subr.bf16.mxu1 %v5862_v57 }
 0x1d9   : > { %3327 = vmatmul.mubr.bf16.gmra.mrb[8].mxu1 %v6562_v9 }
 0x1da   : > { %3334 = vmatprep.mubr.bf16.mxu1 %v6578_v39  ;;  %5330 = vmatpush3.bf16.msra.mxu1 %v5863_v45  ;;  %v5868_v39 = vld [vmem:[%s7936_s6 + $0xf8] sm:$0xff]  }
 0x1db   : > { %5331 = vmatprep.subr.bf16.mxu1 %v5864_v24 }
 0x1de   : > { %5332 = vmatpush3.bf16.msra.mxu1 %v5865_v38 }
 0x1df   : > { %5333 = vmatprep.subr.bf16.mxu1 %v5866_v53 }
 0x1e1   : > { %3335 = vmatmul.mubr.bf16.gmra.mrb[12].mxu1 %v6607_v50 }
 0x1e2   : > { %3342 = vmatprep.mubr.bf16.mxu1 %v6617_v33  ;;  %5334 = vmatpush3.bf16.msra.mxu1 %v5867_v10 }
 0x1e3   : > { %5335 = vmatprep.subr.bf16.mxu1 %v5868_v39 }
 0x1e6   : > { %5336 = vmatpush3.bf16.msra.mxu1 %v5869_v27 }
 0x1e7   : > { %5729 = vmatprep.subr.bf16.mxu1 %v5912_v49 }
 0x1e9   : > { %3343 = vmatmul.mubr.bf16.gmra.mrb[16].mxu1 %v6637_v43 }
 0x1ea   : > { %3350 = vmatprep.mubr.bf16.mxu1 %v6648_v2 }
 0x1f1   : > { %3351 = vmatmul.mubr.bf16.gmra.mrb[20].mxu1 %v6663_v19 }
 0x1f2   : > { %3358 = vmatprep.mubr.bf16.mxu1 %v6671_v46 }
 0x1f9   : > { %3359 = vmatmul.mubr.bf16.gmra.mrb[24].mxu1 %v6691_v13 }
 0x1fa   : > { %3366 = vmatprep.mubr.bf16.mxu1 %v6699_v47 }
 0x201   : > { %3367 = vmatmul.mubr.bf16.gmra.mrb[28].mxu1 %v6711_v63 }
 0x202   : > { %3374 = vmatprep.mubr.bf16.mxu1 %v6716_v12 }
 0x209   : > { %3375 = vmatmul.mubr.bf16.gmra.mrb[32].mxu1 %v6733_v31 }
 0x20a   : > { %3382 = vmatprep.mubr.bf16.mxu1 %v6741_v22 }
 0x211   : > { %3383 = vmatmul.mubr.bf16.gmra.mrb[36].mxu1 %v6753_v5 }
 0x212   : > { %3390 = vmatprep.mubr.bf16.mxu1 %v6758_v54 }
 0x219   : > { %3391 = vmatmul.mubr.bf16.gmra.mrb[40].mxu1 %v6775_v26  ;;  %v5449_v52 = vpop.f32.mrb[80].mxu0 }
 0x21a   : > { %3398 = vmatprep.mubr.bf16.mxu1 %v6784_v40  ;;  %v5450_v28 = vpop.f32.mrb[81].mxu0 }
 0x21b   : > { %v7070_v51 = vadd.f32 %v5450_v28, %v5449_v52  ;;  %v5452_v36 = vpop.f32.mrb[82].mxu0 }
 0x21c   : > { %v5453_v3 = vpop.f32.mrb[83].mxu0 }
 0x21d   : > { %v7072_v16 = vadd.f32 %v5453_v3, %v5452_v36 }
 0x221   : > { %3399 = vmatmul.mubr.bf16.gmra.mrb[44].mxu1 %v6795_v18 }
 0x222   : > { %3406 = vmatprep.mubr.bf16.mxu1 %v6801_v11  ;;  %v5455_v35 = vpop.f32.mrb[84].mxu0 }
 0x223   : > { %v5456_v62 = vpop.f32.mrb[85].mxu0 }
 0x224   : > { %v7076_v6 = vadd.f32 %v5456_v62, %v5455_v35  ;;  %v5458_v61 = vpop.f32.mrb[86].mxu0 }
 0x225   : > { %v5459_v59 = vpop.f32.mrb[87].mxu0 }
 0x226   : > { %v7078_v44 = vadd.f32 %v5459_v59, %v5458_v61 }
 0x229   : > { %3407 = vmatmul.mubr.bf16.gmra.mrb[48].mxu1 %v6817_v1 }
 0x22a   : > { %3414 = vmatprep.mubr.bf16.mxu1 %v6826_v4  ;;  %v5461_v17 = vpop.f32.mrb[88].mxu0 }
 0x22b   : > { %v5462_v41 = vpop.f32.mrb[89].mxu0 }
 0x22c   : > { %v7082_v57 = vadd.f32 %v5462_v41, %v5461_v17  ;;  %v5464_v45 = vpop.f32.mrb[90].mxu0 }
 0x22d   : > { %v5465_v24 = vpop.f32.mrb[91].mxu0 }
 0x22e   : > { %v7084_v38 = vadd.f32 %v5465_v24, %v5464_v45 }
 0x231   : > { %3415 = vmatmul.mubr.bf16.gmra.mrb[52].mxu1 %v6837_v55 }
 0x232   : > { %3422 = vmatprep.mubr.bf16.mxu1 %v6843_v56  ;;  %v5467_v53 = vpop.f32.mrb[92].mxu0 }
 0x233   : > { %v5468_v10 = vpop.f32.mrb[93].mxu0 }
 0x234   : > { %v7088_v39 = vadd.f32 %v5468_v10, %v5467_v53  ;;  %v5470_v27 = vpop.f32.mrb[94].mxu0  ;;  %v8027_v10 = vpack.c.bf16 %v6504_v20, %v6495_v14  ;;  %v5915_v20 = vld [vmem:[%s7936_s6 + $0x108] sm:$0xff]  }
 0x235   : > { %v5471_v49 = vpop.f32.mrb[95].mxu0 }
 0x236   : > { %v7090_v52 = vadd.f32 %v5471_v49, %v5470_v27  ;;  %v5913_v27 = vld [vmem:[%s7936_s6 + $0x100] sm:$0xff]  }
 0x239   : > { %3423 = vmatmul.mubr.bf16.gmra.mrb[56].mxu1 %v6859_v29 }
 0x23a   : > { %3430 = vmatprep.mubr.bf16.mxu1 %v6868_v48  ;;  %v5473_v28 = vpop.f32.mrb[96].mxu0 }
 0x23b   : > { %v5474_v36 = vpop.f32.mrb[97].mxu0 }
 0x23c   : > { %v7094_v3 = vadd.f32 %v5474_v36, %v5473_v28  ;;  %v5476_v35 = vpop.f32.mrb[98].mxu0  ;;  %v5914_v28 = vld [vmem:[%s7936_s6 + $0x148] sm:$0xff]  }
 0x23d   : > { %v5477_v62 = vpop.f32.mrb[99].mxu0 }
 0x23e   : > { %v7096_v61 = vadd.f32 %v5477_v62, %v5476_v35 }
 0x241   : > { %3431 = vmatmul.mubr.bf16.gmra.mrb[60].mxu1 %v6879_v21 }
 0x242   : > { %3471 = vmatprep.mubr.bf16.mxu1 %v6562_v9  ;;  %v5479_v59 = vpop.f32.mrb[100].mxu0 }
 0x243   : > { %v5480_v17 = vpop.f32.mrb[101].mxu0 }
 0x244   : > { %v7100_v41 = vadd.f32 %v5480_v17, %v5479_v59  ;;  %v5482_v45 = vpop.f32.mrb[102].mxu0  ;;  %v8029_v59 = vld [vmem:[#allocation5_spill] sm:$0xff]  ;;  %v8030_v17 = vld [vmem:[#allocation4_spill] sm:$0xff] }
 0x245   : > { %v5483_v24 = vpop.f32.mrb[103].mxu0 }
 0x246   : > { %v7102_v53 = vadd.f32 %v5483_v24, %v5482_v45  ;;  %v8031_v45 = vpack.c.bf16 %v8029_v59, %v8030_v17  ;;  %v8034_v59 = vld [vmem:[#allocation6_spill] sm:$0xff] }
 0x249   : > { %3472 = vmatmul.mubr.bf16.vlgmr.msra.gmra.mrb[64].mxu1 %v8027_v10  ;;  %v5917_v10 = vld [vmem:[%s7936_s6 + $0x110] sm:$0xff]  }
 0x24a   : > { %5737 = vmatpush3.bf16.msra.mxu1 %v5913_v27  ;;  %3479 = vmatprep.mubr.bf16.mxu1 %v6607_v50  ;;  %v5485_v9 = vpop.f32.mrb[104].mxu0  ;;  %v5916_v50 = vld [vmem:[%s7936_s6 + $0x150] sm:$0xff]  }
 0x24b   : > { %v5486_v49 = vpop.f32.mrb[105].mxu0  ;;  %5730 = vmatprep.subr.bf16.mxu1 %v5914_v28 }
 0x24c   : > { %v7114_v36 = vadd.f32 %v5486_v49, %v5485_v9  ;;  %v5488_v35 = vpop.f32.mrb[106].mxu0  ;;  %v5918_v9 = vld [vmem:[%s7936_s6 + $0x158] sm:$0xff]  }
 0x24d   : > { %v5489_v62 = vpop.f32.mrb[107].mxu0 }
 0x24e   : > { %v7116_v14 = vadd.f32 %v5489_v62, %v5488_v35  ;;  %5738 = vmatpush3.bf16.msra.mxu1 %v5915_v20  ;;  %v5919_v20 = vld [vmem:[%s7936_s6 + $0x118] sm:$0xff]  }
 0x24f   : > { %5731 = vmatprep.subr.bf16.mxu1 %v5916_v50  ;;  %v5920_v50 = vld [vmem:[%s7936_s6 + $0x160] sm:$0xff]  }
 0x250   : > { %8028 = vst [vmem:[#allocation34_spill] sm:$0xff] %v7116_v14 }
 0x251   : > { %3480 = vmatmul.mubr.bf16.gmra.mrb[68].mxu1 %v8031_v45  ;;  %v5921_v45 = vld [vmem:[%s7936_s6 + $0x120] sm:$0xff]  }
 0x252   : > { %3487 = vmatprep.mubr.bf16.mxu1 %v6637_v43  ;;  %v5491_v24 = vpop.f32.mrb[108].mxu0  ;;  %5739 = vmatpush3.bf16.msra.mxu1 %v5917_v10  ;;  %v5922_v10 = vld [vmem:[%s7936_s6 + $0x168] sm:$0xff]  }
 0x253   : > { %v5492_v27 = vpop.f32.mrb[109].mxu0  ;;  %5732 = vmatprep.subr.bf16.mxu1 %v5918_v9 }
 0x254   : > { %v7134_v49 = vadd.f32 %v5492_v27, %v5491_v24  ;;  %v5494_v28 = vpop.f32.mrb[110].mxu0 }
 0x255   : > { %v5495_v35 = vpop.f32.mrb[111].mxu0 }
 0x256   : > { %8032 = vst [vmem:[#allocation5_spill] sm:$0xff] %v7134_v49  ;;  %v7136_v62 = vadd.f32 %v5495_v35, %v5494_v28  ;;  %5740 = vmatpush3.bf16.msra.mxu1 %v5919_v20  ;;  %v5923_v28 = vld [vmem:[%s7936_s6 + $0x128] sm:$0xff]   ;;  %v5924_v35 = vld [vmem:[%s7936_s6 + $0x170] sm:$0xff]  }
 0x257   : > { %5733 = vmatprep.subr.bf16.mxu1 %v5920_v50  ;;  %v8039_v20 = vld [vmem:[#allocation7_spill] sm:$0xff] }
 0x258   : > { %8033 = vst [vmem:[#allocation4_spill] sm:$0xff] %v7136_v62 }
 0x259   : > { %3488 = vmatmul.mubr.bf16.gmra.mrb[72].mxu1 %v8034_v59  ;;  %v5925_v59 = vld [vmem:[%s7936_s6 + $0x130] sm:$0xff]  }
 0x25a   : > { %3495 = vmatprep.mubr.bf16.mxu1 %v6663_v19  ;;  %v7146_v17 = vpop.f32.mrb[112].mxu0  ;;  %5741 = vmatpush3.bf16.msra.mxu1 %v5921_v45 }
 0x25b   : > { %8035 = vst [vmem:[#allocation6_spill] sm:$0xff] %v7146_v17  ;;  %v7151_v24 = vpop.f32.mrb[113].mxu0  ;;  %5734 = vmatprep.subr.bf16.mxu1 %v5922_v10  ;;  %v5926_v10 = vld [vmem:[%s7936_s6 + $0x178] sm:$0xff]  }
 0x25c   : > { %8036 = vst [vmem:[#allocation35_spill] sm:$0xff] %v7151_v24  ;;  %v7156_v27 = vpop.f32.mrb[114].mxu0 }
 0x25d   : > { %8037 = vst [vmem:[#allocation36_spill] sm:$0xff] %v7156_v27  ;;  %v7158_v9 = vpop.f32.mrb[115].mxu0 }
 0x25e   : > { %8038 = vst [vmem:[#allocation37_spill] sm:$0xff] %v7158_v9  ;;  %5742 = vmatpush3.bf16.msra.mxu1 %v5923_v28  ;;  %v5870_v28 = vld [vmem:[%s7936_s6 + $0x1c0] sm:$0xff]  }
 0x25f   : > { %5735 = vmatprep.subr.bf16.mxu1 %v5924_v35 }
 0x261   : > { %3496 = vmatmul.mubr.bf16.gmra.mrb[76].mxu1 %v8039_v20 }
 0x262   : > { %3503 = vmatprep.mubr.bf16.mxu1 %v6691_v13  ;;  %v7168_v50 = vpop.f32.mrb[116].mxu0  ;;  %5743 = vmatpush3.bf16.msra.mxu1 %v5925_v59  ;;  %v8044_v59 = vld [vmem:[#allocation8_spill] sm:$0xff] }
 0x263   : > { %8040 = vst [vmem:[#allocation7_spill] sm:$0xff] %v7168_v50  ;;  %v7173_v45 = vpop.f32.mrb[117].mxu0  ;;  %5736 = vmatprep.subr.bf16.mxu1 %v5926_v10 }
 0x264   : > { %8041 = vst [vmem:[#allocation38_spill] sm:$0xff] %v7173_v45  ;;  %v7181_v35 = vpop.f32.mrb[118].mxu0 }
 0x265   : > { %8042 = vst [vmem:[#allocation39_spill] sm:$0xff] %v7181_v35  ;;  %v7183_v20 = vpop.f32.mrb[119].mxu0  ;;  %v8049_v35 = vld [vmem:[#allocation9_spill] sm:$0xff] }
 0x266   : > { %8043 = vst [vmem:[#allocation40_spill] sm:$0xff] %v7183_v20  ;;  %5744 = vmatpush3.bf16.msra.mxu1 %v5927_v37 }
 0x267   : > { %5545 = vmatprep.subr.bf16.mxu1 %v5870_v28 }
 0x269   : > { %3504 = vmatmul.mubr.bf16.gmra.mrb[80].mxu1 %v8044_v59 }
 0x26a   : > { %3511 = vmatprep.mubr.bf16.mxu1 %v6711_v63  ;;  %v7190_v23 = vpop.f32.mrb[120].mxu0 }
 0x26b   : > { %8045 = vst [vmem:[#allocation8_spill] sm:$0xff] %v7190_v23  ;;  %v7192_v10 = vpop.f32.mrb[121].mxu0 }
 0x26c   : > { %8046 = vst [vmem:[#allocation41_spill] sm:$0xff] %v7192_v10  ;;  %v7194_v50 = vpop.f32.mrb[122].mxu0  ;;  %v8059_v10 = vld [vmem:[#allocation11_spill] sm:$0xff] }
 0x26d   : > { %8047 = vst [vmem:[#allocation42_spill] sm:$0xff] %v7194_v50  ;;  %v7196_v45 = vpop.f32.mrb[123].mxu0 }
 0x26e   : > { %8048 = vst [vmem:[#allocation43_spill] sm:$0xff] %v7196_v45 }
 0x271   : > { %3512 = vmatmul.mubr.bf16.gmra.mrb[84].mxu1 %v8049_v35 }
 0x272   : > { %3519 = vmatprep.mubr.bf16.mxu1 %v6733_v31  ;;  %v7200_v20 = vpop.f32.mrb[124].mxu0 }
 0x273   : > { %8050 = vst [vmem:[#allocation9_spill] sm:$0xff] %v7200_v20  ;;  %v7202_v37 = vpop.f32.mrb[125].mxu0 }
 0x274   : > { %8051 = vst [vmem:[#allocation44_spill] sm:$0xff] %v7202_v37  ;;  %v7204_v28 = vpop.f32.mrb[126].mxu0  ;;  %v8064_v37 = vld [vmem:[#allocation12_spill] sm:$0xff] }
 0x275   : > { %8052 = vst [vmem:[#allocation45_spill] sm:$0xff] %v7204_v28  ;;  %v7206_v59 = vpop.f32.mrb[127].mxu0 }
 0x276   : > { %8053 = vst [vmem:[#allocation46_spill] sm:$0xff] %v7206_v59 }
 0x279   : > { %3520 = vmatmul.mubr.bf16.gmra.mrb[88].mxu1 %v8054_v30 }
 0x27a   : > { %3527 = vmatprep.mubr.bf16.mxu1 %v6753_v5  ;;  %v7210_v23 = vpop.f32.mrb[128].mxu0 }
 0x27b   : > { %8055 = vst [vmem:[#allocation10_spill] sm:$0xff] %v7210_v23  ;;  %v7212_v50 = vpop.f32.mrb[129].mxu0  ;;  %v8065_v23 = vld [vmem:[#allocation13_spill] sm:$0xff] }
 0x27c   : > { %8056 = vst [vmem:[#allocation47_spill] sm:$0xff] %v7212_v50  ;;  %v7214_v45 = vpop.f32.mrb[130].mxu0 }
 0x27d   : > { %8057 = vst [vmem:[#allocation48_spill] sm:$0xff] %v7214_v45  ;;  %v7216_v35 = vpop.f32.mrb[131].mxu0 }
 0x27e   : > { %8058 = vst [vmem:[#allocation49_spill] sm:$0xff] %v7216_v35 }
 0x281   : > { %3528 = vmatmul.mubr.bf16.gmra.mrb[92].mxu1 %v8059_v10 }
 0x282   : > { %3535 = vmatprep.mubr.bf16.mxu1 %v6775_v26  ;;  %v7220_v20 = vpop.f32.mrb[132].mxu0 }
 0x283   : > { %8060 = vst [vmem:[#allocation11_spill] sm:$0xff] %v7220_v20  ;;  %v7222_v28 = vpop.f32.mrb[133].mxu0 }
 0x284   : > { %8061 = vst [vmem:[#allocation50_spill] sm:$0xff] %v7222_v28  ;;  %v7224_v59 = vpop.f32.mrb[134].mxu0  ;;  %v8070_v28 = vld [vmem:[#allocation14_spill] sm:$0xff] }
 0x285   : > { %8062 = vst [vmem:[#allocation51_spill] sm:$0xff] %v7224_v59  ;;  %v7226_v30 = vpop.f32.mrb[135].mxu0 }
 0x286   : > { %8063 = vst [vmem:[#allocation52_spill] sm:$0xff] %v7226_v30 }
 0x289   : > { %3536 = vmatmul.mubr.bf16.gmra.mrb[96].mxu1 %v8064_v37 }
 0x28a   : > { %3543 = vmatprep.mubr.bf16.mxu1 %v6795_v18 }
 0x291   : > { %3544 = vmatmul.mubr.bf16.gmra.mrb[100].mxu1 %v8065_v23 }
 0x292   : > { %3551 = vmatprep.mubr.bf16.mxu1 %v6817_v1  ;;  %v7232_v45 = vpop.f32.mrb[136].mxu0 }
 0x293   : > { %8066 = vst [vmem:[#allocation12_spill] sm:$0xff] %v7232_v45  ;;  %v7234_v10 = vpop.f32.mrb[137].mxu0 }
 0x294   : > { %8067 = vst [vmem:[#allocation13_spill] sm:$0xff] %v7234_v10  ;;  %v7236_v35 = vpop.f32.mrb[138].mxu0 }
 0x295   : > { %8068 = vst [vmem:[#allocation53_spill] sm:$0xff] %v7236_v35  ;;  %v7238_v20 = vpop.f32.mrb[139].mxu0 }
 0x296   : > { %8069 = vst [vmem:[#allocation54_spill] sm:$0xff] %v7238_v20  ;;  %v8075_v20 = vld [vmem:[#allocation15_spill] sm:$0xff] }
 0x299   : > { %3552 = vmatmul.mubr.bf16.gmra.mrb[104].mxu1 %v8070_v28 }
 0x29a   : > { %3559 = vmatprep.mubr.bf16.mxu1 %v6837_v55 }
 0x29b   : > { %v7242_v59 = vpop.f32.mrb[140].mxu0 }
 0x29c   : > { %8071 = vst [vmem:[#allocation14_spill] sm:$0xff] %v7242_v59  ;;  %v5225_v37 = vpop.f32.mrb[0].mxu1  ;;  %v7244_v30 = vpop.f32.mrb[141].mxu0 }
 0x29d   : > { %8072 = vst [vmem:[#allocation55_spill] sm:$0xff] %v7244_v30  ;;  %v5226_v23 = vpop.f32.mrb[1].mxu1  ;;  %v7246_v50 = vpop.f32.mrb[142].mxu0 }
 0x29e   : > { %8073 = vst [vmem:[#allocation56_spill] sm:$0xff] %v7246_v50  ;;  %v7248_v27 = vadd.f32 %v5226_v23, %v5225_v37  ;;  %v5228_v45 = vpop.f32.mrb[2].mxu1  ;;  %v7250_v10 = vpop.f32.mrb[143].mxu0  ;;  %v8076_v37 = vld [vmem:[#allocation16_spill] sm:$0xff] }
 0x29f   : > { %8074 = vst [vmem:[#allocation57_spill] sm:$0xff] %v7250_v10  ;;  %v5229_v35 = vpop.f32.mrb[3].mxu1 }
 0x2a0   : > { %v7252_v17 = vadd.f32 %v5229_v35, %v5228_v45 }
 0x2a1   : > { %3560 = vmatmul.mubr.bf16.gmra.mrb[108].mxu1 %v8075_v20 }
 0x2a2   : > { %3567 = vmatprep.mubr.bf16.mxu1 %v6859_v29 }
 0x2a4   : > { %v5231_v9 = vpop.f32.mrb[4].mxu1 }
 0x2a5   : > { %v5232_v59 = vpop.f32.mrb[5].mxu1 }
 0x2a6   : > { %v7256_v24 = vadd.f32 %v5232_v59, %v5231_v9  ;;  %v5234_v30 = vpop.f32.mrb[6].mxu1 }
 0x2a7   : > { %v5235_v0 = vpop.f32.mrb[7].mxu1 }
 0x2a8   : > { %v7258_v8 = vadd.f32 %v5235_v0, %v5234_v30 }
 0x2a9   : > { %3568 = vmatmul.mubr.bf16.gmra.mrb[112].mxu1 %v8076_v37 }
 0x2aa   : > { %3575 = vmatprep.mubr.bf16.mxu1 %v6879_v21 }
 0x2ac   : > { %v5237_v23 = vpop.f32.mrb[8].mxu1 }
 0x2ad   : > { %v5238_v50 = vpop.f32.mrb[9].mxu1 }
 0x2ae   : > { %v7262_v45 = vadd.f32 %v5238_v50, %v5237_v23  ;;  %v5240_v35 = vpop.f32.mrb[10].mxu1 }
 0x2af   : > { %v5241_v10 = vpop.f32.mrb[11].mxu1 }
 0x2b0   : > { %v7264_v58 = vadd.f32 %v5241_v10, %v5240_v35 }
 0x2b1   : > { %3576 = vmatmul.mubr.bf16.gmra.mrb[116].mxu1 %v8077_v60 }
 0x2b2   : > { %3583 = vmatprep.mubr.bf16.mxu1 %v6914_v32  ;;  %v8079_v32 = vld [vmem:[#allocation22_spill] sm:$0xff] }
 0x2b4   : > { %v5243_v9 = vpop.f32.mrb[12].mxu1 }
 0x2b5   : > { %v5244_v59 = vpop.f32.mrb[13].mxu1 }
 0x2b6   : > { %v7268_v0 = vadd.f32 %v5244_v59, %v5243_v9  ;;  %v5246_v30 = vpop.f32.mrb[14].mxu1 }
 0x2b7   : > { %v5247_v42 = vpop.f32.mrb[15].mxu1 }
 0x2b8   : > { %v7270_v7 = vadd.f32 %v5247_v42, %v5246_v30 }
 0x2b9   : > { %3584 = vmatmul.mubr.bf16.gmra.mrb[120].mxu1 %v8078_v15 }
 0x2ba   : > { %3591 = vmatprep.mubr.bf16.mxu1 %v6938_v34  ;;  %v5871_v34 = vld [vmem:[%s7936_s6 + $0x180] sm:$0xff]  }
 0x2bc   : > { %v5249_v50 = vpop.f32.mrb[16].mxu1 }
 0x2bd   : > { %v5250_v23 = vpop.f32.mrb[17].mxu1 }
 0x2be   : > { %v7274_v10 = vadd.f32 %v5250_v23, %v5249_v50  ;;  %v5252_v35 = vpop.f32.mrb[18].mxu1  ;;  %v5872_v50 = vld [vmem:[%s7936_s6 + $0x1c8] sm:$0xff]   ;;  %v5874_v23 = vld [vmem:[%s7936_s6 + $0x1d0] sm:$0xff]  }
 0x2bf   : > { %v5253_v21 = vpop.f32.mrb[19].mxu1 }
 0x2c0   : > { %v7276_v62 = vadd.f32 %v5253_v21, %v5252_v35 }
 0x2c1   : > { %3592 = vmatmul.mubr.bf16.gmra.mrb[124].mxu1 %v8079_v32 }
 0x2c2   : > { %3696 = vmatprep.mubr.bf16.mxu1 %v8070_v28  ;;  %v5873_v28 = vld [vmem:[%s7936_s6 + $0x188] sm:$0xff]  }
 0x2c4   : > { %v5255_v9 = vpop.f32.mrb[20].mxu1 }
 0x2c5   : > { %v5256_v59 = vpop.f32.mrb[21].mxu1 }
 0x2c6   : > { %v7280_v42 = vadd.f32 %v5256_v59, %v5255_v9  ;;  %v5258_v30 = vpop.f32.mrb[22].mxu1 }
 0x2c7   : > { %v5259_v49 = vpop.f32.mrb[23].mxu1 }
 0x2c8   : > { %v7288_v21 = vadd.f32 %v5259_v49, %v5258_v30  ;;  %v5876_v30 = vld [vmem:[%s7936_s6 + $0x1d8] sm:$0xff]  }
 0x2c9   : > { %3697 = vmatmul.mubr.bf16.vlgmr.msra.gmra.mrb[128].mxu1 %v6758_v54 }
 0x2ca   : > { %5546 = vmatpush3.bf16.msra.mxu1 %v5871_v34  ;;  %3704 = vmatprep.mubr.bf16.mxu1 %v8075_v20  ;;  %v5875_v34 = vld [vmem:[%s7936_s6 + $0x190] sm:$0xff]  }
 0x2cb   : > { %5547 = vmatprep.subr.bf16.mxu1 %v5872_v50 }
 0x2cc   : > { %v5261_v35 = vpop.f32.mrb[24].mxu1 }
 0x2cd   : > { %v5262_v9 = vpop.f32.mrb[25].mxu1 }
 0x2ce   : > { %v7298_v59 = vadd.f32 %v5262_v9, %v5261_v35  ;;  %v5264_v49 = vpop.f32.mrb[26].mxu1  ;;  %5548 = vmatpush3.bf16.msra.mxu1 %v5873_v28  ;;  %v5877_v28 = vld [vmem:[%s7936_s6 + $0x198] sm:$0xff]  }
 0x2cf   : > { %v5265_v20 = vpop.f32.mrb[27].mxu1  ;;  %5549 = vmatprep.subr.bf16.mxu1 %v5874_v23  ;;  %v5878_v23 = vld [vmem:[%s7936_s6 + $0x1e0] sm:$0xff]  }
 0x2d0   : > { %v7306_v50 = vadd.f32 %v5265_v20, %v5264_v49  ;;  %v5880_v20 = vld [vmem:[%s7936_s6 + $0x1e8] sm:$0xff]  }
 0x2d1   : > { %3705 = vmatmul.mubr.bf16.gmra.mrb[132].mxu1 %v6784_v40 }
 0x2d2   : > { %3712 = vmatprep.mubr.bf16.mxu1 %v8076_v37  ;;  %5550 = vmatpush3.bf16.msra.mxu1 %v5875_v34  ;;  %v5879_v37 = vld [vmem:[%s7936_s6 + $0x1a0] sm:$0xff]  }
 0x2d3   : > { %5551 = vmatprep.subr.bf16.mxu1 %v5876_v30 }
 0x2d4   : > { %v5267_v35 = vpop.f32.mrb[28].mxu1 }
 0x2d5   : > { %v5268_v9 = vpop.f32.mrb[29].mxu1 }
 0x2d6   : > { %v7316_v29 = vadd.f32 %v5268_v9, %v5267_v35  ;;  %v5270_v49 = vpop.f32.mrb[30].mxu1  ;;  %5552 = vmatpush3.bf16.msra.mxu1 %v5877_v28  ;;  %v5881_v28 = vld [vmem:[%s7936_s6 + $0x1a8] sm:$0xff]  }
 0x2d7   : > { %v5271_v34 = vpop.f32.mrb[31].mxu1  ;;  %5553 = vmatprep.subr.bf16.mxu1 %v5878_v23  ;;  %v5882_v23 = vld [vmem:[%s7936_s6 + $0x1f0] sm:$0xff]  }
 0x2d8   : > { %8080 = vst [vmem:[#allocation15_spill] sm:$0xff] %v7316_v29  ;;  %v7324_v30 = vadd.f32 %v5271_v34, %v5270_v49  ;;  %v5884_v34 = vld [vmem:[%s7936_s6 + $0x1f8] sm:$0xff]  }
 0x2d9   : > { %3713 = vmatmul.mubr.bf16.gmra.mrb[136].mxu1 %v6801_v11 }
 0x2da   : > { %8081 = vst [vmem:[#allocation16_spill] sm:$0xff] %v7324_v30  ;;  %3720 = vmatprep.mubr.bf16.mxu1 %v8077_v60  ;;  %5554 = vmatpush3.bf16.msra.mxu1 %v5879_v37  ;;  %v5883_v60 = vld [vmem:[%s7936_s6 + $0x1b0] sm:$0xff]  }
 0x2db   : > { %5555 = vmatprep.subr.bf16.mxu1 %v5880_v20 }
 0x2dc   : > { %v5273_v35 = vpop.f32.mrb[32].mxu1 }
 0x2dd   : > { %v5274_v9 = vpop.f32.mrb[33].mxu1 }
 0x2de   : > { %v7334_v29 = vadd.f32 %v5274_v9, %v5273_v35  ;;  %v5276_v49 = vpop.f32.mrb[34].mxu1  ;;  %5556 = vmatpush3.bf16.msra.mxu1 %v5881_v28  ;;  %v5885_v28 = vld [vmem:[%s7936_s6 + $0x1b8] sm:$0xff]  }
 0x2df   : > { %v5277_v37 = vpop.f32.mrb[35].mxu1  ;;  %5557 = vmatprep.subr.bf16.mxu1 %v5882_v23 }
 0x2e0   : > { %8082 = vst [vmem:[#allocation17_spill] sm:$0xff] %v7334_v29  ;;  %v7342_v20 = vadd.f32 %v5277_v37, %v5276_v49 }
 0x2e1   : > { %3721 = vmatmul.mubr.bf16.gmra.mrb[140].mxu1 %v6826_v4 }
 0x2e2   : > { %8083 = vst [vmem:[#allocation19_spill] sm:$0xff] %v7342_v20  ;;  %3728 = vmatprep.mubr.bf16.mxu1 %v8078_v15  ;;  %5558 = vmatpush3.bf16.msra.mxu1 %v5883_v60 }
 0x2e3   : > { %5559 = vmatprep.subr.bf16.mxu1 %v5884_v34 }
 0x2e4   : > { %v5279_v35 = vpop.f32.mrb[36].mxu1 }
 0x2e5   : > { %v5280_v9 = vpop.f32.mrb[37].mxu1 }
 0x2e6   : > { %v7349_v29 = vadd.f32 %v5280_v9, %v5279_v35  ;;  %v5282_v23 = vpop.f32.mrb[38].mxu1  ;;  %5560 = vmatpush3.bf16.msra.mxu1 %v5885_v28  ;;  %v8088_v35 = vld [vmem:[#allocation24_spill] sm:$0xff] }
 0x2e7   : > { %v5283_v30 = vpop.f32.mrb[39].mxu1 }
 0x2e8   : > { %8084 = vst [vmem:[#allocation22_spill] sm:$0xff] %v7349_v29  ;;  %v7351_v14 = vadd.f32 %v5283_v30, %v5282_v23 }
 0x2e9   : > { %3729 = vmatmul.mubr.bf16.gmra.mrb[144].mxu1 %v6843_v56 }
 0x2ea   : > { %8085 = vst [vmem:[#allocation58_spill] sm:$0xff] %v7351_v14  ;;  %3736 = vmatprep.mubr.bf16.mxu1 %v8079_v32  ;;  %v8091_v32 = vld [vmem:[#allocation21_spill] sm:$0xff] }
 0x2ec   : > { %v5285_v15 = vpop.f32.mrb[40].mxu1 }
 0x2ed   : > { %v5286_v49 = vpop.f32.mrb[41].mxu1 }
 0x2ee   : > { %v7355_v60 = vadd.f32 %v5286_v49, %v5285_v15  ;;  %v5288_v37 = vpop.f32.mrb[42].mxu1 }
 0x2ef   : > { %v5289_v20 = vpop.f32.mrb[43].mxu1 }
 0x2f0   : > { %8086 = vst [vmem:[#allocation59_spill] sm:$0xff] %v7355_v60  ;;  %v7357_v34 = vadd.f32 %v5289_v20, %v5288_v37 }
 0x2f1   : > { %3737 = vmatmul.mubr.bf16.gmra.mrb[148].mxu1 %v6868_v48 }
 0x2f2   : > { %8087 = vst [vmem:[#allocation60_spill] sm:$0xff] %v7357_v34  ;;  %3744 = vmatprep.mubr.bf16.mxu1 %v8088_v35  ;;  %v8093_v35 = vld [vmem:[#allocation25_spill] sm:$0xff] }
 0x2f4   : > { %v5291_v28 = vpop.f32.mrb[44].mxu1 }
 0x2f5   : > { %v5292_v9 = vpop.f32.mrb[45].mxu1 }
 0x2f6   : > { %v7361_v30 = vadd.f32 %v5292_v9, %v5291_v28  ;;  %v5294_v23 = vpop.f32.mrb[46].mxu1 }
 0x2f7   : > { %v5295_v14 = vpop.f32.mrb[47].mxu1 }
 0x2f8   : > { %8089 = vst [vmem:[#allocation24_spill] sm:$0xff] %v7361_v30  ;;  %v7363_v29 = vadd.f32 %v5295_v14, %v5294_v23 }
 0x2f9   : > { %3745 = vmatmul.mubr.bf16.gmra.mrb[152].mxu1 %v8091_v32 }
 0x2fa   : > { %8090 = vst [vmem:[#allocation61_spill] sm:$0xff] %v7363_v29  ;;  %3752 = vmatprep.mubr.bf16.mxu1 %v6956_v25 }
 0x2fc   : > { %v5297_v15 = vpop.f32.mrb[48].mxu1 }
 0x2fd   : > { %v5298_v49 = vpop.f32.mrb[49].mxu1 }
 0x2fe   : > { %v7367_v20 = vadd.f32 %v5298_v49, %v5297_v15  ;;  %v5300_v37 = vpop.f32.mrb[50].mxu1 }
 0x2ff   : > { %v5301_v34 = vpop.f32.mrb[51].mxu1 }
 0x300   : > { %v7369_v60 = vadd.f32 %v5301_v34, %v5300_v37 }
 0x301   : > { %3753 = vmatmul.mubr.bf16.gmra.mrb[156].mxu1 %v8093_v35 }
 0x302   : > { %8092 = vst [vmem:[#allocation21_spill] sm:$0xff] %v7369_v60  ;;  %3793 = vmatprep.mubr.bf16.mxu1 %v6617_v33 }
 0x304   : > { %v5303_v28 = vpop.f32.mrb[52].mxu1 }
 0x305   : > { %v5304_v9 = vpop.f32.mrb[53].mxu1 }
 0x306   : > { %v7373_v14 = vadd.f32 %v5304_v9, %v5303_v28  ;;  %v5306_v23 = vpop.f32.mrb[54].mxu1 }
 0x307   : > { %v5307_v29 = vpop.f32.mrb[55].mxu1 }
 0x308   : > { %v7375_v30 = vadd.f32 %v5307_v29, %v5306_v23 }
 0x309   : > { %3794 = vmatmul.mubr.bf16.vlgmr.msra.gmra.mrb[160].mxu1 %v6637_v43 }
 0x30a   : > { %3801 = vmatprep.mubr.bf16.mxu1 %v6648_v2 }
 0x30c   : > { %v5309_v25 = vpop.f32.mrb[56].mxu1 }
 0x30d   : > { %v5310_v15 = vpop.f32.mrb[57].mxu1 }
 0x30e   : > { %v7379_v34 = vadd.f32 %v5310_v15, %v5309_v25  ;;  %v5312_v49 = vpop.f32.mrb[58].mxu1 }
 0x30f   : > { %v5313_v37 = vpop.f32.mrb[59].mxu1 }
 0x310   : > { %v7381_v60 = vadd.f32 %v5313_v37, %v5312_v49 }
 0x311   : > { %3802 = vmatmul.mubr.bf16.gmra.mrb[164].mxu1 %v6663_v19 }
 0x312   : > { %3809 = vmatprep.mubr.bf16.mxu1 %v6671_v46 }
 0x314   : > { %v5315_v33 = vpop.f32.mrb[60].mxu1 }
 0x315   : > { %v5316_v28 = vpop.f32.mrb[61].mxu1 }
 0x316   : > { %v7385_v29 = vadd.f32 %v5316_v28, %v5315_v33  ;;  %v5318_v9 = vpop.f32.mrb[62].mxu1 }
 0x317   : > { %v5319_v43 = vpop.f32.mrb[63].mxu1 }
 0x318   : > { %v7387_v23 = vadd.f32 %v5319_v43, %v5318_v9 }
 0x319   : > { %3810 = vmatmul.mubr.bf16.gmra.mrb[168].mxu1 %v6691_v13 }
 0x31a   : > { %3817 = vmatprep.mubr.bf16.mxu1 %v6699_v47 }
 0x31c   : > { %v5337_v2 = vpop.f32.mrb[64].mxu1 }
 0x31d   : > { %v5338_v25 = vpop.f32.mrb[65].mxu1 }
 0x31e   : > { %v5339_v15 = vadd.f32 %v5338_v25, %v5337_v2  ;;  %v5340_v49 = vpop.f32.mrb[66].mxu1 }
 0x31f   : > { %v5341_v37 = vpop.f32.mrb[67].mxu1 }
 0x320   : > { %v3474_v19 = vadd.f32 %v5339_v15, %v7248_v27  ;;  %v5342_v46 = vadd.f32 %v5341_v37, %v5340_v49 }
 0x321   : > { %3818 = vmatmul.mubr.bf16.gmra.mrb[172].mxu1 %v6711_v63 }
 0x322   : > { %v3477_v33 = vadd.f32 %v5342_v46, %v7252_v17  ;;  %3825 = vmatprep.mubr.bf16.mxu1 %v6716_v12  ;;  %v7396_v28 = vadd.f32 %v7070_v51, %v3474_v19 }
 0x324   : > { %v5343_v13 = vpop.f32.mrb[68].mxu1  ;;  %v7399_v47 = vadd.f32 %v7072_v16, %v3477_v33 }
 0x325   : > { %v5344_v9 = vpop.f32.mrb[69].mxu1 }
 0x326   : > { %v5345_v43 = vadd.f32 %v5344_v9, %v5343_v13  ;;  %v5346_v2 = vpop.f32.mrb[70].mxu1 }
 0x327   : > { %v5347_v25 = vpop.f32.mrb[71].mxu1 }
 0x328   : > { %v3482_v27 = vadd.f32 %v5345_v43, %v7256_v24  ;;  %v5348_v15 = vadd.f32 %v5347_v25, %v5346_v2 }
 0x329   : > { %3826 = vmatmul.mubr.bf16.gmra.mrb[176].mxu1 %v6733_v31  ;;  %v5886_v31 = vld [vmem:[%s7938_s8] ss:$8 sps:$4 sm:$0xff]  }
 0x32a   : > { %v3485_v63 = vadd.f32 %v5348_v15, %v7258_v8  ;;  %3833 = vmatprep.mubr.bf16.mxu1 %v6741_v22  ;;  %v7406_v12 = vadd.f32 %v7076_v6, %v3482_v27  ;;  %v5888_v22 = vld [vmem:[%s7938_s8 + $0x4] ss:$8 sps:$4 sm:$0xff]  }
 0x32b   : > { %4313 = vmatprep.subr.bf16.mxu0 %v5888_v22 }
 0x32c   : > { %v5349_v51 = vpop.f32.mrb[72].mxu1  ;;  %v7409_v16 = vadd.f32 %v7078_v44, %v3485_v63  ;;  %4314 = vmatpush1.bf16.msra.mxu0 %v5886_v31 }
 0x32d   : > { %v5350_v17 = vpop.f32.mrb[73].mxu1 }
 0x32e   : > { %v5351_v49 = vadd.f32 %v5350_v17, %v5349_v51  ;;  %v5352_v37 = vpop.f32.mrb[74].mxu1 }
 0x32f   : > { %v5353_v19 = vpop.f32.mrb[75].mxu1 }
 0x330   : > { %v3490_v24 = vadd.f32 %v5351_v49, %v7262_v45  ;;  %v5354_v46 = vadd.f32 %v5353_v19, %v5352_v37 }
 0x331   : > { %3834 = vmatmul.mubr.bf16.gmra.mrb[180].mxu1 %v6753_v5 }
 0x332   : > { %v3493_v8 = vadd.f32 %v5354_v46, %v7264_v58  ;;  %3841 = vmatprep.mubr.bf16.mxu1 %v6758_v54  ;;  %v7422_v6 = vadd.f32 %v7082_v57, %v3490_v24  ;;  %v5889_v54 = vld [vmem:[%s7938_s8 + $0x10] ss:$8 sps:$4 sm:$0xff]   ;;  %v5891_v58 = vld [vmem:[%s7938_s8 + $0x14] ss:$8 sps:$4 sm:$0xff]  }
 0x333   : > { %4315 = vmatprep.subr.bf16.mxu0 %v5891_v58 }
 0x334   : > { %v5355_v44 = vpop.f32.mrb[76].mxu1  ;;  %v7425_v45 = vadd.f32 %v7084_v38, %v3493_v8  ;;  %4316 = vmatpush1.bf16.msra.mxu0 %v5889_v54 }
 0x335   : > { %v5356_v33 = vpop.f32.mrb[77].mxu1 }
 0x336   : > { %v5357_v13 = vadd.f32 %v5356_v33, %v5355_v44  ;;  %v5358_v9 = vpop.f32.mrb[78].mxu1 }
 0x337   : > { %v5359_v43 = vpop.f32.mrb[79].mxu1 }
 0x338   : > { %v3498_v2 = vadd.f32 %v5357_v13, %v7268_v0  ;;  %v5360_v5 = vadd.f32 %v5359_v43, %v5358_v9  ;;  %v8094_v43 = vld [vmem:[#allocation34_spill] sm:$0xff] }
 0x339   : > { %3842 = vmatmul.mubr.bf16.gmra.mrb[184].mxu1 %v6775_v26 }
 0x33a   : > { %v3501_v57 = vadd.f32 %v5360_v5, %v7270_v7  ;;  %3849 = vmatprep.mubr.bf16.mxu1 %v6784_v40  ;;  %v7438_v38 = vadd.f32 %v7088_v39, %v3498_v2  ;;  %v5892_v40 = vld [vmem:[%s7938_s8 + $0x20] ss:$8 sps:$4 sm:$0xff]   ;;  %v5894_v7 = vld [vmem:[%s7938_s8 + $0x24] ss:$8 sps:$4 sm:$0xff]  }
 0x33b   : > { %4317 = vmatprep.subr.bf16.mxu0 %v5894_v7 }
 0x33c   : > { %v5361_v0 = vpop.f32.mrb[80].mxu1  ;;  %v7441_v25 = vadd.f32 %v7090_v52, %v3501_v57  ;;  %4318 = vmatpush1.bf16.msra.mxu0 %v5892_v40  ;;  %v8099_v40 = vld [vmem:[#allocation4_spill] sm:$0xff] }
 0x33d   : > { %v5362_v27 = vpop.f32.mrb[81].mxu1 }
 0x33e   : > { %v5363_v15 = vadd.f32 %v5362_v27, %v5361_v0  ;;  %v5364_v63 = vpop.f32.mrb[82].mxu1  ;;  %v8095_v0 = vld [vmem:[#allocation15_spill] sm:$0xff] }
 0x33f   : > { %v5365_v51 = vpop.f32.mrb[83].mxu1 }
 0x340   : > { %v3506_v17 = vadd.f32 %v5363_v15, %v7274_v10  ;;  %v5366_v26 = vadd.f32 %v5365_v51, %v5364_v63  ;;  %v8097_v15 = vld [vmem:[#allocation16_spill] sm:$0xff]  ;;  %v8098_v51 = vld [vmem:[#allocation5_spill] sm:$0xff] }
 0x341   : > { %3850 = vmatmul.mubr.bf16.gmra.mrb[188].mxu1 %v6795_v18 }
 0x342   : > { %v3509_v39 = vadd.f32 %v5366_v26, %v7276_v62  ;;  %3857 = vmatprep.mubr.bf16.mxu1 %v6801_v11  ;;  %v7454_v52 = vadd.f32 %v7094_v3, %v3506_v17  ;;  %v5895_v11 = vld [vmem:[%s7938_s8 + $0x30] ss:$8 sps:$4 sm:$0xff]   ;;  %v5897_v3 = vld [vmem:[%s7938_s8 + $0x34] ss:$8 sps:$4 sm:$0xff]  }
 0x343   : > { %4319 = vmatprep.subr.bf16.mxu0 %v5897_v3 }
 0x344   : > { %v5367_v10 = vpop.f32.mrb[84].mxu1  ;;  %v7457_v49 = vadd.f32 %v7096_v61, %v3509_v39  ;;  %4320 = vmatpush1.bf16.msra.mxu0 %v5895_v11 }
 0x345   : > { %v5368_v37 = vpop.f32.mrb[85].mxu1 }
 0x346   : > { %v5369_v19 = vadd.f32 %v5368_v37, %v5367_v10  ;;  %v5370_v24 = vpop.f32.mrb[86].mxu1 }
 0x347   : > { %v5371_v46 = vpop.f32.mrb[87].mxu1 }
 0x348   : > { %v3514_v31 = vadd.f32 %v5369_v19, %v7280_v42  ;;  %v5372_v18 = vadd.f32 %v5371_v46, %v5370_v24  ;;  %v8100_v24 = vld [vmem:[#allocation17_spill] sm:$0xff] }
 0x349   : > { %3858 = vmatmul.mubr.bf16.gmra.mrb[192].mxu1 %v6817_v1 }
 0x34a   : > { %v3517_v61 = vadd.f32 %v5372_v18, %v7288_v21  ;;  %3865 = vmatprep.mubr.bf16.mxu1 %v6826_v4  ;;  %v7470_v62 = vadd.f32 %v7100_v41, %v3514_v31  ;;  %v5898_v4 = vld [vmem:[%s7938_s8 + $0x40] ss:$8 sps:$4 sm:$0xff]   ;;  %v5900_v41 = vld [vmem:[%s7938_s8 + $0x44] ss:$8 sps:$4 sm:$0xff]   ;;  %v8101_v18 = vld [vmem:[#allocation20_spill] sm:$0xff] }
 0x34b   : > { %4321 = vmatprep.subr.bf16.mxu0 %v5900_v41  ;;  %v8104_v41 = vld [vmem:[#allocation23_spill] sm:$0xff] }
 0x34c   : > { %v5373_v42 = vpop.f32.mrb[88].mxu1  ;;  %v7473_v22 = vadd.f32 %v7102_v53, %v3517_v61  ;;  %4322 = vmatpush1.bf16.msra.mxu0 %v5898_v4 }
 0x34d   : > { %v5374_v8 = vpop.f32.mrb[89].mxu1 }
 0x34e   : > { %v5375_v44 = vadd.f32 %v5374_v8, %v5373_v42  ;;  %v5376_v33 = vpop.f32.mrb[90].mxu1 }
 0x34f   : > { %v5377_v13 = vpop.f32.mrb[91].mxu1 }
 0x350   : > { %v3522_v9 = vadd.f32 %v5375_v44, %v7298_v59  ;;  %v5378_v1 = vadd.f32 %v5377_v13, %v5376_v33  ;;  %v5906_v44 = vld [vmem:[%s7938_s8 + $0x64] ss:$8 sps:$4 sm:$0xff]   ;;  %v5904_v13 = vld [vmem:[%s7938_s8 + $0x60] ss:$8 sps:$4 sm:$0xff]  }
 0x351   : > { %3866 = vmatmul.mubr.bf16.gmra.mrb[196].mxu1 %v6837_v55 }
 0x352   : > { %v3525_v53 = vadd.f32 %v5378_v1, %v7306_v50  ;;  %3873 = vmatprep.mubr.bf16.mxu1 %v6843_v56  ;;  %v7486_v21 = vadd.f32 %v7114_v36, %v3522_v9  ;;  %v5901_v56 = vld [vmem:[%s7938_s8 + $0x50] ss:$8 sps:$4 sm:$0xff]   ;;  %v5903_v36 = vld [vmem:[%s7938_s8 + $0x54] ss:$8 sps:$4 sm:$0xff]   ;;  %v8096_v50 = vld [vmem:[#allocation18_spill] sm:$0xff] }
 0x353   : > { %4323 = vmatprep.subr.bf16.mxu0 %v5903_v36  ;;  %v8103_v9 = vld [vmem:[#allocation22_spill] sm:$0xff]  ;;  %v8108_v36 = vld [vmem:[#allocation27_spill] sm:$0xff] }
 0x354   : > { %v5379_v59 = vpop.f32.mrb[92].mxu1  ;;  %v7489_v2 = vadd.f32 %v8094_v43, %v3525_v53  ;;  %4324 = vmatpush1.bf16.msra.mxu0 %v5901_v56  ;;  %v5907_v43 = vld [vmem:[%s7938_s8 + $0x70] ss:$8 sps:$4 sm:$0xff]  }
 0x355   : > { %v5380_v5 = vpop.f32.mrb[93].mxu1  ;;  %4325 = vmatprep.subr.bf16.mxu0 %v5906_v44 }
 0x356   : > { %v5381_v54 = vadd.f32 %v5380_v5, %v5379_v59  ;;  %v5382_v58 = vpop.f32.mrb[94].mxu1  ;;  %v5909_v59 = vld [vmem:[%s7938_s8 + $0x74] ss:$8 sps:$4 sm:$0xff]  }
 0x357   : > { %v5383_v57 = vpop.f32.mrb[95].mxu1 }
 0x358   : > { %v3530_v27 = vadd.f32 %v5381_v54, %v8095_v0  ;;  %v5384_v55 = vadd.f32 %v5383_v57, %v5382_v58  ;;  %4326 = vmatpush1.bf16.msra.mxu0 %v5904_v13 }
 0x359   : > { %3874 = vmatmul.mubr.bf16.gmra.mrb[200].mxu1 %v8096_v50  ;;  %4327 = vmatprep.subr.bf16.mxu0 %v5909_v59  ;;  %v8109_v50 = vld [vmem:[#allocation60_spill] sm:$0xff] }
 0x35a   : > { %v3533_v63 = vadd.f32 %v5384_v55, %v8097_v15  ;;  %3881 = vmatprep.mubr.bf16.mxu1 %v6868_v48  ;;  %v7502_v17 = vadd.f32 %v8098_v51, %v3530_v27  ;;  %v8102_v48 = vld [vmem:[#allocation19_spill] sm:$0xff]  ;;  %v8118_v59 = vld [vmem:[#allocation32_spill] sm:$0xff] }
 0x35c   : > { %v5385_v26 = vpop.f32.mrb[96].mxu1  ;;  %v7505_v7 = vadd.f32 %v8099_v40, %v3533_v63  ;;  %4328 = vmatpush1.bf16.msra.mxu0 %v5907_v43  ;;  %v8110_v63 = vld [vmem:[#allocation28_spill] sm:$0xff] }
 0x35d   : > { %v5386_v39 = vpop.f32.mrb[97].mxu1 }
 0x35e   : > { %v5387_v10 = vadd.f32 %v5386_v39, %v5385_v26  ;;  %v5388_v37 = vpop.f32.mrb[98].mxu1 }
 0x35f   : > { %v5389_v19 = vpop.f32.mrb[99].mxu1 }
 0x360   : > { %v7508_v46 = vadd.f32 %v5387_v10, %v8100_v24  ;;  %v5390_v31 = vadd.f32 %v5389_v19, %v5388_v37  ;;  %v8111_v37 = vld [vmem:[#allocation24_spill] sm:$0xff] }
 0x361   : > { %3882 = vmatmul.mubr.bf16.gmra.mrb[204].mxu1 %v8101_v18  ;;  %v8113_v18 = vld [vmem:[#allocation29_spill] sm:$0xff] }
 0x362   : > { %v7512_v11 = vadd.f32 %v5390_v31, %v8102_v48  ;;  %3889 = vmatprep.mubr.bf16.mxu1 %v8091_v32  ;;  %v8105_v32 = vld [vmem:[#allocation58_spill] sm:$0xff] }
 0x363   : > { %v8112_v31 = vld [vmem:[#allocation30_spill] sm:$0xff] }
 0x364   : > { %v5391_v3 = vpop.f32.mrb[100].mxu1  ;;  %v8114_v48 = vpack.c.bf16 %v8112_v31, %v8113_v18 }
 0x365   : > { %v5392_v61 = vpop.f32.mrb[101].mxu1 }
 0x366   : > { %v5393_v42 = vadd.f32 %v5392_v61, %v5391_v3  ;;  %v5394_v8 = vpop.f32.mrb[102].mxu1  ;;  %v8115_v3 = vld [vmem:[#allocation61_spill] sm:$0xff] }
 0x367   : > { %v5395_v33 = vpop.f32.mrb[103].mxu1 }
 0x368   : > { %v7522_v1 = vadd.f32 %v5393_v42, %v8103_v9  ;;  %v5396_v4 = vadd.f32 %v5395_v33, %v5394_v8  ;;  %v8116_v42 = vld [vmem:[#allocation31_spill] sm:$0xff] }
 0x369   : > { %3890 = vmatmul.mubr.bf16.gmra.mrb[208].mxu1 %v8104_v41 }
 0x36a   : > { %v7526_v53 = vadd.f32 %v5396_v4, %v8105_v32  ;;  %3897 = vmatprep.mubr.bf16.mxu1 %v8093_v35  ;;  %v8107_v35 = vld [vmem:[#allocation59_spill] sm:$0xff]  ;;  %v8117_v32 = vld [vmem:[#allocation33_spill] sm:$0xff] }
 0x36b   : > { %v8119_v43 = vpack.c.bf16 %v8117_v32, %v8118_v59 }
 0x36c   : > { %v5397_v5 = vpop.f32.mrb[104].mxu1 }
 0x36d   : > { %v5398_v58 = vpop.f32.mrb[105].mxu1 }
 0x36e   : > { %v5399_v57 = vadd.f32 %v5398_v58, %v5397_v5  ;;  %v5400_v0 = vpop.f32.mrb[106].mxu1  ;;  %v8120_v5 = vld [vmem:[#allocation21_spill] sm:$0xff] }
 0x36f   : > { %v5401_v27 = vpop.f32.mrb[107].mxu1 }
 0x370   : > { %v7538_v55 = vadd.f32 %v5399_v57, %v8107_v35  ;;  %v5402_v56 = vadd.f32 %v5401_v27, %v5400_v0 }
 0x371   : > { %3898 = vmatmul.mubr.bf16.gmra.mrb[212].mxu1 %v8108_v36 }
 0x372   : > { %v7542_v15 = vadd.f32 %v5402_v56, %v8109_v50  ;;  %5111 = vmatprep.mubr.msk.bf16.mxu1 %vm5109_vm4, %v8110_v63 }
 0x374   : > { %v5403_v51 = vpop.f32.mrb[108].mxu1 }
 0x375   : > { %v5404_v26 = vpop.f32.mrb[109].mxu1 }
 0x376   : > { %v5405_v40 = vadd.f32 %v5404_v26, %v5403_v51  ;;  %v5406_v39 = vpop.f32.mrb[110].mxu1 }
 0x377   : > { %v5407_v10 = vpop.f32.mrb[111].mxu1 }
 0x378   : > { %v7546_v19 = vadd.f32 %v5405_v40, %v8111_v37  ;;  %v5408_v24 = vadd.f32 %v5407_v10, %v5406_v39 }
 0x379   : > { %3906 = vmatmul.mubr.bf16.gmra.mrb[216].mxu1 %v8114_v48 }
 0x37a   : > { %v7552_v61 = vadd.f32 %v5408_v24, %v8115_v3  ;;  %5116 = vmatprep.mubr.msk.bf16.mxu1 %vm5109_vm4, %v8116_v42 }
 0x37c   : > { %v5409_v8 = vpop.f32.mrb[112].mxu1 }
 0x37d   : > { %v5410_v44 = vpop.f32.mrb[113].mxu1 }
 0x37e   : > { %v5411_v33 = vadd.f32 %v5410_v44, %v5409_v8  ;;  %v5412_v13 = vpop.f32.mrb[114].mxu1 }
 0x37f   : > { %v5413_v9 = vpop.f32.mrb[115].mxu1 }
 0x380   : > { %v7556_v4 = vadd.f32 %v5411_v33, %v7367_v20  ;;  %v5414_v41 = vadd.f32 %v5413_v9, %v5412_v13 }
 0x381   : > { %3914 = vmatmul.mubr.bf16.gmra.mrb[220].mxu1 %v8119_v43 }
 0x382   : > { %v7562_v54 = vadd.f32 %v5414_v41, %v8120_v5 }
 0x384   : > { %v5415_v58 = vpop.f32.mrb[116].mxu1 }
 0x385   : > { %v5416_v57 = vpop.f32.mrb[117].mxu1 }
 0x386   : > { %v5417_v0 = vadd.f32 %v5416_v57, %v5415_v58  ;;  %v5418_v27 = vpop.f32.mrb[118].mxu1 }
 0x387   : > { %v5419_v35 = vpop.f32.mrb[119].mxu1 }
 0x388   : > { %v7565_v56 = vadd.f32 %v5417_v0, %v7373_v14  ;;  %v5420_v36 = vadd.f32 %v5419_v35, %v5418_v27 }
 0x38a   : > { %v7568_v20 = vadd.f32 %v5420_v36, %v7375_v30 }
 0x38c   : > { %v5421_v50 = vpop.f32.mrb[120].mxu1 }
 0x38d   : > { %v5422_v63 = vpop.f32.mrb[121].mxu1 }
 0x38e   : > { %v5423_v51 = vadd.f32 %v5422_v63, %v5421_v50  ;;  %v5424_v26 = vpop.f32.mrb[122].mxu1 }
 0x38f   : > { %v5425_v40 = vpop.f32.mrb[123].mxu1 }
 0x390   : > { %v7571_v39 = vadd.f32 %v5423_v51, %v7379_v34  ;;  %v5426_v10 = vadd.f32 %v5425_v40, %v5424_v26 }
 0x392   : > { %v7574_v37 = vadd.f32 %v5426_v10, %v7381_v60 }
 0x394   : > { %v5427_v24 = vpop.f32.mrb[124].mxu1 }
 0x395   : > { %v5428_v31 = vpop.f32.mrb[125].mxu1 }
 0x396   : > { %v5429_v14 = vadd.f32 %v5428_v31, %v5427_v24  ;;  %v5430_v18 = vpop.f32.mrb[126].mxu1 }
 0x397   : > { %v5431_v48 = vpop.f32.mrb[127].mxu1 }
 0x398   : > { %v7577_v30 = vadd.f32 %v5429_v14, %v7385_v29  ;;  %v5432_v3 = vadd.f32 %v5431_v48, %v5430_v18 }
 0x39a   : > { %v7580_v42 = vadd.f32 %v5432_v3, %v7387_v23 }
 0x39c   : > { %v5497_v8 = vpop.f32.mrb[128].mxu1 }
 0x39d   : > { %v5498_v44 = vpop.f32.mrb[129].mxu1 }
 0x39e   : > { %v5499_v34 = vadd.f32 %v5498_v44, %v5497_v8  ;;  %v5500_v33 = vpop.f32.mrb[130].mxu1 }
 0x39f   : > { %v5501_v13 = vpop.f32.mrb[131].mxu1 }
 0x3a0   : > { %v7583_v60 = vadd.f32 %v5499_v34, %v7508_v46  ;;  %v5502_v9 = vadd.f32 %v5501_v13, %v5500_v33 }
 0x3a2   : > { %v7586_v41 = vadd.f32 %v5502_v9, %v7512_v11 }
 0x3a4   : > { %v5503_v32 = vpop.f32.mrb[132].mxu1 }
 0x3a5   : > { %v5504_v59 = vpop.f32.mrb[133].mxu1 }
 0x3a6   : > { %v5505_v29 = vadd.f32 %v5504_v59, %v5503_v32  ;;  %v5506_v43 = vpop.f32.mrb[134].mxu1 }
 0x3a7   : > { %v5507_v5 = vpop.f32.mrb[135].mxu1 }
 0x3a8   : > { %v7589_v23 = vadd.f32 %v5505_v29, %v7522_v1  ;;  %v5508_v58 = vadd.f32 %v5507_v5, %v5506_v43 }
 0x3aa   : > { %v7592_v57 = vadd.f32 %v5508_v58, %v7526_v53 }
 0x3ac   : > { %v5509_v0 = vpop.f32.mrb[136].mxu1 }
 0x3ad   : > { %v5510_v27 = vpop.f32.mrb[137].mxu1 }
 0x3ae   : > { %v5511_v46 = vadd.f32 %v5510_v27, %v5509_v0  ;;  %v5512_v35 = vpop.f32.mrb[138].mxu1 }
 0x3af   : > { %v5513_v36 = vpop.f32.mrb[139].mxu1 }
 0x3b0   : > { %v7595_v11 = vadd.f32 %v5511_v46, %v7538_v55  ;;  %v5514_v50 = vadd.f32 %v5513_v36, %v5512_v35 }
 0x3b2   : > { %v7598_v63 = vadd.f32 %v5514_v50, %v7542_v15 }
 0x3b4   : > { %v5515_v51 = vpop.f32.mrb[140].mxu1 }
 0x3b5   : > { %v5516_v26 = vpop.f32.mrb[141].mxu1 }
 0x3b6   : > { %v5517_v1 = vadd.f32 %v5516_v26, %v5515_v51  ;;  %v5518_v40 = vpop.f32.mrb[142].mxu1 }
 0x3b7   : > { %v5519_v10 = vpop.f32.mrb[143].mxu1 }
 0x3b8   : > { %v7601_v53 = vadd.f32 %v5517_v1, %v7546_v19  ;;  %v5520_v24 = vadd.f32 %v5519_v10, %v5518_v40 }
 0x3ba   : > { %v7604_v31 = vadd.f32 %v5520_v24, %v7552_v61 }
 0x3bc   : > { %v5521_v14 = vpop.f32.mrb[144].mxu1 }
 0x3bd   : > { %v5522_v18 = vpop.f32.mrb[145].mxu1 }
 0x3be   : > { %v5523_v55 = vadd.f32 %v5522_v18, %v5521_v14  ;;  %v5524_v48 = vpop.f32.mrb[146].mxu1  ;;  %v7634_v18 = vld [vmem:[%s7937_s7] ss:$0 sm:$0xff] }
 0x3bf   : > { %v5525_v3 = vpop.f32.mrb[147].mxu1 }
 0x3c0   : > { %v7607_v15 = vadd.f32 %v5523_v55, %v7556_v4  ;;  %v5526_v8 = vadd.f32 %v5525_v3, %v5524_v48  ;;  %v8121_v55 = vld [vmem:[#allocation35_spill] sm:$0xff] }
 0x3c2   : > { %v7610_v44 = vadd.f32 %v5526_v8, %v7562_v54  ;;  %v8122_v8 = vld [vmem:[#allocation37_spill] sm:$0xff] }
 0x3c4   : > { %v5527_v34 = vpop.f32.mrb[148].mxu1 }
 0x3c5   : > { %v5528_v33 = vpop.f32.mrb[149].mxu1 }
 0x3c6   : > { %v5529_v19 = vadd.f32 %v5528_v33, %v5527_v34  ;;  %v5530_v13 = vpop.f32.mrb[150].mxu1 }
 0x3c7   : > { %v5531_v9 = vpop.f32.mrb[151].mxu1 }
 0x3c8   : > { %v7613_v61 = vadd.f32 %v5529_v19, %v7565_v56  ;;  %v5532_v32 = vadd.f32 %v5531_v9, %v5530_v13 }
 0x3ca   : > { %v7616_v59 = vadd.f32 %v5532_v32, %v7568_v20 }
 0x3cc   : > { %v5533_v29 = vpop.f32.mrb[152].mxu1 }
 0x3cd   : > { %v5534_v43 = vpop.f32.mrb[153].mxu1 }
 0x3ce   : > { %v5535_v4 = vadd.f32 %v5534_v43, %v5533_v29  ;;  %v5536_v5 = vpop.f32.mrb[154].mxu1 }
 0x3cf   : > { %v5537_v58 = vpop.f32.mrb[155].mxu1 }
 0x3d0   : > { %v7619_v54 = vadd.f32 %v5535_v4, %v7571_v39  ;;  %v5538_v0 = vadd.f32 %v5537_v58, %v5536_v5 }
 0x3d2   : > { %v7622_v27 = vadd.f32 %v5538_v0, %v7574_v37  ;;  %v8123_v0 = vld [vmem:[#allocation6_spill] sm:$0xff] }
 0x3d4   : > { %v5539_v46 = vpop.f32.mrb[156].mxu1 }
 0x3d5   : > { %v5540_v35 = vpop.f32.mrb[157].mxu1 }
 0x3d6   : > { %v5541_v56 = vadd.f32 %v5540_v35, %v5539_v46  ;;  %v5542_v36 = vpop.f32.mrb[158].mxu1 }
 0x3d7   : > { %v5543_v50 = vpop.f32.mrb[159].mxu1 }
 0x3d8   : > { %v7625_v20 = vadd.f32 %v5541_v56, %v7577_v30  ;;  %v5544_v51 = vadd.f32 %v5543_v50, %v5542_v36  ;;  %v8124_v50 = vld [vmem:[#allocation36_spill] sm:$0xff] }
 0x3da   : > { %v7628_v26 = vadd.f32 %v5544_v51, %v7580_v42  ;;  %v7641_v42 = vld [vmem:[%s7937_s7 + $0x1] ss:$0 sm:$0xff] }
 0x3dc   : > { %v5561_v1 = vpop.f32.mrb[160].mxu1 }
 0x3dd   : > { %v5562_v40 = vpop.f32.mrb[161].mxu1 }
 0x3de   : > { %v5563_v39 = vadd.f32 %v5562_v40, %v5561_v1  ;;  %v5564_v10 = vpop.f32.mrb[162].mxu1 }
 0x3df   : > { %v5565_v24 = vpop.f32.mrb[163].mxu1 }
 0x3e0   : > { %v3796_v37 = vadd.f32 %v5563_v39, %v7396_v28  ;;  %v5566_v14 = vadd.f32 %v5565_v24, %v5564_v10 }
 0x3e2   : > { %v3957_v30 = vadd.f32 %v8121_v55, %v3796_v37  ;;  %v3799_v48 = vadd.f32 %v5566_v14, %v7399_v47  ;;  %v8125_v14 = vmov 0  }
 0x3e4   : > { %v4088_v3 = vmul.f32 %v7634_v18, %v3957_v30  ;;  %v3960_v34 = vadd.f32 %v8122_v8, %v3799_v48  ;;  %v5567_v28 = vpop.f32.mrb[164].mxu1  ;;  %v8126_v48 = vld [vmem:[#allocation38_spill] sm:$0xff] }
 0x3e5   : > { %v5568_v33 = vpop.f32.mrb[165].mxu1 }
 0x3e6   : > { %v4125_v19 = vadd.f32 %v7641_v42, %v4088_v3  ;;  %v4089_v13 = vmul.f32 %v7634_v18, %v3960_v34  ;;  %v5569_v9 = vadd.f32 %v5568_v33, %v5567_v28  ;;  %v5570_v32 = vpop.f32.mrb[166].mxu1 }
 0x3e7   : > { %v5571_v29 = vpop.f32.mrb[167].mxu1 }
 0x3e8   : > { %v4126_v47 = vadd.f32 %v7641_v42, %v4089_v13  ;;  %v3804_v43 = vadd.f32 %v5569_v9, %v7406_v12  ;;  %v5572_v4 = vadd.f32 %v5571_v29, %v5570_v32  ;;  %v4157_v5 = vmax.f32 %v4125_v19, 0.0  ;;  %v8127_v19 = vld [vmem:[#allocation40_spill] sm:$0xff] }
 0x3ea   : > { %v4158_v58 = vmax.f32 %v4126_v47, 0.0  ;;  %v3965_v46 = vadd.f32 %v8123_v0, %v3804_v43  ;;  %v3807_v35 = vadd.f32 %v5572_v4, %v7409_v16 }
 0x3ec   : > { %v4189_v56 = vpack.c.bf16 %v4158_v58, %v4157_v5  ;;  %v4090_v36 = vmul.f32 %v7634_v18, %v3965_v46  ;;  %v3968_v51 = vadd.f32 %v8124_v50, %v3807_v35  ;;  %v5573_v1 = vpop.f32.mrb[168].mxu1  ;;  %v8128_v46 = vld [vmem:[#allocation7_spill] sm:$0xff] }
 0x3ed   : > { %v5574_v40 = vpop.f32.mrb[169].mxu1 }
 0x3ee   : > { %v4091_v39 = vmul.f32 %v7634_v18, %v3968_v51  ;;  %v5575_v10 = vadd.f32 %v5574_v40, %v5573_v1  ;;  %v5576_v24 = vpop.f32.mrb[170].mxu1  ;;  %4346 = vmatmul.mubr.bf16.vlgmr.msra.gmra.mrb[144].mxu0 %v4189_v56  ;;  %v4127_v12 = vadd.f32 %v7641_v42, %v4090_v36  ;;  %v8129_v1 = vld [vmem:[#allocation39_spill] sm:$0xff] }
 0x3ef   : > { %v5577_v37 = vpop.f32.mrb[171].mxu1  ;;  %4355 = vmatprep.mubr.bf16.mxu0 %v8125_v14 }
 0x3f0   : > { %v3812_v55 = vadd.f32 %v5575_v10, %v7422_v6  ;;  %v5578_v16 = vadd.f32 %v5577_v37, %v5576_v24  ;;  %v4128_v30 = vadd.f32 %v7641_v42, %v4091_v39  ;;  %v4159_v34 = vmax.f32 %v4127_v12, 0.0 }
 0x3f2   : > { %v3973_v3 = vadd.f32 %v8126_v48, %v3812_v55  ;;  %v3815_v8 = vadd.f32 %v5578_v16, %v7425_v45  ;;  %v4160_v28 = vmax.f32 %v4128_v30, 0.0 }
 0x3f4   : > { %v4092_v33 = vmul.f32 %v7634_v18, %v3973_v3  ;;  %v3976_v13 = vadd.f32 %v8127_v19, %v3815_v8  ;;  %v5579_v9 = vpop.f32.mrb[172].mxu1  ;;  %v4190_v32 = vpack.c.bf16 %v4160_v28, %v4159_v34  ;;  %v8130_v3 = vld [vmem:[#allocation41_spill] sm:$0xff] }
 0x3f5   : > { %v5580_v29 = vpop.f32.mrb[173].mxu1 }
 0x3f6   : > { %v4093_v47 = vmul.f32 %v7634_v18, %v3976_v13  ;;  %v5581_v43 = vadd.f32 %v5580_v29, %v5579_v9  ;;  %v5582_v6 = vpop.f32.mrb[174].mxu1  ;;  %4356 = vmatmul.mubr.bf16.gmra.mrb[148].mxu0 %v4190_v32  ;;  %v4129_v4 = vadd.f32 %v7641_v42, %v4092_v33  ;;  %v8131_v13 = vld [vmem:[#allocation43_spill] sm:$0xff] }
 0x3f7   : > { %v5583_v5 = vpop.f32.mrb[175].mxu1  ;;  %4365 = vmatprep.mubr.bf16.mxu0 %v8125_v14 }
 0x3f8   : > { %v3820_v45 = vadd.f32 %v5581_v43, %v7438_v38  ;;  %v5584_v58 = vadd.f32 %v5583_v5, %v5582_v6  ;;  %v4130_v0 = vadd.f32 %v7641_v42, %v4093_v47  ;;  %v4161_v36 = vmax.f32 %v4129_v4, 0.0 }
 0x3fa   : > { %v3981_v35 = vadd.f32 %v8128_v46, %v3820_v45  ;;  %v3823_v56 = vadd.f32 %v5584_v58, %v7441_v25  ;;  %v4162_v50 = vmax.f32 %v4130_v0, 0.0  ;;  %v8132_v0 = vld [vmem:[#allocation8_spill] sm:$0xff] }
 0x3fc   : > { %v4094_v51 = vmul.f32 %v7634_v18, %v3981_v35  ;;  %v3984_v40 = vadd.f32 %v8129_v1, %v3823_v56  ;;  %v5585_v39 = vpop.f32.mrb[176].mxu1  ;;  %v4191_v10 = vpack.c.bf16 %v4162_v50, %v4161_v36 }
 0x3fd   : > { %v5586_v24 = vpop.f32.mrb[177].mxu1 }
 0x3fe   : > { %v4095_v12 = vmul.f32 %v7634_v18, %v3984_v40  ;;  %v5587_v37 = vadd.f32 %v5586_v24, %v5585_v39  ;;  %v5588_v38 = vpop.f32.mrb[178].mxu1  ;;  %4366 = vmatmul.mubr.bf16.gmra.mrb[152].mxu0 %v4191_v10  ;;  %v4131_v55 = vadd.f32 %v7641_v42, %v4094_v51  ;;  %v8133_v51 = vld [vmem:[#allocation42_spill] sm:$0xff] }
 0x3ff   : > { %v5589_v16 = vpop.f32.mrb[179].mxu1  ;;  %4375 = vmatprep.mubr.bf16.mxu0 %v8125_v14 }
 0x400   : > { %v3828_v25 = vadd.f32 %v5587_v37, %v7454_v52  ;;  %v5590_v30 = vadd.f32 %v5589_v16, %v5588_v38  ;;  %v4132_v48 = vadd.f32 %v7641_v42, %v4095_v12  ;;  %v4163_v28 = vmax.f32 %v4131_v55, 0.0 }
 0x402   : > { %v3989_v8 = vadd.f32 %v8130_v3, %v3828_v25  ;;  %v3831_v34 = vadd.f32 %v5590_v30, %v7457_v49  ;;  %v4164_v33 = vmax.f32 %v4132_v48, 0.0  ;;  %v8134_v25 = vld [vmem:[#allocation44_spill] sm:$0xff] }
 0x404   : > { %v4096_v19 = vmul.f32 %v7634_v18, %v3989_v8  ;;  %v3992_v9 = vadd.f32 %v8131_v13, %v3831_v34  ;;  %v5591_v32 = vpop.f32.mrb[180].mxu1  ;;  %v4192_v29 = vpack.c.bf16 %v4164_v33, %v4163_v28  ;;  %v8135_v28 = vld [vmem:[#allocation46_spill] sm:$0xff] }
 0x405   : > { %v5592_v47 = vpop.f32.mrb[181].mxu1 }
 0x406   : > { %v4097_v43 = vmul.f32 %v7634_v18, %v3992_v9  ;;  %v5593_v6 = vadd.f32 %v5592_v47, %v5591_v32  ;;  %v5594_v52 = vpop.f32.mrb[182].mxu1  ;;  %4376 = vmatmul.mubr.bf16.gmra.mrb[156].mxu0 %v4192_v29  ;;  %v4133_v4 = vadd.f32 %v7641_v42, %v4096_v19 }
 0x407   : > { %v5595_v5 = vpop.f32.mrb[183].mxu1  ;;  %4385 = vmatprep.mubr.bf16.mxu0 %v8125_v14 }
 0x408   : > { %v3836_v49 = vadd.f32 %v5593_v6, %v7470_v62  ;;  %v5596_v45 = vadd.f32 %v5595_v5, %v5594_v52  ;;  %v4134_v58 = vadd.f32 %v7641_v42, %v4097_v43  ;;  %v4165_v56 = vmax.f32 %v4133_v4, 0.0  ;;  %v8136_v4 = vld [vmem:[#allocation9_spill] sm:$0xff] }
 0x40a   : > { %v3997_v46 = vadd.f32 %v8132_v0, %v3836_v49  ;;  %v3839_v35 = vadd.f32 %v5596_v45, %v7473_v22  ;;  %v4166_v36 = vmax.f32 %v4134_v58, 0.0 }
 0x40c   : > { %v4098_v50 = vmul.f32 %v7634_v18, %v3997_v46  ;;  %v4000_v1 = vadd.f32 %v8133_v51, %v3839_v35  ;;  %v5597_v40 = vpop.f32.mrb[184].mxu1  ;;  %v4193_v39 = vpack.c.bf16 %v4166_v36, %v4165_v56  ;;  %v8137_v46 = vld [vmem:[#allocation45_spill] sm:$0xff] }
 0x40d   : > { %v5598_v10 = vpop.f32.mrb[185].mxu1 }
 0x40e   : > { %v4099_v24 = vmul.f32 %v7634_v18, %v4000_v1  ;;  %v5599_v12 = vadd.f32 %v5598_v10, %v5597_v40  ;;  %v5600_v62 = vpop.f32.mrb[186].mxu1  ;;  %4386 = vmatmul.mubr.bf16.gmra.mrb[160].mxu0 %v4193_v39  ;;  %v4135_v37 = vadd.f32 %v7641_v42, %v4098_v50 }
 0x40f   : > { %v5601_v38 = vpop.f32.mrb[187].mxu1  ;;  %4395 = vmatprep.mubr.bf16.mxu0 %v8125_v14 }
 0x410   : > { %v3844_v22 = vadd.f32 %v5599_v12, %v7486_v21  ;;  %v5602_v55 = vadd.f32 %v5601_v38, %v5600_v62  ;;  %v4136_v16 = vadd.f32 %v7641_v42, %v4099_v24  ;;  %v4167_v3 = vmax.f32 %v4135_v37, 0.0  ;;  %v8138_v12 = vld [vmem:[#allocation47_spill] sm:$0xff] }
 0x412   : > { %v4005_v30 = vadd.f32 %v8134_v25, %v3844_v22  ;;  %v3847_v48 = vadd.f32 %v5602_v55, %v7489_v2  ;;  %v4168_v8 = vmax.f32 %v4136_v16, 0.0  ;;  %v8139_v16 = vld [vmem:[#allocation49_spill] sm:$0xff] }
 0x414   : > { %v4100_v34 = vmul.f32 %v7634_v18, %v4005_v30  ;;  %v4008_v33 = vadd.f32 %v8135_v28, %v3847_v48  ;;  %v5603_v19 = vpop.f32.mrb[188].mxu1  ;;  %v4194_v13 = vpack.c.bf16 %v4168_v8, %v4167_v3 }
 0x415   : > { %v5604_v9 = vpop.f32.mrb[189].mxu1 }
 0x416   : > { %v4101_v32 = vmul.f32 %v7634_v18, %v4008_v33  ;;  %v5605_v29 = vadd.f32 %v5604_v9, %v5603_v19  ;;  %v5606_v21 = vpop.f32.mrb[190].mxu1  ;;  %4396 = vmatmul.mubr.bf16.gmra.mrb[164].mxu0 %v4194_v13  ;;  %v4137_v47 = vadd.f32 %v7641_v42, %v4100_v34  ;;  %v8140_v9 = vld [vmem:[#allocation10_spill] sm:$0xff] }
 0x417   : > { %v5607_v43 = vpop.f32.mrb[191].mxu1  ;;  %4405 = vmatprep.mubr.bf16.mxu0 %v8125_v14 }
 0x418   : > { %v3852_v2 = vadd.f32 %v5605_v29, %v7502_v17  ;;  %v5608_v6 = vadd.f32 %v5607_v43, %v5606_v21  ;;  %v4138_v52 = vadd.f32 %v7641_v42, %v4101_v32  ;;  %v4169_v45 = vmax.f32 %v4137_v47, 0.0 }
 0x41a   : > { %v4013_v5 = vadd.f32 %v8136_v4, %v3852_v2  ;;  %v3855_v49 = vadd.f32 %v5608_v6, %v7505_v7  ;;  %v4170_v58 = vmax.f32 %v4138_v52, 0.0  ;;  %v8141_v2 = vld [vmem:[#allocation48_spill] sm:$0xff] }
 0x41c   : > { %v4102_v0 = vmul.f32 %v7634_v18, %v4013_v5  ;;  %v4016_v35 = vadd.f32 %v8137_v46, %v3855_v49  ;;  %v5609_v56 = vpop.f32.mrb[192].mxu1  ;;  %v4195_v36 = vpack.c.bf16 %v4170_v58, %v4169_v45 }
 0x41d   : > { %v5610_v50 = vpop.f32.mrb[193].mxu1 }
 0x41e   : > { %v4103_v51 = vmul.f32 %v7634_v18, %v4016_v35  ;;  %v5611_v1 = vadd.f32 %v5610_v50, %v5609_v56  ;;  %v5612_v17 = vpop.f32.mrb[194].mxu1  ;;  %4406 = vmatmul.mubr.bf16.gmra.mrb[168].mxu0 %v4195_v36  ;;  %v4139_v40 = vadd.f32 %v7641_v42, %v4102_v0  ;;  %v8142_v56 = vld [vmem:[#allocation50_spill] sm:$0xff] }
 0x41f   : > { %v5613_v39 = vpop.f32.mrb[195].mxu1  ;;  %4415 = vmatprep.mubr.bf16.mxu0 %v8125_v14 }
 0x420   : > { %v3860_v7 = vadd.f32 %v5611_v1, %v7583_v60  ;;  %v5614_v10 = vadd.f32 %v5613_v39, %v5612_v17  ;;  %v4140_v24 = vadd.f32 %v7641_v42, %v4103_v51  ;;  %v4171_v38 = vmax.f32 %v4139_v40, 0.0  ;;  %v8143_v40 = vld [vmem:[#allocation52_spill] sm:$0xff] }
 0x422   : > { %v4021_v62 = vadd.f32 %v8138_v12, %v3860_v7  ;;  %v3863_v37 = vadd.f32 %v5614_v10, %v7586_v41  ;;  %v4172_v22 = vmax.f32 %v4140_v24, 0.0 }
 0x424   : > { %v4104_v55 = vmul.f32 %v7634_v18, %v4021_v62  ;;  %v4024_v25 = vadd.f32 %v8139_v16, %v3863_v37  ;;  %v5615_v30 = vpop.f32.mrb[196].mxu1  ;;  %v4196_v48 = vpack.c.bf16 %v4172_v22, %v4171_v38  ;;  %v8144_v16 = vld [vmem:[#allocation11_spill] sm:$0xff] }
 0x425   : > { %v5616_v3 = vpop.f32.mrb[197].mxu1 }
 0x426   : > { %v4105_v8 = vmul.f32 %v7634_v18, %v4024_v25  ;;  %v5617_v34 = vadd.f32 %v5616_v3, %v5615_v30  ;;  %v5618_v60 = vpop.f32.mrb[198].mxu1  ;;  %4416 = vmatmul.mubr.bf16.gmra.mrb[172].mxu0 %v4196_v48  ;;  %v4141_v28 = vadd.f32 %v7641_v42, %v4104_v55 }
 0x427   : > { %v5619_v33 = vpop.f32.mrb[199].mxu1  ;;  %4425 = vmatprep.mubr.bf16.mxu0 %v8125_v14 }
 0x428   : > { %v3868_v41 = vadd.f32 %v5617_v34, %v7589_v23  ;;  %v5620_v19 = vadd.f32 %v5619_v33, %v5618_v60  ;;  %v4142_v13 = vadd.f32 %v7641_v42, %v4105_v8  ;;  %v4173_v21 = vmax.f32 %v4141_v28, 0.0  ;;  %v8145_v34 = vld [vmem:[#allocation51_spill] sm:$0xff] }
 0x42a   : > { %v4029_v32 = vadd.f32 %v8140_v9, %v3868_v41  ;;  %v3871_v29 = vadd.f32 %v5620_v19, %v7592_v57  ;;  %v4174_v47 = vmax.f32 %v4142_v13, 0.0 }
 0x42c   : > { %v4106_v43 = vmul.f32 %v7634_v18, %v4029_v32  ;;  %v4032_v6 = vadd.f32 %v8141_v2, %v3871_v29  ;;  %v5621_v52 = vpop.f32.mrb[200].mxu1  ;;  %v4197_v4 = vpack.c.bf16 %v4174_v47, %v4173_v21  ;;  %v8146_v47 = vld [vmem:[#allocation13_spill] sm:$0xff] }
 0x42d   : > { %v5622_v5 = vpop.f32.mrb[201].mxu1 }
 0x42e   : > { %v4107_v49 = vmul.f32 %v7634_v18, %v4032_v6  ;;  %v5623_v45 = vadd.f32 %v5622_v5, %v5621_v52  ;;  %v5624_v23 = vpop.f32.mrb[202].mxu1  ;;  %4426 = vmatmul.mubr.bf16.gmra.mrb[176].mxu0 %v4197_v4  ;;  %v4143_v58 = vadd.f32 %v7641_v42, %v4106_v43  ;;  %v8147_v5 = vld [vmem:[#allocation54_spill] sm:$0xff] }
 0x42f   : > { %v5625_v0 = vpop.f32.mrb[203].mxu1  ;;  %4435 = vmatprep.mubr.bf16.mxu0 %v8125_v14 }
 0x430   : > { %v3876_v57 = vadd.f32 %v5623_v45, %v7595_v11  ;;  %v5626_v46 = vadd.f32 %v5625_v0, %v5624_v23  ;;  %v4144_v35 = vadd.f32 %v7641_v42, %v4107_v49  ;;  %v4175_v51 = vmax.f32 %v4143_v58, 0.0 }
 0x432   : > { %v4037_v36 = vadd.f32 %v8142_v56, %v3876_v57  ;;  %v3879_v50 = vadd.f32 %v5626_v46, %v7598_v63  ;;  %v4176_v1 = vmax.f32 %v4144_v35, 0.0 }
 0x434   : > { %v4108_v17 = vmul.f32 %v7634_v18, %v4037_v36  ;;  %v4040_v39 = vadd.f32 %v8143_v40, %v3879_v50  ;;  %v5627_v7 = vpop.f32.mrb[204].mxu1  ;;  %v4198_v10 = vpack.c.bf16 %v4176_v1, %v4175_v51  ;;  %v8148_v50 = vld [vmem:[#allocation12_spill] sm:$0xff] }
 0x435   : > { %v5628_v24 = vpop.f32.mrb[205].mxu1 }
 0x436   : > { %v4109_v12 = vmul.f32 %v7634_v18, %v4040_v39  ;;  %v5629_v62 = vadd.f32 %v5628_v24, %v5627_v7  ;;  %v5630_v11 = vpop.f32.mrb[206].mxu1  ;;  %4436 = vmatmul.mubr.bf16.gmra.mrb[180].mxu0 %v4198_v10  ;;  %v4145_v37 = vadd.f32 %v7641_v42, %v4108_v17  ;;  %v8149_v7 = vld [vmem:[#allocation53_spill] sm:$0xff] }
 0x437   : > { %v5631_v38 = vpop.f32.mrb[207].mxu1  ;;  %4445 = vmatprep.mubr.bf16.mxu0 %v8125_v14 }
 0x438   : > { %v3884_v63 = vadd.f32 %v5629_v62, %v7601_v53  ;;  %v5632_v22 = vadd.f32 %v5631_v38, %v5630_v11  ;;  %v4146_v55 = vadd.f32 %v7641_v42, %v4109_v12  ;;  %v4177_v48 = vmax.f32 %v4145_v37, 0.0 }
 0x43a   : > { %v4045_v25 = vadd.f32 %v8144_v16, %v3884_v63  ;;  %v3887_v30 = vadd.f32 %v5632_v22, %v7604_v31  ;;  %v4178_v3 = vmax.f32 %v4146_v55, 0.0  ;;  %v8150_v16 = vld [vmem:[#allocation55_spill] sm:$0xff] }
 0x43c   : > { %v4110_v8 = vmul.f32 %v7634_v18, %v4045_v25  ;;  %v4048_v60 = vadd.f32 %v8145_v34, %v3887_v30  ;;  %v5633_v28 = vpop.f32.mrb[208].mxu1  ;;  %v4199_v33 = vpack.c.bf16 %v4178_v3, %v4177_v48  ;;  %v8151_v34 = vld [vmem:[#allocation57_spill] sm:$0xff] }
 0x43d   : > { %v5634_v41 = vpop.f32.mrb[209].mxu1 }
 0x43e   : > { %v4111_v19 = vmul.f32 %v7634_v18, %v4048_v60  ;;  %v5635_v13 = vadd.f32 %v5634_v41, %v5633_v28  ;;  %v5636_v53 = vpop.f32.mrb[210].mxu1  ;;  %4446 = vmatmul.mubr.bf16.gmra.mrb[184].mxu0 %v4199_v33  ;;  %v4147_v9 = vadd.f32 %v7641_v42, %v4110_v8 }
 0x43f   : > { %v5637_v32 = vpop.f32.mrb[211].mxu1  ;;  %4455 = vmatprep.mubr.bf16.mxu0 %v8125_v14 }
 0x440   : > { %v3892_v31 = vadd.f32 %v5635_v13, %v7607_v15  ;;  %v5638_v29 = vadd.f32 %v5637_v32, %v5636_v53  ;;  %v4148_v21 = vadd.f32 %v7641_v42, %v4111_v19  ;;  %v4179_v6 = vmax.f32 %v4147_v9, 0.0 }
 0x442   : > { %v4053_v43 = vadd.f32 %v8146_v47, %v3892_v31  ;;  %v3895_v2 = vadd.f32 %v5638_v29, %v7610_v44  ;;  %v4180_v52 = vmax.f32 %v4148_v21, 0.0  ;;  %v8152_v29 = vld [vmem:[#allocation14_spill] sm:$0xff] }
 0x444   : > { %v4112_v4 = vmul.f32 %v7634_v18, %v4053_v43  ;;  %v4056_v49 = vadd.f32 %v8147_v5, %v3895_v2  ;;  %v5639_v45 = vpop.f32.mrb[212].mxu1  ;;  %v4200_v23 = vpack.c.bf16 %v4180_v52, %v4179_v6  ;;  %v8153_v52 = vld [vmem:[#allocation56_spill] sm:$0xff] }
 0x445   : > { %v5640_v58 = vpop.f32.mrb[213].mxu1 }
 0x446   : > { %v4113_v0 = vmul.f32 %v7634_v18, %v4056_v49  ;;  %v5641_v57 = vadd.f32 %v5640_v58, %v5639_v45  ;;  %v5642_v15 = vpop.f32.mrb[214].mxu1  ;;  %4456 = vmatmul.mubr.bf16.gmra.mrb[188].mxu0 %v4200_v23  ;;  %v4149_v46 = vadd.f32 %v7641_v42, %v4112_v4 }
 0x447   : > { %v5643_v35 = vpop.f32.mrb[215].mxu1  ;;  %4465 = vmatprep.mubr.bf16.mxu0 %v8125_v14 }
 0x448   : > { %v3900_v44 = vadd.f32 %v5641_v57, %v7613_v61  ;;  %v5644_v56 = vadd.f32 %v5643_v35, %v5642_v15  ;;  %v4150_v36 = vadd.f32 %v7641_v42, %v4113_v0  ;;  %v4181_v17 = vmax.f32 %v4149_v46, 0.0  ;;  %v4221_v0 = vld [vmem:[%s7939_s9] sm:$0x3]  ;;  %v8154_v57 = vld [vmem:[#allocation3_spill] sm:$0xff] }
 0x449   : > { %v7787_v15 = vrot.slane %v4221_v0, %v8154_v57  ;;  %v5928_v35 = vld [vmem:[%s6129_s21] sm:$0xff] }
 0x44a   : > { %v4061_v51 = vadd.f32 %v8148_v50, %v3900_v44  ;;  %v3903_v1 = vadd.f32 %v5644_v56, %v7616_v59  ;;  %v4182_v40 = vmax.f32 %v4150_v36, 0.0  ;;  %v4506_v44 = vunpack.c.l.bf16 %v5928_v35  ;;  %v5929_v50 = vld [vmem:[%s6129_s21 + $0x8] sm:$0xff] }
 0x44b   : > { %v4507_v56 = vunpack.c.h.bf16 %v5928_v35 }
 0x44c   : > { %v4114_v39 = vmul.f32 %v7634_v18, %v4061_v51  ;;  %v4064_v10 = vadd.f32 %v8149_v7, %v3903_v1  ;;  %v5645_v24 = vpop.f32.mrb[216].mxu1  ;;  %v4201_v12 = vpack.c.bf16 %v4182_v40, %v4181_v17  ;;  %v4508_v51 = vunpack.c.l.bf16 %v5929_v50 }
 0x44d   : > { %v5646_v62 = vpop.f32.mrb[217].mxu1  ;;  %v4509_v40 = vunpack.c.h.bf16 %v5929_v50 }
 0x44e   : > { %v4115_v11 = vmul.f32 %v7634_v18, %v4064_v10  ;;  %v5647_v37 = vadd.f32 %v5646_v62, %v5645_v24  ;;  %v5648_v61 = vpop.f32.mrb[218].mxu1  ;;  %4466 = vmatmul.mubr.bf16.gmra.mrb[192].mxu0 %v4201_v12  ;;  %v4151_v38 = vadd.f32 %v7641_v42, %v4114_v39 }
 0x44f   : > { %v5649_v63 = vpop.f32.mrb[219].mxu1  ;;  %4475 = vmatprep.mubr.bf16.mxu0 %v8125_v14 }
 0x450   : > { %v3908_v59 = vadd.f32 %v5647_v37, %v7619_v54  ;;  %v5650_v22 = vadd.f32 %v5649_v63, %v5648_v61  ;;  %v4152_v55 = vadd.f32 %v7641_v42, %v4115_v11  ;;  %v4183_v48 = vmax.f32 %v4151_v38, 0.0  ;;  %v5930_v61 = vld [vmem:[%s6129_s21 + $0x10] sm:$0xff] }
 0x451   : > { %v4510_v38 = vunpack.c.l.bf16 %v5930_v61 }
 0x452   : > { %v4069_v25 = vadd.f32 %v8150_v16, %v3908_v59  ;;  %v3911_v30 = vadd.f32 %v5650_v22, %v7622_v27  ;;  %v4184_v3 = vmax.f32 %v4152_v55, 0.0  ;;  %v4511_v22 = vunpack.c.h.bf16 %v5930_v61 }
 0x454   : > { %v4116_v8 = vmul.f32 %v7634_v18, %v4069_v25  ;;  %v4072_v60 = vadd.f32 %v8151_v34, %v3911_v30  ;;  %v5651_v28 = vpop.f32.mrb[220].mxu1  ;;  %v4202_v33 = vpack.c.bf16 %v4184_v3, %v4183_v48  ;;  %v5931_v25 = vld [vmem:[%s6129_s21 + $0x18] sm:$0xff] }
 0x455   : > { %v5652_v41 = vpop.f32.mrb[221].mxu1  ;;  %v4512_v30 = vunpack.c.l.bf16 %v5931_v25 }
 0x456   : > { %v4117_v19 = vmul.f32 %v7634_v18, %v4072_v60  ;;  %v5653_v13 = vadd.f32 %v5652_v41, %v5651_v28  ;;  %v5654_v54 = vpop.f32.mrb[222].mxu1  ;;  %4476 = vmatmul.mubr.bf16.gmra.mrb[196].mxu0 %v4202_v33  ;;  %v4153_v53 = vadd.f32 %v7641_v42, %v4116_v8  ;;  %v4513_v8 = vunpack.c.h.bf16 %v5931_v25 }
 0x457   : > { %v5655_v9 = vpop.f32.mrb[223].mxu1  ;;  %4485 = vmatprep.mubr.bf16.mxu0 %v8125_v14 }
 0x458   : > { %v3916_v27 = vadd.f32 %v5653_v13, %v7625_v20  ;;  %v5656_v32 = vadd.f32 %v5655_v9, %v5654_v54  ;;  %v4154_v31 = vadd.f32 %v7641_v42, %v4117_v19  ;;  %v4185_v43 = vmax.f32 %v4153_v53, 0.0  ;;  %v5932_v53 = vld [vmem:[%s6129_s21 + $0x20] sm:$0xff] }
 0x459   : > { %v4514_v9 = vunpack.c.l.bf16 %v5932_v53 }
 0x45a   : > { %v4077_v21 = vadd.f32 %v8152_v29, %v3916_v27  ;;  %v3919_v47 = vadd.f32 %v5656_v32, %v7628_v26  ;;  %v4186_v2 = vmax.f32 %v4154_v31, 0.0  ;;  %v4515_v31 = vunpack.c.h.bf16 %v5932_v53 }
 0x45c   : > { %v4118_v6 = vmul.f32 %v7634_v18, %v4077_v21  ;;  %v4080_v4 = vadd.f32 %v8153_v52, %v3919_v47  ;;  %v4203_v5 = vpack.c.bf16 %v4186_v2, %v4185_v43  ;;  %v5933_v47 = vld [vmem:[%s6129_s21 + $0x28] sm:$0xff] }
 0x45d   : > { %v4516_v43 = vunpack.c.l.bf16 %v5933_v47  ;;  %v4517_v52 = vunpack.c.h.bf16 %v5933_v47 }
 0x45e   : > { %v4119_v49 = vmul.f32 %v7634_v18, %v4080_v4  ;;  %4486 = vmatmul.mubr.bf16.gmra.mrb[200].mxu0 %v4203_v5  ;;  %v4155_v20 = vadd.f32 %v7641_v42, %v4118_v6  ;;  %v8155_v18 = vld [vmem:[#allocation2_spill] sm:$0xff] }
 0x45f   : > { %4495 = vmatprep.mubr.bf16.mxu0 %v8125_v14  ;;  %v7790_v46 = vrot.slane %v4221_v0, %v8155_v18  ;;  %v5934_v0 = vld [vmem:[%s6129_s21 + $0x30] sm:$0xff] }
 0x460   : > { %v4156_v45 = vadd.f32 %v7641_v42, %v4119_v49  ;;  %v4187_v23 = vmax.f32 %v4155_v20, 0.0  ;;  %v4518_v57 = vunpack.c.l.bf16 %v5934_v0 }
 0x462   : > { %v4188_v26 = vmax.f32 %v4156_v45, 0.0 }
 0x464   : > { %v4204_v58 = vpack.c.bf16 %v4188_v26, %v4187_v23 }
 0x466   : > { %4496 = vmatmul.mubr.bf16.gmra.mrb[204].mxu0 %v4204_v58 }
 0x4c1   : > { %v4347_v14 = vpop.f32.mrb[144].mxu0 }
 0x4c2   : > { %v4348_v42 = vadd.f32 %v4347_v14, %v7787_v15  ;;  %v4349_v36 = vpop.f32.mrb[145].mxu0 }
 0x4c3   : > { %v4350_v1 = vadd.f32 %v4349_v36, %v7790_v46  ;;  %v4351_v17 = vpop.f32.mrb[146].mxu0 }
 0x4c4   : > { %v4570_v39 = vadd.f32 %v4506_v44, %v4348_v42  ;;  %v4352_v7 = vadd.f32 %v4351_v17, %v7787_v15  ;;  %v4353_v10 = vpop.f32.mrb[147].mxu0  ;;  %v4519_v44 = vunpack.c.h.bf16 %v5934_v0  ;;  %v5935_v42 = vld [vmem:[%s6129_s21 + $0x38] sm:$0xff] }
 0x4c5   : > { %v4571_v24 = vadd.f32 %v4507_v56, %v4350_v1  ;;  %v4354_v12 = vadd.f32 %v4353_v10, %v7790_v46  ;;  %v4520_v36 = vunpack.c.l.bf16 %v5935_v42  ;;  %v4521_v1 = vunpack.c.h.bf16 %v5935_v42 }
 0x4c6   : > { %v4572_v62 = vadd.f32 %v4508_v51, %v4352_v7 }
 0x4c7   : > { %v5177_v11 = vpack.c.bf16 %v4571_v24, %v4570_v39  ;;  %v4573_v37 = vadd.f32 %v4509_v40, %v4354_v12 }
 0x4c9   : > { %4826 = vst [vmem:[%s7803_s17] sm:$0xff] %v5177_v11  ;;  %v5178_v63 = vpack.c.bf16 %v4573_v37, %v4572_v62  ;;  %v4357_v59 = vpop.f32.mrb[148].mxu0  ;;  %v5936_v11 = vld [vmem:[%s6129_s21 + $0x40] sm:$0xff] }
 0x4ca   : > { %v4358_v55 = vadd.f32 %v4357_v59, %v7787_v15  ;;  %v4359_v16 = vpop.f32.mrb[149].mxu0  ;;  %v4522_v37 = vunpack.c.l.bf16 %v5936_v11 }
 0x4cb   : > { %4827 = vst [vmem:[%s7803_s17 + $0x8] sm:$0xff] %v5178_v63  ;;  %v4360_v48 = vadd.f32 %v4359_v16, %v7790_v46  ;;  %v4361_v3 = vpop.f32.mrb[150].mxu0  ;;  %v4523_v63 = vunpack.c.h.bf16 %v5936_v11 }
 0x4cc   : > { %v4574_v34 = vadd.f32 %v4510_v38, %v4358_v55  ;;  %v4362_v60 = vadd.f32 %v4361_v3, %v7787_v15  ;;  %v4363_v28 = vpop.f32.mrb[151].mxu0  ;;  %v5937_v55 = vld [vmem:[%s6129_s21 + $0x48] sm:$0xff] }
 0x4cd   : > { %v4575_v33 = vadd.f32 %v4511_v22, %v4360_v48  ;;  %v4364_v41 = vadd.f32 %v4363_v28, %v7790_v46  ;;  %v4524_v16 = vunpack.c.l.bf16 %v5937_v55  ;;  %v4525_v48 = vunpack.c.h.bf16 %v5937_v55 }
 0x4ce   : > { %v4576_v19 = vadd.f32 %v4512_v30, %v4362_v60 }
 0x4cf   : > { %v5179_v13 = vpack.c.bf16 %v4575_v33, %v4574_v34  ;;  %v4577_v54 = vadd.f32 %v4513_v8, %v4364_v41 }
 0x4d1   : > { %4828 = vst [vmem:[%s7803_s17 + $0x10] sm:$0xff] %v5179_v13  ;;  %v5180_v27 = vpack.c.bf16 %v4577_v54, %v4576_v19  ;;  %v4367_v32 = vpop.f32.mrb[152].mxu0  ;;  %v5938_v13 = vld [vmem:[%s6129_s21 + $0x50] sm:$0xff] }
 0x4d2   : > { %v4368_v29 = vadd.f32 %v4367_v32, %v7787_v15  ;;  %v4369_v21 = vpop.f32.mrb[153].mxu0  ;;  %v4526_v54 = vunpack.c.l.bf16 %v5938_v13 }
 0x4d3   : > { %4829 = vst [vmem:[%s7803_s17 + $0x18] sm:$0xff] %v5180_v27  ;;  %v4370_v2 = vadd.f32 %v4369_v21, %v7790_v46  ;;  %v4371_v6 = vpop.f32.mrb[154].mxu0  ;;  %v4527_v27 = vunpack.c.h.bf16 %v5938_v13 }
 0x4d4   : > { %v4578_v4 = vadd.f32 %v4514_v9, %v4368_v29  ;;  %v4372_v5 = vadd.f32 %v4371_v6, %v7787_v15  ;;  %v4373_v49 = vpop.f32.mrb[155].mxu0  ;;  %v5939_v29 = vld [vmem:[%s6129_s21 + $0x58] sm:$0xff] }
 0x4d5   : > { %v4579_v20 = vadd.f32 %v4515_v31, %v4370_v2  ;;  %v4374_v45 = vadd.f32 %v4373_v49, %v7790_v46  ;;  %v4528_v21 = vunpack.c.l.bf16 %v5939_v29  ;;  %v4529_v2 = vunpack.c.h.bf16 %v5939_v29 }
 0x4d6   : > { %v4580_v23 = vadd.f32 %v4516_v43, %v4372_v5 }
 0x4d7   : > { %v5181_v26 = vpack.c.bf16 %v4579_v20, %v4578_v4  ;;  %v4581_v58 = vadd.f32 %v4517_v52, %v4374_v45 }
 0x4d9   : > { %4830 = vst [vmem:[%s7803_s17 + $0x20] sm:$0xff] %v5181_v26  ;;  %v5182_v18 = vpack.c.bf16 %v4581_v58, %v4580_v23  ;;  %v4377_v35 = vpop.f32.mrb[156].mxu0  ;;  %v5940_v26 = vld [vmem:[%s6129_s21 + $0x60] sm:$0xff] }
 0x4da   : > { %v4378_v14 = vadd.f32 %v4377_v35, %v7787_v15  ;;  %v4379_v56 = vpop.f32.mrb[157].mxu0  ;;  %v4530_v58 = vunpack.c.l.bf16 %v5940_v26 }
 0x4db   : > { %4831 = vst [vmem:[%s7803_s17 + $0x28] sm:$0xff] %v5182_v18  ;;  %v4380_v50 = vadd.f32 %v4379_v56, %v7790_v46  ;;  %v4381_v51 = vpop.f32.mrb[158].mxu0  ;;  %v4531_v18 = vunpack.c.h.bf16 %v5940_v26 }
 0x4dc   : > { %v4582_v17 = vadd.f32 %v4518_v57, %v4378_v14  ;;  %v4382_v40 = vadd.f32 %v4381_v51, %v7787_v15  ;;  %v4383_v39 = vpop.f32.mrb[159].mxu0  ;;  %v5941_v14 = vld [vmem:[%s6129_s21 + $0x68] sm:$0xff] }
 0x4dd   : > { %v4583_v7 = vadd.f32 %v4519_v44, %v4380_v50  ;;  %v4384_v10 = vadd.f32 %v4383_v39, %v7790_v46  ;;  %v4532_v56 = vunpack.c.l.bf16 %v5941_v14  ;;  %v4533_v50 = vunpack.c.h.bf16 %v5941_v14 }
 0x4de   : > { %v4584_v24 = vadd.f32 %v4520_v36, %v4382_v40 }
 0x4df   : > { %v5183_v12 = vpack.c.bf16 %v4583_v7, %v4582_v17  ;;  %v4585_v62 = vadd.f32 %v4521_v1, %v4384_v10 }
 0x4e1   : > { %4832 = vst [vmem:[%s7803_s17 + $0x30] sm:$0xff] %v5183_v12  ;;  %v5184_v61 = vpack.c.bf16 %v4585_v62, %v4584_v24  ;;  %v4387_v38 = vpop.f32.mrb[160].mxu0  ;;  %v5942_v12 = vld [vmem:[%s6129_s21 + $0x70] sm:$0xff] }
 0x4e2   : > { %v4388_v59 = vadd.f32 %v4387_v38, %v7787_v15  ;;  %v4389_v22 = vpop.f32.mrb[161].mxu0  ;;  %v4534_v62 = vunpack.c.l.bf16 %v5942_v12 }
 0x4e3   : > { %4833 = vst [vmem:[%s7803_s17 + $0x38] sm:$0xff] %v5184_v61  ;;  %v4390_v25 = vadd.f32 %v4389_v22, %v7790_v46  ;;  %v4391_v30 = vpop.f32.mrb[162].mxu0  ;;  %v4535_v61 = vunpack.c.h.bf16 %v5942_v12 }
 0x4e4   : > { %v4586_v3 = vadd.f32 %v4522_v37, %v4388_v59  ;;  %v4392_v8 = vadd.f32 %v4391_v30, %v7787_v15  ;;  %v4393_v34 = vpop.f32.mrb[163].mxu0  ;;  %v5943_v59 = vld [vmem:[%s6129_s21 + $0x78] sm:$0xff] }
 0x4e5   : > { %v4587_v60 = vadd.f32 %v4523_v63, %v4390_v25  ;;  %v4394_v28 = vadd.f32 %v4393_v34, %v7790_v46  ;;  %v4536_v22 = vunpack.c.l.bf16 %v5943_v59  ;;  %v4537_v25 = vunpack.c.h.bf16 %v5943_v59 }
 0x4e6   : > { %v4588_v33 = vadd.f32 %v4524_v16, %v4392_v8 }
 0x4e7   : > { %v5185_v41 = vpack.c.bf16 %v4587_v60, %v4586_v3  ;;  %v4589_v19 = vadd.f32 %v4525_v48, %v4394_v28 }
 0x4e9   : > { %4834 = vst [vmem:[%s7803_s17 + $0x40] sm:$0xff] %v5185_v41  ;;  %v5186_v53 = vpack.c.bf16 %v4589_v19, %v4588_v33  ;;  %v4397_v9 = vpop.f32.mrb[164].mxu0  ;;  %v5944_v41 = vld [vmem:[%s6129_s21 + $0x80] sm:$0xff] }
 0x4ea   : > { %v4398_v32 = vadd.f32 %v4397_v9, %v7787_v15  ;;  %v4399_v31 = vpop.f32.mrb[165].mxu0  ;;  %v4538_v19 = vunpack.c.l.bf16 %v5944_v41 }
 0x4eb   : > { %4835 = vst [vmem:[%s7803_s17 + $0x48] sm:$0xff] %v5186_v53  ;;  %v4400_v47 = vadd.f32 %v4399_v31, %v7790_v46  ;;  %v4401_v43 = vpop.f32.mrb[166].mxu0  ;;  %v4539_v53 = vunpack.c.h.bf16 %v5944_v41 }
 0x4ec   : > { %v4590_v6 = vadd.f32 %v4526_v54, %v4398_v32  ;;  %v4402_v52 = vadd.f32 %v4401_v43, %v7787_v15  ;;  %v4403_v4 = vpop.f32.mrb[167].mxu0  ;;  %v5945_v32 = vld [vmem:[%s6129_s21 + $0x88] sm:$0xff] }
 0x4ed   : > { %v4591_v5 = vadd.f32 %v4527_v27, %v4400_v47  ;;  %v4404_v49 = vadd.f32 %v4403_v4, %v7790_v46  ;;  %v4540_v31 = vunpack.c.l.bf16 %v5945_v32  ;;  %v4541_v47 = vunpack.c.h.bf16 %v5945_v32 }
 0x4ee   : > { %v4592_v20 = vadd.f32 %v4528_v21, %v4402_v52 }
 0x4ef   : > { %v5187_v45 = vpack.c.bf16 %v4591_v5, %v4590_v6  ;;  %v4593_v23 = vadd.f32 %v4529_v2, %v4404_v49 }
 0x4f1   : > { %4836 = vst [vmem:[%s7803_s17 + $0x50] sm:$0xff] %v5187_v45  ;;  %v5188_v0 = vpack.c.bf16 %v4593_v23, %v4592_v20  ;;  %v4407_v57 = vpop.f32.mrb[168].mxu0  ;;  %v5946_v45 = vld [vmem:[%s6129_s21 + $0x90] sm:$0xff] }
 0x4f2   : > { %v4408_v35 = vadd.f32 %v4407_v57, %v7787_v15  ;;  %v4409_v44 = vpop.f32.mrb[169].mxu0  ;;  %v4542_v23 = vunpack.c.l.bf16 %v5946_v45 }
 0x4f3   : > { %4837 = vst [vmem:[%s7803_s17 + $0x58] sm:$0xff] %v5188_v0  ;;  %v4410_v42 = vadd.f32 %v4409_v44, %v7790_v46  ;;  %v4411_v36 = vpop.f32.mrb[170].mxu0  ;;  %v4543_v0 = vunpack.c.h.bf16 %v5946_v45 }
 0x4f4   : > { %v4594_v51 = vadd.f32 %v4530_v58, %v4408_v35  ;;  %v4412_v1 = vadd.f32 %v4411_v36, %v7787_v15  ;;  %v4413_v17 = vpop.f32.mrb[171].mxu0  ;;  %v5947_v35 = vld [vmem:[%s6129_s21 + $0x98] sm:$0xff] }
 0x4f5   : > { %v4595_v40 = vadd.f32 %v4531_v18, %v4410_v42  ;;  %v4414_v39 = vadd.f32 %v4413_v17, %v7790_v46  ;;  %v4544_v44 = vunpack.c.l.bf16 %v5947_v35  ;;  %v4545_v42 = vunpack.c.h.bf16 %v5947_v35 }
 0x4f6   : > { %v4596_v7 = vadd.f32 %v4532_v56, %v4412_v1 }
 0x4f7   : > { %v5189_v10 = vpack.c.bf16 %v4595_v40, %v4594_v51  ;;  %v4597_v24 = vadd.f32 %v4533_v50, %v4414_v39 }
 0x4f9   : > { %4838 = vst [vmem:[%s7803_s17 + $0x60] sm:$0xff] %v5189_v10  ;;  %v5190_v11 = vpack.c.bf16 %v4597_v24, %v4596_v7  ;;  %v4417_v37 = vpop.f32.mrb[172].mxu0  ;;  %v5948_v10 = vld [vmem:[%s6129_s21 + $0xa0] sm:$0xff] }
 0x4fa   : > { %v4418_v38 = vadd.f32 %v4417_v37, %v7787_v15  ;;  %v4419_v63 = vpop.f32.mrb[173].mxu0  ;;  %v4546_v24 = vunpack.c.l.bf16 %v5948_v10 }
 0x4fb   : > { %4839 = vst [vmem:[%s7803_s17 + $0x68] sm:$0xff] %v5190_v11  ;;  %v4420_v55 = vadd.f32 %v4419_v63, %v7790_v46  ;;  %v4421_v16 = vpop.f32.mrb[174].mxu0  ;;  %v4547_v11 = vunpack.c.h.bf16 %v5948_v10 }
 0x4fc   : > { %v4598_v30 = vadd.f32 %v4534_v62, %v4418_v38  ;;  %v4422_v48 = vadd.f32 %v4421_v16, %v7787_v15  ;;  %v4423_v3 = vpop.f32.mrb[175].mxu0  ;;  %v5949_v38 = vld [vmem:[%s6129_s21 + $0xa8] sm:$0xff] }
 0x4fd   : > { %v4599_v8 = vadd.f32 %v4535_v61, %v4420_v55  ;;  %v4424_v34 = vadd.f32 %v4423_v3, %v7790_v46  ;;  %v4548_v63 = vunpack.c.l.bf16 %v5949_v38  ;;  %v4549_v55 = vunpack.c.h.bf16 %v5949_v38 }
 0x4fe   : > { %v4600_v60 = vadd.f32 %v4536_v22, %v4422_v48 }
 0x4ff   : > { %v5191_v28 = vpack.c.bf16 %v4599_v8, %v4598_v30  ;;  %v4601_v33 = vadd.f32 %v4537_v25, %v4424_v34 }
 0x501   : > { %4840 = vst [vmem:[%s7803_s17 + $0x70] sm:$0xff] %v5191_v28  ;;  %v5192_v13 = vpack.c.bf16 %v4601_v33, %v4600_v60  ;;  %v4427_v54 = vpop.f32.mrb[176].mxu0  ;;  %v5950_v28 = vld [vmem:[%s6129_s21 + $0xb0] sm:$0xff] }
 0x502   : > { %v4428_v9 = vadd.f32 %v4427_v54, %v7787_v15  ;;  %v4429_v27 = vpop.f32.mrb[177].mxu0  ;;  %v4550_v33 = vunpack.c.l.bf16 %v5950_v28 }
 0x503   : > { %4841 = vst [vmem:[%s7803_s17 + $0x78] sm:$0xff] %v5192_v13  ;;  %v4430_v29 = vadd.f32 %v4429_v27, %v7790_v46  ;;  %v4431_v21 = vpop.f32.mrb[178].mxu0  ;;  %v4551_v13 = vunpack.c.h.bf16 %v5950_v28 }
 0x504   : > { %v4602_v43 = vadd.f32 %v4538_v19, %v4428_v9  ;;  %v4432_v2 = vadd.f32 %v4431_v21, %v7787_v15  ;;  %v4433_v6 = vpop.f32.mrb[179].mxu0  ;;  %v5951_v9 = vld [vmem:[%s6129_s21 + $0xb8] sm:$0xff] }
 0x505   : > { %v4603_v52 = vadd.f32 %v4539_v53, %v4430_v29  ;;  %v4434_v4 = vadd.f32 %v4433_v6, %v7790_v46  ;;  %v4552_v27 = vunpack.c.l.bf16 %v5951_v9  ;;  %v4553_v29 = vunpack.c.h.bf16 %v5951_v9 }
 0x506   : > { %v4604_v5 = vadd.f32 %v4540_v31, %v4432_v2 }
 0x507   : > { %v5193_v49 = vpack.c.bf16 %v4603_v52, %v4602_v43  ;;  %v4605_v20 = vadd.f32 %v4541_v47, %v4434_v4 }
 0x509   : > { %4842 = vst [vmem:[%s7803_s17 + $0x80] sm:$0xff] %v5193_v49  ;;  %v5194_v26 = vpack.c.bf16 %v4605_v20, %v4604_v5  ;;  %v4437_v58 = vpop.f32.mrb[180].mxu0  ;;  %v5952_v49 = vld [vmem:[%s6129_s21 + $0xc0] sm:$0xff] }
 0x50a   : > { %v4438_v57 = vadd.f32 %v4437_v58, %v7787_v15  ;;  %v4439_v18 = vpop.f32.mrb[181].mxu0  ;;  %v4554_v20 = vunpack.c.l.bf16 %v5952_v49 }
 0x50b   : > { %4843 = vst [vmem:[%s7803_s17 + $0x88] sm:$0xff] %v5194_v26  ;;  %v4440_v14 = vadd.f32 %v4439_v18, %v7790_v46  ;;  %v4441_v56 = vpop.f32.mrb[182].mxu0  ;;  %v4555_v26 = vunpack.c.h.bf16 %v5952_v49 }
 0x50c   : > { %v4606_v36 = vadd.f32 %v4542_v23, %v4438_v57  ;;  %v4442_v50 = vadd.f32 %v4441_v56, %v7787_v15  ;;  %v4443_v51 = vpop.f32.mrb[183].mxu0  ;;  %v5953_v57 = vld [vmem:[%s6129_s21 + $0xc8] sm:$0xff] }
 0x50d   : > { %v4607_v1 = vadd.f32 %v4543_v0, %v4440_v14  ;;  %v4444_v17 = vadd.f32 %v4443_v51, %v7790_v46  ;;  %v4556_v18 = vunpack.c.l.bf16 %v5953_v57  ;;  %v4557_v14 = vunpack.c.h.bf16 %v5953_v57 }
 0x50e   : > { %v4608_v40 = vadd.f32 %v4544_v44, %v4442_v50 }
 0x50f   : > { %v5195_v39 = vpack.c.bf16 %v4607_v1, %v4606_v36  ;;  %v4609_v7 = vadd.f32 %v4545_v42, %v4444_v17 }
 0x511   : > { %4844 = vst [vmem:[%s7803_s17 + $0x90] sm:$0xff] %v5195_v39  ;;  %v5196_v12 = vpack.c.bf16 %v4609_v7, %v4608_v40  ;;  %v4447_v62 = vpop.f32.mrb[184].mxu0  ;;  %v5954_v39 = vld [vmem:[%s6129_s21 + $0xd0] sm:$0xff] }
 0x512   : > { %v4448_v37 = vadd.f32 %v4447_v62, %v7787_v15  ;;  %v4449_v61 = vpop.f32.mrb[185].mxu0  ;;  %v4558_v7 = vunpack.c.l.bf16 %v5954_v39 }
 0x513   : > { %4845 = vst [vmem:[%s7803_s17 + $0x98] sm:$0xff] %v5196_v12  ;;  %v4450_v59 = vadd.f32 %v4449_v61, %v7790_v46  ;;  %v4451_v22 = vpop.f32.mrb[186].mxu0  ;;  %v4559_v12 = vunpack.c.h.bf16 %v5954_v39 }
 0x514   : > { %v4610_v16 = vadd.f32 %v4546_v24, %v4448_v37  ;;  %v4452_v25 = vadd.f32 %v4451_v22, %v7787_v15  ;;  %v4453_v30 = vpop.f32.mrb[187].mxu0  ;;  %v5955_v37 = vld [vmem:[%s6129_s21 + $0xd8] sm:$0xff] }
 0x515   : > { %v4611_v48 = vadd.f32 %v4547_v11, %v4450_v59  ;;  %v4454_v3 = vadd.f32 %v4453_v30, %v7790_v46  ;;  %v4560_v61 = vunpack.c.l.bf16 %v5955_v37  ;;  %v4561_v59 = vunpack.c.h.bf16 %v5955_v37 }
 0x516   : > { %v4612_v8 = vadd.f32 %v4548_v63, %v4452_v25 }
 0x517   : > { %v5197_v34 = vpack.c.bf16 %v4611_v48, %v4610_v16  ;;  %v4613_v60 = vadd.f32 %v4549_v55, %v4454_v3 }
 0x519   : > { %4846 = vst [vmem:[%s7803_s17 + $0xa0] sm:$0xff] %v5197_v34  ;;  %v5198_v41 = vpack.c.bf16 %v4613_v60, %v4612_v8  ;;  %v4457_v19 = vpop.f32.mrb[188].mxu0  ;;  %v5956_v34 = vld [vmem:[%s6129_s21 + $0xe0] sm:$0xff] }
 0x51a   : > { %v4458_v54 = vadd.f32 %v4457_v19, %v7787_v15  ;;  %v4459_v53 = vpop.f32.mrb[189].mxu0  ;;  %v4562_v60 = vunpack.c.l.bf16 %v5956_v34 }
 0x51b   : > { %4847 = vst [vmem:[%s7803_s17 + $0xa8] sm:$0xff] %v5198_v41  ;;  %v4460_v32 = vadd.f32 %v4459_v53, %v7790_v46  ;;  %v4461_v31 = vpop.f32.mrb[190].mxu0  ;;  %v4563_v41 = vunpack.c.h.bf16 %v5956_v34 }
 0x51c   : > { %v4614_v21 = vadd.f32 %v4550_v33, %v4458_v54  ;;  %v4462_v47 = vadd.f32 %v4461_v31, %v7787_v15  ;;  %v4463_v43 = vpop.f32.mrb[191].mxu0  ;;  %v5957_v54 = vld [vmem:[%s6129_s21 + $0xe8] sm:$0xff] }
 0x51d   : > { %v4615_v2 = vadd.f32 %v4551_v13, %v4460_v32  ;;  %v4464_v6 = vadd.f32 %v4463_v43, %v7790_v46  ;;  %v4564_v53 = vunpack.c.l.bf16 %v5957_v54  ;;  %v4565_v32 = vunpack.c.h.bf16 %v5957_v54 }
 0x51e   : > { %v4616_v52 = vadd.f32 %v4552_v27, %v4462_v47 }
 0x51f   : > { %v5199_v4 = vpack.c.bf16 %v4615_v2, %v4614_v21  ;;  %v4617_v5 = vadd.f32 %v4553_v29, %v4464_v6 }
 0x521   : > { %4848 = vst [vmem:[%s7803_s17 + $0xb0] sm:$0xff] %v5199_v4  ;;  %v5200_v45 = vpack.c.bf16 %v4617_v5, %v4616_v52  ;;  %v4467_v23 = vpop.f32.mrb[192].mxu0  ;;  %v5958_v4 = vld [vmem:[%s6129_s21 + $0xf0] sm:$0xff] }
 0x522   : > { %v4468_v58 = vadd.f32 %v4467_v23, %v7787_v15  ;;  %v4469_v0 = vpop.f32.mrb[193].mxu0  ;;  %v4566_v5 = vunpack.c.l.bf16 %v5958_v4 }
 0x523   : > { %4849 = vst [vmem:[%s7803_s17 + $0xb8] sm:$0xff] %v5200_v45  ;;  %v4470_v35 = vadd.f32 %v4469_v0, %v7790_v46  ;;  %v4471_v44 = vpop.f32.mrb[194].mxu0  ;;  %v4567_v45 = vunpack.c.h.bf16 %v5958_v4 }
 0x524   : > { %v4618_v56 = vadd.f32 %v4554_v20, %v4468_v58  ;;  %v4472_v42 = vadd.f32 %v4471_v44, %v7787_v15  ;;  %v4473_v36 = vpop.f32.mrb[195].mxu0  ;;  %v5959_v58 = vld [vmem:[%s6129_s21 + $0xf8] sm:$0xff] }
 0x525   : > { %v4619_v50 = vadd.f32 %v4555_v26, %v4470_v35  ;;  %v4474_v51 = vadd.f32 %v4473_v36, %v7790_v46  ;;  %v4568_v0 = vunpack.c.l.bf16 %v5959_v58  ;;  %v4569_v35 = vunpack.c.h.bf16 %v5959_v58 }
 0x526   : > { %v4620_v1 = vadd.f32 %v4556_v18, %v4472_v42 }
 0x527   : > { %v5201_v17 = vpack.c.bf16 %v4619_v50, %v4618_v56  ;;  %v4621_v40 = vadd.f32 %v4557_v14, %v4474_v51 }
 0x529   : > { %4850 = vst [vmem:[%s7803_s17 + $0xc0] sm:$0xff] %v5201_v17  ;;  %v5202_v10 = vpack.c.bf16 %v4621_v40, %v4620_v1  ;;  %v4477_v24 = vpop.f32.mrb[196].mxu0 }
 0x52a   : > { %v4478_v62 = vadd.f32 %v4477_v24, %v7787_v15  ;;  %v4479_v11 = vpop.f32.mrb[197].mxu0 }
 0x52b   : > { %4851 = vst [vmem:[%s7803_s17 + $0xc8] sm:$0xff] %v5202_v10  ;;  %v4480_v38 = vadd.f32 %v4479_v11, %v7790_v46  ;;  %v4481_v63 = vpop.f32.mrb[198].mxu0 }
 0x52c   : > { %v4622_v22 = vadd.f32 %v4558_v7, %v4478_v62  ;;  %v4482_v55 = vadd.f32 %v4481_v63, %v7787_v15  ;;  %v4483_v16 = vpop.f32.mrb[199].mxu0 }
 0x52d   : > { %v4623_v25 = vadd.f32 %v4559_v12, %v4480_v38  ;;  %v4484_v30 = vadd.f32 %v4483_v16, %v7790_v46 }
 0x52e   : > { %v4624_v48 = vadd.f32 %v4560_v61, %v4482_v55 }
 0x52f   : > { %v5203_v3 = vpack.c.bf16 %v4623_v25, %v4622_v22  ;;  %v4625_v8 = vadd.f32 %v4561_v59, %v4484_v30 }
 0x531   : > { %4852 = vst [vmem:[%s7803_s17 + $0xd0] sm:$0xff] %v5203_v3  ;;  %v5204_v28 = vpack.c.bf16 %v4625_v8, %v4624_v48  ;;  %v4487_v33 = vpop.f32.mrb[200].mxu0 }
 0x532   : > { %v4488_v19 = vadd.f32 %v4487_v33, %v7787_v15  ;;  %v4489_v13 = vpop.f32.mrb[201].mxu0 }
 0x533   : > { %4853 = vst [vmem:[%s7803_s17 + $0xd8] sm:$0xff] %v5204_v28  ;;  %v4490_v9 = vadd.f32 %v4489_v13, %v7790_v46  ;;  %v4491_v27 = vpop.f32.mrb[202].mxu0 }
 0x534   : > { %v4626_v31 = vadd.f32 %v4562_v60, %v4488_v19  ;;  %v4492_v29 = vadd.f32 %v4491_v27, %v7787_v15  ;;  %v4493_v21 = vpop.f32.mrb[203].mxu0 }
 0x535   : > { %v4627_v47 = vadd.f32 %v4563_v41, %v4490_v9  ;;  %v4494_v43 = vadd.f32 %v4493_v21, %v7790_v46 }
 0x536   : > { %v4628_v2 = vadd.f32 %v4564_v53, %v4492_v29 }
 0x537   : > { %v5205_v6 = vpack.c.bf16 %v4627_v47, %v4626_v31  ;;  %v4629_v52 = vadd.f32 %v4565_v32, %v4494_v43 }
 0x539   : > { %4854 = vst [vmem:[%s7803_s17 + $0xe0] sm:$0xff] %v5205_v6  ;;  %v5206_v49 = vpack.c.bf16 %v4629_v52, %v4628_v2  ;;  %v4497_v20 = vpop.f32.mrb[204].mxu0 }
 0x53a   : > { %v4498_v23 = vadd.f32 %v4497_v20, %v7787_v15  ;;  %v4499_v26 = vpop.f32.mrb[205].mxu0 }
 0x53b   : > { %4855 = vst [vmem:[%s7803_s17 + $0xe8] sm:$0xff] %v5206_v49  ;;  %v4500_v57 = vadd.f32 %v4499_v26, %v7790_v46  ;;  %v4501_v18 = vpop.f32.mrb[206].mxu0 }
 0x53c   : > { %v4630_v44 = vadd.f32 %v4566_v5, %v4498_v23  ;;  %v4502_v14 = vadd.f32 %v4501_v18, %v7787_v15  ;;  %v4503_v56 = vpop.f32.mrb[207].mxu0 }
 0x53d   : > { %v4631_v42 = vadd.f32 %v4567_v45, %v4500_v57  ;;  %v4504_v36 = vadd.f32 %v4503_v56, %v7790_v46 }
 0x53e   : > { %v4632_v50 = vadd.f32 %v4568_v0, %v4502_v14 }
 0x53f   : > { %v5207_v51 = vpack.c.bf16 %v4631_v42, %v4630_v44  ;;  %v4633_v1 = vadd.f32 %v4569_v35, %v4504_v36 }
 0x541   : > { %4856 = vst [vmem:[%s7803_s17 + $0xf0] sm:$0xff] %v5207_v51  ;;  %v5208_v17 = vpack.c.bf16 %v4633_v1, %v4632_v50 }
 0x543   : > { %4857 = vst [vmem:[%s7803_s17 + $0xf8] sm:$0xff] %v5208_v17 }
 0x544 PF: > { %s20_s13 = sadd.s32 1, %s5966_s13  }
 0x545   : > { %p17_p10 = scmp.ge.s32.totalorder %s20_s13, 4  }
 0x547   :  { %19 = sbr.rel (!%p17_p10) target bundleno = 1 (0x1), region = 97 }

// kernel: _lambda_.24
= control target key start
LH: loop header
LB: loop body
LE: loop exit
PB: predicated region body
PF: predicated region fallthrough
CT: control target
= control target key end

     0   :  { %s277_s6 = smov 0   ;;  %s338_s0 = inlined_call_operand.vmem [shape: bf16[8,8,2,256], index: 0, kind: input, shape index: {}]   ;;  %s339_s1 = inlined_call_operand.vmem [shape: bf16[4,4,2,256], index: 1, kind: output, shape index: {}]  }
   0x1 LB: > { %s240_s7 = sadd.s32 4294967295, %s265_s6   ;;  %p244_p0 = scmp.ge.s32.totalorder %s265_s6, 1  ;;  %s265_s6 = sphi %s277_s6, %s11_s6  }
   0x2   : > { %p88_p1 = scmp.lt.s32.totalorder %s265_s6, 3 }
   0x4   : > { %p89_p2 = pnand %p244_p0, %p88_p1 }
   0x5   : > { %s245_s8 = sshll.u32 (!%p89_p2), %s240_s7, 2  ;;  %s247_s9 = sshll.u32 (!%p89_p2), %s240_s7, 1 }
   0x6   : > { %92 = sbr.rel (%p89_p2) target bundleno = 33 (0x21), region = 24  ;;  %p109_p3 = scmp.lt.s32.totalorder (!%p89_p2), %s245_s8, 7 }
   0x7   : > { %p115_p4 = scmp.lt.s32.totalorder (!%p89_p2), %s247_s9, 3 }
   0xd   : > { %s341_s8 = smov (!%p109_p3, %s245_s8), 7  ;;  %s343_s9 = smov (!%p115_p4, %s247_s9), 3 }
   0xe   : > { %s246_s10 = sshll.u32 %s341_s8, 4  ;;  %s248_s14 = sshll.u32 %s343_s9, 3 }
   0xf   : > { %s288_s13 = scalar_lea.vmem %s338_s0, %s246_s10  ;;  %s302_s17 = scalar_lea.vmem %s339_s1, %s248_s14 }
  0x10   : > { %v120_v0 = vld [vmem:[%s288_s13] sm:$0x3]  ;;  %v121_v1 = vld [vmem:[%s288_s13 + $0x2] sm:$0x3]  ;;  %v128_v2 = vld [vmem:[%s288_s13 + $0x10] sm:$0x3] }
  0x11   : > { %v129_v3 = vld [vmem:[%s288_s13 + $0x12] sm:$0x3]  ;;  %v152_v4 = vmax.bf16 %v128_v2, %v120_v0  ;;  %v122_v5 = vld [vmem:[%s288_s13 + $0x4] sm:$0x3]  ;;  %v123_v6 = vld [vmem:[%s288_s13 + $0x6] sm:$0x3] }
  0x12   : > { %v153_v7 = vmax.bf16 %v129_v3, %v121_v1  ;;  %v130_v8 = vld [vmem:[%s288_s13 + $0x14] sm:$0x3]  ;;  %v131_v9 = vld [vmem:[%s288_s13 + $0x16] sm:$0x3]  ;;  %v124_v10 = vld [vmem:[%s288_s13 + $0x8] sm:$0x3] }
  0x13   : > { %v154_v11 = vmax.bf16 %v130_v8, %v122_v5  ;;  %v155_v12 = vmax.bf16 %v131_v9, %v123_v6  ;;  %v125_v13 = vld [vmem:[%s288_s13 + $0xa] sm:$0x3]  ;;  %v132_v14 = vld [vmem:[%s288_s13 + $0x18] sm:$0x3]  ;;  %v133_v15 = vld [vmem:[%s288_s13 + $0x1a] sm:$0x3] }
  0x14   : > { %v168_v16 = vmax.bf16 %v153_v7, %v152_v4  ;;  %v156_v17 = vmax.bf16 %v132_v14, %v124_v10  ;;  %v157_v18 = vmax.bf16 %v133_v15, %v125_v13  ;;  %v126_v19 = vld [vmem:[%s288_s13 + $0xc] sm:$0x3]  ;;  %v127_v20 = vld [vmem:[%s288_s13 + $0xe] sm:$0x3]  ;;  %v134_v21 = vld [vmem:[%s288_s13 + $0x1c] sm:$0x3] }
  0x15   : > { %v169_v22 = vmax.bf16 %v155_v12, %v154_v11  ;;  %v135_v23 = vld [vmem:[%s288_s13 + $0x1e] sm:$0x3]  ;;  %v158_v24 = vmax.bf16 %v134_v21, %v126_v19  ;;  %v136_v25 = vld [vmem:[%s288_s13 + $0x20] sm:$0x3]  ;;  %v137_v26 = vld [vmem:[%s288_s13 + $0x22] sm:$0x3] }
  0x16   : > { %176 = vst [vmem:[%s302_s17] sm:$0x3] %v168_v16  ;;  %v170_v27 = vmax.bf16 %v157_v18, %v156_v17  ;;  %v159_v28 = vmax.bf16 %v135_v23, %v127_v20  ;;  %v144_v29 = vld [vmem:[%s288_s13 + $0x30] sm:$0x3]  ;;  %v145_v30 = vld [vmem:[%s288_s13 + $0x32] sm:$0x3] }
  0x17   : > { %v138_v31 = vld [vmem:[%s288_s13 + $0x24] sm:$0x3]  ;;  %177 = vst [vmem:[%s302_s17 + $0x2] sm:$0x3] %v169_v22  ;;  %v160_v32 = vmax.bf16 %v144_v29, %v136_v25  ;;  %v161_v33 = vmax.bf16 %v145_v30, %v137_v26  ;;  %v139_v34 = vld [vmem:[%s288_s13 + $0x26] sm:$0x3] }
  0x18   : > { %v146_v35 = vld [vmem:[%s288_s13 + $0x34] sm:$0x3]  ;;  %v147_v36 = vld [vmem:[%s288_s13 + $0x36] sm:$0x3]  ;;  %178 = vst [vmem:[%s302_s17 + $0x4] sm:$0x3] %v170_v27  ;;  %v171_v37 = vmax.bf16 %v159_v28, %v158_v24 }
  0x19   : > { %v162_v38 = vmax.bf16 %v146_v35, %v138_v31  ;;  %v163_v39 = vmax.bf16 %v147_v36, %v139_v34  ;;  %v140_v40 = vld [vmem:[%s288_s13 + $0x28] sm:$0x3]  ;;  %v141_v41 = vld [vmem:[%s288_s13 + $0x2a] sm:$0x3]  ;;  %v148_v42 = vld [vmem:[%s288_s13 + $0x38] sm:$0x3]  ;;  %v172_v43 = vmax.bf16 %v161_v33, %v160_v32 }
  0x1a   : > { %v149_v44 = vld [vmem:[%s288_s13 + $0x3a] sm:$0x3]  ;;  %v164_v45 = vmax.bf16 %v148_v42, %v140_v40  ;;  %v142_v46 = vld [vmem:[%s288_s13 + $0x2c] sm:$0x3]  ;;  %v143_v47 = vld [vmem:[%s288_s13 + $0x2e] sm:$0x3] }
  0x1b   : > { %179 = vst [vmem:[%s302_s17 + $0x6] sm:$0x3] %v171_v37  ;;  %v173_v48 = vmax.bf16 %v163_v39, %v162_v38  ;;  %v165_v49 = vmax.bf16 %v149_v44, %v141_v41  ;;  %v150_v50 = vld [vmem:[%s288_s13 + $0x3c] sm:$0x3]  ;;  %v151_v51 = vld [vmem:[%s288_s13 + $0x3e] sm:$0x3] }
  0x1c   : > { %180 = vst [vmem:[%s302_s17 + $0x8] sm:$0x3] %v172_v43  ;;  %v166_v52 = vmax.bf16 %v150_v50, %v142_v46  ;;  %v167_v53 = vmax.bf16 %v151_v51, %v143_v47 }
  0x1d   : > { %181 = vst [vmem:[%s302_s17 + $0xa] sm:$0x3] %v173_v48  ;;  %v174_v54 = vmax.bf16 %v165_v49, %v164_v45 }
  0x1e   : > { %v175_v55 = vmax.bf16 %v167_v53, %v166_v52 }
  0x1f   : > { %182 = vst [vmem:[%s302_s17 + $0xc] sm:$0x3] %v174_v54 }
  0x20   : > { %183 = vst [vmem:[%s302_s17 + $0xe] sm:$0x3] %v175_v55 }
  0x21 PF: > { %s11_s6 = sadd.s32 1, %s265_s6  }
  0x22   : > { %p8_p5 = scmp.ge.s32.totalorder %s11_s6, 4  }
  0x24   :  { %10 = sbr.rel (!%p8_p5) target bundleno = 1 (0x1), region = 54 }

// kernel: _lambda_.20
= control target key start
LH: loop header
LB: loop body
LE: loop exit
PB: predicated region body
PF: predicated region fallthrough
CT: control target
= control target key end

     0   :  { %s3232_s13 = smov 0   ;;  %s4035_s0 = inlined_call_operand.vmem [shape: bf16[128,256], index: 0, kind: input, shape index: {}, may-alias: {0,1,2}]   ;;  %s4036_s1 = inlined_call_operand.vmem [shape: bf16[128,256], index: 1, kind: input, shape index: {}, may-alias: {0,1,2}]   ;;  %s4037_s2 = inlined_call_operand.vmem [shape: bf16[128,256], index: 2, kind: input, shape index: {}, may-alias: {0,1,2}]   ;;  %s4038_s3 = inlined_call_operand.vmem [shape: f32[2,256], index: 3, kind: input, shape index: {}]   ;;  %s4039_s4 = inlined_call_operand.vmem [shape: bf16[256,128], index: 4, kind: input, shape index: {}]   ;;  %s4040_s5 = inlined_call_operand.vmem [shape: f32[2,128], index: 5, kind: input, shape index: {}]   ;;  %s4041_s6 = inlined_call_operand.vmem [shape: bf16[1152,128], index: 6, kind: input, shape index: {}]   ;;  %s4042_s7 = inlined_call_operand.vmem [shape: f32[2,128], index: 7, kind: input, shape index: {}]   ;;  %s4043_s8 = inlined_call_operand.vmem [shape: bf16[128,256], index: 8, kind: input, shape index: {}]   ;;  %s4044_s9 = inlined_call_operand.vmem [shape: f32[1,256], index: 9, kind: input, shape index: {}]   ;;  %s4045_s10 = inlined_call_operand.vmem [shape: bf16[128,256], index: 10, kind: output, shape index: {}]  }
   0x1 LB: > { %s3238_s14 = sadd.s32 4294967295, %s3174_s13   ;;  %p2588_p0 = scmp.ge.s32.totalorder %s3174_s13, 1  ;;  %s3174_s13 = sphi %s3232_s13, %s20_s13  }
   0x2   : > { %p370_p1 = scmp.lt.s32.totalorder %s3174_s13, 3 }
   0x4   : > { %p371_p2 = pnand %p2588_p0, %p370_p1 }
   0x5   : > { %v3034_v0 = vld [vmem:[%s4039_s4 + $0x40] sm:$0xff] (!%p371_p2)   ;;  %s2589_s17 = sshll.u32 (!%p371_p2), %s3238_s14, 2  ;;  %v3036_v2 = vld [vmem:[%s4039_s4 + $0x48] sm:$0xff] (!%p371_p2)   ;;  %v3038_v4 = vld [vmem:[%s4039_s4 + $0x50] sm:$0xff] (!%p371_p2)   ;;  %v573_v5 = vlaneseq (!%p371_p2)  ;;  %s2594_s25 = sshll.u32 (!%p371_p2), %s3238_s14, 3 }
   0x6   : > { %374 = sbr.rel (%p371_p2) target bundleno = 847 (0x34f), region = 60  ;;  %v3035_v1 = vld [vmem:[%s4039_s4] sm:$0xff] (!%p371_p2)   ;;  %s2590_s20 = sadd.s32 (!%p371_p2), 4294967295, %s2589_s17  ;;  %2761 = vmatprep.subr.bf16.mxu0 (!%p371_p2), %v3034_v0  ;;  %v3037_v3 = vld [vmem:[%s4039_s4 + $0x8] sm:$0xff] (!%p371_p2)   ;;  %v3039_v6 = vld [vmem:[%s4039_s4 + $0x10] sm:$0xff] (!%p371_p2)  }
   0x7   : > { %p432_p3 = scmp.gt.s32.totalorder (!%p371_p2), %s2590_s20, 0  ;;  %2762 = vmatpush3.bf16.msra.mxu0 (!%p371_p2), %v3035_v1  ;;  %s453_s28 = sadd.s32 (!%p371_p2), 4, %s2589_s17  ;;  %v3040_v7 = vld [vmem:[%s4039_s4 + $0x58] sm:$0xff] (!%p371_p2)   ;;  %v3264_v8 = vshrl.u32 (!%p371_p2), %v573_v5, 7  ;;  %v3042_v10 = vld [vmem:[%s4039_s4 + $0x60] sm:$0xff] (!%p371_p2)   ;;  %v3044_v14 = vld [vmem:[%s4039_s4 + $0x68] sm:$0xff] (!%p371_p2)  }
   0x8   : > { %2763 = vmatprep.subr.bf16.mxu0 (!%p371_p2), %v3036_v2  ;;  %p454_p5 = scmp.lt.s32.totalorder (!%p371_p2), %s453_s28, 7  ;;  %v3041_v9 = vld [vmem:[%s4039_s4 + $0x18] sm:$0xff] (!%p371_p2)   ;;  %v3043_v11 = vld [vmem:[%s4039_s4 + $0x20] sm:$0xff] (!%p371_p2)   ;;  %p446_p6 = scmp.lt.s32.totalorder (!%p371_p2), %s2594_s25, 15  ;;  %v3045_v16 = vld [vmem:[%s4039_s4 + $0x28] sm:$0xff] (!%p371_p2)  }
   0x9   : > { %v3279_v12 = vsub.s32 (!%p371_p2), 0, %v3264_v8  ;;  %v3283_v13 = vsub.s32 (!%p371_p2), 1, %v3264_v8  ;;  %v571_v18 = vld [vmem:[%s4038_s3] ss:$2 sm:$0x3] (!%p371_p2)  ;;  %v3046_v19 = vld [vmem:[%s4039_s4 + $0x70] sm:$0xff] (!%p371_p2)  }
   0xa   : > { %v2616_v22 = vld [vmem:[%s4038_s3 + $0x1] ss:$2 sm:$0x3] (!%p371_p2)  ;;  %v3047_v39 = vld [vmem:[%s4039_s4 + $0x30] sm:$0xff] (!%p371_p2)   ;;  %v3048_v48 = vld [vmem:[%s4039_s4 + $0x78] sm:$0xff] (!%p371_p2)   ;;  %p1104_p8 = scmp.eq.s32.totalorder (!%p371_p2), %s3238_s14, 0 }
   0xb   : > { %2764 = vmatpush3.bf16.msra.mxu0 (!%p371_p2), %v3037_v3  ;;  %v3301_v20 = vrot.slane (!%p371_p2), %v571_v18, %v3279_v12  ;;  %v3304_v21 = vrot.slane (!%p371_p2), %v571_v18, %v3283_v13  ;;  %v3311_v27 = vrot.slane (!%p371_p2), %v2616_v22, %v3279_v12  ;;  %v3314_v28 = vrot.slane (!%p371_p2), %v2616_v22, %v3283_v13  ;;  %v3049_v53 = vld [vmem:[%s4039_s4 + $0x38] sm:$0xff] (!%p371_p2)   ;;  %p1132_p9 = scmp.eq.s32.totalorder (!%p371_p2), %s3238_s14, 1 }
   0xc   : > { %2765 = vmatprep.subr.bf16.mxu0 (!%p371_p2), %v3038_v4  ;;  %vm1263_vm4 = vcmp.lt.s32.totalorder (!%p371_p2), %v3264_v8, 6  ;;  %vm1232_vm5 = vcmp.lt.s32.totalorder (!%p371_p2), %v3264_v8, 2 }
   0xd   : > { %s4071_s20 = smov (!%p432_p3, %s2590_s20), 0  ;;  %s4075_s28 = smov (!%p454_p5, %s453_s28), 7 }
   0xe   : > { %s2591_s27 = sshll.u32 %s4071_s20, 1  ;;  %s4077_s25 = smov (!%p446_p6, %s2594_s25), 15 }
   0xf   : > { %p435_p4 = scmp.lt.s32.totalorder %s2591_s27, 15  ;;  %2766 = vmatpush3.bf16.msra.mxu0 %v3039_v6  ;;  %s2598_s15 = sshll.u32 %s4075_s28, 1 }
  0x10   : > { %2767 = vmatprep.subr.bf16.mxu0 %v3040_v7  ;;  %s2750_s20 = sshll.u32 %s4077_s25, 3  ;;  %p457_p7 = scmp.lt.s32.totalorder %s2598_s15, 15 }
  0x11   : > { %s4073_s27 = smov (!%p435_p4, %s2591_s27), 15  ;;  %s3321_s22 = scalar_lea.vmem %s4036_s1, %s2750_s20 }
  0x12   : > { %s2749_s17 = sshll.u32 %s4073_s27, 3  ;;  %v475_v31 = vld [vmem:[%s3321_s22] sm:$0xff]  ;;  %v476_v32 = vld [vmem:[%s3321_s22 + $0x8] sm:$0xff]  ;;  %v477_v33 = vld [vmem:[%s3321_s22 + $0x10] sm:$0xff]  ;;  %s4079_s15 = smov (!%p457_p7, %s2598_s15), 15 }
  0x13   : > { %s439_s24 = scalar_lea.vmem %s4035_s0, %s2749_s17  ;;  %2768 = vmatpush3.bf16.msra.mxu0 %v3041_v9  ;;  %v2607_v36 = vcombine.high %v475_v31, %v476_v32  ;;  %v2606_v37 = vcombine.low %v475_v31, %v476_v32  ;;  %v478_v38 = vld [vmem:[%s3321_s22 + $0x18] sm:$0xff]  ;;  %s2751_s26 = sshll.u32 %s4079_s15, 3  ;;  %v479_v62 = vld [vmem:[%s3321_s22 + $0x20] sm:$0xff]  ;;  %v480_v63 = vld [vmem:[%s3321_s22 + $0x28] sm:$0xff] }
  0x14   : > { %2769 = vmatprep.subr.bf16.mxu0 %v3042_v10  ;;  %v3050_v15 = vld [vmem:[%s439_s24] ss:$8 sps:$4 sm:$0xff]   ;;  %v3052_v17 = vld [vmem:[%s439_s24 + $0x4] ss:$8 sps:$4 sm:$0xff]   ;;  %v2609_v42 = vcombine.high %v477_v33, %v478_v38  ;;  %v2608_v43 = vcombine.low %v477_v33, %v478_v38  ;;  %s3341_s30 = scalar_lea.vmem %s4037_s2, %s2751_s26  ;;  %v2610_v31 = vcombine.low %v479_v62, %v480_v63  ;;  %s4004_s28 = scalar_lea.vmem %s4045_s10, %s2750_s20 }
  0x15   : > { %v547_v23 = vunpack.c.l.bf16 %v3050_v15  ;;  %v549_v24 = vunpack.c.h.bf16 %v3050_v15  ;;  %v548_v25 = vunpack.c.l.bf16 %v3052_v17  ;;  %v550_v26 = vunpack.c.h.bf16 %v3052_v17  ;;  %v481_v15 = vld [vmem:[%s3321_s22 + $0x30] sm:$0xff]  ;;  %s1105_s27 = scalar_select %p1104_p8, 1, 0 }
  0x16   : > { %v552_v46 = vunpack.c.l.bf16 %v2607_v36  ;;  %v554_v47 = vunpack.c.h.bf16 %v2607_v36  ;;  %v551_v51 = vunpack.c.l.bf16 %v2606_v37  ;;  %v553_v52 = vunpack.c.h.bf16 %v2606_v37  ;;  %s3674_s19 = scalar_select %p1132_p9, 1, 0 }
  0x17   : > { %2770 = vmatpush3.bf16.msra.mxu0 %v3043_v11  ;;  %v583_v29 = vmul.f32 %v3301_v20, %v547_v23  ;;  %v585_v30 = vmul.f32 %v3301_v20, %v549_v24  ;;  %v584_v34 = vmul.f32 %v3304_v21, %v548_v25  ;;  %v586_v35 = vmul.f32 %v3304_v21, %v550_v26 }
  0x18   : > { %2771 = vmatprep.subr.bf16.mxu0 %v3044_v14  ;;  %v588_v56 = vmul.f32 %v3304_v21, %v552_v46  ;;  %v590_v57 = vmul.f32 %v3304_v21, %v554_v47  ;;  %v587_v59 = vmul.f32 %v3301_v20, %v551_v51  ;;  %v589_v60 = vmul.f32 %v3301_v20, %v553_v52 }
  0x19   : > { %v620_v40 = vadd.f32 %v3311_v27, %v583_v29  ;;  %v622_v41 = vadd.f32 %v3311_v27, %v585_v30  ;;  %v621_v44 = vadd.f32 %v3314_v28, %v584_v34  ;;  %v623_v45 = vadd.f32 %v3314_v28, %v586_v35 }
  0x1a   : > { %v556_v61 = vunpack.c.l.bf16 %v2609_v42  ;;  %v625_v1 = vadd.f32 %v3314_v28, %v588_v56  ;;  %v627_v2 = vadd.f32 %v3314_v28, %v590_v57  ;;  %v558_v3 = vunpack.c.h.bf16 %v2609_v42 }
  0x1b   : > { %2772 = vmatpush3.bf16.msra.mxu0 %v3045_v16  ;;  %v644_v49 = vmax.f32 %v620_v40, 0.0  ;;  %v646_v50 = vmax.f32 %v622_v41, 0.0  ;;  %v645_v54 = vmax.f32 %v621_v44, 0.0  ;;  %v647_v55 = vmax.f32 %v623_v45, 0.0  ;;  %v482_v16 = vld [vmem:[%s3321_s22 + $0x38] sm:$0xff] }
  0x1c   : > { %2773 = vmatprep.subr.bf16.mxu0 %v3046_v19  ;;  %v624_v4 = vadd.f32 %v3311_v27, %v587_v59  ;;  %v626_v5 = vadd.f32 %v3311_v27, %v589_v60  ;;  %v592_v6 = vmul.f32 %v3304_v21, %v556_v61  ;;  %v555_v7 = vunpack.c.l.bf16 %v2608_v43  ;;  %v3061_v44 = vld [vmem:[%s3341_s30 + $0x4] ss:$8 sps:$4 sm:$0xff]  }
  0x1d   : > { %v668_v58 = vpack.c.bf16 %v646_v50, %v644_v49  ;;  %v669_v0 = vpack.c.bf16 %v647_v55, %v645_v54  ;;  %v649_v9 = vmax.f32 %v625_v1, 0.0  ;;  %v651_v10 = vmax.f32 %v627_v2, 0.0 }
  0x1e   : > { %v594_v11 = vmul.f32 %v3304_v21, %v558_v3  ;;  %v557_v14 = vunpack.c.h.bf16 %v2608_v43  ;;  %v648_v17 = vmax.f32 %v624_v4, 0.0  ;;  %v650_v18 = vmax.f32 %v626_v5, 0.0 }
  0x1f   : > { %2774 = vmatpush3.bf16.msra.mxu0 %v3047_v39  ;;  %840 = vmatprep.mubr.bf16.mxu0 %v669_v0  ;;  %v629_v19 = vadd.f32 %v3314_v28, %v592_v6  ;;  %v591_v22 = vmul.f32 %v3301_v20, %v555_v7  ;;  %v671_v23 = vpack.c.bf16 %v651_v10, %v649_v9  ;;  %v559_v37 = vunpack.c.l.bf16 %v2610_v31 }
  0x20   : > { %2775 = vmatprep.subr.bf16.mxu0 %v3048_v48  ;;  %v631_v24 = vadd.f32 %v3314_v28, %v594_v11  ;;  %v593_v25 = vmul.f32 %v3301_v20, %v557_v14  ;;  %v2611_v26 = vcombine.high %v479_v62, %v480_v63  ;;  %v561_v38 = vunpack.c.h.bf16 %v2610_v31 }
  0x21   : > { %v653_v29 = vmax.f32 %v629_v19, 0.0  ;;  %v628_v30 = vadd.f32 %v3311_v27, %v591_v22  ;;  %v2613_v39 = vcombine.high %v481_v15, %v482_v16  ;;  %v670_v40 = vpack.c.bf16 %v650_v18, %v648_v17 }
  0x22   : > { %v655_v32 = vmax.f32 %v631_v24, 0.0  ;;  %v630_v33 = vadd.f32 %v3311_v27, %v593_v25  ;;  %v560_v34 = vunpack.c.l.bf16 %v2611_v26  ;;  %v562_v35 = vunpack.c.h.bf16 %v2611_v26 }
  0x23   : > { %2776 = vmatpush3.bf16.msra.mxu0 %v3049_v53  ;;  %v652_v36 = vmax.f32 %v628_v30, 0.0  ;;  %v595_v45 = vmul.f32 %v3301_v20, %v559_v37  ;;  %v597_v46 = vmul.f32 %v3301_v20, %v561_v38  ;;  %v564_v47 = vunpack.c.l.bf16 %v2613_v39  ;;  %v3063_v53 = vld [vmem:[%s3341_s30] ss:$8 sps:$4 sm:$0xff]  }
  0x24   : > { %v654_v41 = vmax.f32 %v630_v33, 0.0  ;;  %v596_v42 = vmul.f32 %v3304_v21, %v560_v34  ;;  %v598_v43 = vmul.f32 %v3304_v21, %v562_v35  ;;  %v566_v48 = vunpack.c.h.bf16 %v2613_v39  ;;  %v3066_v38 = vld [vmem:[%s4041_s6 + $0x148] sm:$0xff]  }
  0x25   : > { %v673_v49 = vpack.c.bf16 %v655_v32, %v653_v29  ;;  %v2612_v52 = vcombine.low %v481_v15, %v482_v16  ;;  %v632_v54 = vadd.f32 %v3311_v27, %v595_v45  ;;  %v634_v55 = vadd.f32 %v3311_v27, %v597_v46  ;;  %v3067_v39 = vld [vmem:[%s4041_s6 + $0x108] sm:$0xff]   ;;  %v3073_v45 = vld [vmem:[%s4041_s6 + $0x120] sm:$0xff]  }
  0x26   : > { %841 = vmatmul.mubr.bf16.vlgmr.msra.gmra.mrb[0].mxu0 %v668_v58  ;;  %v633_v50 = vadd.f32 %v3314_v28, %v596_v42  ;;  %v635_v51 = vadd.f32 %v3314_v28, %v598_v43  ;;  %v600_v56 = vmul.f32 %v3304_v21, %v564_v47  ;;  %v602_v57 = vmul.f32 %v3304_v21, %v566_v48  ;;  %v3070_v42 = vld [vmem:[%s4041_s6 + $0x158] sm:$0xff]   ;;  %v3074_v46 = vld [vmem:[%s4041_s6 + $0x168] sm:$0xff]   ;;  %v3076_v48 = vld [vmem:[%s4041_s6 + $0x170] sm:$0xff]  }
  0x27   : > { %848 = vmatprep.mubr.bf16.mxu0 %v671_v23  ;;  %v563_v60 = vunpack.c.l.bf16 %v2612_v52  ;;  %v565_v61 = vunpack.c.h.bf16 %v2612_v52  ;;  %v656_v62 = vmax.f32 %v632_v54, 0.0  ;;  %v658_v63 = vmax.f32 %v634_v55, 0.0  ;;  %v3071_v43 = vld [vmem:[%s4041_s6 + $0x118] sm:$0xff]   ;;  %v3075_v47 = vld [vmem:[%s4041_s6 + $0x128] sm:$0xff]  }
  0x28   : > { %v657_v58 = vmax.f32 %v633_v50, 0.0  ;;  %v659_v59 = vmax.f32 %v635_v51, 0.0  ;;  %v637_v0 = vadd.f32 %v3314_v28, %v600_v56  ;;  %v639_v1 = vadd.f32 %v3314_v28, %v602_v57  ;;  %v3077_v50 = vld [vmem:[%s4041_s6 + $0x40] sm:$0xff]   ;;  %v3080_v52 = vld [vmem:[%s4041_s6 + $0x178] sm:$0xff]   ;;  %v3081_v54 = vld [vmem:[%s4041_s6 + $0x48] sm:$0xff]  }
  0x29   : > { %v599_v2 = vmul.f32 %v3301_v20, %v563_v60  ;;  %v601_v3 = vmul.f32 %v3301_v20, %v565_v61  ;;  %v568_v4 = vunpack.c.l.bf16 %v3061_v44  ;;  %v570_v7 = vunpack.c.h.bf16 %v3061_v44  ;;  %v3072_v44 = vld [vmem:[%s4041_s6 + $0x160] sm:$0xff]   ;;  %2813 = vmatprep.subr.bf16.mxu1 %v3077_v50  ;;  %v3083_v55 = vld [vmem:[%s4041_s6 + $0x8] sm:$0xff]   ;;  %v3084_v57 = vld [vmem:[%s4041_s6 + $0x50] sm:$0xff]  }
  0x2a   : > { %v661_v5 = vmax.f32 %v637_v0, 0.0  ;;  %v663_v6 = vmax.f32 %v639_v1, 0.0  ;;  %v567_v14 = vunpack.c.l.bf16 %v3063_v53  ;;  %v569_v16 = vunpack.c.h.bf16 %v3063_v53  ;;  %v3079_v51 = vld [vmem:[%s4041_s6] sm:$0xff]   ;;  %v3082_v53 = vld [vmem:[%s4041_s6 + $0x138] sm:$0xff]   ;;  %v3095_v0 = vld [vmem:[%s4041_s6 + $0x28] sm:$0xff]  }
  0x2b   : > { %v636_v9 = vadd.f32 %v3311_v27, %v599_v2  ;;  %v638_v10 = vadd.f32 %v3311_v27, %v601_v3  ;;  %v604_v11 = vmul.f32 %v3304_v21, %v568_v4  ;;  %v606_v15 = vmul.f32 %v3304_v21, %v570_v7  ;;  %2814 = vmatpush3.bf16.msra.mxu1 %v3079_v51  ;;  %v3458_v56 = vld [vmem:[%s4041_s6 + $0x200] sm:$0xff]   ;;  %v3089_v60 = vld [vmem:[%s4041_s6 + $0x18] sm:$0xff]   ;;  %v3096_v1 = vld [vmem:[%s4041_s6 + $0x70] sm:$0xff]  }
  0x2c   : > { %v603_v22 = vmul.f32 %v3301_v20, %v567_v14  ;;  %v672_v23 = vpack.c.bf16 %v654_v41, %v652_v36  ;;  %v605_v25 = vmul.f32 %v3301_v20, %v569_v16  ;;  %v675_v26 = vpack.c.bf16 %v659_v59, %v657_v58  ;;  %v3069_v41 = vld [vmem:[%s4041_s6 + $0x110] sm:$0xff]   ;;  %2815 = vmatprep.subr.bf16.mxu1 %v3081_v54  ;;  %v3087_v59 = vld [vmem:[%s4041_s6 + $0x58] sm:$0xff]   ;;  %v3090_v61 = vld [vmem:[%s4041_s6 + $0x60] sm:$0xff]  }
  0x2d   : > { %v660_v17 = vmax.f32 %v636_v9, 0.0  ;;  %v662_v18 = vmax.f32 %v638_v10, 0.0  ;;  %v641_v19 = vadd.f32 %v3314_v28, %v604_v11  ;;  %v643_v24 = vadd.f32 %v3314_v28, %v606_v15  ;;  %v3064_v28 = vld [vmem:[%s4041_s6 + $0x140] sm:$0xff]   ;;  %v3086_v58 = vld [vmem:[%s4041_s6 + $0x10] sm:$0xff]   ;;  %v3099_v3 = vld [vmem:[%s4041_s6 + $0x78] sm:$0xff]  }
  0x2e   : > { %849 = vmatmul.mubr.bf16.gmra.mrb[4].mxu0 %v670_v40  ;;  %v640_v30 = vadd.f32 %v3311_v27, %v603_v22  ;;  %v642_v32 = vadd.f32 %v3311_v27, %v605_v25  ;;  %v674_v34 = vpack.c.bf16 %v658_v63, %v656_v62  ;;  %v677_v35 = vpack.c.bf16 %v663_v6, %v661_v5  ;;  %v3065_v27 = vld [vmem:[%s4041_s6 + $0x100] sm:$0xff]   ;;  %v3068_v40 = vld [vmem:[%s4041_s6 + $0x150] sm:$0xff]   ;;  %v3093_v63 = vld [vmem:[%s4041_s6 + $0x68] sm:$0xff]  }
  0x2f   : > { %856 = vmatprep.mubr.bf16.mxu0 %v673_v49  ;;  %v665_v29 = vmax.f32 %v641_v19, 0.0  ;;  %v667_v31 = vmax.f32 %v643_v24, 0.0  ;;  %v676_v36 = vpack.c.bf16 %v662_v18, %v660_v17  ;;  %2893 = vmatprep.subr.bf16.mxu0 %v3064_v28  ;;  %v3078_v49 = vld [vmem:[%s4041_s6 + $0x130] sm:$0xff]   ;;  %v3092_v62 = vld [vmem:[%s4041_s6 + $0x20] sm:$0xff]   ;;  %v3101_v4 = vld [vmem:[%s4041_s6 + $0x38] sm:$0xff]   ;;  %v937_v10 = vadd.s32 8, %v3264_v8 }
  0x30   : > { %v664_v21 = vmax.f32 %v640_v30, 0.0  ;;  %v666_v33 = vmax.f32 %v642_v32, 0.0  ;;  %2894 = vmatpush3.bf16.msra.mxu0 %v3065_v27  ;;  %2816 = vmatpush3.bf16.msra.mxu1 %v3083_v55  ;;  %v3098_v2 = vld [vmem:[%s4041_s6 + $0x30] sm:$0xff]   ;;  %v3102_v5 = vld [vmem:[%s4041_s6 + $0xc0] sm:$0xff]   ;;  %v952_v19 = vand.u32 15, %v3264_v8  ;;  %v1106_v22 = vstv %s1105_s27 }
  0x31   : > { %v679_v37 = vpack.c.bf16 %v667_v31, %v665_v29  ;;  %2895 = vmatprep.subr.bf16.mxu0 %v3066_v38  ;;  %2817 = vmatprep.subr.bf16.mxu1 %v3084_v57  ;;  %v3504_v9 = vld [vmem:[%s4040_s5] ss:$0 sm:$0xff]  ;;  %v3510_v16 = vld [vmem:[%s4040_s5 + $0x1] ss:$0 sm:$0xff]  ;;  %v939_v29 = vadd.s32 24, %v3264_v8  ;;  %vm3518_vm0 = vcmp.eq.s32.totalorder %v1106_v22, 1 }
  0x32   : > { %v678_v20 = vpack.c.bf16 %v666_v33, %v664_v21  ;;  %vm3523_vm1 = vcmp.lt.s32.totalorder %v952_v19, 2  ;;  %vm2707_vm3 = vmneg %vm3518_vm0  ;;  %v941_v55 = vadd.s32 40, %v3264_v8  ;;  %v943_v30 = vadd.s32 56, %v3264_v8 }
  0x33   : > { %vm2709_vm6 = vmpackc.low %vm2707_vm3, %vm2707_vm3 }
  0x34   : > { %2896 = vmatpush3.bf16.msra.mxu0 %v3067_v39  ;;  %2818 = vmatpush3.bf16.msra.mxu1 %v3086_v58  ;;  %v973_v39 = vand.u32 15, %v939_v29  ;;  %v942_v29 = vadd.s32 48, %v3264_v8 }
  0x35   : > { %2897 = vmatprep.subr.bf16.mxu0 %v3068_v40  ;;  %2819 = vmatprep.subr.bf16.mxu1 %v3087_v59 }
  0x36   : > { %857 = vmatmul.mubr.bf16.gmra.mrb[8].mxu0 %v672_v23  ;;  %v959_v23 = vand.u32 15, %v937_v10  ;;  %vm3570_vm8 = vcmp.ge.s32.totalorder %v973_v39, 14 }
  0x37   : > { %864 = vmatprep.mubr.bf16.mxu0 %v675_v26  ;;  %v938_v26 = vadd.s32 16, %v3264_v8 }
  0x38   : > { %2898 = vmatpush3.bf16.msra.mxu0 %v3069_v41  ;;  %2820 = vmatpush3.bf16.msra.mxu1 %v3089_v60  ;;  %vm3527_vm2 = vcmp.ge.s32.totalorder %v959_v23, 14 }
  0x39   : > { %2899 = vmatprep.subr.bf16.mxu0 %v3070_v42  ;;  %2821 = vmatprep.subr.bf16.mxu1 %v3090_v61  ;;  %v966_v27 = vand.u32 15, %v938_v26 }
  0x3b   : > { %vm3553_vm7 = vcmp.lt.s32.totalorder %v966_v27, 2 }
  0x3c   : > { %2900 = vmatpush3.bf16.msra.mxu0 %v3071_v43  ;;  %2822 = vmatpush3.bf16.msra.mxu1 %v3092_v62 }
  0x3d   : > { %2901 = vmatprep.subr.bf16.mxu0 %v3072_v44  ;;  %2823 = vmatprep.subr.bf16.mxu1 %v3093_v63 }
  0x3e   : > { %865 = vmatmul.mubr.bf16.gmra.mrb[12].mxu0 %v674_v34 }
  0x3f   : > { %872 = vmatprep.mubr.bf16.mxu0 %v677_v35 }
  0x40   : > { %2902 = vmatpush3.bf16.msra.mxu0 %v3073_v45  ;;  %2824 = vmatpush3.bf16.msra.mxu1 %v3095_v0 }
  0x41   : > { %2903 = vmatprep.subr.bf16.mxu0 %v3074_v46  ;;  %2825 = vmatprep.subr.bf16.mxu1 %v3096_v1 }
  0x44   : > { %2904 = vmatpush3.bf16.msra.mxu0 %v3075_v47  ;;  %2826 = vmatpush3.bf16.msra.mxu1 %v3098_v2 }
  0x45   : > { %2905 = vmatprep.subr.bf16.mxu0 %v3076_v48  ;;  %2827 = vmatprep.subr.bf16.mxu1 %v3099_v3  ;;  %v940_v48 = vadd.s32 32, %v3264_v8 }
  0x46   : > { %873 = vmatmul.mubr.bf16.gmra.mrb[16].mxu0 %v676_v36 }
  0x47   : > { %880 = vmatprep.mubr.bf16.mxu0 %v679_v37  ;;  %v980_v63 = vand.u32 15, %v940_v48 }
  0x48   : > { %2906 = vmatpush3.bf16.msra.mxu0 %v3078_v49  ;;  %2828 = vmatpush3.bf16.msra.mxu1 %v3101_v4 }
  0x49   : > { %2907 = vmatprep.subr.bf16.mxu0 %v3080_v52  ;;  %2853 = vmatprep.subr.bf16.mxu1 %v3102_v5  ;;  %vm3588_vm9 = vcmp.lt.s32.totalorder %v980_v63, 2  ;;  %v944_v63 = vadd.s32 64, %v3264_v8 }
  0x4c   : > { %2908 = vmatpush3.bf16.msra.mxu0 %v3082_v53 }
  0x4d   : > { %2985 = vmatprep.subr.bf16.mxu0 %v3458_v56 }
  0x4e   : > { %881 = vmatmul.mubr.bf16.gmra.mrb[20].mxu0 %v678_v20 }
  0xf9   : > { %v2777_v6 = vpop.f32.mrb[0].mxu0 }
  0xfa   : > { %v2778_v7 = vpop.f32.mrb[1].mxu0 }
  0xfb   : > { %v2779_v11 = vadd.f32 %v2778_v7, %v2777_v6  ;;  %v2780_v14 = vpop.f32.mrb[2].mxu0  ;;  %v987_v6 = vand.u32 15, %v941_v55 }
  0xfc   : > { %v2781_v15 = vpop.f32.mrb[3].mxu0 }
  0xfd   : > { %v894_v17 = vmul.f32 %v2779_v11, %v3504_v9  ;;  %v2782_v18 = vadd.f32 %v2781_v15, %v2780_v14  ;;  %vm3604_vm10 = vcmp.ge.s32.totalorder %v987_v6, 14 }
  0xff   : > { %v895_v24 = vmul.f32 %v2782_v18, %v3504_v9  ;;  %v911_v25 = vadd.f32 %v3510_v16, %v894_v17 }
 0x101   : > { %v2783_v31 = vpop.f32.mrb[4].mxu0  ;;  %v912_v32 = vadd.f32 %v3510_v16, %v895_v24  ;;  %v923_v21 = vmax.f32 %v911_v25, 0.0 }
 0x102   : > { %v2784_v34 = vpop.f32.mrb[5].mxu0 }
 0x103   : > { %v2785_v36 = vadd.f32 %v2784_v34, %v2783_v31  ;;  %v2786_v37 = vpop.f32.mrb[6].mxu0  ;;  %v924_v20 = vmax.f32 %v912_v32, 0.0  ;;  %v3535_v28 = vsel %vm3518_vm0, 0.0, %v923_v21 }
 0x104   : > { %v2787_v38 = vpop.f32.mrb[7].mxu0  ;;  %v1208_v40 = vsel %vm3523_vm1, 0.0, %v3535_v28  ;;  %v1220_v51 = vrot.slane %v3535_v28, 6 }
 0x105   : > { %v896_v41 = vmul.f32 %v2785_v36, %v3504_v9  ;;  %v2788_v42 = vadd.f32 %v2787_v38, %v2786_v37  ;;  %v1161_v43 = vsel %vm3518_vm0, 0.0, %v924_v20  ;;  %v3545_v44 = vrot.slane %v1208_v40, 2 }
 0x106   : > { %v1185_v45 = vsel %vm3527_vm2, 0.0, %v1161_v43  ;;  %v1252_v46 = vrot.slane %v1161_v43, 2  ;;  %v2710_v47 = vpack.c.bf16 %v924_v20, %v923_v21  ;;  %v1001_v43 = vand.u32 15, %v943_v30  ;;  %v3091_v30 = vld [vmem:[%s4041_s6 + $0x210] sm:$0xff]  }
 0x107   : > { %v913_v49 = vadd.f32 %v3510_v16, %v896_v41  ;;  %v897_v50 = vmul.f32 %v2788_v42, %v3504_v9  ;;  %v1221_v52 = vrot.slane %v1185_v45, 6  ;;  %v994_v41 = vand.u32 15, %v942_v29 }
 0x108   : > { %v3560_v54 = vsel %vm1263_vm4, %v3545_v44, %v1252_v46  ;;  %2711 = vmatprep.mubr.msk.bf16.mxu1 %vm2709_vm6, %v2710_v47  ;;  %vm3640_vm12 = vcmp.ge.s32.totalorder %v1001_v43, 14  ;;  %v3094_v43 = vld [vmem:[%s4041_s6 + $0x218] sm:$0xff]  }
 0x109   : > { %v925_v57 = vmax.f32 %v913_v49, 0.0  ;;  %v914_v58 = vadd.f32 %v3510_v16, %v897_v50  ;;  %v2789_v59 = vpop.f32.mrb[8].mxu0  ;;  %v3568_v60 = vsel %vm1232_vm5, %v1220_v51, %v1221_v52  ;;  %vm3625_vm11 = vcmp.lt.s32.totalorder %v994_v41, 2 }
 0x10a   : > { %v2790_v62 = vpop.f32.mrb[9].mxu0  ;;  %v946_v41 = vadd.s32 80, %v3264_v8 }
 0x10b   : > { %v1210_v0 = vsel %vm3553_vm7, 0.0, %v925_v57  ;;  %v926_v1 = vmax.f32 %v914_v58, 0.0  ;;  %v2791_v2 = vadd.f32 %v2790_v62, %v2789_v59  ;;  %v2792_v3 = vpop.f32.mrb[10].mxu0  ;;  %v1222_v4 = vrot.slane %v925_v57, 6 }
 0x10c   : > { %v2793_v5 = vpop.f32.mrb[11].mxu0  ;;  %v1253_v7 = vrot.slane %v1210_v0, 2  ;;  %v945_v0 = vadd.s32 72, %v3264_v8 }
 0x10d   : > { %v1187_v10 = vsel %vm3570_vm8, 0.0, %v926_v1  ;;  %v3578_v11 = vpack.c.bf16 %v926_v1, %v925_v57  ;;  %v898_v14 = vmul.f32 %v2791_v2, %v3504_v9  ;;  %v2794_v15 = vadd.f32 %v2793_v5, %v2792_v3 }
 0x10e   : > { %v1254_v17 = vrot.slane %v926_v1, 2  ;;  %v1223_v18 = vrot.slane %v1187_v10, 6  ;;  %v1242_v19 = vsel %vm1232_vm5, %v1221_v52, %v1222_v4  ;;  %v3585_v22 = vsel %vm1263_vm4, %v1252_v46, %v1253_v7  ;;  %v3088_v1 = vld [vmem:[%s4041_s6 + $0x208] sm:$0xff]  }
 0x10f   : > { %v915_v23 = vadd.f32 %v3510_v16, %v898_v14  ;;  %v899_v25 = vmul.f32 %v2794_v15, %v3504_v9  ;;  %v1276_v26 = vpack.c.bf16 %v3585_v22, %v3560_v54  ;;  %v3126_v54 = vld [vmem:[%s4041_s6 + $0x1d8] sm:$0xff]  }
 0x110   : > { %v1272_v31 = vsel %vm1263_vm4, %v1253_v7, %v1254_v17  ;;  %v1241_v32 = vsel %vm1232_vm5, %v1222_v4, %v1223_v18  ;;  %v3127_v22 = vld [vmem:[%s4041_s6 + $0x198] sm:$0xff]  }
 0x111   : > { %v927_v21 = vmax.f32 %v915_v23, 0.0  ;;  %v916_v33 = vadd.f32 %v3510_v16, %v899_v25  ;;  %v2795_v34 = vpop.f32.mrb[12].mxu0  ;;  %v3602_v35 = vpack.c.bf16 %v1241_v32, %v1242_v19  ;;  %v1008_v23 = vand.u32 15, %v944_v63 }
 0x112   : > { %v2796_v37 = vpop.f32.mrb[13].mxu0  ;;  %v1015_v25 = vand.u32 15, %v945_v0  ;;  %v1022_v63 = vand.u32 15, %v946_v41  ;;  %v1134_v0 = vstv %s3674_s19 }
 0x113   : > { %v1212_v20 = vsel %vm3588_vm9, 0.0, %v927_v21  ;;  %v928_v27 = vmax.f32 %v916_v33, 0.0  ;;  %v2797_v38 = vadd.f32 %v2796_v37, %v2795_v34  ;;  %v2798_v39 = vpop.f32.mrb[14].mxu0  ;;  %v1224_v40 = vrot.slane %v927_v21, 6 }
 0x114   : > { %v2799_v42 = vpop.f32.mrb[15].mxu0  ;;  %v1255_v45 = vrot.slane %v1212_v20, 2  ;;  %vm3667_vm13 = vcmp.lt.s32.totalorder %v1008_v23, 2  ;;  %vm3686_vm14 = vcmp.ge.s32.totalorder %v1015_v25, 14  ;;  %vm3712_vm15 = vcmp.eq.s32.totalorder %v1134_v0, 1  ;;  %v3112_v0 = vld [vmem:[%s4041_s6 + $0xe0] sm:$0xff]  }
 0x115   : > { %v1189_v46 = vsel %vm3604_vm10, 0.0, %v928_v27  ;;  %v900_v47 = vmul.f32 %v2797_v38, %v3504_v9  ;;  %v2800_v48 = vadd.f32 %v2799_v42, %v2798_v39  ;;  %v1256_v49 = vrot.slane %v928_v27, 2  ;;  %vm2712_vm2 = vmneg %vm3712_vm15 }
 0x116   : > { %v1271_v50 = vsel %vm1263_vm4, %v1254_v17, %v1255_v45  ;;  %v3615_v52 = vpack.c.bf16 %v928_v27, %v927_v21  ;;  %v1225_v53 = vrot.slane %v1189_v46, 6  ;;  %v1240_v55 = vsel %vm1232_vm5, %v1223_v18, %v1224_v40  ;;  %vm2714_vm3 = vmpackc.low %vm2712_vm2, %vm2712_vm2 }
 0x117   : > { %v917_v57 = vadd.f32 %v3510_v16, %v900_v47  ;;  %v901_v58 = vmul.f32 %v2800_v48, %v3504_v9  ;;  %v3621_v59 = vpack.c.bf16 %v1271_v50, %v1272_v31  ;;  %v1270_v61 = vsel %vm1263_vm4, %v1255_v45, %v1256_v49 }
 0x118   : > { %v1239_v2 = vsel %vm1232_vm5, %v1224_v40, %v1225_v53  ;;  %v947_v42 = vadd.s32 88, %v3264_v8  ;;  %vm1206_vm0 = vcmp.lt.s32.totalorder %v1022_v63, 2  ;;  %v3107_v8 = vld [vmem:[%s4041_s6 + $0x88] sm:$0xff]   ;;  %v3110_v63 = vld [vmem:[%s4041_s6 + $0xd8] sm:$0xff]  }
 0x119   : > { %v929_v3 = vmax.f32 %v917_v57, 0.0  ;;  %v918_v4 = vadd.f32 %v3510_v16, %v901_v58  ;;  %v2801_v5 = vpop.f32.mrb[16].mxu0  ;;  %2026 = vmatprep.mubr.bf16.mxu0 %v3621_v59  ;;  %v3638_v6 = vpack.c.bf16 %v1239_v2, %v1240_v55 }
 0x11a   : > { %v2802_v10 = vpop.f32.mrb[17].mxu0  ;;  %2027 = vmatmul.mubr.bf16.vlgmr.msra.gmra.mrb[24].mxu0 %v3578_v11  ;;  %v1029_v2 = vand.u32 15, %v947_v42 }
 0x11b   : > { %v1214_v14 = vsel %vm3625_vm11, 0.0, %v929_v3  ;;  %v930_v15 = vmax.f32 %v918_v4, 0.0  ;;  %v2803_v17 = vadd.f32 %v2802_v10, %v2801_v5  ;;  %v2804_v18 = vpop.f32.mrb[18].mxu0  ;;  %2986 = vmatpush3.bf16.msra.mxu0 %v3458_v56  ;;  %v1226_v19 = vrot.slane %v929_v3, 6  ;;  %v3097_v4 = vld [vmem:[%s4041_s6 + $0x220] sm:$0xff]  }
 0x11c   : > { %v2805_v24 = vpop.f32.mrb[19].mxu0  ;;  %2987 = vmatprep.subr.bf16.mxu0 %v3088_v1  ;;  %v1257_v29 = vrot.slane %v1214_v14, 2  ;;  %vm1183_vm1 = vcmp.ge.s32.totalorder %v1029_v2, 14  ;;  %v3114_v2 = vld [vmem:[%s4041_s6 + $0xe8] sm:$0xff]  }
 0x11d   : > { %v1191_v31 = vsel %vm3640_vm12, 0.0, %v930_v15  ;;  %v902_v32 = vmul.f32 %v2803_v17, %v3504_v9  ;;  %v2806_v21 = vadd.f32 %v2805_v24, %v2804_v18  ;;  %v1258_v33 = vrot.slane %v930_v15, 2 }
 0x11e   : > { %v1269_v56 = vsel %vm1263_vm4, %v1256_v49, %v1257_v29  ;;  %v3657_v34 = vpack.c.bf16 %v930_v15, %v929_v3  ;;  %v1227_v36 = vrot.slane %v1191_v31, 6  ;;  %v1238_v37 = vsel %vm1232_vm5, %v1225_v53, %v1226_v19  ;;  %v3100_v31 = vld [vmem:[%s4041_s6 + $0x228] sm:$0xff]  }
 0x11f   : > { %v919_v20 = vadd.f32 %v3510_v16, %v902_v32  ;;  %v903_v27 = vmul.f32 %v2806_v21, %v3504_v9  ;;  %2988 = vmatpush3.bf16.msra.mxu0 %v3088_v1  ;;  %v3663_v38 = vpack.c.bf16 %v1269_v56, %v1270_v61  ;;  %v1268_v39 = vsel %vm1263_vm4, %v1257_v29, %v1258_v33 }
 0x120   : > { %2989 = vmatprep.subr.bf16.mxu0 %v3091_v30  ;;  %v1237_v45 = vsel %vm1232_vm5, %v1226_v19, %v1227_v36 }
 0x121   : > { %v931_v46 = vmax.f32 %v919_v20, 0.0  ;;  %v920_v47 = vadd.f32 %v3510_v16, %v903_v27  ;;  %v2807_v48 = vpop.f32.mrb[20].mxu0  ;;  %2034 = vmatprep.mubr.bf16.mxu0 %v3663_v38  ;;  %v3684_v49 = vpack.c.bf16 %v1237_v45, %v1238_v37  ;;  %v3103_v27 = vld [vmem:[%s4041_s6 + $0x230] sm:$0xff]  }
 0x122   : > { %v2808_v53 = vpop.f32.mrb[21].mxu0  ;;  %2035 = vmatmul.mubr.bf16.gmra.mrb[28].mxu0 %v3615_v52 }
 0x123   : > { %v1216_v55 = vsel %vm3667_vm13, 0.0, %v931_v46  ;;  %v932_v57 = vmax.f32 %v920_v47, 0.0  ;;  %v2809_v58 = vadd.f32 %v2808_v53, %v2807_v48  ;;  %v2810_v61 = vpop.f32.mrb[22].mxu0  ;;  %2990 = vmatpush3.bf16.msra.mxu0 %v3091_v30  ;;  %v1228_v62 = vrot.slane %v931_v46, 6  ;;  %v3147_v30 = vld [vmem:[%s4043_s8 + $0x34] ss:$8 sps:$4 sm:$0xff]  }
 0x124   : > { %v2811_v1 = vpop.f32.mrb[23].mxu0  ;;  %2991 = vmatprep.subr.bf16.mxu0 %v3094_v43  ;;  %v1259_v3 = vrot.slane %v1216_v55, 2  ;;  %v3104_v55 = vld [vmem:[%s4041_s6 + $0x80] sm:$0xff]  }
 0x125   : > { %v1193_v5 = vsel %vm3686_vm14, 0.0, %v932_v57  ;;  %v904_v7 = vmul.f32 %v2809_v58, %v3504_v9  ;;  %v2812_v10 = vadd.f32 %v2811_v1, %v2810_v61  ;;  %v1260_v14 = vrot.slane %v932_v57, 2  ;;  %v3113_v1 = vld [vmem:[%s4041_s6 + $0xa0] sm:$0xff]  }
 0x126   : > { %v1267_v15 = vsel %vm1263_vm4, %v1258_v33, %v1259_v3  ;;  %v3702_v17 = vpack.c.bf16 %v932_v57, %v931_v46  ;;  %v1229_v18 = vrot.slane %v1193_v5, 6  ;;  %v1236_v19 = vsel %vm1232_vm5, %v1227_v36, %v1228_v62  ;;  %v3117_v5 = vld [vmem:[%s4041_s6 + $0xb0] sm:$0xff]  }
 0x127   : > { %v921_v23 = vadd.f32 %v3510_v16, %v904_v7  ;;  %v905_v24 = vmul.f32 %v2812_v10, %v3504_v9  ;;  %2992 = vmatpush3.bf16.msra.mxu0 %v3094_v43  ;;  %v3708_v25 = vpack.c.bf16 %v1267_v15, %v1268_v39  ;;  %v1266_v29 = vsel %vm1263_vm4, %v1259_v3, %v1260_v14  ;;  %v3115_v3 = vld [vmem:[%s4041_s6 + $0xa8] sm:$0xff]   ;;  %v3118_v7 = vld [vmem:[%s4041_s6 + $0xf8] sm:$0xff]   ;;  %v3121_v15 = vld [vmem:[%s4041_s6 + $0x180] sm:$0xff]  }
 0x128   : > { %2993 = vmatprep.subr.bf16.mxu0 %v3097_v4  ;;  %v1235_v32 = vsel %vm1232_vm5, %v1228_v62, %v1229_v18  ;;  %v3109_v62 = vld [vmem:[%s4041_s6 + $0x90] sm:$0xff]   ;;  %v3119_v10 = vld [vmem:[%s4041_s6 + $0xb8] sm:$0xff]  }
 0x129   : > { %v933_v21 = vmax.f32 %v921_v23, 0.0  ;;  %v922_v9 = vadd.f32 %v3510_v16, %v905_v24  ;;  %2042 = vmatprep.mubr.bf16.mxu0 %v3708_v25  ;;  %v3723_v33 = vpack.c.bf16 %v1235_v32, %v1236_v19  ;;  %v3124_v19 = vld [vmem:[%s4041_s6 + $0x1d0] sm:$0xff]   ;;  %v3129_v24 = vld [vmem:[%s4041_s6 + $0x1a0] sm:$0xff]  }
 0x12a   : > { %2043 = vmatmul.mubr.bf16.gmra.mrb[32].mxu0 %v3657_v34  ;;  %v3125_v23 = vld [vmem:[%s4041_s6 + $0x190] sm:$0xff]  }
 0x12b   : > { %v1170_v56 = vsel %vm3712_vm15, 0.0, %v933_v21  ;;  %v934_v36 = vmax.f32 %v922_v9, 0.0  ;;  %2994 = vmatpush3.bf16.msra.mxu0 %v3097_v4  ;;  %v3116_v4 = vld [vmem:[%s4041_s6 + $0xf0] sm:$0xff]  }
 0x12c   : > { %v1218_v37 = vsel %vm1206_vm0, 0.0, %v1170_v56  ;;  %v1230_v20 = vrot.slane %v1170_v56, 6  ;;  %2995 = vmatprep.subr.bf16.mxu0 %v3100_v31  ;;  %v3133_v32 = vld [vmem:[%s4041_s6 + $0x1b0] sm:$0xff]   ;;  %v3148_v56 = vld [vmem:[%s4043_s8 + $0x40] ss:$8 sps:$4 sm:$0xff]  }
 0x12d   : > { %v1261_v16 = vrot.slane %v1218_v37, 2  ;;  %v1171_v39 = vsel %vm3712_vm15, 0.0, %v934_v36  ;;  %v3733_v40 = vpack.c.bf16 %v934_v36, %v933_v21  ;;  %v3135_v21 = vld [vmem:[%s4041_s6 + $0x1b8] sm:$0xff]  }
 0x12e   : > { %v1195_v41 = vsel %vm1183_vm1, 0.0, %v1171_v39  ;;  %v1262_v42 = vrot.slane %v1171_v39, 2  ;;  %v3737_v43 = vsel %vm1232_vm5, %v1229_v18, %v1230_v20  ;;  %v3122_v18 = vld [vmem:[%s4041_s6 + $0x1c8] sm:$0xff]   ;;  %v3145_v9 = vld [vmem:[%s4043_s8 + $0x30] ss:$8 sps:$4 sm:$0xff]  }
 0x12f   : > { %v1231_v45 = vrot.slane %v1195_v41, 6  ;;  %2996 = vmatpush3.bf16.msra.mxu0 %v3100_v31  ;;  %v1265_v46 = vsel %vm1263_vm4, %v1260_v14, %v1261_v16  ;;  %v3120_v14 = vld [vmem:[%s4041_s6 + $0x1c0] sm:$0xff]   ;;  %v3132_v31 = vld [vmem:[%s4041_s6 + $0x1f0] sm:$0xff]  }
 0x130   : > { %v1280_v47 = vpack.c.bf16 %v1265_v46, %v1266_v29  ;;  %2997 = vmatprep.subr.bf16.mxu0 %v3103_v27  ;;  %v1264_v48 = vsel %vm1263_vm4, %v1261_v16, %v1262_v42  ;;  %v1275_v50 = vsel %vm1263_vm4, %v1262_v42, %v3545_v44  ;;  %v3105_v44 = vld [vmem:[%s4041_s6 + $0xc8] sm:$0xff]   ;;  %v3153_v36 = vld [vmem:[%s4043_s8 + $0x54] ss:$8 sps:$4 sm:$0xff]   ;;  %v3151_v37 = vld [vmem:[%s4043_s8 + $0x50] ss:$8 sps:$4 sm:$0xff]  }
 0x131   : > { %v1244_v53 = vsel %vm1232_vm5, %v1231_v45, %v1220_v51  ;;  %v1281_v57 = vpack.c.bf16 %v1275_v50, %v1264_v48  ;;  %v3755_v58 = vsel %vm1232_vm5, %v1230_v20, %v1231_v45  ;;  %v3106_v51 = vld [vmem:[%s4041_s6 + $0x238] sm:$0xff]   ;;  %v3131_v29 = vld [vmem:[%s4041_s6 + $0x1a8] sm:$0xff]  }
 0x132   : > { %2050 = vmatprep.mubr.bf16.mxu0 %v1280_v47  ;;  %v1245_v61 = vpack.c.bf16 %v3568_v60, %v1244_v53  ;;  %v1250_v28 = vpack.c.bf16 %v3755_v58, %v3737_v43  ;;  %v3108_v60 = vld [vmem:[%s4041_s6 + $0xd0] sm:$0xff]   ;;  %v3156_v20 = vld [vmem:[%s4043_s8 + $0x64] ss:$8 sps:$4 sm:$0xff]  }
 0x133   : > { %2051 = vmatmul.mubr.bf16.gmra.mrb[36].mxu0 %v3702_v17  ;;  %v3159_v16 = vld [vmem:[%s4043_s8 + $0x74] ss:$8 sps:$4 sm:$0xff]   ;;  %v3157_v39 = vld [vmem:[%s4043_s8 + $0x70] ss:$8 sps:$4 sm:$0xff]  }
 0x134   : > { %1897 = vmatmul.mubr.bf16.vlgmr.msra.gmra.mrb[0].mxu1 %v1245_v61  ;;  %2998 = vmatpush3.bf16.msra.mxu0 %v3103_v27  ;;  %v3154_v27 = vld [vmem:[%s4043_s8 + $0x60] ss:$8 sps:$4 sm:$0xff]  }
 0x135   : > { %2854 = vmatpush3.bf16.msra.mxu1 %v3104_v55  ;;  %3001 = vmatprep.mubr.bf16.mxu0 %v3663_v38 }
 0x136   : > { %1904 = vmatprep.mubr.bf16.mxu1 %v3578_v11  ;;  %2855 = vmatprep.subr.bf16.mxu1 %v3105_v44  ;;  %v3111_v11 = vld [vmem:[%s4041_s6 + $0x98] sm:$0xff]  }
 0x137   : > { %2999 = vmatprep.subr.bf16.mxu0 %v3106_v51 }
 0x138   : > { %3000 = vmatpush3.bf16.msra.mxu0 %v3106_v51 }
 0x139   : > { %2856 = vmatpush3.bf16.msra.mxu1 %v3107_v8 }
 0x13a   : > { %2857 = vmatprep.subr.bf16.mxu1 %v3108_v60 }
 0x13b   : > { %3002 = vmatmul.mubr.bf16.vlgmr.msra.gmra.mrb[40].mxu0 %v3708_v25 }
 0x13c   : > { %1905 = vmatmul.mubr.bf16.gmra.mrb[4].mxu1 %v3602_v35  ;;  %3005 = vmatprep.mubr.bf16.mxu0 %v1280_v47 }
 0x13d   : > { %2858 = vmatpush3.bf16.msra.mxu1 %v3109_v62  ;;  %1912 = vmatprep.mubr.bf16.mxu1 %v3615_v52 }
 0x13e   : > { %2859 = vmatprep.subr.bf16.mxu1 %v3110_v63 }
 0x141   : > { %2860 = vmatpush3.bf16.msra.mxu1 %v3111_v11 }
 0x142   : > { %2861 = vmatprep.subr.bf16.mxu1 %v3112_v0 }
 0x143   : > { %3006 = vmatmul.mubr.bf16.gmra.mrb[44].mxu0 %v1281_v57 }
 0x144   : > { %1913 = vmatmul.mubr.bf16.gmra.mrb[8].mxu1 %v3638_v6 }
 0x145   : > { %2862 = vmatpush3.bf16.msra.mxu1 %v3113_v1  ;;  %1920 = vmatprep.mubr.bf16.mxu1 %v3657_v34 }
 0x146   : > { %2863 = vmatprep.subr.bf16.mxu1 %v3114_v2 }
 0x149   : > { %2864 = vmatpush3.bf16.msra.mxu1 %v3115_v3 }
 0x14a   : > { %2865 = vmatprep.subr.bf16.mxu1 %v3116_v4 }
 0x14c   : > { %1921 = vmatmul.mubr.bf16.gmra.mrb[12].mxu1 %v3684_v49 }
 0x14d   : > { %2866 = vmatpush3.bf16.msra.mxu1 %v3117_v5  ;;  %1961 = vmatprep.mubr.bf16.mxu1 %v3602_v35  ;;  %v3123_v35 = vld [vmem:[%s4041_s6 + $0x188] sm:$0xff]  }
 0x14e   : > { %2867 = vmatprep.subr.bf16.mxu1 %v3118_v7 }
 0x151   : > { %2868 = vmatpush3.bf16.msra.mxu1 %v3119_v10 }
 0x152   : > { %2933 = vmatprep.subr.bf16.mxu1 %v3120_v14 }
 0x154   : > { %1962 = vmatmul.mubr.bf16.vlgmr.msra.gmra.mrb[16].mxu1 %v1276_v26  ;;  %v3128_v26 = vld [vmem:[%s4041_s6 + $0x1e0] sm:$0xff]  }
 0x155   : > { %2934 = vmatpush3.bf16.msra.mxu1 %v3121_v15  ;;  %1969 = vmatprep.mubr.bf16.mxu1 %v3638_v6 }
 0x156   : > { %2935 = vmatprep.subr.bf16.mxu1 %v3122_v18 }
 0x159   : > { %2936 = vmatpush3.bf16.msra.mxu1 %v3123_v35 }
 0x15a   : > { %2937 = vmatprep.subr.bf16.mxu1 %v3124_v19 }
 0x15c   : > { %1970 = vmatmul.mubr.bf16.gmra.mrb[20].mxu1 %v3621_v59  ;;  %v3130_v59 = vld [vmem:[%s4041_s6 + $0x1e8] sm:$0xff]  }
 0x15d   : > { %2938 = vmatpush3.bf16.msra.mxu1 %v3125_v23  ;;  %1977 = vmatprep.mubr.bf16.mxu1 %v3684_v49 }
 0x15e   : > { %2939 = vmatprep.subr.bf16.mxu1 %v3126_v54 }
 0x161   : > { %2940 = vmatpush3.bf16.msra.mxu1 %v3127_v22 }
 0x162   : > { %2941 = vmatprep.subr.bf16.mxu1 %v3128_v26 }
 0x164   : > { %1978 = vmatmul.mubr.bf16.gmra.mrb[24].mxu1 %v3663_v38  ;;  %v3134_v38 = vld [vmem:[%s4041_s6 + $0x1f8] sm:$0xff]  }
 0x165   : > { %2942 = vmatpush3.bf16.msra.mxu1 %v3129_v24  ;;  %1985 = vmatprep.mubr.bf16.mxu1 %v3723_v33 }
 0x166   : > { %2943 = vmatprep.subr.bf16.mxu1 %v3130_v59 }
 0x169   : > { %2944 = vmatpush3.bf16.msra.mxu1 %v3131_v29 }
 0x16a   : > { %2945 = vmatprep.subr.bf16.mxu1 %v3132_v31 }
 0x16c   : > { %1986 = vmatmul.mubr.bf16.gmra.mrb[28].mxu1 %v3708_v25  ;;  %v3142_v25 = vld [vmem:[%s4043_s8 + $0x20] ss:$8 sps:$4 sm:$0xff]  }
 0x16d   : > { %2946 = vmatpush3.bf16.msra.mxu1 %v3133_v32  ;;  %2091 = vmatprep.mubr.bf16.mxu1 %v3615_v52  ;;  %v3138_v52 = vld [vmem:[%s4043_s8 + $0x4] ss:$8 sps:$4 sm:$0xff]  }
 0x16e   : > { %2947 = vmatprep.subr.bf16.mxu1 %v3134_v38  ;;  %2335 = vmatprep.subr.bf16.mxu0 %v3138_v52 }
 0x171   : > { %2948 = vmatpush3.bf16.msra.mxu1 %v3135_v21 }
 0x172   : > { %3009 = vmatprep.subr.bf16.mxu1 %v3138_v52 }
 0x174   : > { %2092 = vmatmul.mubr.bf16.vlgmr.msra.gmra.mrb[32].mxu1 %v3638_v6  ;;  %v3136_v6 = vld [vmem:[%s4043_s8] ss:$8 sps:$4 sm:$0xff]  }
 0x175   : > { %2099 = vmatprep.mubr.bf16.mxu1 %v3657_v34  ;;  %2336 = vmatpush1.bf16.msra.mxu0 %v3136_v6  ;;  %v3141_v34 = vld [vmem:[%s4043_s8 + $0x14] ss:$8 sps:$4 sm:$0xff]  }
 0x176   : > { %3017 = vmatpush1.bf16.msra.mxu1 %v3136_v6  ;;  %2337 = vmatprep.subr.bf16.mxu0 %v3141_v34 }
 0x177   : > { %3010 = vmatprep.subr.bf16.mxu1 %v3141_v34 }
 0x17c   : > { %2100 = vmatmul.mubr.bf16.gmra.mrb[36].mxu1 %v3684_v49  ;;  %v3139_v49 = vld [vmem:[%s4043_s8 + $0x10] ss:$8 sps:$4 sm:$0xff]  }
 0x17d   : > { %2107 = vmatprep.mubr.bf16.mxu1 %v3702_v17  ;;  %2338 = vmatpush1.bf16.msra.mxu0 %v3139_v49  ;;  %v3144_v17 = vld [vmem:[%s4043_s8 + $0x24] ss:$8 sps:$4 sm:$0xff]  }
 0x17e   : > { %3018 = vmatpush1.bf16.msra.mxu1 %v3139_v49  ;;  %2339 = vmatprep.subr.bf16.mxu0 %v3144_v17 }
 0x17f   : > { %3011 = vmatprep.subr.bf16.mxu1 %v3144_v17 }
 0x181   : > { %2340 = vmatpush1.bf16.msra.mxu0 %v3142_v25 }
 0x182   : > { %3019 = vmatpush1.bf16.msra.mxu1 %v3142_v25  ;;  %2341 = vmatprep.subr.bf16.mxu0 %v3147_v30 }
 0x183   : > { %3012 = vmatprep.subr.bf16.mxu1 %v3147_v30 }
 0x184   : > { %2108 = vmatmul.mubr.bf16.gmra.mrb[40].mxu1 %v3723_v33  ;;  %v3150_v33 = vld [vmem:[%s4043_s8 + $0x44] ss:$8 sps:$4 sm:$0xff]  }
 0x185   : > { %2716 = vmatprep.mubr.msk.bf16.mxu1 %vm2714_vm3, %v3733_v40  ;;  %2342 = vmatpush1.bf16.msra.mxu0 %v3145_v9  ;;  %v3176_v40 = vmov 0  }
 0x186   : > { %3020 = vmatpush1.bf16.msra.mxu1 %v3145_v9  ;;  %2343 = vmatprep.subr.bf16.mxu0 %v3150_v33 }
 0x187   : > { %3013 = vmatprep.subr.bf16.mxu1 %v3150_v33  ;;  %2367 = vmatprep.mubr.bf16.mxu0 %v3176_v40 }
 0x189   : > { %2344 = vmatpush1.bf16.msra.mxu0 %v3148_v56 }
 0x18a   : > { %3021 = vmatpush1.bf16.msra.mxu1 %v3148_v56  ;;  %2345 = vmatprep.subr.bf16.mxu0 %v3153_v36 }
 0x18b   : > { %3014 = vmatprep.subr.bf16.mxu1 %v3153_v36 }
 0x18c   : > { %2116 = vmatmul.mubr.bf16.gmra.mrb[44].mxu1 %v1250_v28 }
 0x18d   : > { %2346 = vmatpush1.bf16.msra.mxu0 %v3151_v37  ;;  %2377 = vmatprep.mubr.bf16.mxu1 %v3176_v40 }
 0x18e   : > { %3022 = vmatpush1.bf16.msra.mxu1 %v3151_v37  ;;  %2347 = vmatprep.subr.bf16.mxu0 %v3156_v20 }
 0x18f   : > { %3015 = vmatprep.subr.bf16.mxu1 %v3156_v20 }
 0x191   : > { %2348 = vmatpush1.bf16.msra.mxu0 %v3154_v27 }
 0x192   : > { %3023 = vmatpush1.bf16.msra.mxu1 %v3154_v27  ;;  %2349 = vmatprep.subr.bf16.mxu0 %v3159_v16 }
 0x193   : > { %3016 = vmatprep.subr.bf16.mxu1 %v3159_v16 }
 0x195   : > { %2350 = vmatpush1.bf16.msra.mxu0 %v3157_v39 }
 0x196   : > { %3024 = vmatpush1.bf16.msra.mxu1 %v3157_v39 }
 0x1ed   : > { %v2909_v41 = vpop.f32.mrb[24].mxu0 }
 0x1ee   : > { %v2910_v42 = vpop.f32.mrb[25].mxu0 }
 0x1ef   : > { %v2911_v43 = vadd.f32 %v2910_v42, %v2909_v41  ;;  %v2912_v45 = vpop.f32.mrb[26].mxu0 }
 0x1f0   : > { %v2913_v46 = vpop.f32.mrb[27].mxu0 }
 0x1f1   : > { %v2914_v47 = vadd.f32 %v2913_v46, %v2912_v45 }
 0x1f5   : > { %v2915_v48 = vpop.f32.mrb[28].mxu0 }
 0x1f6   : > { %v2916_v50 = vpop.f32.mrb[29].mxu0 }
 0x1f7   : > { %v3934_v53 = vadd.f32 %v2916_v50, %v2915_v48  ;;  %v2918_v55 = vpop.f32.mrb[30].mxu0 }
 0x1f8   : > { %v2919_v57 = vpop.f32.mrb[31].mxu0 }
 0x1f9   : > { %v3936_v58 = vadd.f32 %v2919_v57, %v2918_v55 }
 0x1fd   : > { %v2921_v61 = vpop.f32.mrb[32].mxu0 }
 0x1fe   : > { %v2922_v44 = vpop.f32.mrb[33].mxu0 }
 0x1ff   : > { %v3938_v28 = vadd.f32 %v2922_v44, %v2921_v61  ;;  %v2924_v51 = vpop.f32.mrb[34].mxu0 }
 0x200   : > { %v2925_v8 = vpop.f32.mrb[35].mxu0 }
 0x201   : > { %v3940_v60 = vadd.f32 %v2925_v8, %v2924_v51 }
 0x206   : > { %v2927_v62 = vpop.f32.mrb[36].mxu0 }
 0x207   : > { %v2829_v63 = vpop.f32.mrb[0].mxu1  ;;  %v2928_v11 = vpop.f32.mrb[37].mxu0 }
 0x208   : > { %v3942_v0 = vadd.f32 %v2928_v11, %v2927_v62  ;;  %v2830_v1 = vpop.f32.mrb[1].mxu1  ;;  %v2930_v2 = vpop.f32.mrb[38].mxu0 }
 0x209   : > { %v2831_v3 = vadd.f32 %v2830_v1, %v2829_v63  ;;  %v2832_v4 = vpop.f32.mrb[2].mxu1  ;;  %v2931_v5 = vpop.f32.mrb[39].mxu0 }
 0x20a   : > { %v3944_v7 = vadd.f32 %v2931_v5, %v2930_v2  ;;  %v2833_v10 = vpop.f32.mrb[3].mxu1 }
 0x20b   : > { %v2834_v14 = vadd.f32 %v2833_v10, %v2832_v4 }
 0x20e   : > { %v3946_v15 = vpop.f32.mrb[40].mxu0 }
 0x20f   : > { %v2835_v18 = vpop.f32.mrb[4].mxu1  ;;  %v3948_v35 = vpop.f32.mrb[41].mxu0 }
 0x210   : > { %v2836_v19 = vpop.f32.mrb[5].mxu1  ;;  %v3950_v23 = vpop.f32.mrb[42].mxu0 }
 0x211   : > { %v2837_v54 = vadd.f32 %v2836_v19, %v2835_v18  ;;  %v2838_v22 = vpop.f32.mrb[6].mxu1  ;;  %v3952_v26 = vpop.f32.mrb[43].mxu0 }
 0x212   : > { %v2839_v24 = vpop.f32.mrb[7].mxu1 }
 0x213   : > { %v2840_v59 = vadd.f32 %v2839_v24, %v2838_v22 }
 0x216   : > { %v3954_v29 = vpop.f32.mrb[44].mxu0 }
 0x217   : > { %v2841_v31 = vpop.f32.mrb[8].mxu1  ;;  %v3956_v32 = vpop.f32.mrb[45].mxu0 }
 0x218   : > { %v2842_v38 = vpop.f32.mrb[9].mxu1  ;;  %v3958_v21 = vpop.f32.mrb[46].mxu0 }
 0x219   : > { %v2843_v52 = vadd.f32 %v2842_v38, %v2841_v31  ;;  %v2844_v6 = vpop.f32.mrb[10].mxu1  ;;  %v3960_v34 = vpop.f32.mrb[47].mxu0 }
 0x21a   : > { %v2845_v49 = vpop.f32.mrb[11].mxu1 }
 0x21b   : > { %v2846_v17 = vadd.f32 %v2845_v49, %v2844_v6 }
 0x21f   : > { %v2847_v25 = vpop.f32.mrb[12].mxu1 }
 0x220   : > { %v2848_v30 = vpop.f32.mrb[13].mxu1 }
 0x221   : > { %v2849_v9 = vadd.f32 %v2848_v30, %v2847_v25  ;;  %v2850_v33 = vpop.f32.mrb[14].mxu1 }
 0x222   : > { %v2851_v56 = vpop.f32.mrb[15].mxu1 }
 0x223   : > { %v2852_v36 = vadd.f32 %v2851_v56, %v2850_v33 }
 0x227   : > { %v2869_v37 = vpop.f32.mrb[16].mxu1 }
 0x228   : > { %v2870_v20 = vpop.f32.mrb[17].mxu1 }
 0x229   : > { %v2871_v27 = vadd.f32 %v2870_v20, %v2869_v37  ;;  %v2872_v16 = vpop.f32.mrb[18].mxu1 }
 0x22a   : > { %v2873_v39 = vpop.f32.mrb[19].mxu1 }
 0x22b   : > { %v1964_v41 = vadd.f32 %v2871_v27, %v2831_v3  ;;  %v2874_v42 = vadd.f32 %v2873_v39, %v2872_v16 }
 0x22d   : > { %v1967_v45 = vadd.f32 %v2874_v42, %v2834_v14  ;;  %v2029_v46 = vadd.f32 %v2911_v43, %v1964_v41 }
 0x22f   : > { %v2875_v48 = vpop.f32.mrb[20].mxu1  ;;  %v2032_v50 = vadd.f32 %v2914_v47, %v1967_v45 }
 0x230   : > { %v2876_v55 = vpop.f32.mrb[21].mxu1 }
 0x231   : > { %v2877_v57 = vadd.f32 %v2876_v55, %v2875_v48  ;;  %v2878_v61 = vpop.f32.mrb[22].mxu1 }
 0x232   : > { %v2879_v44 = vpop.f32.mrb[23].mxu1 }
 0x233   : > { %v1972_v51 = vadd.f32 %v2877_v57, %v2837_v54  ;;  %v2880_v8 = vadd.f32 %v2879_v44, %v2878_v61 }
 0x235   : > { %v1975_v62 = vadd.f32 %v2880_v8, %v2840_v59  ;;  %v2037_v63 = vadd.f32 %v3934_v53, %v1972_v51 }
 0x237   : > { %v2881_v11 = vpop.f32.mrb[24].mxu1  ;;  %v2040_v1 = vadd.f32 %v3936_v58, %v1975_v62 }
 0x238   : > { %v2882_v2 = vpop.f32.mrb[25].mxu1 }
 0x239   : > { %v2883_v4 = vadd.f32 %v2882_v2, %v2881_v11  ;;  %v2884_v3 = vpop.f32.mrb[26].mxu1 }
 0x23a   : > { %v2885_v5 = vpop.f32.mrb[27].mxu1 }
 0x23b   : > { %v1980_v10 = vadd.f32 %v2883_v4, %v2843_v52  ;;  %v2886_v43 = vadd.f32 %v2885_v5, %v2884_v3 }
 0x23d   : > { %v1983_v14 = vadd.f32 %v2886_v43, %v2846_v17  ;;  %v2045_v47 = vadd.f32 %v3938_v28, %v1980_v10 }
 0x23f   : > { %v2887_v18 = vpop.f32.mrb[28].mxu1  ;;  %v2048_v19 = vadd.f32 %v3940_v60, %v1983_v14  ;;  %v2717_v60 = vld [vmem:[%s4042_s7] ss:$0 sm:$0xff] }
 0x240   : > { %v2888_v54 = vpop.f32.mrb[29].mxu1 }
 0x241   : > { %v2889_v22 = vadd.f32 %v2888_v54, %v2887_v18  ;;  %v2890_v24 = vpop.f32.mrb[30].mxu1 }
 0x242   : > { %v2891_v59 = vpop.f32.mrb[31].mxu1 }
 0x243   : > { %v1988_v53 = vadd.f32 %v2889_v22, %v2849_v9  ;;  %v2892_v31 = vadd.f32 %v2891_v59, %v2890_v24 }
 0x245   : > { %v1991_v38 = vadd.f32 %v2892_v31, %v2852_v36  ;;  %v2053_v58 = vadd.f32 %v3942_v0, %v1988_v53  ;;  %v2718_v0 = vld [vmem:[%s4042_s7 + $0x1] ss:$0 sm:$0xff] }
 0x247   : > { %v2949_v6 = vpop.f32.mrb[32].mxu1  ;;  %v2056_v49 = vadd.f32 %v3944_v7, %v1991_v38 }
 0x248   : > { %v2950_v52 = vpop.f32.mrb[33].mxu1 }
 0x249   : > { %v2951_v25 = vadd.f32 %v2950_v52, %v2949_v6  ;;  %v2952_v17 = vpop.f32.mrb[34].mxu1 }
 0x24a   : > { %v2953_v30 = vpop.f32.mrb[35].mxu1 }
 0x24b   : > { %v2094_v28 = vadd.f32 %v2951_v25, %v2029_v46  ;;  %v2954_v33 = vadd.f32 %v2953_v30, %v2952_v17 }
 0x24d   : > { %v2159_v56 = vadd.f32 %v3948_v35, %v2094_v28  ;;  %v2097_v9 = vadd.f32 %v2954_v33, %v2032_v50 }
 0x24f   : > { %v2194_v36 = vmul.f32 %v2717_v60, %v2159_v56  ;;  %v2162_v7 = vadd.f32 %v3952_v26, %v2097_v9  ;;  %v2955_v37 = vpop.f32.mrb[36].mxu1 }
 0x250   : > { %v2956_v20 = vpop.f32.mrb[37].mxu1 }
 0x251   : > { %v2207_v27 = vadd.f32 %v2718_v0, %v2194_v36  ;;  %v2195_v16 = vmul.f32 %v2717_v60, %v2162_v7  ;;  %v2957_v39 = vadd.f32 %v2956_v20, %v2955_v37  ;;  %v2958_v41 = vpop.f32.mrb[38].mxu1 }
 0x252   : > { %v2959_v42 = vpop.f32.mrb[39].mxu1 }
 0x253   : > { %v2208_v45 = vadd.f32 %v2718_v0, %v2195_v16  ;;  %v2102_v46 = vadd.f32 %v2957_v39, %v2037_v63  ;;  %v2960_v48 = vadd.f32 %v2959_v42, %v2958_v41  ;;  %v2215_v55 = vmax.f32 %v2207_v27, 0.0  ;;  %v3161_v39 = vld [vmem:[%s3321_s22 + $0x8] sm:$0xff] }
 0x254   : > { %v2410_v41 = vunpack.c.l.bf16 %v3161_v39 }
 0x255   : > { %v2216_v35 = vmax.f32 %v2208_v45, 0.0  ;;  %v2167_v50 = vadd.f32 %v3946_v15, %v2102_v46  ;;  %v2105_v57 = vadd.f32 %v2960_v48, %v2040_v1  ;;  %v2411_v46 = vunpack.c.h.bf16 %v3161_v39 }
 0x257   : > { %v2223_v61 = vpack.c.bf16 %v2216_v35, %v2215_v55  ;;  %v2196_v44 = vmul.f32 %v2717_v60, %v2167_v50  ;;  %v2170_v51 = vadd.f32 %v3950_v23, %v2105_v57  ;;  %v2961_v26 = vpop.f32.mrb[40].mxu1 }
 0x258   : > { %v2962_v8 = vpop.f32.mrb[41].mxu1 }
 0x259   : > { %v2209_v62 = vadd.f32 %v2718_v0, %v2196_v44  ;;  %v2197_v11 = vmul.f32 %v2717_v60, %v2170_v51  ;;  %v2963_v2 = vadd.f32 %v2962_v8, %v2961_v26  ;;  %v2964_v4 = vpop.f32.mrb[42].mxu1  ;;  %2368 = vmatmul.mubr.bf16.vlgmr.msra.gmra.mrb[48].mxu0 %v2223_v61  ;;  %v3162_v44 = vld [vmem:[%s3321_s22 + $0x10] sm:$0xff] }
 0x25a   : > { %v2965_v3 = vpop.f32.mrb[43].mxu1  ;;  %v2412_v51 = vunpack.c.l.bf16 %v3162_v44 }
 0x25b   : > { %v2210_v5 = vadd.f32 %v2718_v0, %v2197_v11  ;;  %v2110_v63 = vadd.f32 %v2963_v2, %v2045_v47  ;;  %v2966_v10 = vadd.f32 %v2965_v3, %v2964_v4  ;;  %v2217_v43 = vmax.f32 %v2209_v62, 0.0  ;;  %v3163_v4 = vld [vmem:[%s3321_s22 + $0x18] sm:$0xff] }
 0x25c   : > { %v2413_v62 = vunpack.c.h.bf16 %v3162_v44  ;;  %v2414_v3 = vunpack.c.l.bf16 %v3163_v4 }
 0x25d   : > { %v2218_v14 = vmax.f32 %v2210_v5, 0.0  ;;  %v2175_v15 = vadd.f32 %v3956_v32, %v2110_v63  ;;  %v2113_v1 = vadd.f32 %v2966_v10, %v2048_v19  ;;  %v2415_v10 = vunpack.c.h.bf16 %v3163_v4 }
 0x25f   : > { %v2224_v18 = vpack.c.bf16 %v2218_v14, %v2217_v43  ;;  %v2198_v54 = vmul.f32 %v2717_v60, %v2175_v15  ;;  %v2178_v23 = vadd.f32 %v3960_v34, %v2113_v1  ;;  %v2967_v22 = vpop.f32.mrb[44].mxu1 }
 0x260   : > { %v2968_v24 = vpop.f32.mrb[45].mxu1 }
 0x261   : > { %v2199_v59 = vmul.f32 %v2717_v60, %v2178_v23  ;;  %v2969_v53 = vadd.f32 %v2968_v24, %v2967_v22  ;;  %v2970_v31 = vpop.f32.mrb[46].mxu1  ;;  %2378 = vmatmul.mubr.bf16.vlgmr.msra.gmra.mrb[48].mxu1 %v2224_v18  ;;  %v2211_v38 = vadd.f32 %v2718_v0, %v2198_v54  ;;  %v3164_v24 = vld [vmem:[%s3321_s22 + $0x20] sm:$0xff] }
 0x262   : > { %v2971_v6 = vpop.f32.mrb[47].mxu1  ;;  %2387 = vmatprep.mubr.bf16.mxu1 %v3176_v40 }
 0x263   : > { %v2118_v47 = vadd.f32 %v2969_v53, %v2053_v58  ;;  %v2972_v52 = vadd.f32 %v2971_v6, %v2970_v31  ;;  %v2212_v25 = vadd.f32 %v2718_v0, %v2199_v59  ;;  %v2219_v17 = vmax.f32 %v2211_v38, 0.0 }
 0x264   : > { %v2416_v59 = vunpack.c.l.bf16 %v3164_v24  ;;  %v2417_v38 = vunpack.c.h.bf16 %v3164_v24 }
 0x265   : > { %v2183_v32 = vadd.f32 %v3954_v29, %v2118_v47  ;;  %v2121_v19 = vadd.f32 %v2972_v52, %v2056_v49  ;;  %v2220_v30 = vmax.f32 %v2212_v25, 0.0  ;;  %v2243_v29 = vld [vmem:[%s4044_s9] sm:$0x3]  ;;  %v3165_v52 = vld [vmem:[%s3321_s22 + $0x28] sm:$0xff] }
 0x266   : > { %v3988_v49 = vrot.slane %v2243_v29, %v3279_v12  ;;  %v2418_v25 = vunpack.c.l.bf16 %v3165_v52 }
 0x267   : > { %v2200_v34 = vmul.f32 %v2717_v60, %v2183_v32  ;;  %v2186_v28 = vadd.f32 %v3958_v21, %v2121_v19  ;;  %v2225_v33 = vpack.c.bf16 %v2220_v30, %v2219_v17  ;;  %v3991_v21 = vrot.slane %v2243_v29, %v3283_v13 }
 0x268   : > { %v2419_v17 = vunpack.c.h.bf16 %v3165_v52 }
 0x269   : > { %v2201_v56 = vmul.f32 %v2717_v60, %v2186_v28  ;;  %2388 = vmatmul.mubr.bf16.gmra.mrb[52].mxu1 %v2225_v33  ;;  %v2213_v9 = vadd.f32 %v2718_v0, %v2200_v34  ;;  %v3160_v60 = vld [vmem:[%s3321_s22] sm:$0xff] }
 0x26a   : > { %2397 = vmatprep.mubr.bf16.mxu1 %v3176_v40  ;;  %v2408_v20 = vunpack.c.l.bf16 %v3160_v60  ;;  %v2409_v40 = vunpack.c.h.bf16 %v3160_v60 }
 0x26b   : > { %v2214_v36 = vadd.f32 %v2718_v0, %v2201_v56  ;;  %v2221_v58 = vmax.f32 %v2213_v9, 0.0 }
 0x26d   : > { %v2222_v7 = vmax.f32 %v2214_v36, 0.0 }
 0x26f   : > { %v2226_v37 = vpack.c.bf16 %v2222_v7, %v2221_v58  ;;  %v3166_v7 = vld [vmem:[%s3321_s22 + $0x30] sm:$0xff] }
 0x271   : > { %2398 = vmatmul.mubr.bf16.gmra.mrb[56].mxu1 %v2226_v37  ;;  %v2420_v37 = vunpack.c.l.bf16 %v3166_v7 }
 0x32c   : > { %v2369_v27 = vpop.f32.mrb[48].mxu0 }
 0x32d   : > { %v2370_v0 = vadd.f32 %v2369_v27, %v3988_v49  ;;  %v2371_v16 = vpop.f32.mrb[49].mxu0 }
 0x32e   : > { %v2372_v42 = vadd.f32 %v2371_v16, %v3991_v21  ;;  %v2373_v45 = vpop.f32.mrb[50].mxu0 }
 0x32f   : > { %v2424_v12 = vadd.f32 %v2408_v20, %v2370_v0  ;;  %v2374_v48 = vadd.f32 %v2373_v45, %v3988_v49  ;;  %v2375_v13 = vpop.f32.mrb[51].mxu0  ;;  %v2421_v20 = vunpack.c.h.bf16 %v3166_v7  ;;  %v3167_v0 = vld [vmem:[%s3321_s22 + $0x38] sm:$0xff] }
 0x330   : > { %v2425_v55 = vadd.f32 %v2409_v40, %v2372_v42  ;;  %v2376_v35 = vadd.f32 %v2375_v13, %v3991_v21  ;;  %v2422_v16 = vunpack.c.l.bf16 %v3167_v0  ;;  %v2423_v42 = vunpack.c.h.bf16 %v3167_v0 }
 0x331   : > { %v2426_v50 = vadd.f32 %v2410_v41, %v2374_v48 }
 0x332   : > { %v2753_v57 = vpack.c.bf16 %v2425_v55, %v2424_v12  ;;  %v2427_v61 = vadd.f32 %v2411_v46, %v2376_v35 }
 0x334   : > { %2488 = vst [vmem:[%s4004_s28] sm:$0xff] %v2753_v57  ;;  %v2754_v26 = vpack.c.bf16 %v2427_v61, %v2426_v50  ;;  %v2379_v8 = vpop.f32.mrb[48].mxu1 }
 0x335   : > { %v2380_v11 = vadd.f32 %v2379_v8, %v3988_v49  ;;  %v2381_v2 = vpop.f32.mrb[49].mxu1 }
 0x336   : > { %2489 = vst [vmem:[%s4004_s28 + $0x8] sm:$0xff] %v2754_v26  ;;  %v2382_v5 = vadd.f32 %v2381_v2, %v3991_v21  ;;  %v2383_v63 = vpop.f32.mrb[50].mxu1 }
 0x337   : > { %v2428_v43 = vadd.f32 %v2412_v51, %v2380_v11  ;;  %v2384_v14 = vadd.f32 %v2383_v63, %v3988_v49  ;;  %v2385_v15 = vpop.f32.mrb[51].mxu1 }
 0x338   : > { %v2429_v1 = vadd.f32 %v2413_v62, %v2382_v5  ;;  %v2386_v18 = vadd.f32 %v2385_v15, %v3991_v21 }
 0x339   : > { %v2430_v54 = vadd.f32 %v2414_v3, %v2384_v14 }
 0x33a   : > { %v2755_v23 = vpack.c.bf16 %v2429_v1, %v2428_v43  ;;  %v2431_v22 = vadd.f32 %v2415_v10, %v2386_v18 }
 0x33c   : > { %2490 = vst [vmem:[%s4004_s28 + $0x10] sm:$0xff] %v2755_v23  ;;  %v2756_v53 = vpack.c.bf16 %v2431_v22, %v2430_v54  ;;  %v2389_v31 = vpop.f32.mrb[52].mxu1 }
 0x33d   : > { %v2390_v6 = vadd.f32 %v2389_v31, %v3988_v49  ;;  %v2391_v47 = vpop.f32.mrb[53].mxu1 }
 0x33e   : > { %2491 = vst [vmem:[%s4004_s28 + $0x18] sm:$0xff] %v2756_v53  ;;  %v2392_v32 = vadd.f32 %v2391_v47, %v3991_v21  ;;  %v2393_v19 = vpop.f32.mrb[54].mxu1 }
 0x33f   : > { %v2432_v30 = vadd.f32 %v2416_v59, %v2390_v6  ;;  %v2394_v34 = vadd.f32 %v2393_v19, %v3988_v49  ;;  %v2395_v28 = vpop.f32.mrb[55].mxu1 }
 0x340   : > { %v2433_v33 = vadd.f32 %v2417_v38, %v2392_v32  ;;  %v2396_v56 = vadd.f32 %v2395_v28, %v3991_v21 }
 0x341   : > { %v2434_v9 = vadd.f32 %v2418_v25, %v2394_v34 }
 0x342   : > { %v2757_v36 = vpack.c.bf16 %v2433_v33, %v2432_v30  ;;  %v2435_v58 = vadd.f32 %v2419_v17, %v2396_v56 }
 0x344   : > { %2492 = vst [vmem:[%s4004_s28 + $0x20] sm:$0xff] %v2757_v36  ;;  %v2758_v29 = vpack.c.bf16 %v2435_v58, %v2434_v9  ;;  %v2399_v60 = vpop.f32.mrb[56].mxu1 }
 0x345   : > { %v2400_v27 = vadd.f32 %v2399_v60, %v3988_v49  ;;  %v2401_v40 = vpop.f32.mrb[57].mxu1 }
 0x346   : > { %2493 = vst [vmem:[%s4004_s28 + $0x28] sm:$0xff] %v2758_v29  ;;  %v2402_v39 = vadd.f32 %v2401_v40, %v3991_v21  ;;  %v2403_v41 = vpop.f32.mrb[58].mxu1 }
 0x347   : > { %v2436_v45 = vadd.f32 %v2420_v37, %v2400_v27  ;;  %v2404_v46 = vadd.f32 %v2403_v41, %v3988_v49  ;;  %v2405_v12 = vpop.f32.mrb[59].mxu1 }
 0x348   : > { %v2437_v48 = vadd.f32 %v2421_v20, %v2402_v39  ;;  %v2406_v13 = vadd.f32 %v2405_v12, %v3991_v21 }
 0x349   : > { %v2438_v55 = vadd.f32 %v2422_v16, %v2404_v46 }
 0x34a   : > { %v2759_v35 = vpack.c.bf16 %v2437_v48, %v2436_v45  ;;  %v2439_v50 = vadd.f32 %v2423_v42, %v2406_v13 }
 0x34c   : > { %2494 = vst [vmem:[%s4004_s28 + $0x30] sm:$0xff] %v2759_v35  ;;  %v2760_v57 = vpack.c.bf16 %v2439_v50, %v2438_v55 }
 0x34e   : > { %2495 = vst [vmem:[%s4004_s28 + $0x38] sm:$0xff] %v2760_v57 }
 0x34f PF: > { %s20_s13 = sadd.s32 1, %s3174_s13  }
 0x350   : > { %p17_p10 = scmp.ge.s32.totalorder %s20_s13, 4  }
 0x352   :  { %19 = sbr.rel (!%p17_p10) target bundleno = 1 (0x1), region = 97 }

// kernel: _lambda_.30
= control target key start
LH: loop header
LB: loop body
LE: loop exit
PB: predicated region body
PF: predicated region fallthrough
CT: control target
= control target key end

     0   :  { %s1485_s9 = smov 0   ;;  %s1706_s0 = inlined_call_operand.vmem [shape: bf16[4,4,2,256], index: 0, kind: input, shape index: {}]   ;;  %s1707_s1 = inlined_call_operand.vmem [shape: bf16[8,8,2,256], index: 1, kind: input, shape index: {}]   ;;  %s1708_s2 = inlined_call_operand.vmem [shape: bf16[8,8,2,256], index: 2, kind: output, shape index: {}]  }
   0x1 LB: > { %s1373_s10 = sadd.s32 4294967295, %s1466_s9   ;;  %p1377_p0 = scmp.ge.s32.totalorder %s1466_s9, 1  ;;  %s1466_s9 = sphi %s1485_s9, %s12_s9  }
   0x2   : > { %p124_p1 = scmp.lt.s32.totalorder %s1466_s9, 3 }
   0x4   : > { %p125_p2 = pnand %p1377_p0, %p124_p1 }
   0x5   : > { %s1378_s11 = sshll.u32 (!%p125_p2), %s1373_s10, 1  ;;  %s1380_s12 = sshll.u32 (!%p125_p2), %s1373_s10, 2  ;;  %v1468_v0 = vmov (!%p125_p2), 1983009808   ;;  %v316_v2 = vlaneseq (!%p125_p2)  ;;  %v1469_v3 = vmov (!%p125_p2), 1966171168  }
   0x6   : > { %128 = sbr.rel (%p125_p2) target bundleno = 74 (0x4a), region = 28  ;;  %p152_p3 = scmp.lt.s32.totalorder (!%p125_p2), %s1378_s11, 3  ;;  %v314_v1 = vunpack.c.l.s4 (!%p125_p2), %v1468_v0  ;;  %v763_v4 = vunpack.c.l.s4 (!%p125_p2), %v1469_v3 }
   0x7   : > { %p158_p4 = scmp.lt.s32.totalorder (!%p125_p2), %s1380_s12, 7  ;;  %v317_v6 = vshrl.u32 (!%p125_p2), %v316_v2, 7 }
   0x8   : > { %v315_v5 = vunpack.c.0.s8 (!%p125_p2), %v314_v1  ;;  %v764_v7 = vunpack.c.0.s8 (!%p125_p2), %v763_v4 }
   0xa   : > { %v1520_v18 = vsub.s32 (!%p125_p2), %v315_v5, %v317_v6  ;;  %v1525_v24 = vsub.s32 (!%p125_p2), %v764_v7, %v317_v6 }
   0xd   : > { %s1710_s11 = smov (!%p152_p3, %s1378_s11), 3  ;;  %s1712_s12 = smov (!%p158_p4, %s1380_s12), 7 }
   0xe   : > { %s1379_s13 = sshll.u32 %s1710_s11, 3  ;;  %s1381_s17 = sshll.u32 %s1712_s12, 4 }
   0xf   : > { %s1498_s16 = scalar_lea.vmem %s1706_s0, %s1379_s13  ;;  %s1506_s20 = scalar_lea.vmem %s1707_s1, %s1381_s17 }
  0x10   : > { %v169_v8 = vld [vmem:[%s1498_s16] sm:$0x3]  ;;  %v170_v9 = vld [vmem:[%s1498_s16 + $0x2] sm:$0x3]  ;;  %v171_v10 = vld [vmem:[%s1498_s16 + $0x4] sm:$0x3]  ;;  %s1553_s23 = scalar_lea.vmem %s1708_s2, %s1381_s17 }
  0x11   : > { %v1511_v11 = vunpack.c.l.bf16 %v169_v8  ;;  %v185_v12 = vld [vmem:[%s1506_s20] sm:$0x3]  ;;  %v186_v13 = vld [vmem:[%s1506_s20 + $0x2] sm:$0x3]  ;;  %v1515_v14 = vunpack.c.l.bf16 %v170_v9  ;;  %v187_v15 = vld [vmem:[%s1506_s20 + $0x4] sm:$0x3]  ;;  %v1518_v16 = vunpack.c.l.bf16 %v171_v10 }
  0x12   : > { %v217_v17 = vunpack.c.l.bf16 %v185_v12  ;;  %v218_v19 = vunpack.c.l.bf16 %v186_v13  ;;  %v219_v20 = vunpack.c.l.bf16 %v187_v15  ;;  %v188_v21 = vld [vmem:[%s1506_s20 + $0x6] sm:$0x3]  ;;  %v189_v22 = vld [vmem:[%s1506_s20 + $0x8] sm:$0x3]  ;;  %v190_v23 = vld [vmem:[%s1506_s20 + $0xa] sm:$0x3] }
  0x13   : > { %v220_v25 = vunpack.c.l.bf16 %v188_v21  ;;  %v221_v26 = vunpack.c.l.bf16 %v189_v22  ;;  %v222_v27 = vunpack.c.l.bf16 %v190_v23  ;;  %v172_v28 = vld [vmem:[%s1498_s16 + $0x6] sm:$0x3]  ;;  %v191_v29 = vld [vmem:[%s1506_s20 + $0xc] sm:$0x3]  ;;  %v192_v30 = vld [vmem:[%s1506_s20 + $0xe] sm:$0x3] }
  0x14   : > { %v249_v31 = vadd.f32 %v217_v17, %v1511_v11  ;;  %v250_v32 = vadd.f32 %v218_v19, %v1511_v11  ;;  %v251_v33 = vadd.f32 %v219_v20, %v1515_v14  ;;  %v1533_v34 = vunpack.c.l.bf16 %v172_v28  ;;  %v193_v63 = vld [vmem:[%s1506_s20 + $0x10] sm:$0x3]  ;;  %v194_v0 = vld [vmem:[%s1506_s20 + $0x12] sm:$0x3]  ;;  %v195_v1 = vld [vmem:[%s1506_s20 + $0x14] sm:$0x3] }
  0x15   : > { %v252_v35 = vadd.f32 %v220_v25, %v1515_v14  ;;  %v253_v36 = vadd.f32 %v221_v26, %v1518_v16  ;;  %v254_v37 = vadd.f32 %v222_v27, %v1518_v16  ;;  %v223_v38 = vunpack.c.l.bf16 %v191_v29  ;;  %v196_v6 = vld [vmem:[%s1506_s20 + $0x16] sm:$0x3]  ;;  %v197_v7 = vld [vmem:[%s1506_s20 + $0x18] sm:$0x3]  ;;  %v198_v8 = vld [vmem:[%s1506_s20 + $0x1a] sm:$0x3] }
  0x16   : > { %v319_v39 = vrot.slane %v249_v31, %v1520_v18  ;;  %v327_v40 = vrot.slane %v250_v32, %v1520_v18  ;;  %v335_v41 = vrot.slane %v251_v33, %v1520_v18  ;;  %v224_v42 = vunpack.c.l.bf16 %v192_v30  ;;  %v199_v21 = vld [vmem:[%s1506_s20 + $0x1c] sm:$0x3]  ;;  %v200_v27 = vld [vmem:[%s1506_s20 + $0x1e] sm:$0x3] }
  0x17   : > { %v343_v43 = vrot.slane %v252_v35, %v1520_v18  ;;  %v351_v44 = vrot.slane %v253_v36, %v1520_v18  ;;  %v359_v45 = vrot.slane %v254_v37, %v1520_v18  ;;  %v255_v46 = vadd.f32 %v223_v38, %v1533_v34 }
  0x18   : > { %v320_v47 = vcombine.high %v319_v39, %v319_v39  ;;  %v328_v48 = vcombine.high %v327_v40, %v327_v40  ;;  %v336_v49 = vcombine.high %v335_v41, %v335_v41  ;;  %v256_v50 = vadd.f32 %v224_v42, %v1533_v34 }
  0x19   : > { %v344_v51 = vcombine.high %v343_v43, %v343_v43  ;;  %v352_v52 = vcombine.high %v351_v44, %v351_v44  ;;  %v360_v53 = vcombine.high %v359_v45, %v359_v45  ;;  %v367_v54 = vrot.slane %v255_v46, %v1520_v18 }
  0x1a   : > { %v1384_v55 = vpack.c.bf16 %v320_v47, %v319_v39  ;;  %v1385_v56 = vpack.c.bf16 %v328_v48, %v327_v40  ;;  %v1386_v57 = vpack.c.bf16 %v336_v49, %v335_v41  ;;  %v375_v58 = vrot.slane %v256_v50, %v1520_v18 }
  0x1b   : > { %v1387_v59 = vpack.c.bf16 %v344_v51, %v343_v43  ;;  %v1388_v60 = vpack.c.bf16 %v352_v52, %v351_v44  ;;  %v1389_v61 = vpack.c.bf16 %v360_v53, %v359_v45  ;;  %v368_v62 = vcombine.high %v367_v54, %v367_v54 }
  0x1c   : > { %v768_v2 = vrot.slane %v1384_v55, %v1525_v24  ;;  %v783_v3 = vrot.slane %v1385_v56, %v1525_v24  ;;  %v798_v4 = vrot.slane %v1386_v57, %v1525_v24  ;;  %v376_v5 = vcombine.high %v375_v58, %v375_v58 }
  0x1d   : > { %v813_v9 = vrot.slane %v1387_v59, %v1525_v24  ;;  %v828_v10 = vrot.slane %v1388_v60, %v1525_v24  ;;  %v843_v12 = vrot.slane %v1389_v61, %v1525_v24  ;;  %v1390_v13 = vpack.c.bf16 %v368_v62, %v367_v54  ;;  %v202_v59 = vld [vmem:[%s1506_s20 + $0x22] sm:$0x3] }
  0x1e   : > { %1416 = vst.sshfl [vmem:[%s1553_s23] sm:$0x5 pattern:$0x73625140] %v768_v2  ;;  %v1391_v15 = vpack.c.bf16 %v376_v5, %v375_v58  ;;  %v225_v17 = vunpack.c.l.bf16 %v193_v63  ;;  %v226_v19 = vunpack.c.l.bf16 %v194_v0  ;;  %v227_v20 = vunpack.c.l.bf16 %v195_v1  ;;  %v201_v58 = vld [vmem:[%s1506_s20 + $0x20] sm:$0x3] }
  0x1f   : > { %1417 = vst.sshfl [vmem:[%s1553_s23 + $0x2] sm:$0x5 pattern:$0x73625140] %v783_v3  ;;  %v858_v22 = vrot.slane %v1390_v13, %v1525_v24  ;;  %v228_v23 = vunpack.c.l.bf16 %v196_v6  ;;  %v229_v25 = vunpack.c.l.bf16 %v197_v7  ;;  %v230_v26 = vunpack.c.l.bf16 %v198_v8  ;;  %v174_v0 = vld [vmem:[%s1498_s16 + $0xa] sm:$0x3] }
  0x20   : > { %1418 = vst.sshfl [vmem:[%s1553_s23 + $0x4] sm:$0x5 pattern:$0x73625140] %v798_v4  ;;  %v873_v28 = vrot.slane %v1391_v15, %v1525_v24  ;;  %v257_v29 = vadd.f32 %v225_v17, %v1511_v11  ;;  %v258_v30 = vadd.f32 %v226_v19, %v1511_v11  ;;  %v259_v31 = vadd.f32 %v227_v20, %v1515_v14  ;;  %v203_v1 = vld [vmem:[%s1506_s20 + $0x24] sm:$0x3] }
  0x21   : > { %1419 = vst.sshfl [vmem:[%s1553_s23 + $0x6] sm:$0x5 pattern:$0x73625140] %v813_v9  ;;  %v260_v32 = vadd.f32 %v228_v23, %v1515_v14  ;;  %v261_v33 = vadd.f32 %v229_v25, %v1518_v16  ;;  %v262_v35 = vadd.f32 %v230_v26, %v1518_v16  ;;  %v231_v36 = vunpack.c.l.bf16 %v199_v21  ;;  %v204_v2 = vld [vmem:[%s1506_s20 + $0x26] sm:$0x3] }
  0x22   : > { %1420 = vst.sshfl [vmem:[%s1553_s23 + $0x8] sm:$0x5 pattern:$0x73625140] %v828_v10  ;;  %v383_v37 = vrot.slane %v257_v29, %v1520_v18  ;;  %v391_v38 = vrot.slane %v258_v30, %v1520_v18  ;;  %v399_v39 = vrot.slane %v259_v31, %v1520_v18  ;;  %v232_v40 = vunpack.c.l.bf16 %v200_v27  ;;  %v175_v7 = vld [vmem:[%s1498_s16 + $0xc] sm:$0x3] }
  0x23   : > { %1421 = vst.sshfl [vmem:[%s1553_s23 + $0xa] sm:$0x5 pattern:$0x73625140] %v843_v12  ;;  %v407_v11 = vrot.slane %v260_v32, %v1520_v18  ;;  %v415_v41 = vrot.slane %v261_v33, %v1520_v18  ;;  %v423_v42 = vrot.slane %v262_v35, %v1520_v18  ;;  %v263_v14 = vadd.f32 %v231_v36, %v1533_v34  ;;  %v205_v13 = vld [vmem:[%s1506_s20 + $0x28] sm:$0x3] }
  0x24   : > { %1422 = vst.sshfl [vmem:[%s1553_s23 + $0xc] sm:$0x5 pattern:$0x73625140] %v858_v22  ;;  %v384_v43 = vcombine.high %v383_v37, %v383_v37  ;;  %v392_v16 = vcombine.high %v391_v38, %v391_v38  ;;  %v400_v44 = vcombine.high %v399_v39, %v399_v39  ;;  %v264_v45 = vadd.f32 %v232_v40, %v1533_v34  ;;  %v173_v34 = vld [vmem:[%s1498_s16 + $0x8] sm:$0x3] }
  0x25   : > { %1423 = vst.sshfl [vmem:[%s1553_s23 + $0xe] sm:$0x5 pattern:$0x73625140] %v873_v28  ;;  %v408_v46 = vcombine.high %v407_v11, %v407_v11  ;;  %v416_v47 = vcombine.high %v415_v41, %v415_v41  ;;  %v424_v48 = vcombine.high %v423_v42, %v423_v42  ;;  %v431_v49 = vrot.slane %v263_v14, %v1520_v18  ;;  %v206_v15 = vld [vmem:[%s1506_s20 + $0x2a] sm:$0x3] }
  0x26   : > { %v1392_v50 = vpack.c.bf16 %v384_v43, %v383_v37  ;;  %v1393_v51 = vpack.c.bf16 %v392_v16, %v391_v38  ;;  %v1394_v52 = vpack.c.bf16 %v400_v44, %v399_v39  ;;  %v439_v53 = vrot.slane %v264_v45, %v1520_v18  ;;  %v176_v22 = vld [vmem:[%s1498_s16 + $0xe] sm:$0x3]  ;;  %v207_v23 = vld [vmem:[%s1506_s20 + $0x2c] sm:$0x3] }
  0x27   : > { %v1395_v54 = vpack.c.bf16 %v408_v46, %v407_v11  ;;  %v1396_v55 = vpack.c.bf16 %v416_v47, %v415_v41  ;;  %v1397_v56 = vpack.c.bf16 %v424_v48, %v423_v42  ;;  %v432_v57 = vcombine.high %v431_v49, %v431_v49  ;;  %v208_v33 = vld [vmem:[%s1506_s20 + $0x2e] sm:$0x3] }
  0x28   : > { %v888_v60 = vrot.slane %v1392_v50, %v1525_v24  ;;  %v903_v61 = vrot.slane %v1393_v51, %v1525_v24  ;;  %v918_v62 = vrot.slane %v1394_v52, %v1525_v24  ;;  %v440_v63 = vcombine.high %v439_v53, %v439_v53 }
  0x29   : > { %v933_v3 = vrot.slane %v1395_v54, %v1525_v24  ;;  %v948_v4 = vrot.slane %v1396_v55, %v1525_v24  ;;  %v963_v5 = vrot.slane %v1397_v56, %v1525_v24  ;;  %v1398_v6 = vpack.c.bf16 %v432_v57, %v431_v49  ;;  %v209_v56 = vld [vmem:[%s1506_s20 + $0x30] sm:$0x3]  ;;  %v210_v57 = vld [vmem:[%s1506_s20 + $0x32] sm:$0x3] }
  0x2a   : > { %1424 = vst.sshfl [vmem:[%s1553_s23 + $0x10] sm:$0x5 pattern:$0x73625140] %v888_v60  ;;  %v1399_v8 = vpack.c.bf16 %v440_v63, %v439_v53  ;;  %v1611_v9 = vunpack.c.l.bf16 %v173_v34  ;;  %v233_v10 = vunpack.c.l.bf16 %v201_v58  ;;  %v234_v12 = vunpack.c.l.bf16 %v202_v59 }
  0x2b   : > { %1425 = vst.sshfl [vmem:[%s1553_s23 + $0x12] sm:$0x5 pattern:$0x73625140] %v903_v61  ;;  %v978_v17 = vrot.slane %v1398_v6, %v1525_v24  ;;  %v1619_v19 = vunpack.c.l.bf16 %v174_v0  ;;  %v235_v20 = vunpack.c.l.bf16 %v203_v1  ;;  %v236_v21 = vunpack.c.l.bf16 %v204_v2  ;;  %v211_v61 = vld [vmem:[%s1506_s20 + $0x34] sm:$0x3] }
  0x2c   : > { %1426 = vst.sshfl [vmem:[%s1553_s23 + $0x14] sm:$0x5 pattern:$0x73625140] %v918_v62  ;;  %v993_v25 = vrot.slane %v1399_v8, %v1525_v24  ;;  %v265_v26 = vadd.f32 %v233_v10, %v1611_v9  ;;  %v266_v27 = vadd.f32 %v234_v12, %v1611_v9  ;;  %v1626_v28 = vunpack.c.l.bf16 %v175_v7  ;;  %v212_v62 = vld [vmem:[%s1506_s20 + $0x36] sm:$0x3] }
  0x2d   : > { %1427 = vst.sshfl [vmem:[%s1553_s23 + $0x16] sm:$0x5 pattern:$0x73625140] %v933_v3  ;;  %v267_v29 = vadd.f32 %v235_v20, %v1619_v19  ;;  %v268_v30 = vadd.f32 %v236_v21, %v1619_v19  ;;  %v237_v31 = vunpack.c.l.bf16 %v205_v13  ;;  %v238_v32 = vunpack.c.l.bf16 %v206_v15  ;;  %v213_v7 = vld [vmem:[%s1506_s20 + $0x38] sm:$0x3] }
  0x2e   : > { %1428 = vst.sshfl [vmem:[%s1553_s23 + $0x18] sm:$0x5 pattern:$0x73625140] %v948_v4  ;;  %v447_v35 = vrot.slane %v265_v26, %v1520_v18  ;;  %v455_v36 = vrot.slane %v266_v27, %v1520_v18  ;;  %v1635_v37 = vunpack.c.l.bf16 %v176_v22  ;;  %v239_v38 = vunpack.c.l.bf16 %v207_v23  ;;  %v214_v8 = vld [vmem:[%s1506_s20 + $0x3a] sm:$0x3] }
  0x2f   : > { %1429 = vst.sshfl [vmem:[%s1553_s23 + $0x1a] sm:$0x5 pattern:$0x73625140] %v963_v5  ;;  %v463_v39 = vrot.slane %v267_v29, %v1520_v18  ;;  %v471_v40 = vrot.slane %v268_v30, %v1520_v18  ;;  %v269_v11 = vadd.f32 %v237_v31, %v1626_v28  ;;  %v270_v41 = vadd.f32 %v238_v32, %v1626_v28  ;;  %v216_v30 = vld [vmem:[%s1506_s20 + $0x3e] sm:$0x3] }
  0x30   : > { %1430 = vst.sshfl [vmem:[%s1553_s23 + $0x1c] sm:$0x5 pattern:$0x73625140] %v978_v17  ;;  %v448_v42 = vcombine.high %v447_v35, %v447_v35  ;;  %v456_v14 = vcombine.high %v455_v36, %v455_v36  ;;  %v271_v43 = vadd.f32 %v239_v38, %v1635_v37  ;;  %v240_v16 = vunpack.c.l.bf16 %v208_v33  ;;  %v215_v17 = vld [vmem:[%s1506_s20 + $0x3c] sm:$0x3] }
  0x31   : > { %1431 = vst.sshfl [vmem:[%s1553_s23 + $0x1e] sm:$0x5 pattern:$0x73625140] %v993_v25  ;;  %v464_v44 = vcombine.high %v463_v39, %v463_v39  ;;  %v472_v45 = vcombine.high %v471_v40, %v471_v40  ;;  %v479_v46 = vrot.slane %v269_v11, %v1520_v18  ;;  %v487_v47 = vrot.slane %v270_v41, %v1520_v18 }
  0x32   : > { %v1400_v48 = vpack.c.bf16 %v448_v42, %v447_v35  ;;  %v1401_v49 = vpack.c.bf16 %v456_v14, %v455_v36  ;;  %v495_v50 = vrot.slane %v271_v43, %v1520_v18  ;;  %v272_v51 = vadd.f32 %v240_v16, %v1635_v37 }
  0x33   : > { %v1402_v52 = vpack.c.bf16 %v464_v44, %v463_v39  ;;  %v1403_v53 = vpack.c.bf16 %v472_v45, %v471_v40  ;;  %v480_v54 = vcombine.high %v479_v46, %v479_v46  ;;  %v488_v55 = vcombine.high %v487_v47, %v487_v47 }
  0x34   : > { %v1008_v34 = vrot.slane %v1400_v48, %v1525_v24  ;;  %v1023_v58 = vrot.slane %v1401_v49, %v1525_v24  ;;  %v496_v59 = vcombine.high %v495_v50, %v495_v50  ;;  %v503_v60 = vrot.slane %v272_v51, %v1520_v18 }
  0x35   : > { %v1038_v63 = vrot.slane %v1402_v52, %v1525_v24  ;;  %v1053_v0 = vrot.slane %v1403_v53, %v1525_v24  ;;  %v1404_v1 = vpack.c.bf16 %v480_v54, %v479_v46  ;;  %v1405_v2 = vpack.c.bf16 %v488_v55, %v487_v47 }
  0x36   : > { %1432 = vst.sshfl [vmem:[%s1553_s23 + $0x20] sm:$0x5 pattern:$0x73625140] %v1008_v34  ;;  %v1406_v3 = vpack.c.bf16 %v496_v59, %v495_v50  ;;  %v504_v4 = vcombine.high %v503_v60, %v503_v60  ;;  %v241_v5 = vunpack.c.l.bf16 %v209_v56  ;;  %v242_v6 = vunpack.c.l.bf16 %v210_v57 }
  0x37   : > { %1433 = vst.sshfl [vmem:[%s1553_s23 + $0x22] sm:$0x5 pattern:$0x73625140] %v1023_v58  ;;  %v1068_v10 = vrot.slane %v1404_v1, %v1525_v24  ;;  %v1083_v12 = vrot.slane %v1405_v2, %v1525_v24  ;;  %v243_v13 = vunpack.c.l.bf16 %v211_v61  ;;  %v244_v15 = vunpack.c.l.bf16 %v212_v62 }
  0x38   : > { %1434 = vst.sshfl [vmem:[%s1553_s23 + $0x24] sm:$0x5 pattern:$0x73625140] %v1038_v63  ;;  %v1098_v20 = vrot.slane %v1406_v3, %v1525_v24  ;;  %v1407_v21 = vpack.c.bf16 %v504_v4, %v503_v60  ;;  %v273_v22 = vadd.f32 %v241_v5, %v1611_v9  ;;  %v274_v23 = vadd.f32 %v242_v6, %v1611_v9 }
  0x39   : > { %1435 = vst.sshfl [vmem:[%s1553_s23 + $0x26] sm:$0x5 pattern:$0x73625140] %v1053_v0  ;;  %v275_v25 = vadd.f32 %v243_v13, %v1619_v19  ;;  %v276_v26 = vadd.f32 %v244_v15, %v1619_v19  ;;  %v245_v27 = vunpack.c.l.bf16 %v213_v7  ;;  %v246_v29 = vunpack.c.l.bf16 %v214_v8 }
  0x3a   : > { %1436 = vst.sshfl [vmem:[%s1553_s23 + $0x28] sm:$0x5 pattern:$0x73625140] %v1068_v10  ;;  %v1113_v31 = vrot.slane %v1407_v21, %v1525_v24  ;;  %v511_v32 = vrot.slane %v273_v22, %v1520_v18  ;;  %v519_v33 = vrot.slane %v274_v23, %v1520_v18  ;;  %v247_v35 = vunpack.c.l.bf16 %v215_v17 }
  0x3b   : > { %1437 = vst.sshfl [vmem:[%s1553_s23 + $0x2a] sm:$0x5 pattern:$0x73625140] %v1083_v12  ;;  %v527_v9 = vrot.slane %v275_v25, %v1520_v18  ;;  %v535_v36 = vrot.slane %v276_v26, %v1520_v18  ;;  %v277_v38 = vadd.f32 %v245_v27, %v1626_v28  ;;  %v278_v39 = vadd.f32 %v246_v29, %v1626_v28 }
  0x3c   : > { %1438 = vst.sshfl [vmem:[%s1553_s23 + $0x2c] sm:$0x5 pattern:$0x73625140] %v1098_v20  ;;  %v512_v19 = vcombine.high %v511_v32, %v511_v32  ;;  %v520_v40 = vcombine.high %v519_v33, %v519_v33  ;;  %v279_v11 = vadd.f32 %v247_v35, %v1635_v37  ;;  %v248_v41 = vunpack.c.l.bf16 %v216_v30 }
  0x3d   : > { %1439 = vst.sshfl [vmem:[%s1553_s23 + $0x2e] sm:$0x5 pattern:$0x73625140] %v1113_v31  ;;  %v528_v42 = vcombine.high %v527_v9, %v527_v9  ;;  %v536_v14 = vcombine.high %v535_v36, %v535_v36  ;;  %v543_v43 = vrot.slane %v277_v38, %v1520_v18  ;;  %v551_v16 = vrot.slane %v278_v39, %v1520_v18 }
  0x3e   : > { %v1408_v44 = vpack.c.bf16 %v512_v19, %v511_v32  ;;  %v1409_v45 = vpack.c.bf16 %v520_v40, %v519_v33  ;;  %v559_v46 = vrot.slane %v279_v11, %v1520_v18  ;;  %v280_v28 = vadd.f32 %v248_v41, %v1635_v37 }
  0x3f   : > { %v1410_v47 = vpack.c.bf16 %v528_v42, %v527_v9  ;;  %v1411_v48 = vpack.c.bf16 %v536_v14, %v535_v36  ;;  %v544_v49 = vcombine.high %v543_v43, %v543_v43  ;;  %v552_v50 = vcombine.high %v551_v16, %v551_v16 }
  0x40   : > { %v1128_v51 = vrot.slane %v1408_v44, %v1525_v24  ;;  %v1143_v52 = vrot.slane %v1409_v45, %v1525_v24  ;;  %v560_v53 = vcombine.high %v559_v46, %v559_v46  ;;  %v567_v54 = vrot.slane %v280_v28, %v1520_v18 }
  0x41   : > { %v1158_v55 = vrot.slane %v1410_v47, %v1525_v24  ;;  %v1173_v37 = vrot.slane %v1411_v48, %v1525_v24  ;;  %v1412_v56 = vpack.c.bf16 %v544_v49, %v543_v43  ;;  %v1413_v57 = vpack.c.bf16 %v552_v50, %v551_v16 }
  0x42   : > { %1440 = vst.sshfl [vmem:[%s1553_s23 + $0x30] sm:$0x5 pattern:$0x73625140] %v1128_v51  ;;  %v1414_v34 = vpack.c.bf16 %v560_v53, %v559_v46  ;;  %v568_v58 = vcombine.high %v567_v54, %v567_v54 }
  0x43   : > { %1441 = vst.sshfl [vmem:[%s1553_s23 + $0x32] sm:$0x5 pattern:$0x73625140] %v1143_v52  ;;  %v1188_v59 = vrot.slane %v1412_v56, %v1525_v24  ;;  %v1203_v60 = vrot.slane %v1413_v57, %v1525_v24 }
  0x44   : > { %1442 = vst.sshfl [vmem:[%s1553_s23 + $0x34] sm:$0x5 pattern:$0x73625140] %v1158_v55  ;;  %v1218_v18 = vrot.slane %v1414_v34, %v1525_v24  ;;  %v1415_v61 = vpack.c.bf16 %v568_v58, %v567_v54 }
  0x45   : > { %1443 = vst.sshfl [vmem:[%s1553_s23 + $0x36] sm:$0x5 pattern:$0x73625140] %v1173_v37 }
  0x46   : > { %1444 = vst.sshfl [vmem:[%s1553_s23 + $0x38] sm:$0x5 pattern:$0x73625140] %v1188_v59  ;;  %v1233_v62 = vrot.slane %v1415_v61, %v1525_v24 }
  0x47   : > { %1445 = vst.sshfl [vmem:[%s1553_s23 + $0x3a] sm:$0x5 pattern:$0x73625140] %v1203_v60 }
  0x48   : > { %1446 = vst.sshfl [vmem:[%s1553_s23 + $0x3c] sm:$0x5 pattern:$0x73625140] %v1218_v18 }
  0x49   : > { %1447 = vst.sshfl [vmem:[%s1553_s23 + $0x3e] sm:$0x5 pattern:$0x73625140] %v1233_v62 }
  0x4a PF: > { %s12_s9 = sadd.s32 1, %s1466_s9  }
  0x4b   : > { %p9_p5 = scmp.ge.s32.totalorder %s12_s9, 4  }
  0x4d   :  { %11 = sbr.rel (!%p9_p5) target bundleno = 1 (0x1), region = 61 }

// kernel: _lambda_.25
= control target key start
LH: loop header
LB: loop body
LE: loop exit
PB: predicated region body
PF: predicated region fallthrough
CT: control target
= control target key end

     0   :  { %s2482_s13 = smov 0   ;;  %s2978_s0 = inlined_call_operand.vmem [shape: bf16[32,256], index: 0, kind: input, shape index: {}, may-alias: {0,1,2}]   ;;  %s2979_s1 = inlined_call_operand.vmem [shape: bf16[32,256], index: 1, kind: input, shape index: {}, may-alias: {0,1,2}]   ;;  %s2980_s2 = inlined_call_operand.vmem [shape: bf16[32,256], index: 2, kind: input, shape index: {}, may-alias: {0,1,2}]   ;;  %s2981_s3 = inlined_call_operand.vmem [shape: f32[2,256], index: 3, kind: input, shape index: {}]   ;;  %s2982_s4 = inlined_call_operand.vmem [shape: bf16[256,128], index: 4, kind: input, shape index: {}]   ;;  %s2983_s5 = inlined_call_operand.vmem [shape: f32[2,128], index: 5, kind: input, shape index: {}]   ;;  %s2984_s6 = inlined_call_operand.vmem [shape: bf16[1152,128], index: 6, kind: input, shape index: {}]   ;;  %s2985_s7 = inlined_call_operand.vmem [shape: f32[2,128], index: 7, kind: input, shape index: {}]   ;;  %s2986_s8 = inlined_call_operand.vmem [shape: bf16[128,256], index: 8, kind: input, shape index: {}]   ;;  %s2987_s9 = inlined_call_operand.vmem [shape: f32[1,256], index: 9, kind: input, shape index: {}]   ;;  %s2988_s10 = inlined_call_operand.vmem [shape: bf16[32,256], index: 10, kind: output, shape index: {}]  }
   0x1 LB: > { %s2488_s14 = sadd.s32 4294967295, %s2421_s13   ;;  %p1973_p0 = scmp.ge.s32.totalorder %s2421_s13, 1  ;;  %s2421_s13 = sphi %s2482_s13, %s20_s13  }
   0x2   : > { %p366_p1 = scmp.lt.s32.totalorder %s2421_s13, 3 }
   0x4   : > { %p367_p2 = pnand %p1973_p0, %p366_p1 }
   0x5   : > { %v2293_v0 = vld [vmem:[%s2982_s4 + $0x40] sm:$0xff] (!%p367_p2)   ;;  %s2496_s17 = sshll.u32 (!%p367_p2), %s2488_s14, 1  ;;  %v2295_v2 = vld [vmem:[%s2982_s4 + $0x48] sm:$0xff] (!%p367_p2)   ;;  %v2297_v4 = vld [vmem:[%s2982_s4 + $0x50] sm:$0xff] (!%p367_p2)   ;;  %v516_v6 = vlaneseq (!%p367_p2)  ;;  %vm489_vm0 = vcmask (!%p367_p2), 1043456   ;;  %p823_p7 = scmp.eq.s32.totalorder (!%p367_p2), %s2488_s14, 0 }
   0x6   : > { %370 = sbr.rel (%p367_p2) target bundleno = 786 (0x312), region = 60  ;;  %v2294_v1 = vld [vmem:[%s2982_s4] sm:$0xff] (!%p367_p2)   ;;  %s1975_s20 = sadd.s32 (!%p367_p2), 4294967295, %s2496_s17  ;;  %2136 = vmatprep.subr.bf16.mxu0 (!%p367_p2), %v2293_v0  ;;  %v2296_v3 = vld [vmem:[%s2982_s4 + $0x8] sm:$0xff] (!%p367_p2)   ;;  %v2298_v5 = vld [vmem:[%s2982_s4 + $0x10] sm:$0xff] (!%p367_p2)   ;;  %vm2423_vm9 = vmmov (!%p367_p2), 1  }
   0x7   : > { %p426_p3 = scmp.gt.s32.totalorder (!%p367_p2), %s1975_s20, 0  ;;  %2137 = vmatpush3.bf16.msra.mxu0 (!%p367_p2), %v2294_v1  ;;  %p1976_p4 = scmp.lt.s32.totalorder (!%p367_p2), %s1975_s20, 3  ;;  %v2299_v7 = vld [vmem:[%s2982_s4 + $0x58] sm:$0xff] (!%p367_p2)   ;;  %v2525_v9 = vshrl.u32 (!%p367_p2), %v516_v6, 7  ;;  %v2301_v10 = vld [vmem:[%s2982_s4 + $0x60] sm:$0xff] (!%p367_p2)   ;;  %v2303_v14 = vld [vmem:[%s2982_s4 + $0x68] sm:$0xff] (!%p367_p2)  }
   0x8   : > { %2138 = vmatprep.subr.bf16.mxu0 (!%p367_p2), %v2295_v2  ;;  %p438_p5 = scmp.lt.s32.totalorder (!%p367_p2), %s2496_s17, 3  ;;  %v2300_v8 = vld [vmem:[%s2982_s4 + $0x18] sm:$0xff] (!%p367_p2)   ;;  %s445_s22 = sadd.s32 (!%p367_p2), 2, %s2496_s17  ;;  %v2302_v13 = vld [vmem:[%s2982_s4 + $0x20] sm:$0xff] (!%p367_p2)   ;;  %v2304_v17 = vld [vmem:[%s2982_s4 + $0x28] sm:$0xff] (!%p367_p2)  }
   0x9   : > { %v2542_v11 = vsub.s32 (!%p367_p2), 0, %v2525_v9  ;;  %v2545_v12 = vsub.s32 (!%p367_p2), 1, %v2525_v9  ;;  %p2550_p6 = scmp.lt.s32.totalorder (!%p367_p2), %s445_s22, 3  ;;  %v514_v21 = vld [vmem:[%s2981_s3] ss:$2 sm:$0x3] (!%p367_p2) }
   0xa   : > { %v2003_v22 = vld [vmem:[%s2981_s3 + $0x1] ss:$2 sm:$0x3] (!%p367_p2)  ;;  %v2305_v24 = vld [vmem:[%s2982_s4 + $0x70] sm:$0xff] (!%p367_p2)   ;;  %v2319_v38 = vld [vmem:[%s2984_s6 + $0x48] sm:$0xff] (!%p367_p2)   ;;  %p835_p8 = scmp.eq.s32.totalorder (!%p367_p2), %s2488_s14, 1 }
   0xb   : > { %2139 = vmatpush3.bf16.msra.mxu0 (!%p367_p2), %v2296_v3  ;;  %v2572_v26 = vrot.slane (!%p367_p2), %v514_v21, %v2542_v11  ;;  %v523_v27 = vrot.slane (!%p367_p2), %v514_v21, %v2545_v12  ;;  %v2317_v28 = vld [vmem:[%s2984_s6 + $0x40] sm:$0xff] (!%p367_p2)   ;;  %v540_v30 = vrot.slane (!%p367_p2), %v2003_v22, %v2542_v11  ;;  %v544_v31 = vrot.slane (!%p367_p2), %v2003_v22, %v2545_v12  ;;  %v2306_v39 = vld [vmem:[%s2982_s4 + $0x30] sm:$0xff] (!%p367_p2)   ;;  %v2321_v44 = vld [vmem:[%s2984_s6 + $0x8] sm:$0xff] (!%p367_p2)  }
   0xc   : > { %2140 = vmatprep.subr.bf16.mxu0 (!%p367_p2), %v2297_v4  ;;  %v2318_v33 = vld [vmem:[%s2984_s6] sm:$0xff] (!%p367_p2)   ;;  %2164 = vmatprep.subr.bf16.mxu1 (!%p367_p2), %v2317_v28  ;;  %v2307_v45 = vld [vmem:[%s2982_s4 + $0x78] sm:$0xff] (!%p367_p2)   ;;  %v2328_v28 = vld [vmem:[%s2984_s6 + $0xd0] sm:$0xff] (!%p367_p2)   ;;  %vm871_vm7 = vcmp.lt.s32.totalorder (!%p367_p2), %v2525_v9, 2  ;;  %vm882_vm8 = vcmp.lt.s32.totalorder (!%p367_p2), %v2525_v9, 6 }
   0xd   : > { %s3003_s20 = smov (!%p426_p3, %s1975_s20), 0  ;;  %s3007_s22 = smov (!%p2550_p6, %s445_s22), 3  ;;  %2165 = vmatpush3.bf16.msra.mxu1 %v2318_v33  ;;  %v2308_v53 = vld [vmem:[%s2982_s4 + $0x38] sm:$0xff]   ;;  %v2320_v60 = vld [vmem:[%s2984_s6 + $0xc0] sm:$0xff]  }
   0xe   : > { %s3005_s20 = smov (!%p1976_p4, %s3003_s20), 3  ;;  %s3009_s22 = smov (!%p2550_p6, %s3007_s22), 3  ;;  %2166 = vmatprep.subr.bf16.mxu1 %v2319_v38  ;;  %v2322_v4 = vld [vmem:[%s2984_s6 + $0x80] sm:$0xff]  }
   0xf   : > { %s2516_s29 = scalar_select %p438_p5, %s2496_s17, 3  ;;  %2141 = vmatpush3.bf16.msra.mxu0 %v2298_v5  ;;  %v2333_v33 = vld [vmem:[%s2984_s6 + $0x20] sm:$0xff]  }
  0x10   : > { %s2130_s12 = sshll.u32 %s3005_s20, 3  ;;  %2142 = vmatprep.subr.bf16.mxu0 %v2299_v7  ;;  %s2132_s21 = sshll.u32 %s3009_s22, 3  ;;  %v2338_v38 = vld [vmem:[%s2984_s6 + $0xa0] sm:$0xff]  }
  0x11   : > { %s2131_s15 = sshll.u32 %s2516_s29, 3  ;;  %s432_s25 = scalar_lea.vmem %s2978_s0, %s2130_s12  ;;  %2167 = vmatpush3.bf16.msra.mxu1 %v2321_v44  ;;  %v2344_v44 = vld [vmem:[%s2984_s6 + $0xf0] sm:$0xff]  }
  0x12   : > { %s2539_s27 = scalar_lea.vmem %s2979_s1, %s2131_s15  ;;  %v467_v16 = vld [vmem:[%s432_s25] sm:$0xff]  ;;  %s452_s28 = scalar_lea.vmem %s2980_s2, %s2132_s21 }
  0x13   : > { %2143 = vmatpush3.bf16.msra.mxu0 %v2300_v8  ;;  %v465_v15 = vld [vmem:[%s2539_s27] sm:$0xff]  ;;  %v1995_v18 = vcombine.low %v467_v16, %v467_v16  ;;  %v1996_v19 = vcombine.high %v467_v16, %v467_v16  ;;  %v466_v25 = vld [vmem:[%s2539_s27 + $0x8] sm:$0xff]  ;;  %s824_s11 = scalar_select %p823_p7, 1, 0 }
  0x14   : > { %2144 = vmatprep.subr.bf16.mxu0 %v2301_v10  ;;  %v1998_v20 = vcombine.high %v465_v15, %v465_v15  ;;  %v1997_v23 = vcombine.low %v465_v15, %v465_v15  ;;  %v2000_v46 = vcombine.high %v466_v25, %v466_v25  ;;  %v1999_v47 = vcombine.low %v466_v25, %v466_v25  ;;  %v468_v52 = vld [vmem:[%s452_s28] sm:$0xff]  ;;  %v2325_v25 = vld [vmem:[%s2984_s6 + $0x10] sm:$0xff]   ;;  %s2719_s21 = scalar_select %p835_p8, 1, 0 }
  0x15   : > { %v2002_v54 = vcombine.high %v468_v52, %v468_v52  ;;  %v2001_v55 = vcombine.low %v468_v52, %v468_v52  ;;  %v768_v52 = vadd.s32 8, %v2525_v9  ;;  %s462_s20 = scalar_lea.vmem %s2988_s10, %s2131_s15 }
  0x16   : > { %v496_v29 = vsel %vm489_vm0, %v1996_v19, %v1998_v20  ;;  %v492_v32 = vsel %vm489_vm0, %v1995_v18, %v1997_v23  ;;  %v2323_v23 = vld [vmem:[%s2984_s6 + $0x50] sm:$0xff]  }
  0x17   : > { %2145 = vmatpush3.bf16.msra.mxu0 %v2302_v13  ;;  %v507_v34 = vunpack.c.l.bf16 %v496_v29  ;;  %v509_v35 = vunpack.c.h.bf16 %v496_v29  ;;  %v506_v36 = vunpack.c.l.bf16 %v492_v32  ;;  %v508_v37 = vunpack.c.h.bf16 %v492_v32  ;;  %2168 = vmatprep.subr.bf16.mxu1 %v2323_v23  ;;  %v2329_v29 = vld [vmem:[%s2984_s6 + $0x18] sm:$0xff]  }
  0x18   : > { %2146 = vmatprep.subr.bf16.mxu0 %v2303_v14  ;;  %v504_v61 = vsel %vm489_vm0, %v2000_v46, %v2002_v54  ;;  %v500_v62 = vsel %vm489_vm0, %v1999_v47, %v2001_v55  ;;  %2169 = vmatpush3.bf16.msra.mxu1 %v2325_v25  ;;  %v2332_v32 = vld [vmem:[%s2984_s6 + $0xd8] sm:$0xff]   ;;  %v2346_v46 = vld [vmem:[%s2984_s6 + $0xb0] sm:$0xff]   ;;  %v2020_v54 = vld [vmem:[%s2983_s5] ss:$0 sm:$0xff]  ;;  %v837_v23 = vstv %s2719_s21 }
  0x19   : > { %v527_v40 = vmul.f32 %v523_v27, %v507_v34  ;;  %v529_v41 = vmul.f32 %v523_v27, %v509_v35  ;;  %v526_v42 = vmul.f32 %v2572_v26, %v506_v36  ;;  %v528_v43 = vmul.f32 %v2572_v26, %v508_v37  ;;  %v2334_v34 = vld [vmem:[%s2984_s6 + $0x98] sm:$0xff]   ;;  %v2335_v35 = vld [vmem:[%s2984_s6 + $0x68] sm:$0xff]   ;;  %v2336_v36 = vld [vmem:[%s2984_s6 + $0xe0] sm:$0xff]  }
  0x1a   : > { %v511_v0 = vunpack.c.l.bf16 %v504_v61  ;;  %v513_v1 = vunpack.c.h.bf16 %v504_v61  ;;  %v510_v2 = vunpack.c.l.bf16 %v500_v62  ;;  %v512_v3 = vunpack.c.h.bf16 %v500_v62  ;;  %v2337_v37 = vld [vmem:[%s2984_s6 + $0x28] sm:$0xff]   ;;  %v2347_v47 = vld [vmem:[%s2984_s6 + $0xf8] sm:$0xff]  }
  0x1b   : > { %2147 = vmatpush3.bf16.msra.mxu0 %v2304_v17  ;;  %v548_v48 = vadd.f32 %v544_v31, %v527_v40  ;;  %v550_v49 = vadd.f32 %v544_v31, %v529_v41  ;;  %v547_v50 = vadd.f32 %v540_v30, %v526_v42  ;;  %v549_v51 = vadd.f32 %v540_v30, %v528_v43  ;;  %v2340_v40 = vld [vmem:[%s2984_s6 + $0xe8] sm:$0xff]   ;;  %v2341_v41 = vld [vmem:[%s2984_s6 + $0x30] sm:$0xff]   ;;  %v2343_v43 = vld [vmem:[%s2984_s6 + $0x78] sm:$0xff]  }
  0x1c   : > { %2148 = vmatprep.subr.bf16.mxu0 %v2305_v24  ;;  %v531_v6 = vmul.f32 %v523_v27, %v511_v0  ;;  %v533_v7 = vmul.f32 %v523_v27, %v513_v1  ;;  %v530_v8 = vmul.f32 %v2572_v26, %v510_v2  ;;  %v532_v10 = vmul.f32 %v2572_v26, %v512_v3  ;;  %v2324_v24 = vld [vmem:[%s2984_s6 + $0xc8] sm:$0xff]   ;;  %v2327_v27 = vld [vmem:[%s2984_s6 + $0x58] sm:$0xff]  }
  0x1d   : > { %v556_v56 = vmax.f32 %v548_v48, 0.0  ;;  %v558_v57 = vmax.f32 %v550_v49, 0.0  ;;  %v555_v58 = vmax.f32 %v547_v50, 0.0  ;;  %v557_v59 = vmax.f32 %v549_v51, 0.0  ;;  %v2326_v26 = vld [vmem:[%s2984_s6 + $0x88] sm:$0xff]   ;;  %2170 = vmatprep.subr.bf16.mxu1 %v2327_v27  ;;  %v2348_v48 = vld [vmem:[%s2984_s6 + $0x140] sm:$0xff]  }
  0x1e   : > { %v552_v13 = vadd.f32 %v544_v31, %v531_v6  ;;  %v554_v14 = vadd.f32 %v544_v31, %v533_v7  ;;  %v551_v15 = vadd.f32 %v540_v30, %v530_v8  ;;  %v553_v16 = vadd.f32 %v540_v30, %v532_v10  ;;  %v2330_v30 = vld [vmem:[%s2984_s6 + $0x90] sm:$0xff]   ;;  %2171 = vmatpush3.bf16.msra.mxu1 %v2329_v29  ;;  %v2331_v31 = vld [vmem:[%s2984_s6 + $0x60] sm:$0xff]   ;;  %v2342_v42 = vld [vmem:[%s2984_s6 + $0xa8] sm:$0xff]  }
  0x1f   : > { %2149 = vmatpush3.bf16.msra.mxu0 %v2306_v39  ;;  %v564_v63 = vpack.c.bf16 %v558_v57, %v556_v56  ;;  %v563_v5 = vpack.c.bf16 %v557_v59, %v555_v58  ;;  %2172 = vmatprep.subr.bf16.mxu1 %v2331_v31  ;;  %v2339_v39 = vld [vmem:[%s2984_s6 + $0x70] sm:$0xff]   ;;  %v2349_v49 = vld [vmem:[%s2984_s6 + $0xb8] sm:$0xff]   ;;  %v2352_v50 = vld [vmem:[%s2984_s6 + $0x1c0] sm:$0xff]   ;;  %v775_v59 = vand.u32 7, %v2525_v9  ;;  %v825_v62 = vstv %s824_s11 }
  0x20   : > { %2150 = vmatprep.subr.bf16.mxu0 %v2307_v45  ;;  %v560_v17 = vmax.f32 %v552_v13, 0.0  ;;  %v562_v18 = vmax.f32 %v554_v14, 0.0  ;;  %v559_v19 = vmax.f32 %v551_v15, 0.0  ;;  %v561_v20 = vmax.f32 %v553_v16, 0.0  ;;  %v2345_v45 = vld [vmem:[%s2984_s6 + $0x38] sm:$0xff]   ;;  %v2353_v10 = vld [vmem:[%s2984_s6 + $0x108] sm:$0xff]  }
  0x21   : > { %727 = vmatprep.mubr.bf16.mxu0 %v564_v63  ;;  %v2021_v58 = vld [vmem:[%s2983_s5 + $0x1] ss:$0 sm:$0xff]  ;;  %v782_v63 = vand.u32 7, %v768_v52  ;;  %v769_v0 = vadd.s32 16, %v2525_v9  ;;  %v770_v3 = vadd.s32 24, %v2525_v9  ;;  %vm2715_vm1 = vcmp.eq.s32.totalorder %v825_v62, 1 }
  0x22   : > { %v566_v21 = vpack.c.bf16 %v562_v18, %v560_v17  ;;  %v565_v22 = vpack.c.bf16 %v561_v20, %v559_v19  ;;  %2173 = vmatpush3.bf16.msra.mxu1 %v2333_v33  ;;  %vm2721_vm2 = vcmp.ge.s32.totalorder %v775_v59, 6  ;;  %vm2725_vm3 = vcmp.lt.s32.totalorder %v775_v59, 2  ;;  %vm2094_vm5 = vmneg %vm2715_vm1  ;;  %v2354_v13 = vld [vmem:[%s2984_s6 + $0x180] sm:$0xff]   ;;  %v2355_v16 = vld [vmem:[%s2984_s6 + $0x150] sm:$0xff]  }
  0x23   : > { %2151 = vmatpush3.bf16.msra.mxu0 %v2308_v53  ;;  %2174 = vmatprep.subr.bf16.mxu1 %v2335_v35  ;;  %vm2729_vm4 = vcmp.ge.s32.totalorder %v782_v63, 6  ;;  %v789_v15 = vand.u32 7, %v769_v0  ;;  %vm2735_vm6 = vcmp.lt.s32.totalorder %v782_v63, 2  ;;  %vm2095_vm10 = vmpackc.low %vm2423_vm9, %vm2094_vm5  ;;  %vm2760_vm13 = vcmp.eq.s32.totalorder %v837_v23, 1  ;;  %v2362_v23 = vld [vmem:[%s2984_s6 + $0x190] sm:$0xff]  }
  0x24   : > { %2186 = vmatprep.subr.bf16.mxu0 %v2320_v60 }
  0x25   : > { %vm853_vm11 = vcmp.ge.s32.totalorder %v789_v15, 6  ;;  %vm861_vm12 = vcmp.lt.s32.totalorder %v789_v15, 2 }
  0x26   : > { %728 = vmatmul.mubr.bf16.vlgmr.msra.gmra.mrb[0].mxu0 %v563_v5  ;;  %2175 = vmatpush3.bf16.msra.mxu1 %v2337_v37 }
  0x27   : > { %2187 = vmatpush3.bf16.msra.mxu0 %v2322_v4  ;;  %735 = vmatprep.mubr.bf16.mxu0 %v566_v21 }
  0x28   : > { %2188 = vmatprep.subr.bf16.mxu0 %v2324_v24  ;;  %2176 = vmatprep.subr.bf16.mxu1 %v2339_v39 }
  0x2a   : > { %2177 = vmatpush3.bf16.msra.mxu1 %v2341_v41 }
  0x2b   : > { %2189 = vmatpush3.bf16.msra.mxu0 %v2326_v26  ;;  %2178 = vmatprep.subr.bf16.mxu1 %v2343_v43 }
  0x2c   : > { %2190 = vmatprep.subr.bf16.mxu0 %v2328_v28 }
  0x2e   : > { %736 = vmatmul.mubr.bf16.gmra.mrb[4].mxu0 %v565_v22  ;;  %2179 = vmatpush3.bf16.msra.mxu1 %v2345_v45  ;;  %v796_v22 = vand.u32 7, %v770_v3  ;;  %v2351_v3 = vld [vmem:[%s2984_s6 + $0x148] sm:$0xff]  }
  0x2f   : > { %2191 = vmatpush3.bf16.msra.mxu0 %v2330_v30  ;;  %2208 = vmatprep.subr.bf16.mxu1 %v2348_v48 }
  0x30   : > { %2192 = vmatprep.subr.bf16.mxu0 %v2332_v32  ;;  %vm854_vm14 = vcmp.ge.s32.totalorder %v796_v22, 6  ;;  %vm862_vm15 = vcmp.lt.s32.totalorder %v796_v22, 2  ;;  %v2361_v22 = vld [vmem:[%s2984_s6 + $0x118] sm:$0xff]  }
  0x33   : > { %2193 = vmatpush3.bf16.msra.mxu0 %v2334_v34 }
  0x34   : > { %2194 = vmatprep.subr.bf16.mxu0 %v2336_v36 }
  0x37   : > { %2195 = vmatpush3.bf16.msra.mxu0 %v2338_v38 }
  0x38   : > { %2196 = vmatprep.subr.bf16.mxu0 %v2340_v40 }
  0x3b   : > { %2197 = vmatpush3.bf16.msra.mxu0 %v2342_v42  ;;  %v2381_v42 = vld [vmem:[%s2984_s6 + $0x200] sm:$0xff]  }
  0x3c   : > { %2198 = vmatprep.subr.bf16.mxu0 %v2344_v44 }
  0x3f   : > { %2199 = vmatpush3.bf16.msra.mxu0 %v2346_v46 }
  0x40   : > { %2200 = vmatprep.subr.bf16.mxu0 %v2347_v47 }
  0x43   : > { %2201 = vmatpush3.bf16.msra.mxu0 %v2349_v49 }
  0x44   : > { %2230 = vmatprep.subr.bf16.mxu0 %v2352_v50 }
  0xf9   : > { %v2152_v51 = vpop.f32.mrb[0].mxu0 }
  0xfa   : > { %v2153_v53 = vpop.f32.mrb[1].mxu0 }
  0xfb   : > { %v2154_v55 = vadd.f32 %v2153_v53, %v2152_v51  ;;  %v2155_v56 = vpop.f32.mrb[2].mxu0 }
  0xfc   : > { %v2156_v57 = vpop.f32.mrb[3].mxu0 }
  0xfd   : > { %v749_v60 = vmul.f32 %v2154_v55, %v2020_v54  ;;  %v2157_v61 = vadd.f32 %v2156_v57, %v2155_v56 }
  0xff   : > { %v750_v1 = vmul.f32 %v2157_v61, %v2020_v54  ;;  %v758_v2 = vadd.f32 %v2021_v58, %v749_v60  ;;  %v2350_v61 = vld [vmem:[%s2984_s6 + $0x100] sm:$0xff]  }
 0x101   : > { %v759_v6 = vadd.f32 %v2021_v58, %v750_v1  ;;  %v2158_v7 = vpop.f32.mrb[4].mxu0  ;;  %v762_v8 = vmax.f32 %v758_v2, 0.0 }
 0x102   : > { %v2159_v14 = vpop.f32.mrb[5].mxu0 }
 0x103   : > { %v763_v17 = vmax.f32 %v759_v6, 0.0  ;;  %v2160_v18 = vadd.f32 %v2159_v14, %v2158_v7  ;;  %v2161_v19 = vpop.f32.mrb[6].mxu0  ;;  %v847_v20 = vsel %vm2715_vm1, 0.0, %v762_v8  ;;  %vm2098_vm1 = vmneg %vm2760_vm13 }
 0x104   : > { %v2162_v21 = vpop.f32.mrb[7].mxu0  ;;  %v855_v24 = vsel %vm2721_vm2, 0.0, %v847_v20  ;;  %v863_v25 = vsel %vm2725_vm3, 0.0, %v847_v20  ;;  %vm2099_vm2 = vmpackc.low %vm2098_vm1, %vm2423_vm9 }
 0x105   : > { %v751_v26 = vmul.f32 %v2160_v18, %v2020_v54  ;;  %v2163_v27 = vadd.f32 %v2162_v21, %v2161_v19  ;;  %v867_v28 = vrot.slane %v855_v24, 6  ;;  %v878_v29 = vrot.slane %v863_v25, 2  ;;  %v2357_v18 = vld [vmem:[%s2984_s6 + $0x110] sm:$0xff]   ;;  %v2358_v19 = vld [vmem:[%s2984_s6 + $0x188] sm:$0xff]   ;;  %v2363_v24 = vld [vmem:[%s2984_s6 + $0x160] sm:$0xff]  }
 0x106   : > { %v889_v30 = vpack.c.bf16 %v763_v17, %v847_v20  ;;  %v2096_v31 = vpack.c.bf16 %v763_v17, %v762_v8  ;;  %v856_v32 = vsel %vm2729_vm4, 0.0, %v763_v17  ;;  %v864_v33 = vsel %vm2735_vm6, 0.0, %v763_v17  ;;  %v2356_v17 = vld [vmem:[%s2984_s6 + $0x1c8] sm:$0xff]   ;;  %v2359_v20 = vld [vmem:[%s2984_s6 + $0x158] sm:$0xff]   ;;  %v2360_v21 = vld [vmem:[%s2984_s6 + $0x1d0] sm:$0xff]  }
 0x107   : > { %v760_v34 = vadd.f32 %v2021_v58, %v751_v26  ;;  %v752_v35 = vmul.f32 %v2163_v27, %v2020_v54  ;;  %v868_v36 = vrot.slane %v856_v32, 6  ;;  %v879_v37 = vrot.slane %v864_v33, 2  ;;  %v2364_v25 = vld [vmem:[%s2984_s6 + $0x1d8] sm:$0xff]   ;;  %v2365_v26 = vld [vmem:[%s2984_s6 + $0x120] sm:$0xff]   ;;  %v2371_v32 = vld [vmem:[%s2984_s6 + $0x170] sm:$0xff]  }
 0x108   : > { %2097 = vmatprep.mubr.msk.bf16.mxu1 %vm2095_vm10, %v2096_v31  ;;  %v900_v57 = vrot.slane %v889_v30, 4  ;;  %v2366_v27 = vld [vmem:[%s2984_s6 + $0x198] sm:$0xff]   ;;  %v2369_v30 = vld [vmem:[%s2984_s6 + $0x128] sm:$0xff]   ;;  %v2370_v31 = vld [vmem:[%s2984_s6 + $0x1a0] sm:$0xff]  }
 0x109   : > { %v764_v38 = vmax.f32 %v760_v34, 0.0  ;;  %v761_v39 = vadd.f32 %v2021_v58, %v752_v35  ;;  %v874_v40 = vsel %vm871_vm7, %v867_v28, %v868_v36  ;;  %v885_v41 = vsel %vm882_vm8, %v878_v29, %v879_v37  ;;  %v2372_v33 = vld [vmem:[%s2984_s6 + $0x1e8] sm:$0xff]   ;;  %v2373_v34 = vld [vmem:[%s2984_s6 + $0x130] sm:$0xff]  }
 0x10a   : > { %v2374_v35 = vld [vmem:[%s2984_s6 + $0x1a8] sm:$0xff]  }
 0x10b   : > { %v857_v43 = vsel %vm853_vm11, 0.0, %v764_v38  ;;  %v865_v44 = vsel %vm861_vm12, 0.0, %v764_v38  ;;  %v765_v45 = vmax.f32 %v761_v39, 0.0  ;;  %v2378_v39 = vld [vmem:[%s2984_s6 + $0x1b0] sm:$0xff]  }
 0x10c   : > { %v869_v46 = vrot.slane %v857_v43, 6  ;;  %v880_v47 = vrot.slane %v865_v44, 2  ;;  %v2424_v43 = vmov 0.0   ;;  %v2382_v44 = vld [vmem:[%s2984_s6 + $0x208] sm:$0xff]  }
 0x10d   : > { %v2100_v48 = vpack.c.bf16 %v765_v45, %v764_v38  ;;  %v850_v49 = vsel %vm2760_vm13, 0.0, %v765_v45  ;;  %v2383_v45 = vld [vmem:[%s2984_s6 + $0x210] sm:$0xff]  }
 0x10e   : > { %v858_v50 = vsel %vm854_vm14, 0.0, %v850_v49  ;;  %v866_v51 = vsel %vm862_vm15, 0.0, %v850_v49  ;;  %v890_v52 = vpack.c.bf16 %v850_v49, %v764_v38  ;;  %v873_v53 = vsel %vm871_vm7, %v868_v36, %v869_v46  ;;  %v2375_v36 = vld [vmem:[%s2984_s6 + $0x178] sm:$0xff]   ;;  %v2387_v49 = vld [vmem:[%s2984_s6 + $0x230] sm:$0xff]  }
 0x10f   : > { %v870_v54 = vrot.slane %v858_v50, 6  ;;  %v881_v55 = vrot.slane %v866_v51, 2  ;;  %v884_v56 = vsel %vm882_vm8, %v879_v37, %v880_v47  ;;  %v2376_v37 = vld [vmem:[%s2984_s6 + $0x1f0] sm:$0xff]   ;;  %v2377_v38 = vld [vmem:[%s2984_s6 + $0x138] sm:$0xff]   ;;  %v2389_v51 = vld [vmem:[%s2986_s8] ss:$8 sps:$4 sm:$0xff]  }
 0x110   : > { %v887_v58 = vpack.c.bf16 %v884_v56, %v885_v41  ;;  %v901_v59 = vrot.slane %v890_v52, 4  ;;  %v2380_v41 = vld [vmem:[%s2984_s6 + $0x1b8] sm:$0xff]   ;;  %v2391_v52 = vld [vmem:[%s2986_s8 + $0x4] ss:$8 sps:$4 sm:$0xff]   ;;  %v2395_v56 = vld [vmem:[%s2986_s8 + $0x20] ss:$8 sps:$4 sm:$0xff]  }
 0x111   : > { %v875_v60 = vsel %vm871_vm7, %v870_v54, %v867_v28  ;;  %v872_v62 = vsel %vm871_vm7, %v869_v46, %v870_v54  ;;  %v883_v63 = vsel %vm882_vm8, %v880_v47, %v881_v55  ;;  %v886_v0 = vsel %vm882_vm8, %v881_v55, %v878_v29  ;;  %v2367_v28 = vld [vmem:[%s2984_s6 + $0x168] sm:$0xff]   ;;  %v2368_v29 = vld [vmem:[%s2984_s6 + $0x1e0] sm:$0xff]   ;;  %v2384_v46 = vld [vmem:[%s2984_s6 + $0x218] sm:$0xff]  }
 0x112   : > { %v876_v1 = vpack.c.bf16 %v874_v40, %v875_v60  ;;  %v2781_v2 = vpack.c.bf16 %v872_v62, %v873_v53  ;;  %v2786_v4 = vpack.c.bf16 %v886_v0, %v883_v63  ;;  %v2789_v5 = vsel %vm489_vm0, %v900_v57, %v901_v59  ;;  %v2379_v40 = vld [vmem:[%s2984_s6 + $0x1f8] sm:$0xff]   ;;  %v2385_v47 = vld [vmem:[%s2984_s6 + $0x220] sm:$0xff]  }
 0x113   : > { %v906_v7 = vrot.slane %v887_v58, 4  ;;  %v2388_v50 = vld [vmem:[%s2984_s6 + $0x238] sm:$0xff]   ;;  %v2397_v55 = vld [vmem:[%s2986_s8 + $0x24] ss:$8 sps:$4 sm:$0xff]   ;;  %v2401_v60 = vld [vmem:[%s2986_s8 + $0x40] ss:$8 sps:$4 sm:$0xff]  }
 0x114   : > { %v894_v6 = vrot.slane %v876_v1, 4  ;;  %1519 = vmatmul.mubr.bf16.vlgmr.msra.gmra.mrb[0].mxu1 %v876_v1  ;;  %v895_v9 = vrot.slane %v2781_v2, 4  ;;  %v907_v8 = vrot.slane %v2786_v4, 4  ;;  %v2394_v53 = vld [vmem:[%s2986_s8 + $0x14] ss:$8 sps:$4 sm:$0xff]  }
 0x115   : > { %2209 = vmatpush3.bf16.msra.mxu1 %v2350_v61  ;;  %v2392_v54 = vld [vmem:[%s2986_s8 + $0x10] ss:$8 sps:$4 sm:$0xff]   ;;  %v2400_v57 = vld [vmem:[%s2986_s8 + $0x34] ss:$8 sps:$4 sm:$0xff]   ;;  %v2403_v59 = vld [vmem:[%s2986_s8 + $0x44] ss:$8 sps:$4 sm:$0xff]  }
 0x116   : > { %v896_v14 = vsel %vm489_vm0, %v894_v6, %v895_v9  ;;  %2210 = vmatprep.subr.bf16.mxu1 %v2351_v3  ;;  %v908_v15 = vsel %vm489_vm0, %v906_v7, %v907_v8  ;;  %vm2425_vm0 = vmmov 0   ;;  %v2406_v61 = vld [vmem:[%s2986_s8 + $0x54] ss:$8 sps:$4 sm:$0xff]   ;;  %v2404_v62 = vld [vmem:[%s2986_s8 + $0x50] ss:$8 sps:$4 sm:$0xff]   ;;  %v2426_v3 = vmov 0  }
 0x117   : > { %1559 = vmatprep.mubr.bf16.mxu0 %v896_v14  ;;  %1600 = vmatprep.mubr.bf16.mxu1 %v908_v15  ;;  %v2409_v63 = vld [vmem:[%s2986_s8 + $0x64] ss:$8 sps:$4 sm:$0xff]   ;;  %v2407_v0 = vld [vmem:[%s2986_s8 + $0x60] ss:$8 sps:$4 sm:$0xff]   ;;  %v2412_v1 = vld [vmem:[%s2986_s8 + $0x74] ss:$8 sps:$4 sm:$0xff]  }
 0x118   : > { %1560 = vmatmul.mubr.bf16.vlgmr.msra.gmra.mrb[8].mxu0 %v887_v58  ;;  %v2398_v58 = vld [vmem:[%s2986_s8 + $0x30] ss:$8 sps:$4 sm:$0xff]  }
 0x119   : > { %2211 = vmatpush3.bf16.msra.mxu1 %v2353_v10  ;;  %2231 = vmatpush3.bf16.msra.mxu0 %v2354_v13 }
 0x11a   : > { %2101 = vmatprep.mubr.msk.bf16.mxu0 %vm2099_vm2, %v2100_v48  ;;  %2212 = vmatprep.subr.bf16.mxu1 %v2355_v16  ;;  %v2386_v48 = vld [vmem:[%s2984_s6 + $0x228] sm:$0xff]  }
 0x11b   : > { %2232 = vmatprep.subr.bf16.mxu0 %v2356_v17 }
 0x11d   : > { %2213 = vmatpush3.bf16.msra.mxu1 %v2357_v18  ;;  %2233 = vmatpush3.bf16.msra.mxu0 %v2358_v19 }
 0x11e   : > { %2214 = vmatprep.subr.bf16.mxu1 %v2359_v20  ;;  %2234 = vmatprep.subr.bf16.mxu0 %v2360_v21 }
 0x121   : > { %2215 = vmatpush3.bf16.msra.mxu1 %v2361_v22  ;;  %2235 = vmatpush3.bf16.msra.mxu0 %v2362_v23 }
 0x122   : > { %2216 = vmatprep.subr.bf16.mxu1 %v2363_v24  ;;  %2236 = vmatprep.subr.bf16.mxu0 %v2364_v25 }
 0x125   : > { %2217 = vmatpush3.bf16.msra.mxu1 %v2365_v26  ;;  %2237 = vmatpush3.bf16.msra.mxu0 %v2366_v27 }
 0x126   : > { %2218 = vmatprep.subr.bf16.mxu1 %v2367_v28  ;;  %2238 = vmatprep.subr.bf16.mxu0 %v2368_v29 }
 0x129   : > { %2219 = vmatpush3.bf16.msra.mxu1 %v2369_v30  ;;  %2239 = vmatpush3.bf16.msra.mxu0 %v2370_v31 }
 0x12a   : > { %2220 = vmatprep.subr.bf16.mxu1 %v2371_v32  ;;  %2240 = vmatprep.subr.bf16.mxu0 %v2372_v33 }
 0x12d   : > { %2221 = vmatpush3.bf16.msra.mxu1 %v2373_v34  ;;  %2241 = vmatpush3.bf16.msra.mxu0 %v2374_v35 }
 0x12e   : > { %2222 = vmatprep.subr.bf16.mxu1 %v2375_v36  ;;  %2242 = vmatprep.subr.bf16.mxu0 %v2376_v37  ;;  %v2102_v37 = vld [vmem:[%s2985_s7] ss:$0 sm:$0xff] }
 0x131   : > { %2223 = vmatpush3.bf16.msra.mxu1 %v2377_v38  ;;  %2243 = vmatpush3.bf16.msra.mxu0 %v2378_v39 }
 0x132   : > { %2244 = vmatprep.subr.bf16.mxu0 %v2379_v40  ;;  %2261 = vmatprep.subr.bf16.mxu1 %v2424_v43  ;;  %v2103_v40 = vld [vmem:[%s2985_s7 + $0x1] ss:$0 sm:$0xff] }
 0x134   : > { %1601 = vmatmul.mubr.bf16.vlgmr.msra.gmra.mrb[4].mxu1 %v2789_v5 }
 0x135   : > { %2245 = vmatpush3.bf16.msra.mxu0 %v2380_v41  ;;  %2262 = vmatpush3.bf16.msra.mxu1 %v2381_v42 }
 0x136   : > { %2263 = vmatprep.subr.bf16.mxu1 %v2424_v43  ;;  %2277 = vmatprep.mubr.msk.bf16.mxu1 %vm2425_vm0, %v2424_v43 }
 0x137   : > { %1816 = vmatprep.subr.bf16.mxu0 %v2391_v52 }
 0x138   : > { %1642 = vmatmul.mubr.bf16.vlgmr.msra.gmra.mrb[12].mxu0 %v2781_v2  ;;  %v2410_v2 = vld [vmem:[%s2986_s8 + $0x70] ss:$8 sps:$4 sm:$0xff]  }
 0x139   : > { %2264 = vmatpush3.bf16.msra.mxu1 %v2382_v44  ;;  %1817 = vmatpush1.bf16.msra.mxu0 %v2389_v51  ;;  %v1724_v51 = vld [vmem:[%s2987_s9] sm:$0x3] }
 0x13a   : > { %2265 = vmatprep.subr.bf16.mxu1 %v2424_v43  ;;  %1818 = vmatprep.subr.bf16.mxu0 %v2394_v53  ;;  %v1729_v52 = vrot.slane %v1724_v51, %v2542_v11  ;;  %v1733_v53 = vrot.slane %v1724_v51, %v2545_v12 }
 0x13b   : > { %1848 = vmatprep.mubr.bf16.mxu0 %v2426_v3 }
 0x13d   : > { %2266 = vmatpush3.bf16.msra.mxu1 %v2383_v45  ;;  %1819 = vmatpush1.bf16.msra.mxu0 %v2392_v54  ;;  %v2413_v54 = vld [vmem:[%s2539_s27] sm:$0xff] }
 0x13e   : > { %2267 = vmatprep.subr.bf16.mxu1 %v2424_v43  ;;  %1820 = vmatprep.subr.bf16.mxu0 %v2397_v55  ;;  %v1859_v55 = vunpack.c.l.bf16 %v2413_v54 }
 0x141   : > { %2268 = vmatpush3.bf16.msra.mxu1 %v2384_v46  ;;  %1821 = vmatpush1.bf16.msra.mxu0 %v2395_v56 }
 0x142   : > { %2269 = vmatprep.subr.bf16.mxu1 %v2424_v43  ;;  %1822 = vmatprep.subr.bf16.mxu0 %v2400_v57  ;;  %v1860_v57 = vunpack.c.h.bf16 %v2413_v54 }
 0x145   : > { %2270 = vmatpush3.bf16.msra.mxu1 %v2385_v47  ;;  %1823 = vmatpush1.bf16.msra.mxu0 %v2398_v58 }
 0x146   : > { %2271 = vmatprep.subr.bf16.mxu1 %v2424_v43  ;;  %1824 = vmatprep.subr.bf16.mxu0 %v2403_v59 }
 0x149   : > { %2272 = vmatpush3.bf16.msra.mxu1 %v2386_v48  ;;  %1825 = vmatpush1.bf16.msra.mxu0 %v2401_v60  ;;  %v2414_v60 = vld [vmem:[%s2539_s27 + $0x8] sm:$0xff] }
 0x14a   : > { %2273 = vmatprep.subr.bf16.mxu1 %v2424_v43  ;;  %1826 = vmatprep.subr.bf16.mxu0 %v2406_v61  ;;  %v1861_v61 = vunpack.c.l.bf16 %v2414_v60 }
 0x14d   : > { %2274 = vmatpush3.bf16.msra.mxu1 %v2387_v49  ;;  %1827 = vmatpush1.bf16.msra.mxu0 %v2404_v62 }
 0x14e   : > { %2275 = vmatprep.subr.bf16.mxu1 %v2424_v43  ;;  %1828 = vmatprep.subr.bf16.mxu0 %v2409_v63 }
 0x151   : > { %2276 = vmatpush3.bf16.msra.mxu1 %v2388_v50  ;;  %1829 = vmatpush1.bf16.msra.mxu0 %v2407_v0  ;;  %v1862_v0 = vunpack.c.h.bf16 %v2414_v60 }
 0x152   : > { %1830 = vmatprep.subr.bf16.mxu0 %v2412_v1 }
 0x154   : > { %2278 = vmatmul.mubr.bf16.vlgmr.msra.gmra.mrb[8].mxu1 %v2786_v4 }
 0x155   : > { %1831 = vmatpush1.bf16.msra.mxu0 %v2410_v2 }
 0x1e7   : > { %v2180_v4 = vpop.f32.mrb[0].mxu1 }
 0x1e8   : > { %v2181_v5 = vpop.f32.mrb[1].mxu1 }
 0x1e9   : > { %v2182_v6 = vadd.f32 %v2181_v5, %v2180_v4  ;;  %v2183_v9 = vpop.f32.mrb[2].mxu1 }
 0x1ea   : > { %v2184_v7 = vpop.f32.mrb[3].mxu1 }
 0x1eb   : > { %v2185_v8 = vadd.f32 %v2184_v7, %v2183_v9  ;;  %v2202_v10 = vpop.f32.mrb[8].mxu0 }
 0x1ec   : > { %v2203_v13 = vpop.f32.mrb[9].mxu0 }
 0x1ed   : > { %v2204_v14 = vadd.f32 %v2203_v13, %v2202_v10  ;;  %v2205_v15 = vpop.f32.mrb[10].mxu0 }
 0x1ee   : > { %v2206_v16 = vpop.f32.mrb[11].mxu0 }
 0x1ef   : > { %v1562_v17 = vadd.f32 %v2204_v14, %v2182_v6  ;;  %v2207_v18 = vadd.f32 %v2206_v16, %v2205_v15 }
 0x1f1   : > { %v1565_v19 = vadd.f32 %v2207_v18, %v2185_v8 }
 0x207   : > { %v2224_v20 = vpop.f32.mrb[4].mxu1 }
 0x208   : > { %v2225_v21 = vpop.f32.mrb[5].mxu1 }
 0x209   : > { %v2226_v22 = vadd.f32 %v2225_v21, %v2224_v20  ;;  %v2227_v23 = vpop.f32.mrb[6].mxu1 }
 0x20a   : > { %v2228_v24 = vpop.f32.mrb[7].mxu1 }
 0x20b   : > { %v1603_v25 = vadd.f32 %v2226_v22, %v1562_v17  ;;  %v2229_v26 = vadd.f32 %v2228_v24, %v2227_v23  ;;  %v2246_v27 = vpop.f32.mrb[12].mxu0 }
 0x20c   : > { %v2247_v28 = vpop.f32.mrb[13].mxu0 }
 0x20d   : > { %v1606_v29 = vadd.f32 %v2229_v26, %v1565_v19  ;;  %v2248_v30 = vadd.f32 %v2247_v28, %v2246_v27  ;;  %v2249_v31 = vpop.f32.mrb[14].mxu0 }
 0x20e   : > { %v2250_v32 = vpop.f32.mrb[15].mxu0 }
 0x20f   : > { %v2251_v33 = vadd.f32 %v2250_v32, %v2249_v31  ;;  %v1644_v34 = vadd.f32 %v2248_v30, %v1603_v25 }
 0x211   : > { %v1647_v35 = vadd.f32 %v2251_v33, %v1606_v29 }
 0x227   : > { %v1684_v36 = vpop.f32.mrb[8].mxu1 }
 0x228   : > { %v1685_v38 = vadd.f32 %v1684_v36, %v1644_v34  ;;  %v2279_v39 = vpop.f32.mrb[9].mxu1 }
 0x229   : > { %v1687_v41 = vpop.f32.mrb[10].mxu1 }
 0x22a   : > { %v1696_v42 = vmul.f32 %v2102_v37, %v1685_v38  ;;  %v1688_v43 = vadd.f32 %v1687_v41, %v1647_v35  ;;  %v2280_v44 = vpop.f32.mrb[11].mxu1 }
 0x22c   : > { %v1703_v45 = vadd.f32 %v2103_v40, %v1696_v42  ;;  %v1697_v46 = vmul.f32 %v2102_v37, %v1688_v43 }
 0x22e   : > { %v1704_v47 = vadd.f32 %v2103_v40, %v1697_v46  ;;  %v1705_v48 = vmax.f32 %v1703_v45, 0.0 }
 0x230   : > { %v1706_v49 = vmax.f32 %v1704_v47, 0.0 }
 0x232   : > { %v1707_v50 = vpack.c.bf16 %v1706_v49, %v1705_v48 }
 0x234   : > { %1849 = vmatmul.mubr.bf16.vlgmr.msra.gmra.mrb[16].mxu0 %v1707_v50 }
 0x307   : > { %v1850_v56 = vpop.f32.mrb[16].mxu0 }
 0x308   : > { %v1851_v58 = vadd.f32 %v1850_v56, %v1729_v52  ;;  %v1852_v59 = vpop.f32.mrb[17].mxu0 }
 0x309   : > { %v1853_v62 = vadd.f32 %v1852_v59, %v1733_v53  ;;  %v1854_v63 = vpop.f32.mrb[18].mxu0 }
 0x30a   : > { %v1863_v1 = vadd.f32 %v1859_v55, %v1851_v58  ;;  %v1855_v2 = vadd.f32 %v1854_v63, %v1729_v52  ;;  %v1856_v3 = vpop.f32.mrb[19].mxu0 }
 0x30b   : > { %v1864_v4 = vadd.f32 %v1860_v57, %v1853_v62  ;;  %v1857_v5 = vadd.f32 %v1856_v3, %v1733_v53 }
 0x30c   : > { %v1865_v11 = vadd.f32 %v1861_v61, %v1855_v2 }
 0x30d   : > { %v2134_v12 = vpack.c.bf16 %v1864_v4, %v1863_v1  ;;  %v1866_v6 = vadd.f32 %v1862_v0, %v1857_v5 }
 0x30f   : > { %1879 = vst [vmem:[%s462_s20] sm:$0xff] %v2134_v12  ;;  %v2135_v9 = vpack.c.bf16 %v1866_v6, %v1865_v11 }
 0x311   : > { %1880 = vst [vmem:[%s462_s20 + $0x8] sm:$0xff] %v2135_v9 }
 0x312 PF: > { %s20_s13 = sadd.s32 1, %s2421_s13  }
 0x313   : > { %p17_p9 = scmp.ge.s32.totalorder %s20_s13, 4  }
 0x315   :  { %19 = sbr.rel (!%p17_p9) target bundleno = 1 (0x1), region = 97 }

// kernel: _lambda_.33
= control target key start
LH: loop header
LB: loop body
LE: loop exit
PB: predicated region body
PF: predicated region fallthrough
CT: control target
= control target key end

     0   :  { %s5085_s9 = smov 0   ;;  %s5858_s0 = inlined_call_operand.vmem [shape: bf16[8,8,2,256], index: 0, kind: input, shape index: {}]   ;;  %s5859_s1 = inlined_call_operand.vmem [shape: bf16[16,16,2,256], index: 1, kind: input, shape index: {}]   ;;  %s5860_s2 = inlined_call_operand.vmem [shape: bf16[16,16,2,256], index: 2, kind: output, shape index: {}]  }
   0x1 LB: > { %s4781_s10 = sadd.s32 4294967295, %s5066_s9   ;;  %p4785_p0 = scmp.ge.s32.totalorder %s5066_s9, 1  ;;  %s5066_s9 = sphi %s5085_s9, %s12_s9  }
   0x2   : > { %p124_p1 = scmp.lt.s32.totalorder %s5066_s9, 3 }
   0x4   : > { %p125_p2 = pnand %p4785_p0, %p124_p1 }
   0x5   : > { %s4786_s11 = sshll.u32 (!%p125_p2), %s4781_s10, 2  ;;  %s4788_s12 = sshll.u32 (!%p125_p2), %s4781_s10, 3  ;;  %v5068_v0 = vmov (!%p125_p2), 1983009808   ;;  %v748_v2 = vlaneseq (!%p125_p2)  ;;  %v5069_v3 = vmov (!%p125_p2), 1966171168  }
   0x6   : > { %128 = sbr.rel (%p125_p2) target bundleno = 223 (0xdf), region = 28  ;;  %p152_p3 = scmp.lt.s32.totalorder (!%p125_p2), %s4786_s11, 7  ;;  %v746_v1 = vunpack.c.l.s4 (!%p125_p2), %v5068_v0  ;;  %v2539_v4 = vunpack.c.l.s4 (!%p125_p2), %v5069_v3 }
   0x7   : > { %p158_p4 = scmp.lt.s32.totalorder (!%p125_p2), %s4788_s12, 15  ;;  %v749_v6 = vshrl.u32 (!%p125_p2), %v748_v2, 7 }
   0x8   : > { %v747_v5 = vunpack.c.0.s8 (!%p125_p2), %v746_v1  ;;  %v2540_v7 = vunpack.c.0.s8 (!%p125_p2), %v2539_v4 }
   0xa   : > { %v5120_v18 = vsub.s32 (!%p125_p2), %v747_v5, %v749_v6  ;;  %v5125_v24 = vsub.s32 (!%p125_p2), %v2540_v7, %v749_v6 }
   0xd   : > { %s5862_s11 = smov (!%p152_p3, %s4786_s11), 7  ;;  %s5864_s12 = smov (!%p158_p4, %s4788_s12), 15 }
   0xe   : > { %s4787_s13 = sshll.u32 %s5862_s11, 4  ;;  %s4789_s17 = sshll.u32 %s5864_s12, 5 }
   0xf   : > { %s5098_s16 = scalar_lea.vmem %s5858_s0, %s4787_s13  ;;  %s5106_s20 = scalar_lea.vmem %s5859_s1, %s4789_s17 }
  0x10   : > { %v169_v8 = vld [vmem:[%s5098_s16] sm:$0x3]  ;;  %v170_v9 = vld [vmem:[%s5098_s16 + $0x2] sm:$0x3]  ;;  %v171_v10 = vld [vmem:[%s5098_s16 + $0x4] sm:$0x3]  ;;  %s5153_s23 = scalar_lea.vmem %s5860_s2, %s4789_s17 }
  0x11   : > { %v5111_v11 = vunpack.c.l.bf16 %v169_v8  ;;  %v233_v12 = vld [vmem:[%s5106_s20] sm:$0x3]  ;;  %v234_v13 = vld [vmem:[%s5106_s20 + $0x2] sm:$0x3]  ;;  %v5115_v14 = vunpack.c.l.bf16 %v170_v9  ;;  %v235_v15 = vld [vmem:[%s5106_s20 + $0x4] sm:$0x3]  ;;  %v5118_v16 = vunpack.c.l.bf16 %v171_v10 }
  0x12   : > { %v361_v17 = vunpack.c.l.bf16 %v233_v12  ;;  %v362_v19 = vunpack.c.l.bf16 %v234_v13  ;;  %v363_v20 = vunpack.c.l.bf16 %v235_v15  ;;  %v236_v21 = vld [vmem:[%s5106_s20 + $0x6] sm:$0x3]  ;;  %v237_v22 = vld [vmem:[%s5106_s20 + $0x8] sm:$0x3]  ;;  %v238_v23 = vld [vmem:[%s5106_s20 + $0xa] sm:$0x3] }
  0x13   : > { %v364_v25 = vunpack.c.l.bf16 %v236_v21  ;;  %v365_v26 = vunpack.c.l.bf16 %v237_v22  ;;  %v366_v27 = vunpack.c.l.bf16 %v238_v23  ;;  %v172_v28 = vld [vmem:[%s5098_s16 + $0x6] sm:$0x3]  ;;  %v239_v29 = vld [vmem:[%s5106_s20 + $0xc] sm:$0x3]  ;;  %v240_v30 = vld [vmem:[%s5106_s20 + $0xe] sm:$0x3] }
  0x14   : > { %v489_v31 = vadd.f32 %v361_v17, %v5111_v11  ;;  %v490_v32 = vadd.f32 %v362_v19, %v5111_v11  ;;  %v491_v33 = vadd.f32 %v363_v20, %v5115_v14  ;;  %v5133_v34 = vunpack.c.l.bf16 %v172_v28  ;;  %v173_v63 = vld [vmem:[%s5098_s16 + $0x8] sm:$0x3]  ;;  %v241_v0 = vld [vmem:[%s5106_s20 + $0x10] sm:$0x3]  ;;  %v242_v1 = vld [vmem:[%s5106_s20 + $0x12] sm:$0x3] }
  0x15   : > { %v492_v35 = vadd.f32 %v364_v25, %v5115_v14  ;;  %v493_v36 = vadd.f32 %v365_v26, %v5118_v16  ;;  %v494_v37 = vadd.f32 %v366_v27, %v5118_v16  ;;  %v367_v38 = vunpack.c.l.bf16 %v239_v29  ;;  %v174_v6 = vld [vmem:[%s5098_s16 + $0xa] sm:$0x3]  ;;  %v243_v7 = vld [vmem:[%s5106_s20 + $0x14] sm:$0x3]  ;;  %v244_v8 = vld [vmem:[%s5106_s20 + $0x16] sm:$0x3] }
  0x16   : > { %v751_v39 = vrot.slane %v489_v31, %v5120_v18  ;;  %v759_v40 = vrot.slane %v490_v32, %v5120_v18  ;;  %v767_v41 = vrot.slane %v491_v33, %v5120_v18  ;;  %v368_v42 = vunpack.c.l.bf16 %v240_v30  ;;  %v175_v15 = vld [vmem:[%s5098_s16 + $0xc] sm:$0x3]  ;;  %v245_v22 = vld [vmem:[%s5106_s20 + $0x18] sm:$0x3]  ;;  %v246_v23 = vld [vmem:[%s5106_s20 + $0x1a] sm:$0x3] }
  0x17   : > { %v775_v43 = vrot.slane %v492_v35, %v5120_v18  ;;  %v783_v44 = vrot.slane %v493_v36, %v5120_v18  ;;  %v791_v45 = vrot.slane %v494_v37, %v5120_v18  ;;  %v495_v46 = vadd.f32 %v367_v38, %v5133_v34  ;;  %v176_v29 = vld [vmem:[%s5098_s16 + $0xe] sm:$0x3]  ;;  %v247_v30 = vld [vmem:[%s5106_s20 + $0x1c] sm:$0x3] }
  0x18   : > { %v752_v47 = vcombine.high %v751_v39, %v751_v39  ;;  %v760_v48 = vcombine.high %v759_v40, %v759_v40  ;;  %v768_v49 = vcombine.high %v767_v41, %v767_v41  ;;  %v496_v50 = vadd.f32 %v368_v42, %v5133_v34 }
  0x19   : > { %v776_v51 = vcombine.high %v775_v43, %v775_v43  ;;  %v784_v52 = vcombine.high %v783_v44, %v783_v44  ;;  %v792_v53 = vcombine.high %v791_v45, %v791_v45  ;;  %v799_v54 = vrot.slane %v495_v46, %v5120_v18 }
  0x1a   : > { %v4792_v55 = vpack.c.bf16 %v752_v47, %v751_v39  ;;  %v4793_v56 = vpack.c.bf16 %v760_v48, %v759_v40  ;;  %v4794_v57 = vpack.c.bf16 %v768_v49, %v767_v41  ;;  %v807_v58 = vrot.slane %v496_v50, %v5120_v18  ;;  %v248_v40 = vld [vmem:[%s5106_s20 + $0x1e] sm:$0x3] }
  0x1b   : > { %v4795_v59 = vpack.c.bf16 %v776_v51, %v775_v43  ;;  %v4796_v60 = vpack.c.bf16 %v784_v52, %v783_v44  ;;  %v4797_v61 = vpack.c.bf16 %v792_v53, %v791_v45  ;;  %v800_v62 = vcombine.high %v799_v54, %v799_v54 }
  0x1c   : > { %v2544_v2 = vrot.slane %v4792_v55, %v5125_v24  ;;  %v2559_v3 = vrot.slane %v4793_v56, %v5125_v24  ;;  %v2574_v4 = vrot.slane %v4794_v57, %v5125_v24  ;;  %v808_v5 = vcombine.high %v807_v58, %v807_v58 }
  0x1d   : > { %v2589_v9 = vrot.slane %v4795_v59, %v5125_v24  ;;  %v2604_v10 = vrot.slane %v4796_v60, %v5125_v24  ;;  %v2619_v12 = vrot.slane %v4797_v61, %v5125_v24  ;;  %v4798_v13 = vpack.c.bf16 %v800_v62, %v799_v54 }
  0x1e   : > { %4920 = vst.sshfl [vmem:[%s5153_s23] sm:$0x5 pattern:$0x73625140] %v2544_v2  ;;  %v4799_v17 = vpack.c.bf16 %v808_v5, %v807_v58  ;;  %v5171_v19 = vunpack.c.l.bf16 %v173_v63  ;;  %v369_v20 = vunpack.c.l.bf16 %v241_v0  ;;  %v370_v21 = vunpack.c.l.bf16 %v242_v1  ;;  %v249_v1 = vld [vmem:[%s5106_s20 + $0x20] sm:$0x3] }
  0x1f   : > { %4921 = vst.sshfl [vmem:[%s5153_s23 + $0x2] sm:$0x5 pattern:$0x73625140] %v2559_v3  ;;  %v2634_v25 = vrot.slane %v4798_v13, %v5125_v24  ;;  %v5179_v26 = vunpack.c.l.bf16 %v174_v6  ;;  %v371_v27 = vunpack.c.l.bf16 %v243_v7  ;;  %v372_v28 = vunpack.c.l.bf16 %v244_v8  ;;  %v250_v2 = vld [vmem:[%s5106_s20 + $0x22] sm:$0x3] }
  0x20   : > { %4922 = vst.sshfl [vmem:[%s5153_s23 + $0x4] sm:$0x5 pattern:$0x73625140] %v2574_v4  ;;  %v2649_v31 = vrot.slane %v4799_v17, %v5125_v24  ;;  %v497_v32 = vadd.f32 %v369_v20, %v5171_v19  ;;  %v498_v33 = vadd.f32 %v370_v21, %v5171_v19  ;;  %v5186_v35 = vunpack.c.l.bf16 %v175_v15  ;;  %v251_v7 = vld [vmem:[%s5106_s20 + $0x24] sm:$0x3] }
  0x21   : > { %4923 = vst.sshfl [vmem:[%s5153_s23 + $0x6] sm:$0x5 pattern:$0x73625140] %v2589_v9  ;;  %v499_v36 = vadd.f32 %v371_v27, %v5179_v26  ;;  %v500_v37 = vadd.f32 %v372_v28, %v5179_v26  ;;  %v373_v38 = vunpack.c.l.bf16 %v245_v22  ;;  %v374_v39 = vunpack.c.l.bf16 %v246_v23  ;;  %v252_v8 = vld [vmem:[%s5106_s20 + $0x26] sm:$0x3] }
  0x22   : > { %4924 = vst.sshfl [vmem:[%s5153_s23 + $0x8] sm:$0x5 pattern:$0x73625140] %v2604_v10  ;;  %v815_v41 = vrot.slane %v497_v32, %v5120_v18  ;;  %v823_v42 = vrot.slane %v498_v33, %v5120_v18  ;;  %v5195_v43 = vunpack.c.l.bf16 %v176_v29  ;;  %v375_v44 = vunpack.c.l.bf16 %v247_v30  ;;  %v253_v22 = vld [vmem:[%s5106_s20 + $0x28] sm:$0x3] }
  0x23   : > { %4925 = vst.sshfl [vmem:[%s5153_s23 + $0xa] sm:$0x5 pattern:$0x73625140] %v2619_v12  ;;  %v831_v45 = vrot.slane %v499_v36, %v5120_v18  ;;  %v839_v46 = vrot.slane %v500_v37, %v5120_v18  ;;  %v501_v47 = vadd.f32 %v373_v38, %v5186_v35  ;;  %v502_v48 = vadd.f32 %v374_v39, %v5186_v35  ;;  %v254_v23 = vld [vmem:[%s5106_s20 + $0x2a] sm:$0x3] }
  0x24   : > { %4926 = vst.sshfl [vmem:[%s5153_s23 + $0xc] sm:$0x5 pattern:$0x73625140] %v2634_v25  ;;  %v816_v49 = vcombine.high %v815_v41, %v815_v41  ;;  %v824_v50 = vcombine.high %v823_v42, %v823_v42  ;;  %v503_v51 = vadd.f32 %v375_v44, %v5195_v43  ;;  %v376_v52 = vunpack.c.l.bf16 %v248_v40  ;;  %v255_v30 = vld [vmem:[%s5106_s20 + $0x2c] sm:$0x3] }
  0x25   : > { %4927 = vst.sshfl [vmem:[%s5153_s23 + $0xe] sm:$0x5 pattern:$0x73625140] %v2649_v31  ;;  %v832_v53 = vcombine.high %v831_v45, %v831_v45  ;;  %v840_v54 = vcombine.high %v839_v46, %v839_v46  ;;  %v847_v55 = vrot.slane %v501_v47, %v5120_v18  ;;  %v855_v56 = vrot.slane %v502_v48, %v5120_v18 }
  0x26   : > { %v4800_v57 = vpack.c.bf16 %v816_v49, %v815_v41  ;;  %v4801_v58 = vpack.c.bf16 %v824_v50, %v823_v42  ;;  %v863_v59 = vrot.slane %v503_v51, %v5120_v18  ;;  %v504_v60 = vadd.f32 %v376_v52, %v5195_v43  ;;  %v256_v41 = vld [vmem:[%s5106_s20 + $0x2e] sm:$0x3] }
  0x27   : > { %v4802_v61 = vpack.c.bf16 %v832_v53, %v831_v45  ;;  %v4803_v62 = vpack.c.bf16 %v840_v54, %v839_v46  ;;  %v848_v63 = vcombine.high %v847_v55, %v847_v55  ;;  %v856_v0 = vcombine.high %v855_v56, %v855_v56 }
  0x28   : > { %v2664_v3 = vrot.slane %v4800_v57, %v5125_v24  ;;  %v2679_v4 = vrot.slane %v4801_v58, %v5125_v24  ;;  %v864_v5 = vcombine.high %v863_v59, %v863_v59  ;;  %v871_v6 = vrot.slane %v504_v60, %v5120_v18 }
  0x29   : > { %v2694_v9 = vrot.slane %v4802_v61, %v5125_v24  ;;  %v2709_v10 = vrot.slane %v4803_v62, %v5125_v24  ;;  %v4804_v12 = vpack.c.bf16 %v848_v63, %v847_v55  ;;  %v4805_v13 = vpack.c.bf16 %v856_v0, %v855_v56  ;;  %v257_v0 = vld [vmem:[%s5106_s20 + $0x30] sm:$0x3] }
  0x2a   : > { %4928 = vst.sshfl [vmem:[%s5153_s23 + $0x10] sm:$0x5 pattern:$0x73625140] %v2664_v3  ;;  %v4806_v15 = vpack.c.bf16 %v864_v5, %v863_v59  ;;  %v872_v17 = vcombine.high %v871_v6, %v871_v6  ;;  %v377_v20 = vunpack.c.l.bf16 %v249_v1  ;;  %v378_v21 = vunpack.c.l.bf16 %v250_v2  ;;  %v258_v1 = vld [vmem:[%s5106_s20 + $0x32] sm:$0x3] }
  0x2b   : > { %4929 = vst.sshfl [vmem:[%s5153_s23 + $0x12] sm:$0x5 pattern:$0x73625140] %v2679_v4  ;;  %v2724_v25 = vrot.slane %v4804_v12, %v5125_v24  ;;  %v2739_v27 = vrot.slane %v4805_v13, %v5125_v24  ;;  %v379_v28 = vunpack.c.l.bf16 %v251_v7  ;;  %v380_v29 = vunpack.c.l.bf16 %v252_v8 }
  0x2c   : > { %4930 = vst.sshfl [vmem:[%s5153_s23 + $0x14] sm:$0x5 pattern:$0x73625140] %v2694_v9  ;;  %v2754_v31 = vrot.slane %v4806_v15, %v5125_v24  ;;  %v4807_v32 = vpack.c.bf16 %v872_v17, %v871_v6  ;;  %v505_v33 = vadd.f32 %v377_v20, %v5111_v11  ;;  %v506_v36 = vadd.f32 %v378_v21, %v5111_v11  ;;  %v260_v6 = vld [vmem:[%s5106_s20 + $0x36] sm:$0x3] }
  0x2d   : > { %4931 = vst.sshfl [vmem:[%s5153_s23 + $0x16] sm:$0x5 pattern:$0x73625140] %v2709_v10  ;;  %v507_v37 = vadd.f32 %v379_v28, %v5115_v14  ;;  %v508_v38 = vadd.f32 %v380_v29, %v5115_v14  ;;  %v381_v39 = vunpack.c.l.bf16 %v253_v22  ;;  %v382_v40 = vunpack.c.l.bf16 %v254_v23  ;;  %v261_v20 = vld [vmem:[%s5106_s20 + $0x38] sm:$0x3] }
  0x2e   : > { %4932 = vst.sshfl [vmem:[%s5153_s23 + $0x18] sm:$0x5 pattern:$0x73625140] %v2724_v25  ;;  %v2769_v42 = vrot.slane %v4807_v32, %v5125_v24  ;;  %v879_v44 = vrot.slane %v505_v33, %v5120_v18  ;;  %v887_v45 = vrot.slane %v506_v36, %v5120_v18  ;;  %v383_v46 = vunpack.c.l.bf16 %v255_v30  ;;  %v262_v21 = vld [vmem:[%s5106_s20 + $0x3a] sm:$0x3] }
  0x2f   : > { %4933 = vst.sshfl [vmem:[%s5153_s23 + $0x1a] sm:$0x5 pattern:$0x73625140] %v2739_v27  ;;  %v895_v11 = vrot.slane %v507_v37, %v5120_v18  ;;  %v903_v47 = vrot.slane %v508_v38, %v5120_v18  ;;  %v509_v48 = vadd.f32 %v381_v39, %v5118_v16  ;;  %v510_v49 = vadd.f32 %v382_v40, %v5118_v16  ;;  %v263_v28 = vld [vmem:[%s5106_s20 + $0x3c] sm:$0x3] }
  0x30   : > { %4934 = vst.sshfl [vmem:[%s5153_s23 + $0x1c] sm:$0x5 pattern:$0x73625140] %v2754_v31  ;;  %v880_v14 = vcombine.high %v879_v44, %v879_v44  ;;  %v888_v50 = vcombine.high %v887_v45, %v887_v45  ;;  %v511_v51 = vadd.f32 %v383_v46, %v5133_v34  ;;  %v384_v52 = vunpack.c.l.bf16 %v256_v41  ;;  %v264_v39 = vld [vmem:[%s5106_s20 + $0x3e] sm:$0x3] }
  0x31   : > { %4935 = vst.sshfl [vmem:[%s5153_s23 + $0x1e] sm:$0x5 pattern:$0x73625140] %v2769_v42  ;;  %v896_v53 = vcombine.high %v895_v11, %v895_v11  ;;  %v904_v54 = vcombine.high %v903_v47, %v903_v47  ;;  %v911_v55 = vrot.slane %v509_v48, %v5120_v18  ;;  %v919_v56 = vrot.slane %v510_v49, %v5120_v18 }
  0x32   : > { %v4808_v57 = vpack.c.bf16 %v880_v14, %v879_v44  ;;  %v4809_v58 = vpack.c.bf16 %v888_v50, %v887_v45  ;;  %v927_v16 = vrot.slane %v511_v51, %v5120_v18  ;;  %v512_v59 = vadd.f32 %v384_v52, %v5133_v34  ;;  %v259_v34 = vld [vmem:[%s5106_s20 + $0x34] sm:$0x3] }
  0x33   : > { %v4810_v60 = vpack.c.bf16 %v896_v53, %v895_v11  ;;  %v4811_v61 = vpack.c.bf16 %v904_v54, %v903_v47  ;;  %v912_v62 = vcombine.high %v911_v55, %v911_v55  ;;  %v920_v63 = vcombine.high %v919_v56, %v919_v56 }
  0x34   : > { %v2784_v2 = vrot.slane %v4808_v57, %v5125_v24  ;;  %v2799_v3 = vrot.slane %v4809_v58, %v5125_v24  ;;  %v928_v4 = vcombine.high %v927_v16, %v927_v16  ;;  %v935_v5 = vrot.slane %v512_v59, %v5120_v18  ;;  %v177_v59 = vld [vmem:[%s5098_s16 + $0x10] sm:$0x3] }
  0x35   : > { %v2814_v7 = vrot.slane %v4810_v60, %v5125_v24  ;;  %v2829_v8 = vrot.slane %v4811_v61, %v5125_v24  ;;  %v4812_v9 = vpack.c.bf16 %v912_v62, %v911_v55  ;;  %v4813_v10 = vpack.c.bf16 %v920_v63, %v919_v56  ;;  %v265_v60 = vld [vmem:[%s5106_s20 + $0x40] sm:$0x3] }
  0x36   : > { %4936 = vst.sshfl [vmem:[%s5153_s23 + $0x20] sm:$0x5 pattern:$0x73625140] %v2784_v2  ;;  %v4814_v12 = vpack.c.bf16 %v928_v4, %v927_v16  ;;  %v936_v13 = vcombine.high %v935_v5, %v935_v5  ;;  %v385_v15 = vunpack.c.l.bf16 %v257_v0  ;;  %v386_v17 = vunpack.c.l.bf16 %v258_v1  ;;  %v178_v1 = vld [vmem:[%s5098_s16 + $0x12] sm:$0x3] }
  0x37   : > { %4937 = vst.sshfl [vmem:[%s5153_s23 + $0x22] sm:$0x5 pattern:$0x73625140] %v2799_v3  ;;  %v2844_v22 = vrot.slane %v4812_v9, %v5125_v24  ;;  %v2859_v23 = vrot.slane %v4813_v10, %v5125_v24  ;;  %v387_v25 = vunpack.c.l.bf16 %v259_v34  ;;  %v388_v27 = vunpack.c.l.bf16 %v260_v6  ;;  %v267_v34 = vld [vmem:[%s5106_s20 + $0x44] sm:$0x3] }
  0x38   : > { %4938 = vst.sshfl [vmem:[%s5153_s23 + $0x24] sm:$0x5 pattern:$0x73625140] %v2814_v7  ;;  %v2874_v29 = vrot.slane %v4814_v12, %v5125_v24  ;;  %v4815_v30 = vpack.c.bf16 %v936_v13, %v935_v5  ;;  %v513_v31 = vadd.f32 %v385_v15, %v5171_v19  ;;  %v514_v32 = vadd.f32 %v386_v17, %v5171_v19  ;;  %v268_v10 = vld [vmem:[%s5106_s20 + $0x46] sm:$0x3] }
  0x39   : > { %4939 = vst.sshfl [vmem:[%s5153_s23 + $0x26] sm:$0x5 pattern:$0x73625140] %v2829_v8  ;;  %v515_v33 = vadd.f32 %v387_v25, %v5179_v26  ;;  %v516_v36 = vadd.f32 %v388_v27, %v5179_v26  ;;  %v389_v37 = vunpack.c.l.bf16 %v261_v20  ;;  %v390_v38 = vunpack.c.l.bf16 %v262_v21  ;;  %v179_v12 = vld [vmem:[%s5098_s16 + $0x14] sm:$0x3] }
  0x3a   : > { %4940 = vst.sshfl [vmem:[%s5153_s23 + $0x28] sm:$0x5 pattern:$0x73625140] %v2844_v22  ;;  %v2889_v40 = vrot.slane %v4815_v30, %v5125_v24  ;;  %v943_v41 = vrot.slane %v513_v31, %v5120_v18  ;;  %v951_v42 = vrot.slane %v514_v32, %v5120_v18  ;;  %v391_v44 = vunpack.c.l.bf16 %v263_v28  ;;  %v269_v13 = vld [vmem:[%s5106_s20 + $0x48] sm:$0x3] }
  0x3b   : > { %4941 = vst.sshfl [vmem:[%s5153_s23 + $0x2a] sm:$0x5 pattern:$0x73625140] %v2859_v23  ;;  %v959_v19 = vrot.slane %v515_v33, %v5120_v18  ;;  %v967_v45 = vrot.slane %v516_v36, %v5120_v18  ;;  %v517_v46 = vadd.f32 %v389_v37, %v5186_v35  ;;  %v518_v11 = vadd.f32 %v390_v38, %v5186_v35  ;;  %v270_v22 = vld [vmem:[%s5106_s20 + $0x4a] sm:$0x3] }
  0x3c   : > { %4942 = vst.sshfl [vmem:[%s5153_s23 + $0x2c] sm:$0x5 pattern:$0x73625140] %v2874_v29  ;;  %v944_v26 = vcombine.high %v943_v41, %v943_v41  ;;  %v952_v47 = vcombine.high %v951_v42, %v951_v42  ;;  %v519_v48 = vadd.f32 %v391_v44, %v5195_v43  ;;  %v392_v49 = vunpack.c.l.bf16 %v264_v39  ;;  %v180_v29 = vld [vmem:[%s5098_s16 + $0x16] sm:$0x3] }
  0x3d   : > { %4943 = vst.sshfl [vmem:[%s5153_s23 + $0x2e] sm:$0x5 pattern:$0x73625140] %v2889_v40  ;;  %v960_v14 = vcombine.high %v959_v19, %v959_v19  ;;  %v968_v50 = vcombine.high %v967_v45, %v967_v45  ;;  %v975_v51 = vrot.slane %v517_v46, %v5120_v18  ;;  %v983_v52 = vrot.slane %v518_v11, %v5120_v18  ;;  %v271_v36 = vld [vmem:[%s5106_s20 + $0x4c] sm:$0x3] }
  0x3e   : > { %v4816_v53 = vpack.c.bf16 %v944_v26, %v943_v41  ;;  %v4817_v54 = vpack.c.bf16 %v952_v47, %v951_v42  ;;  %v991_v35 = vrot.slane %v519_v48, %v5120_v18  ;;  %v520_v55 = vadd.f32 %v392_v49, %v5195_v43  ;;  %v266_v43 = vld [vmem:[%s5106_s20 + $0x42] sm:$0x3]  ;;  %v272_v41 = vld [vmem:[%s5106_s20 + $0x4e] sm:$0x3] }
  0x3f   : > { %v4818_v56 = vpack.c.bf16 %v960_v14, %v959_v19  ;;  %v4819_v57 = vpack.c.bf16 %v968_v50, %v967_v45  ;;  %v976_v58 = vcombine.high %v975_v51, %v975_v51  ;;  %v984_v16 = vcombine.high %v983_v52, %v983_v52 }
  0x40   : > { %v2904_v61 = vrot.slane %v4816_v53, %v5125_v24  ;;  %v2919_v62 = vrot.slane %v4817_v54, %v5125_v24  ;;  %v992_v63 = vcombine.high %v991_v35, %v991_v35  ;;  %v999_v0 = vrot.slane %v520_v55, %v5120_v18 }
  0x41   : > { %v2934_v2 = vrot.slane %v4818_v56, %v5125_v24  ;;  %v2949_v3 = vrot.slane %v4819_v57, %v5125_v24  ;;  %v4820_v4 = vpack.c.bf16 %v976_v58, %v975_v51  ;;  %v4821_v5 = vpack.c.bf16 %v984_v16, %v983_v52  ;;  %v181_v58 = vld [vmem:[%s5098_s16 + $0x18] sm:$0x3] }
  0x42   : > { %4944 = vst.sshfl [vmem:[%s5153_s23 + $0x30] sm:$0x5 pattern:$0x73625140] %v2904_v61  ;;  %v4822_v6 = vpack.c.bf16 %v992_v63, %v991_v35  ;;  %v1000_v7 = vcombine.high %v999_v0, %v999_v0  ;;  %v5298_v8 = vunpack.c.l.bf16 %v177_v59  ;;  %v393_v9 = vunpack.c.l.bf16 %v265_v60 }
  0x43   : > { %4945 = vst.sshfl [vmem:[%s5153_s23 + $0x32] sm:$0x5 pattern:$0x73625140] %v2919_v62  ;;  %v2964_v15 = vrot.slane %v4820_v4, %v5125_v24  ;;  %v2979_v17 = vrot.slane %v4821_v5, %v5125_v24  ;;  %v394_v20 = vunpack.c.l.bf16 %v266_v43  ;;  %v5307_v21 = vunpack.c.l.bf16 %v178_v1  ;;  %v273_v62 = vld [vmem:[%s5106_s20 + $0x50] sm:$0x3] }
  0x44   : > { %4946 = vst.sshfl [vmem:[%s5153_s23 + $0x34] sm:$0x5 pattern:$0x73625140] %v2934_v2  ;;  %v2994_v23 = vrot.slane %v4822_v6, %v5125_v24  ;;  %v4823_v25 = vpack.c.bf16 %v1000_v7, %v999_v0  ;;  %v521_v27 = vadd.f32 %v393_v9, %v5298_v8  ;;  %v395_v28 = vunpack.c.l.bf16 %v267_v34  ;;  %v274_v2 = vld [vmem:[%s5106_s20 + $0x52] sm:$0x3] }
  0x45   : > { %4947 = vst.sshfl [vmem:[%s5153_s23 + $0x36] sm:$0x5 pattern:$0x73625140] %v2949_v3  ;;  %v522_v30 = vadd.f32 %v394_v20, %v5298_v8  ;;  %v396_v31 = vunpack.c.l.bf16 %v268_v10  ;;  %v5316_v32 = vunpack.c.l.bf16 %v179_v12  ;;  %v397_v33 = vunpack.c.l.bf16 %v269_v13  ;;  %v182_v3 = vld [vmem:[%s5098_s16 + $0x1a] sm:$0x3] }
  0x46   : > { %4948 = vst.sshfl [vmem:[%s5153_s23 + $0x38] sm:$0x5 pattern:$0x73625140] %v2964_v15  ;;  %v3009_v37 = vrot.slane %v4823_v25, %v5125_v24  ;;  %v1007_v38 = vrot.slane %v521_v27, %v5120_v18  ;;  %v523_v39 = vadd.f32 %v395_v28, %v5307_v21  ;;  %v398_v40 = vunpack.c.l.bf16 %v270_v22  ;;  %v275_v7 = vld [vmem:[%s5106_s20 + $0x54] sm:$0x3] }
  0x47   : > { %4949 = vst.sshfl [vmem:[%s5153_s23 + $0x3a] sm:$0x5 pattern:$0x73625140] %v2979_v17  ;;  %v1015_v42 = vrot.slane %v522_v30, %v5120_v18  ;;  %v524_v44 = vadd.f32 %v396_v31, %v5307_v21  ;;  %v525_v19 = vadd.f32 %v397_v33, %v5316_v32  ;;  %v5327_v45 = vunpack.c.l.bf16 %v180_v29  ;;  %v276_v9 = vld [vmem:[%s5106_s20 + $0x56] sm:$0x3] }
  0x48   : > { %4950 = vst.sshfl [vmem:[%s5153_s23 + $0x3c] sm:$0x5 pattern:$0x73625140] %v2994_v23  ;;  %v1008_v46 = vcombine.high %v1007_v38, %v1007_v38  ;;  %v1023_v11 = vrot.slane %v523_v39, %v5120_v18  ;;  %v526_v26 = vadd.f32 %v398_v40, %v5316_v32  ;;  %v399_v47 = vunpack.c.l.bf16 %v271_v36  ;;  %v183_v17 = vld [vmem:[%s5098_s16 + $0x1c] sm:$0x3] }
  0x49   : > { %4951 = vst.sshfl [vmem:[%s5153_s23 + $0x3e] sm:$0x5 pattern:$0x73625140] %v3009_v37  ;;  %v1016_v48 = vcombine.high %v1015_v42, %v1015_v42  ;;  %v1031_v49 = vrot.slane %v524_v44, %v5120_v18  ;;  %v1039_v14 = vrot.slane %v525_v19, %v5120_v18  ;;  %v400_v50 = vunpack.c.l.bf16 %v272_v41  ;;  %v277_v20 = vld [vmem:[%s5106_s20 + $0x58] sm:$0x3] }
  0x4a   : > { %v4824_v51 = vpack.c.bf16 %v1008_v46, %v1007_v38  ;;  %v1024_v52 = vcombine.high %v1023_v11, %v1023_v11  ;;  %v1047_v53 = vrot.slane %v526_v26, %v5120_v18  ;;  %v527_v54 = vadd.f32 %v399_v47, %v5327_v45  ;;  %v278_v33 = vld [vmem:[%s5106_s20 + $0x5a] sm:$0x3]  ;;  %v184_v36 = vld [vmem:[%s5098_s16 + $0x1e] sm:$0x3]  ;;  %v279_v41 = vld [vmem:[%s5106_s20 + $0x5c] sm:$0x3] }
  0x4b   : > { %v4825_v35 = vpack.c.bf16 %v1016_v48, %v1015_v42  ;;  %v1032_v55 = vcombine.high %v1031_v49, %v1031_v49  ;;  %v1040_v56 = vcombine.high %v1039_v14, %v1039_v14  ;;  %v528_v57 = vadd.f32 %v400_v50, %v5327_v45 }
  0x4c   : > { %v3024_v16 = vrot.slane %v4824_v51, %v5125_v24  ;;  %v4826_v59 = vpack.c.bf16 %v1024_v52, %v1023_v11  ;;  %v1048_v60 = vcombine.high %v1047_v53, %v1047_v53  ;;  %v1055_v61 = vrot.slane %v527_v54, %v5120_v18  ;;  %v280_v11 = vld [vmem:[%s5106_s20 + $0x5e] sm:$0x3] }
  0x4d   : > { %v3039_v63 = vrot.slane %v4825_v35, %v5125_v24  ;;  %v4827_v0 = vpack.c.bf16 %v1032_v55, %v1031_v49  ;;  %v4828_v43 = vpack.c.bf16 %v1040_v56, %v1039_v14  ;;  %v1063_v1 = vrot.slane %v528_v57, %v5120_v18 }
  0x4e   : > { %4952 = vst.sshfl [vmem:[%s5153_s23 + $0x40] sm:$0x5 pattern:$0x73625140] %v3024_v16  ;;  %v3054_v4 = vrot.slane %v4826_v59, %v5125_v24  ;;  %v4829_v5 = vpack.c.bf16 %v1048_v60, %v1047_v53  ;;  %v1056_v34 = vcombine.high %v1055_v61, %v1055_v61  ;;  %v5347_v6 = vunpack.c.l.bf16 %v181_v58 }
  0x4f   : > { %4953 = vst.sshfl [vmem:[%s5153_s23 + $0x42] sm:$0x5 pattern:$0x73625140] %v3039_v63  ;;  %v3069_v10 = vrot.slane %v4827_v0, %v5125_v24  ;;  %v3084_v12 = vrot.slane %v4828_v43, %v5125_v24  ;;  %v1064_v13 = vcombine.high %v1063_v1, %v1063_v1  ;;  %v401_v15 = vunpack.c.l.bf16 %v273_v62  ;;  %v281_v63 = vld [vmem:[%s5106_s20 + $0x60] sm:$0x3] }
  0x50   : > { %4954 = vst.sshfl [vmem:[%s5153_s23 + $0x44] sm:$0x5 pattern:$0x73625140] %v3054_v4  ;;  %v3099_v22 = vrot.slane %v4829_v5, %v5125_v24  ;;  %v4830_v23 = vpack.c.bf16 %v1056_v34, %v1055_v61  ;;  %v402_v25 = vunpack.c.l.bf16 %v274_v2  ;;  %v5358_v27 = vunpack.c.l.bf16 %v182_v3  ;;  %v282_v3 = vld [vmem:[%s5106_s20 + $0x62] sm:$0x3] }
  0x51   : > { %4955 = vst.sshfl [vmem:[%s5153_s23 + $0x46] sm:$0x5 pattern:$0x73625140] %v3069_v10  ;;  %v4831_v28 = vpack.c.bf16 %v1064_v13, %v1063_v1  ;;  %v529_v29 = vadd.f32 %v401_v15, %v5347_v6  ;;  %v403_v30 = vunpack.c.l.bf16 %v275_v7  ;;  %v404_v31 = vunpack.c.l.bf16 %v276_v9  ;;  %v283_v9 = vld [vmem:[%s5106_s20 + $0x64] sm:$0x3] }
  0x52   : > { %4956 = vst.sshfl [vmem:[%s5153_s23 + $0x48] sm:$0x5 pattern:$0x73625140] %v3084_v12  ;;  %v3114_v37 = vrot.slane %v4830_v23, %v5125_v24  ;;  %v530_v38 = vadd.f32 %v402_v25, %v5347_v6  ;;  %v5368_v39 = vunpack.c.l.bf16 %v183_v17  ;;  %v405_v40 = vunpack.c.l.bf16 %v277_v20  ;;  %v284_v10 = vld [vmem:[%s5106_s20 + $0x66] sm:$0x3] }
  0x53   : > { %4957 = vst.sshfl [vmem:[%s5153_s23 + $0x4a] sm:$0x5 pattern:$0x73625140] %v3099_v22  ;;  %v3129_v42 = vrot.slane %v4831_v28, %v5125_v24  ;;  %v1071_v44 = vrot.slane %v529_v29, %v5120_v18  ;;  %v531_v19 = vadd.f32 %v403_v30, %v5358_v27  ;;  %v532_v46 = vadd.f32 %v404_v31, %v5358_v27  ;;  %v285_v20 = vld [vmem:[%s5106_s20 + $0x68] sm:$0x3] }
  0x54   : > { %4958 = vst.sshfl [vmem:[%s5153_s23 + $0x4c] sm:$0x5 pattern:$0x73625140] %v3114_v37  ;;  %v1079_v26 = vrot.slane %v530_v38, %v5120_v18  ;;  %v533_v47 = vadd.f32 %v405_v40, %v5368_v39  ;;  %v406_v48 = vunpack.c.l.bf16 %v278_v33  ;;  %v5379_v49 = vunpack.c.l.bf16 %v184_v36  ;;  %v286_v36 = vld [vmem:[%s5106_s20 + $0x6a] sm:$0x3] }
  0x55   : > { %4959 = vst.sshfl [vmem:[%s5153_s23 + $0x4e] sm:$0x5 pattern:$0x73625140] %v3129_v42  ;;  %v1072_v14 = vcombine.high %v1071_v44, %v1071_v44  ;;  %v1087_v50 = vrot.slane %v531_v19, %v5120_v18  ;;  %v1095_v51 = vrot.slane %v532_v46, %v5120_v18  ;;  %v407_v52 = vunpack.c.l.bf16 %v279_v41  ;;  %v287_v42 = vld [vmem:[%s5106_s20 + $0x6c] sm:$0x3] }
  0x56   : > { %v1080_v53 = vcombine.high %v1079_v26, %v1079_v26  ;;  %v1103_v54 = vrot.slane %v533_v47, %v5120_v18  ;;  %v534_v35 = vadd.f32 %v406_v48, %v5368_v39  ;;  %v408_v55 = vunpack.c.l.bf16 %v280_v11 }
  0x57   : > { %v4832_v56 = vpack.c.bf16 %v1072_v14, %v1071_v44  ;;  %v1088_v57 = vcombine.high %v1087_v50, %v1087_v50  ;;  %v1096_v58 = vcombine.high %v1095_v51, %v1095_v51  ;;  %v535_v16 = vadd.f32 %v407_v52, %v5379_v49 }
  0x58   : > { %v4833_v59 = vpack.c.bf16 %v1080_v53, %v1079_v26  ;;  %v1104_v60 = vcombine.high %v1103_v54, %v1103_v54  ;;  %v1111_v61 = vrot.slane %v534_v35, %v5120_v18  ;;  %v536_v62 = vadd.f32 %v408_v55, %v5379_v49  ;;  %v288_v26 = vld [vmem:[%s5106_s20 + $0x6e] sm:$0x3] }
  0x59   : > { %v3144_v0 = vrot.slane %v4832_v56, %v5125_v24  ;;  %v4834_v43 = vpack.c.bf16 %v1088_v57, %v1087_v50  ;;  %v4835_v1 = vpack.c.bf16 %v1096_v58, %v1095_v51  ;;  %v1119_v2 = vrot.slane %v535_v16, %v5120_v18 }
  0x5a   : > { %v3159_v4 = vrot.slane %v4833_v59, %v5125_v24  ;;  %v4836_v5 = vpack.c.bf16 %v1104_v60, %v1103_v54  ;;  %v1112_v34 = vcombine.high %v1111_v61, %v1111_v61  ;;  %v1127_v7 = vrot.slane %v536_v62, %v5120_v18 }
  0x5b   : > { %4960 = vst.sshfl [vmem:[%s5153_s23 + $0x50] sm:$0x5 pattern:$0x73625140] %v3144_v0  ;;  %v3174_v12 = vrot.slane %v4834_v43, %v5125_v24  ;;  %v3189_v13 = vrot.slane %v4835_v1, %v5125_v24  ;;  %v1120_v15 = vcombine.high %v1119_v2, %v1119_v2  ;;  %v409_v17 = vunpack.c.l.bf16 %v281_v63  ;;  %v289_v63 = vld [vmem:[%s5106_s20 + $0x70] sm:$0x3] }
  0x5c   : > { %4961 = vst.sshfl [vmem:[%s5153_s23 + $0x52] sm:$0x5 pattern:$0x73625140] %v3159_v4  ;;  %v3204_v22 = vrot.slane %v4836_v5, %v5125_v24  ;;  %v4837_v23 = vpack.c.bf16 %v1112_v34, %v1111_v61  ;;  %v1128_v25 = vcombine.high %v1127_v7, %v1127_v7  ;;  %v410_v28 = vunpack.c.l.bf16 %v282_v3 }
  0x5d   : > { %4962 = vst.sshfl [vmem:[%s5153_s23 + $0x54] sm:$0x5 pattern:$0x73625140] %v3174_v12  ;;  %v4838_v29 = vpack.c.bf16 %v1120_v15, %v1119_v2  ;;  %v537_v30 = vadd.f32 %v409_v17, %v5298_v8  ;;  %v411_v31 = vunpack.c.l.bf16 %v283_v9  ;;  %v412_v33 = vunpack.c.l.bf16 %v284_v10  ;;  %v290_v2 = vld [vmem:[%s5106_s20 + $0x72] sm:$0x3] }
  0x5e   : > { %4963 = vst.sshfl [vmem:[%s5153_s23 + $0x56] sm:$0x5 pattern:$0x73625140] %v3189_v13  ;;  %v3219_v37 = vrot.slane %v4837_v23, %v5125_v24  ;;  %v4839_v38 = vpack.c.bf16 %v1128_v25, %v1127_v7  ;;  %v538_v40 = vadd.f32 %v410_v28, %v5298_v8  ;;  %v413_v41 = vunpack.c.l.bf16 %v285_v20  ;;  %v291_v7 = vld [vmem:[%s5106_s20 + $0x74] sm:$0x3] }
  0x5f   : > { %4964 = vst.sshfl [vmem:[%s5153_s23 + $0x58] sm:$0x5 pattern:$0x73625140] %v3204_v22  ;;  %v3234_v44 = vrot.slane %v4838_v29, %v5125_v24  ;;  %v1135_v19 = vrot.slane %v537_v30, %v5120_v18  ;;  %v539_v46 = vadd.f32 %v411_v31, %v5307_v21  ;;  %v540_v11 = vadd.f32 %v412_v33, %v5307_v21  ;;  %v293_v15 = vld [vmem:[%s5106_s20 + $0x78] sm:$0x3] }
  0x60   : > { %4965 = vst.sshfl [vmem:[%s5153_s23 + $0x5a] sm:$0x5 pattern:$0x73625140] %v3219_v37  ;;  %v3249_v47 = vrot.slane %v4839_v38, %v5125_v24  ;;  %v1143_v48 = vrot.slane %v538_v40, %v5120_v18  ;;  %v541_v14 = vadd.f32 %v413_v41, %v5316_v32  ;;  %v414_v8 = vunpack.c.l.bf16 %v286_v36  ;;  %v294_v31 = vld [vmem:[%s5106_s20 + $0x7a] sm:$0x3] }
  0x61   : > { %4966 = vst.sshfl [vmem:[%s5153_s23 + $0x5c] sm:$0x5 pattern:$0x73625140] %v3234_v44  ;;  %v1136_v50 = vcombine.high %v1135_v19, %v1135_v19  ;;  %v1151_v51 = vrot.slane %v539_v46, %v5120_v18  ;;  %v1159_v52 = vrot.slane %v540_v11, %v5120_v18  ;;  %v415_v53 = vunpack.c.l.bf16 %v287_v42  ;;  %v295_v40 = vld [vmem:[%s5106_s20 + $0x7c] sm:$0x3] }
  0x62   : > { %4967 = vst.sshfl [vmem:[%s5153_s23 + $0x5e] sm:$0x5 pattern:$0x73625140] %v3249_v47  ;;  %v1144_v54 = vcombine.high %v1143_v48, %v1143_v48  ;;  %v1167_v21 = vrot.slane %v541_v14, %v5120_v18  ;;  %v542_v35 = vadd.f32 %v414_v8, %v5316_v32  ;;  %v416_v55 = vunpack.c.l.bf16 %v288_v26  ;;  %v296_v46 = vld [vmem:[%s5106_s20 + $0x7e] sm:$0x3] }
  0x63   : > { %v4840_v56 = vpack.c.bf16 %v1136_v50, %v1135_v19  ;;  %v1152_v57 = vcombine.high %v1151_v51, %v1151_v51  ;;  %v1160_v58 = vcombine.high %v1159_v52, %v1159_v52  ;;  %v543_v16 = vadd.f32 %v415_v53, %v5327_v45 }
  0x64   : > { %v4841_v59 = vpack.c.bf16 %v1144_v54, %v1143_v48  ;;  %v1168_v60 = vcombine.high %v1167_v21, %v1167_v21  ;;  %v1175_v61 = vrot.slane %v542_v35, %v5120_v18  ;;  %v544_v62 = vadd.f32 %v416_v55, %v5327_v45  ;;  %v292_v45 = vld [vmem:[%s5106_s20 + $0x76] sm:$0x3] }
  0x65   : > { %v3264_v0 = vrot.slane %v4840_v56, %v5125_v24  ;;  %v4842_v32 = vpack.c.bf16 %v1152_v57, %v1151_v51  ;;  %v4843_v43 = vpack.c.bf16 %v1160_v58, %v1159_v52  ;;  %v1183_v1 = vrot.slane %v543_v16, %v5120_v18 }
  0x66   : > { %v3279_v3 = vrot.slane %v4841_v59, %v5125_v24  ;;  %v4844_v4 = vpack.c.bf16 %v1168_v60, %v1167_v21  ;;  %v1176_v5 = vcombine.high %v1175_v61, %v1175_v61  ;;  %v1191_v34 = vrot.slane %v544_v62, %v5120_v18  ;;  %v185_v59 = vld [vmem:[%s5098_s16 + $0x20] sm:$0x3] }
  0x67   : > { %4968 = vst.sshfl [vmem:[%s5153_s23 + $0x60] sm:$0x5 pattern:$0x73625140] %v3264_v0  ;;  %v3294_v9 = vrot.slane %v4842_v32, %v5125_v24  ;;  %v3309_v10 = vrot.slane %v4843_v43, %v5125_v24  ;;  %v1184_v12 = vcombine.high %v1183_v1, %v1183_v1  ;;  %v417_v13 = vunpack.c.l.bf16 %v289_v63  ;;  %v297_v63 = vld [vmem:[%s5106_s20 + $0x80] sm:$0x3] }
  0x68   : > { %4969 = vst.sshfl [vmem:[%s5153_s23 + $0x62] sm:$0x5 pattern:$0x73625140] %v3279_v3  ;;  %v3324_v17 = vrot.slane %v4844_v4, %v5125_v24  ;;  %v4845_v20 = vpack.c.bf16 %v1176_v5, %v1175_v61  ;;  %v1192_v22 = vcombine.high %v1191_v34, %v1191_v34  ;;  %v418_v23 = vunpack.c.l.bf16 %v290_v2  ;;  %v298_v2 = vld [vmem:[%s5106_s20 + $0x82] sm:$0x3] }
  0x69   : > { %4970 = vst.sshfl [vmem:[%s5153_s23 + $0x64] sm:$0x5 pattern:$0x73625140] %v3294_v9  ;;  %v4846_v25 = vpack.c.bf16 %v1184_v12, %v1183_v1  ;;  %v545_v28 = vadd.f32 %v417_v13, %v5347_v6  ;;  %v419_v29 = vunpack.c.l.bf16 %v291_v7  ;;  %v420_v30 = vunpack.c.l.bf16 %v292_v45  ;;  %v299_v3 = vld [vmem:[%s5106_s20 + $0x84] sm:$0x3] }
  0x6a   : > { %4971 = vst.sshfl [vmem:[%s5153_s23 + $0x66] sm:$0x5 pattern:$0x73625140] %v3309_v10  ;;  %v3339_v33 = vrot.slane %v4845_v20, %v5125_v24  ;;  %v4847_v36 = vpack.c.bf16 %v1192_v22, %v1191_v34  ;;  %v546_v37 = vadd.f32 %v418_v23, %v5347_v6  ;;  %v421_v38 = vunpack.c.l.bf16 %v293_v15  ;;  %v300_v45 = vld [vmem:[%s5106_s20 + $0x86] sm:$0x3] }
  0x6b   : > { %4972 = vst.sshfl [vmem:[%s5153_s23 + $0x68] sm:$0x5 pattern:$0x73625140] %v3324_v17  ;;  %v3354_v41 = vrot.slane %v4846_v25, %v5125_v24  ;;  %v1199_v42 = vrot.slane %v545_v28, %v5120_v18  ;;  %v547_v44 = vadd.f32 %v419_v29, %v5358_v27  ;;  %v548_v19 = vadd.f32 %v420_v30, %v5358_v27  ;;  %v187_v15 = vld [vmem:[%s5098_s16 + $0x24] sm:$0x3] }
  0x6c   : > { %4973 = vst.sshfl [vmem:[%s5153_s23 + $0x6a] sm:$0x5 pattern:$0x73625140] %v3339_v33  ;;  %v3369_v11 = vrot.slane %v4847_v36, %v5125_v24  ;;  %v1207_v26 = vrot.slane %v546_v37, %v5120_v18  ;;  %v549_v47 = vadd.f32 %v421_v38, %v5368_v39  ;;  %v422_v6 = vunpack.c.l.bf16 %v294_v31  ;;  %v301_v25 = vld [vmem:[%s5106_s20 + $0x88] sm:$0x3] }
  0x6d   : > { %4974 = vst.sshfl [vmem:[%s5153_s23 + $0x6c] sm:$0x5 pattern:$0x73625140] %v3354_v41  ;;  %v1200_v48 = vcombine.high %v1199_v42, %v1199_v42  ;;  %v1215_v14 = vrot.slane %v547_v44, %v5120_v18  ;;  %v1223_v8 = vrot.slane %v548_v19, %v5120_v18  ;;  %v423_v50 = vunpack.c.l.bf16 %v295_v40  ;;  %v302_v33 = vld [vmem:[%s5106_s20 + $0x8a] sm:$0x3] }
  0x6e   : > { %4975 = vst.sshfl [vmem:[%s5153_s23 + $0x6e] sm:$0x5 pattern:$0x73625140] %v3369_v11  ;;  %v1208_v51 = vcombine.high %v1207_v26, %v1207_v26  ;;  %v1231_v27 = vrot.slane %v549_v47, %v5120_v18  ;;  %v550_v52 = vadd.f32 %v422_v6, %v5368_v39  ;;  %v424_v53 = vunpack.c.l.bf16 %v296_v46  ;;  %v188_v36 = vld [vmem:[%s5098_s16 + $0x26] sm:$0x3] }
  0x6f   : > { %v4848_v54 = vpack.c.bf16 %v1200_v48, %v1199_v42  ;;  %v1216_v21 = vcombine.high %v1215_v14, %v1215_v14  ;;  %v1224_v35 = vcombine.high %v1223_v8, %v1223_v8  ;;  %v551_v55 = vadd.f32 %v423_v50, %v5379_v49  ;;  %v303_v42 = vld [vmem:[%s5106_s20 + $0x8c] sm:$0x3] }
  0x70   : > { %v4849_v56 = vpack.c.bf16 %v1208_v51, %v1207_v26  ;;  %v1232_v57 = vcombine.high %v1231_v27, %v1231_v27  ;;  %v1239_v58 = vrot.slane %v550_v52, %v5120_v18  ;;  %v552_v16 = vadd.f32 %v424_v53, %v5379_v49  ;;  %v186_v49 = vld [vmem:[%s5098_s16 + $0x22] sm:$0x3]  ;;  %v304_v26 = vld [vmem:[%s5106_s20 + $0x8e] sm:$0x3] }
  0x71   : > { %v3384_v60 = vrot.slane %v4848_v54, %v5125_v24  ;;  %v4850_v39 = vpack.c.bf16 %v1216_v21, %v1215_v14  ;;  %v4851_v61 = vpack.c.bf16 %v1224_v35, %v1223_v8  ;;  %v1247_v62 = vrot.slane %v551_v55, %v5120_v18 }
  0x72   : > { %v3399_v0 = vrot.slane %v4849_v56, %v5125_v24  ;;  %v4852_v32 = vpack.c.bf16 %v1232_v57, %v1231_v27  ;;  %v1240_v43 = vcombine.high %v1239_v58, %v1239_v58  ;;  %v1255_v1 = vrot.slane %v552_v16, %v5120_v18 }
  0x73   : > { %4976 = vst.sshfl [vmem:[%s5153_s23 + $0x70] sm:$0x5 pattern:$0x73625140] %v3384_v60  ;;  %v3414_v4 = vrot.slane %v4850_v39, %v5125_v24  ;;  %v3429_v5 = vrot.slane %v4851_v61, %v5125_v24  ;;  %v1248_v34 = vcombine.high %v1247_v62, %v1247_v62  ;;  %v5481_v7 = vunpack.c.l.bf16 %v185_v59  ;;  %v189_v39 = vld [vmem:[%s5098_s16 + $0x28] sm:$0x3] }
  0x74   : > { %4977 = vst.sshfl [vmem:[%s5153_s23 + $0x72] sm:$0x5 pattern:$0x73625140] %v3399_v0  ;;  %v3444_v9 = vrot.slane %v4852_v32, %v5125_v24  ;;  %v4853_v10 = vpack.c.bf16 %v1240_v43, %v1239_v58  ;;  %v1256_v12 = vcombine.high %v1255_v1, %v1255_v1  ;;  %v425_v13 = vunpack.c.l.bf16 %v297_v63  ;;  %v305_v32 = vld [vmem:[%s5106_s20 + $0x90] sm:$0x3] }
  0x75   : > { %4978 = vst.sshfl [vmem:[%s5153_s23 + $0x74] sm:$0x5 pattern:$0x73625140] %v3414_v4  ;;  %v4854_v17 = vpack.c.bf16 %v1248_v34, %v1247_v62  ;;  %v426_v20 = vunpack.c.l.bf16 %v298_v2  ;;  %v5489_v22 = vunpack.c.l.bf16 %v186_v49  ;;  %v427_v23 = vunpack.c.l.bf16 %v299_v3  ;;  %v306_v43 = vld [vmem:[%s5106_s20 + $0x92] sm:$0x3] }
  0x76   : > { %4979 = vst.sshfl [vmem:[%s5153_s23 + $0x76] sm:$0x5 pattern:$0x73625140] %v3429_v5  ;;  %v3459_v28 = vrot.slane %v4853_v10, %v5125_v24  ;;  %v4855_v29 = vpack.c.bf16 %v1256_v12, %v1255_v1  ;;  %v553_v30 = vadd.f32 %v425_v13, %v5481_v7  ;;  %v428_v31 = vunpack.c.l.bf16 %v300_v45  ;;  %v190_v4 = vld [vmem:[%s5098_s16 + $0x2a] sm:$0x3] }
  0x77   : > { %4980 = vst.sshfl [vmem:[%s5153_s23 + $0x78] sm:$0x5 pattern:$0x73625140] %v3444_v9  ;;  %v3474_v37 = vrot.slane %v4854_v17, %v5125_v24  ;;  %v554_v38 = vadd.f32 %v426_v20, %v5481_v7  ;;  %v555_v40 = vadd.f32 %v427_v23, %v5489_v22  ;;  %v5500_v41 = vunpack.c.l.bf16 %v187_v15  ;;  %v307_v5 = vld [vmem:[%s5106_s20 + $0x94] sm:$0x3] }
  0x78   : > { %4981 = vst.sshfl [vmem:[%s5153_s23 + $0x7a] sm:$0x5 pattern:$0x73625140] %v3459_v28  ;;  %v3489_v44 = vrot.slane %v4855_v29, %v5125_v24  ;;  %v1263_v19 = vrot.slane %v553_v30, %v5120_v18  ;;  %v556_v46 = vadd.f32 %v428_v31, %v5489_v22  ;;  %v429_v11 = vunpack.c.l.bf16 %v301_v25  ;;  %v308_v20 = vld [vmem:[%s5106_s20 + $0x96] sm:$0x3] }
  0x79   : > { %4982 = vst.sshfl [vmem:[%s5153_s23 + $0x7c] sm:$0x5 pattern:$0x73625140] %v3474_v37  ;;  %v1271_v47 = vrot.slane %v554_v38, %v5120_v18  ;;  %v1279_v6 = vrot.slane %v555_v40, %v5120_v18  ;;  %v430_v48 = vunpack.c.l.bf16 %v302_v33  ;;  %v5511_v14 = vunpack.c.l.bf16 %v188_v36  ;;  %v191_v23 = vld [vmem:[%s5098_s16 + $0x2c] sm:$0x3] }
  0x7a   : > { %4983 = vst.sshfl [vmem:[%s5153_s23 + $0x7e] sm:$0x5 pattern:$0x73625140] %v3489_v44  ;;  %v1264_v8 = vcombine.high %v1263_v19, %v1263_v19  ;;  %v1287_v50 = vrot.slane %v556_v46, %v5120_v18  ;;  %v557_v51 = vadd.f32 %v429_v11, %v5500_v41  ;;  %v431_v27 = vunpack.c.l.bf16 %v303_v42  ;;  %v309_v31 = vld [vmem:[%s5106_s20 + $0x98] sm:$0x3] }
  0x7b   : > { %v1272_v52 = vcombine.high %v1271_v47, %v1271_v47  ;;  %v1280_v53 = vcombine.high %v1279_v6, %v1279_v6  ;;  %v558_v54 = vadd.f32 %v430_v48, %v5500_v41  ;;  %v432_v21 = vunpack.c.l.bf16 %v304_v26  ;;  %v310_v40 = vld [vmem:[%s5106_s20 + $0x9a] sm:$0x3]  ;;  %v192_v42 = vld [vmem:[%s5098_s16 + $0x2e] sm:$0x3]  ;;  %v311_v26 = vld [vmem:[%s5106_s20 + $0x9c] sm:$0x3] }
  0x7c   : > { %v4856_v35 = vpack.c.bf16 %v1264_v8, %v1263_v19  ;;  %v1288_v55 = vcombine.high %v1287_v50, %v1287_v50  ;;  %v1295_v56 = vrot.slane %v557_v51, %v5120_v18  ;;  %v559_v57 = vadd.f32 %v431_v27, %v5511_v14 }
  0x7d   : > { %v4857_v58 = vpack.c.bf16 %v1272_v52, %v1271_v47  ;;  %v4858_v16 = vpack.c.bf16 %v1280_v53, %v1279_v6  ;;  %v1303_v59 = vrot.slane %v558_v54, %v5120_v18  ;;  %v560_v60 = vadd.f32 %v432_v21, %v5511_v14 }
  0x7e   : > { %v3504_v61 = vrot.slane %v4856_v35, %v5125_v24  ;;  %v4859_v62 = vpack.c.bf16 %v1288_v55, %v1287_v50  ;;  %v1296_v63 = vcombine.high %v1295_v56, %v1295_v56  ;;  %v1311_v0 = vrot.slane %v559_v57, %v5120_v18  ;;  %v312_v50 = vld [vmem:[%s5106_s20 + $0x9e] sm:$0x3] }
  0x7f   : > { %v3519_v1 = vrot.slane %v4857_v58, %v5125_v24  ;;  %v3534_v2 = vrot.slane %v4858_v16, %v5125_v24  ;;  %v1304_v49 = vcombine.high %v1303_v59, %v1303_v59  ;;  %v1319_v3 = vrot.slane %v560_v60, %v5120_v18 }
  0x80   : > { %4984 = vst.sshfl [vmem:[%s5153_s23 + $0x80] sm:$0x5 pattern:$0x73625140] %v3504_v61  ;;  %v3549_v34 = vrot.slane %v4859_v62, %v5125_v24  ;;  %v4860_v45 = vpack.c.bf16 %v1296_v63, %v1295_v56  ;;  %v1312_v9 = vcombine.high %v1311_v0, %v1311_v0  ;;  %v5533_v10 = vunpack.c.l.bf16 %v189_v39 }
  0x81   : > { %4985 = vst.sshfl [vmem:[%s5153_s23 + $0x82] sm:$0x5 pattern:$0x73625140] %v3519_v1  ;;  %v4861_v12 = vpack.c.bf16 %v1304_v49, %v1303_v59  ;;  %v1320_v13 = vcombine.high %v1319_v3, %v1319_v3  ;;  %v433_v15 = vunpack.c.l.bf16 %v305_v32  ;;  %v434_v17 = vunpack.c.l.bf16 %v306_v43  ;;  %v313_v43 = vld [vmem:[%s5106_s20 + $0xa0] sm:$0x3] }
  0x82   : > { %4986 = vst.sshfl [vmem:[%s5153_s23 + $0x84] sm:$0x5 pattern:$0x73625140] %v3534_v2  ;;  %v3564_v25 = vrot.slane %v4860_v45, %v5125_v24  ;;  %v4862_v28 = vpack.c.bf16 %v1312_v9, %v1311_v0  ;;  %v5541_v29 = vunpack.c.l.bf16 %v190_v4  ;;  %v435_v30 = vunpack.c.l.bf16 %v307_v5  ;;  %v314_v1 = vld [vmem:[%s5106_s20 + $0xa2] sm:$0x3] }
  0x83   : > { %4987 = vst.sshfl [vmem:[%s5153_s23 + $0x86] sm:$0x5 pattern:$0x73625140] %v3549_v34  ;;  %v3579_v33 = vrot.slane %v4861_v12, %v5125_v24  ;;  %v4863_v36 = vpack.c.bf16 %v1320_v13, %v1319_v3  ;;  %v561_v37 = vadd.f32 %v433_v15, %v5533_v10  ;;  %v562_v38 = vadd.f32 %v434_v17, %v5533_v10  ;;  %v315_v5 = vld [vmem:[%s5106_s20 + $0xa4] sm:$0x3] }
  0x84   : > { %4988 = vst.sshfl [vmem:[%s5153_s23 + $0x88] sm:$0x5 pattern:$0x73625140] %v3564_v25  ;;  %v3594_v44 = vrot.slane %v4862_v28, %v5125_v24  ;;  %v563_v19 = vadd.f32 %v435_v30, %v5541_v29  ;;  %v436_v46 = vunpack.c.l.bf16 %v308_v20  ;;  %v5552_v11 = vunpack.c.l.bf16 %v191_v23  ;;  %v316_v23 = vld [vmem:[%s5106_s20 + $0xa6] sm:$0x3] }
  0x85   : > { %4989 = vst.sshfl [vmem:[%s5153_s23 + $0x8a] sm:$0x5 pattern:$0x73625140] %v3579_v33  ;;  %v3609_v47 = vrot.slane %v4863_v36, %v5125_v24  ;;  %v1327_v6 = vrot.slane %v561_v37, %v5120_v18  ;;  %v1335_v48 = vrot.slane %v562_v38, %v5120_v18  ;;  %v437_v8 = vunpack.c.l.bf16 %v309_v31  ;;  %v317_v33 = vld [vmem:[%s5106_s20 + $0xa8] sm:$0x3] }
  0x86   : > { %4990 = vst.sshfl [vmem:[%s5153_s23 + $0x8c] sm:$0x5 pattern:$0x73625140] %v3594_v44  ;;  %v1343_v51 = vrot.slane %v563_v19, %v5120_v18  ;;  %v564_v27 = vadd.f32 %v436_v46, %v5541_v29  ;;  %v438_v52 = vunpack.c.l.bf16 %v310_v40  ;;  %v5563_v53 = vunpack.c.l.bf16 %v192_v42  ;;  %v318_v42 = vld [vmem:[%s5106_s20 + $0xaa] sm:$0x3] }
  0x87   : > { %4991 = vst.sshfl [vmem:[%s5153_s23 + $0x8e] sm:$0x5 pattern:$0x73625140] %v3609_v47  ;;  %v1328_v54 = vcombine.high %v1327_v6, %v1327_v6  ;;  %v1336_v21 = vcombine.high %v1335_v48, %v1335_v48  ;;  %v565_v35 = vadd.f32 %v437_v8, %v5552_v11  ;;  %v439_v55 = vunpack.c.l.bf16 %v311_v26  ;;  %v319_v47 = vld [vmem:[%s5106_s20 + $0xac] sm:$0x3] }
  0x88   : > { %v1344_v56 = vcombine.high %v1343_v51, %v1343_v51  ;;  %v1351_v57 = vrot.slane %v564_v27, %v5120_v18  ;;  %v566_v58 = vadd.f32 %v438_v52, %v5552_v11  ;;  %v440_v16 = vunpack.c.l.bf16 %v312_v50 }
  0x89   : > { %v4864_v59 = vpack.c.bf16 %v1328_v54, %v1327_v6  ;;  %v4865_v60 = vpack.c.bf16 %v1336_v21, %v1335_v48  ;;  %v1359_v39 = vrot.slane %v565_v35, %v5120_v18  ;;  %v567_v61 = vadd.f32 %v439_v55, %v5563_v53 }
  0x8a   : > { %v4866_v62 = vpack.c.bf16 %v1344_v56, %v1343_v51  ;;  %v1352_v63 = vcombine.high %v1351_v57, %v1351_v57  ;;  %v1367_v0 = vrot.slane %v566_v58, %v5120_v18  ;;  %v568_v32 = vadd.f32 %v440_v16, %v5563_v53 }
  0x8b   : > { %v3624_v2 = vrot.slane %v4864_v59, %v5125_v24  ;;  %v3639_v49 = vrot.slane %v4865_v60, %v5125_v24  ;;  %v1360_v3 = vcombine.high %v1359_v39, %v1359_v39  ;;  %v1375_v4 = vrot.slane %v567_v61, %v5120_v18 }
  0x8c   : > { %v3654_v34 = vrot.slane %v4866_v62, %v5125_v24  ;;  %v4867_v45 = vpack.c.bf16 %v1352_v63, %v1351_v57  ;;  %v1368_v9 = vcombine.high %v1367_v0, %v1367_v0  ;;  %v1383_v12 = vrot.slane %v568_v32, %v5120_v18 }
  0x8d   : > { %4992 = vst.sshfl [vmem:[%s5153_s23 + $0x90] sm:$0x5 pattern:$0x73625140] %v3624_v2  ;;  %v4868_v13 = vpack.c.bf16 %v1360_v3, %v1359_v39  ;;  %v1376_v15 = vcombine.high %v1375_v4, %v1375_v4  ;;  %v441_v17 = vunpack.c.l.bf16 %v313_v43  ;;  %v442_v20 = vunpack.c.l.bf16 %v314_v1  ;;  %v321_v43 = vld [vmem:[%s5106_s20 + $0xb0] sm:$0x3] }
  0x8e   : > { %4993 = vst.sshfl [vmem:[%s5153_s23 + $0x92] sm:$0x5 pattern:$0x73625140] %v3639_v49  ;;  %v3669_v25 = vrot.slane %v4867_v45, %v5125_v24  ;;  %v4869_v28 = vpack.c.bf16 %v1368_v9, %v1367_v0  ;;  %v1384_v30 = vcombine.high %v1383_v12, %v1383_v12  ;;  %v443_v31 = vunpack.c.l.bf16 %v315_v5  ;;  %v322_v1 = vld [vmem:[%s5106_s20 + $0xb2] sm:$0x3] }
  0x8f   : > { %4994 = vst.sshfl [vmem:[%s5153_s23 + $0x94] sm:$0x5 pattern:$0x73625140] %v3654_v34  ;;  %v3684_v36 = vrot.slane %v4868_v13, %v5125_v24  ;;  %v4870_v37 = vpack.c.bf16 %v1376_v15, %v1375_v4  ;;  %v569_v38 = vadd.f32 %v441_v17, %v5481_v7  ;;  %v570_v40 = vadd.f32 %v442_v20, %v5481_v7  ;;  %v320_v7 = vld [vmem:[%s5106_s20 + $0xae] sm:$0x3] }
  0x90   : > { %4995 = vst.sshfl [vmem:[%s5153_s23 + $0x96] sm:$0x5 pattern:$0x73625140] %v3669_v25  ;;  %v3699_v44 = vrot.slane %v4869_v28, %v5125_v24  ;;  %v4871_v19 = vpack.c.bf16 %v1384_v30, %v1383_v12  ;;  %v571_v46 = vadd.f32 %v443_v31, %v5489_v22  ;;  %v444_v26 = vunpack.c.l.bf16 %v316_v23  ;;  %v323_v4 = vld [vmem:[%s5106_s20 + $0xb4] sm:$0x3] }
  0x91   : > { %4996 = vst.sshfl [vmem:[%s5153_s23 + $0x98] sm:$0x5 pattern:$0x73625140] %v3684_v36  ;;  %v3714_v6 = vrot.slane %v4870_v37, %v5125_v24  ;;  %v1391_v48 = vrot.slane %v569_v38, %v5120_v18  ;;  %v1399_v8 = vrot.slane %v570_v40, %v5120_v18  ;;  %v445_v50 = vunpack.c.l.bf16 %v317_v33  ;;  %v324_v17 = vld [vmem:[%s5106_s20 + $0xb6] sm:$0x3] }
  0x92   : > { %4997 = vst.sshfl [vmem:[%s5153_s23 + $0x9a] sm:$0x5 pattern:$0x73625140] %v3699_v44  ;;  %v3729_v51 = vrot.slane %v4871_v19, %v5125_v24  ;;  %v1407_v27 = vrot.slane %v571_v46, %v5120_v18  ;;  %v572_v52 = vadd.f32 %v444_v26, %v5489_v22  ;;  %v446_v54 = vunpack.c.l.bf16 %v318_v42  ;;  %v325_v30 = vld [vmem:[%s5106_s20 + $0xb8] sm:$0x3] }
  0x93   : > { %4998 = vst.sshfl [vmem:[%s5153_s23 + $0x9c] sm:$0x5 pattern:$0x73625140] %v3714_v6  ;;  %v1392_v21 = vcombine.high %v1391_v48, %v1391_v48  ;;  %v1400_v35 = vcombine.high %v1399_v8, %v1399_v8  ;;  %v573_v55 = vadd.f32 %v445_v50, %v5500_v41  ;;  %v447_v56 = vunpack.c.l.bf16 %v319_v47  ;;  %v326_v38 = vld [vmem:[%s5106_s20 + $0xba] sm:$0x3] }
  0x94   : > { %4999 = vst.sshfl [vmem:[%s5153_s23 + $0x9e] sm:$0x5 pattern:$0x73625140] %v3729_v51  ;;  %v1408_v57 = vcombine.high %v1407_v27, %v1407_v27  ;;  %v1415_v58 = vrot.slane %v572_v52, %v5120_v18  ;;  %v574_v16 = vadd.f32 %v446_v54, %v5500_v41  ;;  %v448_v59 = vunpack.c.l.bf16 %v320_v7  ;;  %v327_v46 = vld [vmem:[%s5106_s20 + $0xbc] sm:$0x3] }
  0x95   : > { %v4872_v60 = vpack.c.bf16 %v1392_v21, %v1391_v48  ;;  %v4873_v39 = vpack.c.bf16 %v1400_v35, %v1399_v8  ;;  %v1423_v22 = vrot.slane %v573_v55, %v5120_v18  ;;  %v575_v61 = vadd.f32 %v447_v56, %v5511_v14 }
  0x96   : > { %v4874_v62 = vpack.c.bf16 %v1408_v57, %v1407_v27  ;;  %v1416_v63 = vcombine.high %v1415_v58, %v1415_v58  ;;  %v1431_v0 = vrot.slane %v574_v16, %v5120_v18  ;;  %v576_v32 = vadd.f32 %v448_v59, %v5511_v14 }
  0x97   : > { %v3744_v41 = vrot.slane %v4872_v60, %v5125_v24  ;;  %v3759_v2 = vrot.slane %v4873_v39, %v5125_v24  ;;  %v1424_v49 = vcombine.high %v1423_v22, %v1423_v22  ;;  %v1439_v3 = vrot.slane %v575_v61, %v5120_v18 }
  0x98   : > { %v3774_v5 = vrot.slane %v4874_v62, %v5125_v24  ;;  %v4875_v34 = vpack.c.bf16 %v1416_v63, %v1415_v58  ;;  %v1432_v45 = vcombine.high %v1431_v0, %v1431_v0  ;;  %v1447_v9 = vrot.slane %v576_v32, %v5120_v18  ;;  %v193_v62 = vld [vmem:[%s5098_s16 + $0x30] sm:$0x3]  ;;  %v329_v63 = vld [vmem:[%s5106_s20 + $0xc0] sm:$0x3] }
  0x99   : > { %5000 = vst.sshfl [vmem:[%s5153_s23 + $0xa0] sm:$0x5 pattern:$0x73625140] %v3744_v41  ;;  %v4876_v14 = vpack.c.bf16 %v1424_v49, %v1423_v22  ;;  %v1440_v12 = vcombine.high %v1439_v3, %v1439_v3  ;;  %v449_v13 = vunpack.c.l.bf16 %v321_v43  ;;  %v450_v15 = vunpack.c.l.bf16 %v322_v1  ;;  %v330_v1 = vld [vmem:[%s5106_s20 + $0xc2] sm:$0x3] }
  0x9a   : > { %5001 = vst.sshfl [vmem:[%s5153_s23 + $0xa2] sm:$0x5 pattern:$0x73625140] %v3759_v2  ;;  %v3789_v20 = vrot.slane %v4875_v34, %v5125_v24  ;;  %v4877_v23 = vpack.c.bf16 %v1432_v45, %v1431_v0  ;;  %v1448_v25 = vcombine.high %v1447_v9, %v1447_v9  ;;  %v451_v28 = vunpack.c.l.bf16 %v323_v4 }
  0x9b   : > { %5002 = vst.sshfl [vmem:[%s5153_s23 + $0xa4] sm:$0x5 pattern:$0x73625140] %v3774_v5  ;;  %v3804_v31 = vrot.slane %v4876_v14, %v5125_v24  ;;  %v4878_v33 = vpack.c.bf16 %v1440_v12, %v1439_v3  ;;  %v577_v36 = vadd.f32 %v449_v13, %v5533_v10  ;;  %v578_v37 = vadd.f32 %v450_v15, %v5533_v10  ;;  %v328_v10 = vld [vmem:[%s5106_s20 + $0xbe] sm:$0x3] }
  0x9c   : > { %5003 = vst.sshfl [vmem:[%s5153_s23 + $0xa6] sm:$0x5 pattern:$0x73625140] %v3789_v20  ;;  %v3819_v40 = vrot.slane %v4877_v23, %v5125_v24  ;;  %v4879_v42 = vpack.c.bf16 %v1448_v25, %v1447_v9  ;;  %v579_v44 = vadd.f32 %v451_v28, %v5541_v29  ;;  %v452_v19 = vunpack.c.l.bf16 %v324_v17  ;;  %v194_v3 = vld [vmem:[%s5098_s16 + $0x32] sm:$0x3] }
  0x9d   : > { %5004 = vst.sshfl [vmem:[%s5153_s23 + $0xa8] sm:$0x5 pattern:$0x73625140] %v3804_v31  ;;  %v3834_v26 = vrot.slane %v4878_v33, %v5125_v24  ;;  %v1455_v47 = vrot.slane %v577_v36, %v5120_v18  ;;  %v1463_v6 = vrot.slane %v578_v37, %v5120_v18  ;;  %v453_v48 = vunpack.c.l.bf16 %v325_v30  ;;  %v331_v9 = vld [vmem:[%s5106_s20 + $0xc4] sm:$0x3] }
  0x9e   : > { %5005 = vst.sshfl [vmem:[%s5153_s23 + $0xaa] sm:$0x5 pattern:$0x73625140] %v3819_v40  ;;  %v3849_v8 = vrot.slane %v4879_v42, %v5125_v24  ;;  %v1471_v50 = vrot.slane %v579_v44, %v5120_v18  ;;  %v580_v7 = vadd.f32 %v452_v19, %v5541_v29  ;;  %v454_v51 = vunpack.c.l.bf16 %v326_v38  ;;  %v332_v17 = vld [vmem:[%s5106_s20 + $0xc6] sm:$0x3] }
  0x9f   : > { %5006 = vst.sshfl [vmem:[%s5153_s23 + $0xac] sm:$0x5 pattern:$0x73625140] %v3834_v26  ;;  %v1456_v27 = vcombine.high %v1455_v47, %v1455_v47  ;;  %v1464_v52 = vcombine.high %v1463_v6, %v1463_v6  ;;  %v581_v54 = vadd.f32 %v453_v48, %v5552_v11  ;;  %v455_v21 = vunpack.c.l.bf16 %v327_v46  ;;  %v195_v20 = vld [vmem:[%s5098_s16 + $0x34] sm:$0x3] }
  0xa0   : > { %5007 = vst.sshfl [vmem:[%s5153_s23 + $0xae] sm:$0x5 pattern:$0x73625140] %v3849_v8  ;;  %v1472_v35 = vcombine.high %v1471_v50, %v1471_v50  ;;  %v1479_v55 = vrot.slane %v580_v7, %v5120_v18  ;;  %v582_v56 = vadd.f32 %v454_v51, %v5552_v11  ;;  %v456_v57 = vunpack.c.l.bf16 %v328_v10  ;;  %v333_v31 = vld [vmem:[%s5106_s20 + $0xc8] sm:$0x3] }
  0xa1   : > { %v4880_v58 = vpack.c.bf16 %v1456_v27, %v1455_v47  ;;  %v4881_v16 = vpack.c.bf16 %v1464_v52, %v1463_v6  ;;  %v1487_v29 = vrot.slane %v581_v54, %v5120_v18  ;;  %v583_v59 = vadd.f32 %v455_v21, %v5563_v53  ;;  %v334_v40 = vld [vmem:[%s5106_s20 + $0xca] sm:$0x3]  ;;  %v196_v42 = vld [vmem:[%s5098_s16 + $0x36] sm:$0x3]  ;;  %v335_v47 = vld [vmem:[%s5106_s20 + $0xcc] sm:$0x3] }
  0xa2   : > { %v4882_v60 = vpack.c.bf16 %v1472_v35, %v1471_v50  ;;  %v1480_v39 = vcombine.high %v1479_v55, %v1479_v55  ;;  %v1495_v22 = vrot.slane %v582_v56, %v5120_v18  ;;  %v584_v61 = vadd.f32 %v456_v57, %v5563_v53  ;;  %v336_v50 = vld [vmem:[%s5106_s20 + $0xce] sm:$0x3] }
  0xa3   : > { %v3864_v11 = vrot.slane %v4880_v58, %v5125_v24  ;;  %v3879_v0 = vrot.slane %v4881_v16, %v5125_v24  ;;  %v1488_v32 = vcombine.high %v1487_v29, %v1487_v29  ;;  %v1503_v43 = vrot.slane %v583_v59, %v5120_v18 }
  0xa4   : > { %v3894_v41 = vrot.slane %v4882_v60, %v5125_v24  ;;  %v4883_v2 = vpack.c.bf16 %v1480_v39, %v1479_v55  ;;  %v1496_v49 = vcombine.high %v1495_v22, %v1495_v22  ;;  %v1511_v53 = vrot.slane %v584_v61, %v5120_v18 }
  0xa5   : > { %5008 = vst.sshfl [vmem:[%s5153_s23 + $0xb0] sm:$0x5 pattern:$0x73625140] %v3864_v11  ;;  %v4884_v4 = vpack.c.bf16 %v1488_v32, %v1487_v29  ;;  %v1504_v5 = vcombine.high %v1503_v43, %v1503_v43  ;;  %v5664_v34 = vunpack.c.l.bf16 %v193_v62  ;;  %v457_v45 = vunpack.c.l.bf16 %v329_v63 }
  0xa6   : > { %5009 = vst.sshfl [vmem:[%s5153_s23 + $0xb2] sm:$0x5 pattern:$0x73625140] %v3879_v0  ;;  %v3909_v14 = vrot.slane %v4883_v2, %v5125_v24  ;;  %v4885_v12 = vpack.c.bf16 %v1496_v49, %v1495_v22  ;;  %v1512_v13 = vcombine.high %v1511_v53, %v1511_v53  ;;  %v458_v15 = vunpack.c.l.bf16 %v330_v1  ;;  %v197_v22 = vld [vmem:[%s5098_s16 + $0x38] sm:$0x3] }
  0xa7   : > { %5010 = vst.sshfl [vmem:[%s5153_s23 + $0xb4] sm:$0x5 pattern:$0x73625140] %v3894_v41  ;;  %v3924_v23 = vrot.slane %v4884_v4, %v5125_v24  ;;  %v4886_v25 = vpack.c.bf16 %v1504_v5, %v1503_v43  ;;  %v585_v28 = vadd.f32 %v457_v45, %v5664_v34  ;;  %v5673_v30 = vunpack.c.l.bf16 %v194_v3  ;;  %v337_v0 = vld [vmem:[%s5106_s20 + $0xd0] sm:$0x3] }
  0xa8   : > { %5011 = vst.sshfl [vmem:[%s5153_s23 + $0xb6] sm:$0x5 pattern:$0x73625140] %v3909_v14  ;;  %v3939_v33 = vrot.slane %v4885_v12, %v5125_v24  ;;  %v4887_v36 = vpack.c.bf16 %v1512_v13, %v1511_v53  ;;  %v586_v37 = vadd.f32 %v458_v15, %v5664_v34  ;;  %v459_v38 = vunpack.c.l.bf16 %v331_v9  ;;  %v338_v2 = vld [vmem:[%s5106_s20 + $0xd2] sm:$0x3] }
  0xa9   : > { %5012 = vst.sshfl [vmem:[%s5153_s23 + $0xb8] sm:$0x5 pattern:$0x73625140] %v3924_v23  ;;  %v3954_v44 = vrot.slane %v4886_v25, %v5125_v24  ;;  %v1519_v19 = vrot.slane %v585_v28, %v5120_v18  ;;  %v460_v46 = vunpack.c.l.bf16 %v332_v17  ;;  %v5684_v26 = vunpack.c.l.bf16 %v195_v20  ;;  %v198_v5 = vld [vmem:[%s5098_s16 + $0x3a] sm:$0x3] }
  0xaa   : > { %5013 = vst.sshfl [vmem:[%s5153_s23 + $0xba] sm:$0x5 pattern:$0x73625140] %v3939_v33  ;;  %v3969_v6 = vrot.slane %v4887_v36, %v5125_v24  ;;  %v1527_v48 = vrot.slane %v586_v37, %v5120_v18  ;;  %v587_v10 = vadd.f32 %v459_v38, %v5673_v30  ;;  %v461_v8 = vunpack.c.l.bf16 %v333_v31  ;;  %v339_v13 = vld [vmem:[%s5106_s20 + $0xd4] sm:$0x3] }
  0xab   : > { %5014 = vst.sshfl [vmem:[%s5153_s23 + $0xbc] sm:$0x5 pattern:$0x73625140] %v3954_v44  ;;  %v1520_v7 = vcombine.high %v1519_v19, %v1519_v19  ;;  %v588_v51 = vadd.f32 %v460_v46, %v5673_v30  ;;  %v462_v27 = vunpack.c.l.bf16 %v334_v40  ;;  %v5694_v52 = vunpack.c.l.bf16 %v196_v42  ;;  %v340_v25 = vld [vmem:[%s5106_s20 + $0xd6] sm:$0x3] }
  0xac   : > { %5015 = vst.sshfl [vmem:[%s5153_s23 + $0xbe] sm:$0x5 pattern:$0x73625140] %v3969_v6  ;;  %v1528_v54 = vcombine.high %v1527_v48, %v1527_v48  ;;  %v1535_v21 = vrot.slane %v587_v10, %v5120_v18  ;;  %v589_v35 = vadd.f32 %v461_v8, %v5684_v26  ;;  %v463_v55 = vunpack.c.l.bf16 %v335_v47  ;;  %v199_v28 = vld [vmem:[%s5098_s16 + $0x3c] sm:$0x3] }
  0xad   : > { %v4888_v56 = vpack.c.bf16 %v1520_v7, %v1519_v19  ;;  %v1543_v57 = vrot.slane %v588_v51, %v5120_v18  ;;  %v590_v58 = vadd.f32 %v462_v27, %v5684_v26  ;;  %v464_v16 = vunpack.c.l.bf16 %v336_v50  ;;  %v341_v38 = vld [vmem:[%s5106_s20 + $0xd8] sm:$0x3]  ;;  %v342_v46 = vld [vmem:[%s5106_s20 + $0xda] sm:$0x3]  ;;  %v200_v47 = vld [vmem:[%s5098_s16 + $0x3e] sm:$0x3] }
  0xae   : > { %v4889_v29 = vpack.c.bf16 %v1528_v54, %v1527_v48  ;;  %v1536_v59 = vcombine.high %v1535_v21, %v1535_v21  ;;  %v1551_v60 = vrot.slane %v589_v35, %v5120_v18  ;;  %v591_v39 = vadd.f32 %v463_v55, %v5694_v52  ;;  %v343_v50 = vld [vmem:[%s5106_s20 + $0xdc] sm:$0x3] }
  0xaf   : > { %v3984_v61 = vrot.slane %v4888_v56, %v5125_v24  ;;  %v1544_v62 = vcombine.high %v1543_v57, %v1543_v57  ;;  %v1559_v63 = vrot.slane %v590_v58, %v5120_v18  ;;  %v592_v11 = vadd.f32 %v464_v16, %v5694_v52 }
  0xb0   : > { %v3999_v32 = vrot.slane %v4889_v29, %v5125_v24  ;;  %v4890_v43 = vpack.c.bf16 %v1536_v59, %v1535_v21  ;;  %v1552_v1 = vcombine.high %v1551_v60, %v1551_v60  ;;  %v1567_v41 = vrot.slane %v591_v39, %v5120_v18  ;;  %v344_v21 = vld [vmem:[%s5106_s20 + $0xde] sm:$0x3] }
  0xb1   : > { %5016 = vst.sshfl [vmem:[%s5153_s23 + $0xc0] sm:$0x5 pattern:$0x73625140] %v3984_v61  ;;  %v4891_v49 = vpack.c.bf16 %v1544_v62, %v1543_v57  ;;  %v1560_v53 = vcombine.high %v1559_v63, %v1559_v63  ;;  %v1575_v3 = vrot.slane %v592_v11, %v5120_v18  ;;  %v5713_v4 = vunpack.c.l.bf16 %v197_v22 }
  0xb2   : > { %5017 = vst.sshfl [vmem:[%s5153_s23 + $0xc2] sm:$0x5 pattern:$0x73625140] %v3999_v32  ;;  %v4014_v45 = vrot.slane %v4890_v43, %v5125_v24  ;;  %v4892_v9 = vpack.c.bf16 %v1552_v1, %v1551_v60  ;;  %v1568_v14 = vcombine.high %v1567_v41, %v1567_v41  ;;  %v465_v12 = vunpack.c.l.bf16 %v337_v0  ;;  %v345_v32 = vld [vmem:[%s5106_s20 + $0xe0] sm:$0x3] }
  0xb3   : > { %v4029_v15 = vrot.slane %v4891_v49, %v5125_v24  ;;  %v4893_v17 = vpack.c.bf16 %v1560_v53, %v1559_v63  ;;  %v1576_v20 = vcombine.high %v1575_v3, %v1575_v3  ;;  %v466_v23 = vunpack.c.l.bf16 %v338_v2  ;;  %v346_v49 = vld [vmem:[%s5106_s20 + $0xe2] sm:$0x3] }
  0xb4   : > { %5018 = vst.sshfl [vmem:[%s5153_s23 + $0xc4] sm:$0x5 pattern:$0x73625140] %v4014_v45  ;;  %v4044_v31 = vrot.slane %v4892_v9, %v5125_v24  ;;  %v4894_v33 = vpack.c.bf16 %v1568_v14, %v1567_v41  ;;  %v593_v36 = vadd.f32 %v465_v12, %v5713_v4  ;;  %v5725_v37 = vunpack.c.l.bf16 %v198_v5 }
  0xb5   : > { %5019 = vst.sshfl [vmem:[%s5153_s23 + $0xc6] sm:$0x5 pattern:$0x73625140] %v4029_v15  ;;  %v4059_v40 = vrot.slane %v4893_v17, %v5125_v24  ;;  %v4895_v42 = vpack.c.bf16 %v1576_v20, %v1575_v3  ;;  %v594_v44 = vadd.f32 %v466_v23, %v5713_v4  ;;  %v467_v19 = vunpack.c.l.bf16 %v339_v13  ;;  %v347_v15 = vld [vmem:[%s5106_s20 + $0xe4] sm:$0x3] }
  0xb6   : > { %5020 = vst.sshfl [vmem:[%s5153_s23 + $0xc8] sm:$0x5 pattern:$0x73625140] %v4044_v31  ;;  %v4074_v6 = vrot.slane %v4894_v33, %v5125_v24  ;;  %v1583_v48 = vrot.slane %v593_v36, %v5120_v18  ;;  %v468_v10 = vunpack.c.l.bf16 %v340_v25  ;;  %v5736_v8 = vunpack.c.l.bf16 %v199_v28  ;;  %v348_v28 = vld [vmem:[%s5106_s20 + $0xe6] sm:$0x3] }
  0xb7   : > { %5021 = vst.sshfl [vmem:[%s5153_s23 + $0xca] sm:$0x5 pattern:$0x73625140] %v4059_v40  ;;  %v4089_v7 = vrot.slane %v4895_v42, %v5125_v24  ;;  %v1591_v51 = vrot.slane %v594_v44, %v5120_v18  ;;  %v595_v27 = vadd.f32 %v467_v19, %v5725_v37  ;;  %v469_v54 = vunpack.c.l.bf16 %v341_v38  ;;  %v349_v40 = vld [vmem:[%s5106_s20 + $0xe8] sm:$0x3] }
  0xb8   : > { %5022 = vst.sshfl [vmem:[%s5153_s23 + $0xcc] sm:$0x5 pattern:$0x73625140] %v4074_v6  ;;  %v1584_v35 = vcombine.high %v1583_v48, %v1583_v48  ;;  %v596_v55 = vadd.f32 %v468_v10, %v5725_v37  ;;  %v470_v56 = vunpack.c.l.bf16 %v342_v46  ;;  %v5746_v57 = vunpack.c.l.bf16 %v200_v47  ;;  %v350_v47 = vld [vmem:[%s5106_s20 + $0xea] sm:$0x3] }
  0xb9   : > { %5023 = vst.sshfl [vmem:[%s5153_s23 + $0xce] sm:$0x5 pattern:$0x73625140] %v4089_v7  ;;  %v1592_v58 = vcombine.high %v1591_v51, %v1591_v51  ;;  %v1599_v16 = vrot.slane %v595_v27, %v5120_v18  ;;  %v597_v29 = vadd.f32 %v469_v54, %v5736_v8  ;;  %v471_v59 = vunpack.c.l.bf16 %v343_v50  ;;  %v351_v7 = vld [vmem:[%s5106_s20 + $0xec] sm:$0x3] }
  0xba   : > { %v4896_v60 = vpack.c.bf16 %v1584_v35, %v1583_v48  ;;  %v1607_v39 = vrot.slane %v596_v55, %v5120_v18  ;;  %v598_v22 = vadd.f32 %v470_v56, %v5736_v8  ;;  %v472_v61 = vunpack.c.l.bf16 %v344_v21  ;;  %v352_v21 = vld [vmem:[%s5106_s20 + $0xee] sm:$0x3] }
  0xbb   : > { %v4897_v62 = vpack.c.bf16 %v1592_v58, %v1591_v51  ;;  %v1600_v63 = vcombine.high %v1599_v16, %v1599_v16  ;;  %v1615_v11 = vrot.slane %v597_v29, %v5120_v18  ;;  %v599_v0 = vadd.f32 %v471_v59, %v5746_v57 }
  0xbc   : > { %v4104_v43 = vrot.slane %v4896_v60, %v5125_v24  ;;  %v1608_v1 = vcombine.high %v1607_v39, %v1607_v39  ;;  %v1623_v41 = vrot.slane %v598_v22, %v5120_v18  ;;  %v600_v2 = vadd.f32 %v472_v61, %v5746_v57 }
  0xbd   : > { %v4119_v53 = vrot.slane %v4897_v62, %v5125_v24  ;;  %v4898_v3 = vpack.c.bf16 %v1600_v63, %v1599_v16  ;;  %v1616_v5 = vcombine.high %v1615_v11, %v1615_v11  ;;  %v1631_v45 = vrot.slane %v599_v0, %v5120_v18 }
  0xbe   : > { %5024 = vst.sshfl [vmem:[%s5153_s23 + $0xd0] sm:$0x5 pattern:$0x73625140] %v4104_v43  ;;  %v4899_v9 = vpack.c.bf16 %v1608_v1, %v1607_v39  ;;  %v1624_v14 = vcombine.high %v1623_v41, %v1623_v41  ;;  %v1639_v12 = vrot.slane %v600_v2, %v5120_v18  ;;  %v473_v13 = vunpack.c.l.bf16 %v345_v32  ;;  %v353_v32 = vld [vmem:[%s5106_s20 + $0xf0] sm:$0x3] }
  0xbf   : > { %5025 = vst.sshfl [vmem:[%s5153_s23 + $0xd2] sm:$0x5 pattern:$0x73625140] %v4119_v53  ;;  %v4134_v17 = vrot.slane %v4898_v3, %v5125_v24  ;;  %v4900_v20 = vpack.c.bf16 %v1616_v5, %v1615_v11  ;;  %v1632_v23 = vcombine.high %v1631_v45, %v1631_v45  ;;  %v474_v25 = vunpack.c.l.bf16 %v346_v49  ;;  %v354_v49 = vld [vmem:[%s5106_s20 + $0xf2] sm:$0x3] }
  0xc0   : > { %v4149_v31 = vrot.slane %v4899_v9, %v5125_v24  ;;  %v4901_v33 = vpack.c.bf16 %v1624_v14, %v1623_v41  ;;  %v1640_v36 = vcombine.high %v1639_v12, %v1639_v12  ;;  %v601_v38 = vadd.f32 %v473_v13, %v5664_v34  ;;  %v355_v13 = vld [vmem:[%s5106_s20 + $0xf4] sm:$0x3] }
  0xc1   : > { %5026 = vst.sshfl [vmem:[%s5153_s23 + $0xd4] sm:$0x5 pattern:$0x73625140] %v4134_v17  ;;  %v4164_v42 = vrot.slane %v4900_v20, %v5125_v24  ;;  %v4902_v44 = vpack.c.bf16 %v1632_v23, %v1631_v45  ;;  %v602_v19 = vadd.f32 %v474_v25, %v5664_v34  ;;  %v475_v46 = vunpack.c.l.bf16 %v347_v15  ;;  %v356_v23 = vld [vmem:[%s5106_s20 + $0xf6] sm:$0x3] }
  0xc2   : > { %5027 = vst.sshfl [vmem:[%s5153_s23 + $0xd6] sm:$0x5 pattern:$0x73625140] %v4149_v31  ;;  %v4179_v6 = vrot.slane %v4901_v33, %v5125_v24  ;;  %v4903_v48 = vpack.c.bf16 %v1640_v36, %v1639_v12  ;;  %v1647_v10 = vrot.slane %v601_v38, %v5120_v18  ;;  %v476_v50 = vunpack.c.l.bf16 %v348_v28  ;;  %v357_v36 = vld [vmem:[%s5106_s20 + $0xf8] sm:$0x3] }
  0xc3   : > { %5028 = vst.sshfl [vmem:[%s5153_s23 + $0xd8] sm:$0x5 pattern:$0x73625140] %v4164_v42  ;;  %v4194_v51 = vrot.slane %v4902_v44, %v5125_v24  ;;  %v1655_v27 = vrot.slane %v602_v19, %v5120_v18  ;;  %v603_v54 = vadd.f32 %v475_v46, %v5673_v30  ;;  %v477_v34 = vunpack.c.l.bf16 %v349_v40  ;;  %v358_v19 = vld [vmem:[%s5106_s20 + $0xfa] sm:$0x3] }
  0xc4   : > { %5029 = vst.sshfl [vmem:[%s5153_s23 + $0xda] sm:$0x5 pattern:$0x73625140] %v4179_v6  ;;  %v4209_v35 = vrot.slane %v4903_v48, %v5125_v24  ;;  %v1648_v55 = vcombine.high %v1647_v10, %v1647_v10  ;;  %v604_v56 = vadd.f32 %v476_v50, %v5673_v30  ;;  %v478_v58 = vunpack.c.l.bf16 %v350_v47 }
  0xc5   : > { %5030 = vst.sshfl [vmem:[%s5153_s23 + $0xdc] sm:$0x5 pattern:$0x73625140] %v4194_v51  ;;  %v1656_v16 = vcombine.high %v1655_v27, %v1655_v27  ;;  %v1663_v29 = vrot.slane %v603_v54, %v5120_v18  ;;  %v605_v59 = vadd.f32 %v477_v34, %v5684_v26  ;;  %v479_v60 = vunpack.c.l.bf16 %v351_v7 }
  0xc6   : > { %5031 = vst.sshfl [vmem:[%s5153_s23 + $0xde] sm:$0x5 pattern:$0x73625140] %v4209_v35  ;;  %v4904_v39 = vpack.c.bf16 %v1648_v55, %v1647_v10  ;;  %v1671_v22 = vrot.slane %v604_v56, %v5120_v18  ;;  %v606_v61 = vadd.f32 %v478_v58, %v5684_v26  ;;  %v480_v62 = vunpack.c.l.bf16 %v352_v21  ;;  %v359_v10 = vld [vmem:[%s5106_s20 + $0xfc] sm:$0x3] }
  0xc7   : > { %v4905_v63 = vpack.c.bf16 %v1656_v16, %v1655_v27  ;;  %v1664_v30 = vcombine.high %v1663_v29, %v1663_v29  ;;  %v1679_v11 = vrot.slane %v605_v59, %v5120_v18  ;;  %v607_v0 = vadd.f32 %v479_v60, %v5694_v52  ;;  %v360_v27 = vld [vmem:[%s5106_s20 + $0xfe] sm:$0x3] }
  0xc8   : > { %v4224_v43 = vrot.slane %v4904_v39, %v5125_v24  ;;  %v1672_v1 = vcombine.high %v1671_v22, %v1671_v22  ;;  %v1687_v41 = vrot.slane %v606_v61, %v5120_v18  ;;  %v608_v2 = vadd.f32 %v480_v62, %v5694_v52 }
  0xc9   : > { %v4239_v26 = vrot.slane %v4905_v63, %v5125_v24  ;;  %v4906_v53 = vpack.c.bf16 %v1664_v30, %v1663_v29  ;;  %v1680_v3 = vcombine.high %v1679_v11, %v1679_v11  ;;  %v1695_v5 = vrot.slane %v607_v0, %v5120_v18 }
  0xca   : > { %5032 = vst.sshfl [vmem:[%s5153_s23 + $0xe0] sm:$0x5 pattern:$0x73625140] %v4224_v43  ;;  %v4907_v45 = vpack.c.bf16 %v1672_v1, %v1671_v22  ;;  %v1688_v9 = vcombine.high %v1687_v41, %v1687_v41  ;;  %v1703_v14 = vrot.slane %v608_v2, %v5120_v18  ;;  %v481_v12 = vunpack.c.l.bf16 %v353_v32 }
  0xcb   : > { %5033 = vst.sshfl [vmem:[%s5153_s23 + $0xe2] sm:$0x5 pattern:$0x73625140] %v4239_v26  ;;  %v4254_v52 = vrot.slane %v4906_v53, %v5125_v24  ;;  %v4908_v15 = vpack.c.bf16 %v1680_v3, %v1679_v11  ;;  %v1696_v17 = vcombine.high %v1695_v5, %v1695_v5  ;;  %v482_v20 = vunpack.c.l.bf16 %v354_v49 }
  0xcc   : > { %v4269_v25 = vrot.slane %v4907_v45, %v5125_v24  ;;  %v4909_v28 = vpack.c.bf16 %v1688_v9, %v1687_v41  ;;  %v1704_v31 = vcombine.high %v1703_v14, %v1703_v14  ;;  %v609_v33 = vadd.f32 %v481_v12, %v5713_v4 }
  0xcd   : > { %5034 = vst.sshfl [vmem:[%s5153_s23 + $0xe4] sm:$0x5 pattern:$0x73625140] %v4254_v52  ;;  %v4284_v38 = vrot.slane %v4908_v15, %v5125_v24  ;;  %v4910_v40 = vpack.c.bf16 %v1696_v17, %v1695_v5  ;;  %v610_v42 = vadd.f32 %v482_v20, %v5713_v4  ;;  %v483_v44 = vunpack.c.l.bf16 %v355_v13 }
  0xce   : > { %5035 = vst.sshfl [vmem:[%s5153_s23 + $0xe6] sm:$0x5 pattern:$0x73625140] %v4269_v25  ;;  %v4299_v46 = vrot.slane %v4909_v28, %v5125_v24  ;;  %v4911_v47 = vpack.c.bf16 %v1704_v31, %v1703_v14  ;;  %v1711_v6 = vrot.slane %v609_v33, %v5120_v18  ;;  %v484_v48 = vunpack.c.l.bf16 %v356_v23 }
  0xcf   : > { %5036 = vst.sshfl [vmem:[%s5153_s23 + $0xe8] sm:$0x5 pattern:$0x73625140] %v4284_v38  ;;  %v4314_v50 = vrot.slane %v4910_v40, %v5125_v24  ;;  %v1719_v7 = vrot.slane %v610_v42, %v5120_v18  ;;  %v611_v51 = vadd.f32 %v483_v44, %v5725_v37  ;;  %v485_v4 = vunpack.c.l.bf16 %v357_v36 }
  0xd0   : > { %5037 = vst.sshfl [vmem:[%s5153_s23 + $0xea] sm:$0x5 pattern:$0x73625140] %v4299_v46  ;;  %v4329_v54 = vrot.slane %v4911_v47, %v5125_v24  ;;  %v1712_v34 = vcombine.high %v1711_v6, %v1711_v6  ;;  %v612_v21 = vadd.f32 %v484_v48, %v5725_v37  ;;  %v486_v35 = vunpack.c.l.bf16 %v358_v19 }
  0xd1   : > { %5038 = vst.sshfl [vmem:[%s5153_s23 + $0xec] sm:$0x5 pattern:$0x73625140] %v4314_v50  ;;  %v1720_v55 = vcombine.high %v1719_v7, %v1719_v7  ;;  %v1727_v56 = vrot.slane %v611_v51, %v5120_v18  ;;  %v613_v58 = vadd.f32 %v485_v4, %v5736_v8  ;;  %v487_v16 = vunpack.c.l.bf16 %v359_v10 }
  0xd2   : > { %5039 = vst.sshfl [vmem:[%s5153_s23 + $0xee] sm:$0x5 pattern:$0x73625140] %v4329_v54  ;;  %v4912_v29 = vpack.c.bf16 %v1712_v34, %v1711_v6  ;;  %v1735_v59 = vrot.slane %v612_v21, %v5120_v18  ;;  %v614_v60 = vadd.f32 %v486_v35, %v5736_v8  ;;  %v488_v39 = vunpack.c.l.bf16 %v360_v27 }
  0xd3   : > { %v4913_v22 = vpack.c.bf16 %v1720_v55, %v1719_v7  ;;  %v1728_v61 = vcombine.high %v1727_v56, %v1727_v56  ;;  %v1743_v37 = vrot.slane %v613_v58, %v5120_v18  ;;  %v615_v62 = vadd.f32 %v487_v16, %v5746_v57 }
  0xd4   : > { %v4344_v63 = vrot.slane %v4912_v29, %v5125_v24  ;;  %v1736_v30 = vcombine.high %v1735_v59, %v1735_v59  ;;  %v1751_v11 = vrot.slane %v614_v60, %v5120_v18  ;;  %v616_v0 = vadd.f32 %v488_v39, %v5746_v57 }
  0xd5   : > { %v4359_v32 = vrot.slane %v4913_v22, %v5125_v24  ;;  %v4914_v43 = vpack.c.bf16 %v1728_v61, %v1727_v56  ;;  %v1744_v8 = vcombine.high %v1743_v37, %v1743_v37  ;;  %v1759_v1 = vrot.slane %v615_v62, %v5120_v18 }
  0xd6   : > { %5040 = vst.sshfl [vmem:[%s5153_s23 + $0xf0] sm:$0x5 pattern:$0x73625140] %v4344_v63  ;;  %v4915_v41 = vpack.c.bf16 %v1736_v30, %v1735_v59  ;;  %v1752_v2 = vcombine.high %v1751_v11, %v1751_v11  ;;  %v1767_v49 = vrot.slane %v616_v0, %v5120_v18 }
  0xd7   : > { %5041 = vst.sshfl [vmem:[%s5153_s23 + $0xf2] sm:$0x5 pattern:$0x73625140] %v4359_v32  ;;  %v4374_v26 = vrot.slane %v4914_v43, %v5125_v24  ;;  %v4916_v57 = vpack.c.bf16 %v1744_v8, %v1743_v37  ;;  %v1760_v53 = vcombine.high %v1759_v1, %v1759_v1 }
  0xd8   : > { %v4389_v3 = vrot.slane %v4915_v41, %v5125_v24  ;;  %v4917_v5 = vpack.c.bf16 %v1752_v2, %v1751_v11  ;;  %v1768_v45 = vcombine.high %v1767_v49, %v1767_v49 }
  0xd9   : > { %5042 = vst.sshfl [vmem:[%s5153_s23 + $0xf4] sm:$0x5 pattern:$0x73625140] %v4374_v26  ;;  %v4404_v9 = vrot.slane %v4916_v57, %v5125_v24  ;;  %v4918_v14 = vpack.c.bf16 %v1760_v53, %v1759_v1 }
  0xda   : > { %5043 = vst.sshfl [vmem:[%s5153_s23 + $0xf6] sm:$0x5 pattern:$0x73625140] %v4389_v3  ;;  %v4419_v12 = vrot.slane %v4917_v5, %v5125_v24  ;;  %v4919_v18 = vpack.c.bf16 %v1768_v45, %v1767_v49 }
  0xdb   : > { %5044 = vst.sshfl [vmem:[%s5153_s23 + $0xf8] sm:$0x5 pattern:$0x73625140] %v4404_v9  ;;  %v4434_v13 = vrot.slane %v4918_v14, %v5125_v24 }
  0xdc   : > { %5045 = vst.sshfl [vmem:[%s5153_s23 + $0xfa] sm:$0x5 pattern:$0x73625140] %v4419_v12  ;;  %v4449_v52 = vrot.slane %v4919_v18, %v5125_v24 }
  0xdd   : > { %5046 = vst.sshfl [vmem:[%s5153_s23 + $0xfc] sm:$0x5 pattern:$0x73625140] %v4434_v13 }
  0xde   : > { %5047 = vst.sshfl [vmem:[%s5153_s23 + $0xfe] sm:$0x5 pattern:$0x73625140] %v4449_v52 }
  0xdf PF: > { %s12_s9 = sadd.s32 1, %s5066_s9  }
  0xe0   : > { %p9_p5 = scmp.ge.s32.totalorder %s12_s9, 4  }
  0xe2   :  { %11 = sbr.rel (!%p9_p5) target bundleno = 1 (0x1), region = 61 }

</bundles_post_ra>
